<compile_context>
chip_gen: v6e
topology: v6e:2x2x1
jax: 0.10.0
libtpu: 0.0.40
codegen_flags: <defaults>
</compile_context>

<pallas_src>
import functools
import math

import jax
import jax.numpy as jnp
from jax.experimental import pallas as pl
from jax.experimental.pallas import tpu as pltpu

_BN_EPS = 1e-5
_LANE = 128

# 48 MiB scoped VMEM: fits v7x's 64 MiB physical VMEM per TensorCore with
# headroom for double buffering; harmless on v5e/v6e (128 MiB).
_COMPILER_PARAMS = pltpu.CompilerParams(
    dimension_semantics=("parallel", "arbitrary"),
    vmem_limit_bytes=48 * 1024 * 1024,
)


def _round_up(x, m):
    return (x + m - 1) // m * m


# ------------------------------ Pallas kernel -------------------------------

def _make_conv_bn_act_kernel(act, has_residual):
    """matmul (Cout x K grid) -> train-mode BN -> [+residual] -> activation."""

    def kernel(*refs):
        if has_residual:
            x_ref, w_ref, g_ref, b_ref, r_ref, o_ref, acc_ref = refs
        else:
            x_ref, w_ref, g_ref, b_ref, o_ref, acc_ref = refs
            r_ref = None

        k_step = pl.program_id(1)

        @pl.when(k_step == 0)
        def _init():
            acc_ref[...] = jnp.zeros_like(acc_ref)

        # bf16 x bf16 -> f32 accumulation on the MXU.
        acc_ref[...] += jnp.dot(x_ref[...], w_ref[...],
                                preferred_element_type=jnp.float32)

        @pl.when(k_step == pl.num_programs(1) - 1)
        def _finalize():
            acc = acc_ref[...]
            inv_m = 1.0 / acc.shape[0]
            # Single-pass per-channel sum / sum-of-squares.  Batch statistics
            # are exact because the M (rows) axis is never tiled.
            s = jnp.sum(acc, axis=0, keepdims=True)
            ss = jnp.sum(acc * acc, axis=0, keepdims=True)
            mean = s * inv_m
            var = jnp.maximum(ss * inv_m - mean * mean, 0.0)
            y = (acc - mean) * jax.lax.rsqrt(var + _BN_EPS)
            y = y * g_ref[...] + b_ref[...]
            if has_residual:
                y = y + r_ref[...]
            if act == "relu":
                y = jnp.maximum(y, 0.0)
            elif act == "sigmoid":
                y = jax.nn.sigmoid(y)
            o_ref[...] = y

    return kernel


# ------------------------------- JAX glue -----------------------------------

def _im2col(x, kh, kw, stride, padding, dilation):
    """x: NHWC -> patches (N*Ho*Wo, kh*kw*C), plus (Ho, Wo)."""
    n, h, w, c = x.shape
    ho = (h + 2 * padding - dilation * (kh - 1) - 1) // stride + 1
    wo = (w + 2 * padding - dilation * (kw - 1) - 1) // stride + 1
    xp = jnp.pad(x, ((0, 0), (padding, padding), (padding, padding), (0, 0)))
    taps = []
    for i in range(kh):
        for j in range(kw):
            hs, ws = i * dilation, j * dilation
            taps.append(jax.lax.slice(
                xp, (0, hs, ws, 0),
                (n, hs + (ho - 1) * stride + 1, ws + (wo - 1) * stride + 1, c),
                (1, stride, stride, 1)))
    col = jnp.stack(taps, axis=3)  # (N, Ho, Wo, kh*kw, C) -> matches w layout
    return col.reshape(n * ho * wo, kh * kw * c), ho, wo


def conv_bn_act(x, w, gamma, beta, *, stride=1, padding=0, dilation=1,
                act="none", residual=None):
    """Conv2d(bias=False) + BatchNorm2d (train mode) [+ residual] [+ act].

    x: NHWC float32;  w: (Cout, Cin, kh, kw) PyTorch layout.
    """
    n, _, _, cin = x.shape
    cout, cin_w, kh, kw = w.shape
    assert cin == cin_w

    # ---- lower to a 2-D matmul problem with bf16 operands ----
    xb = x.astype(jnp.bfloat16)
    if kh == 1 and kw == 1:
        assert padding == 0 and dilation == 1
        if stride > 1:
            xb = xb[:, ::stride, ::stride, :]
        ho, wo = xb.shape[1], xb.shape[2]
        x2d = xb.reshape(n * ho * wo, cin)          # no im2col for 1x1 convs
    else:
        # TODO(synk): k>1 convs still materialize bf16 im2col patches in HBM;
        # a fully fused tap-grid-axis kernel would remove this round trip.
        x2d, ho, wo = _im2col(xb, kh, kw, stride, padding, dilation)
    m, k = x2d.shape

    w2d = jnp.transpose(w, (2, 3, 1, 0)).reshape(k, cout).astype(jnp.bfloat16)

    # ---- pad K and Cout to lane multiples (MXU alignment, lane-dense stores)
    kp = _round_up(k, _LANE)
    cp = _round_up(cout, _LANE)
    if kp != k:
        x2d = jnp.pad(x2d, ((0, 0), (0, kp - k)))
        w2d = jnp.pad(w2d, ((0, kp - k), (0, 0)))
    if cp != cout:
        w2d = jnp.pad(w2d, ((0, 0), (0, cp - cout)))
    g2d = jnp.pad(gamma.astype(jnp.float32), (0, cp - cout)).reshape(1, cp)
    b2d = jnp.pad(beta.astype(jnp.float32), (0, cp - cout)).reshape(1, cp)

    # ---- tiles: Cout ("parallel", sharded across v7x's 2 TCs) x K reduction
    tn = 256 if (cp % 256 == 0 and cp >= 512) else 128
    tk = 512 if kp % 512 == 0 else (256 if kp % 256 == 0 else 128)
    grid = (cp // tn, kp // tk)

    in_specs = [
        pl.BlockSpec((m, tk), lambda j, l: (0, l)),    # activations
        pl.BlockSpec((tk, tn), lambda j, l: (l, j)),   # weights
        pl.BlockSpec((1, tn), lambda j, l: (0, j)),    # gamma
        pl.BlockSpec((1, tn), lambda j, l: (0, j)),    # beta
    ]
    args = [x2d, w2d, g2d, b2d]
    if residual is not None:
        r2d = residual.astype(jnp.float32).reshape(m, cout)
        if cp != cout:
            r2d = jnp.pad(r2d, ((0, 0), (0, cp - cout)))
        in_specs.append(pl.BlockSpec((m, tn), lambda j, l: (0, j)))
        args.append(r2d)

    kern = _make_conv_bn_act_kernel(act, residual is not None)

    out = pl.pallas_call(
        kern,
        out_shape=jax.ShapeDtypeStruct((m, cp), jnp.float32),
        grid_spec=pltpu.PrefetchScalarGridSpec(
            num_scalar_prefetch=0,
            grid=grid,
            in_specs=in_specs,
            out_specs=pl.BlockSpec((m, tn), lambda j, l: (0, j)),
            scratch_shapes=[pltpu.VMEM((m, tn), jnp.float32)],
        ),
        compiler_params=_COMPILER_PARAMS,
    )(*args)

    return out[:, :cout].reshape(n, ho, wo, cout)


def maxpool2d(x, *, kernel=3, stride=2, padding=1):
    """Max pool via shifted strided slices + jnp.maximum (no im2col buffer).

    Pure VPU-bound elementwise op; done in plain JAX per the perf review.
    """
    n, h, w, c = x.shape
    ho = (h + 2 * padding - kernel) // stride + 1
    wo = (w + 2 * padding - kernel) // stride + 1
    xp = jnp.pad(x, ((0, 0), (padding, padding), (padding, padding), (0, 0)),
                 constant_values=-jnp.inf)
    out = None
    for i in range(kernel):
        for j in range(kernel):
            tap = jax.lax.slice(
                xp, (0, i, j, 0),
                (n, i + (ho - 1) * stride + 1, j + (wo - 1) * stride + 1, c),
                (1, stride, stride, 1))
            out = tap if out is None else jnp.maximum(out, tap)
    return out


# --------------------------- parameter synthesis -----------------------------

class ParamGen:
    """Deterministic weight generator (synthetic, not a checkpoint)."""

    def __init__(self, seed=0):
        self.key = jax.random.PRNGKey(seed)

    def _next(self):
        self.key, k = jax.random.split(self.key)
        return k

    def conv(self, cout, cin, kh, kw):
        fan_in = cin * kh * kw
        w = jax.random.normal(self._next(), (cout, cin, kh, kw), jnp.float32)
        return w * (1.0 / math.sqrt(fan_in))

    def bn(self, c):
        g = 1.0 + 0.1 * jax.random.normal(self._next(), (c,), jnp.float32)
        b = 0.1 * jax.random.normal(self._next(), (c,), jnp.float32)
        return g, b


# ----------------------------- model definition ------------------------------

def make_resnet_bottleneck(pg, in_planes, planes, stride):
    expansion = 4
    p = {
        "conv1": (pg.conv(planes, in_planes, 1, 1), *pg.bn(planes)),
        "conv2": (pg.conv(planes, planes, 3, 3), *pg.bn(planes)),
        "conv3": (pg.conv(planes * expansion, planes, 1, 1),
                  *pg.bn(planes * expansion)),
        "stride": stride,
    }
    if stride != 1 or in_planes != planes * expansion:
        p["downsample"] = (pg.conv(planes * expansion, in_planes, 1, 1),
                           *pg.bn(planes * expansion))
    return p


def resnet_bottleneck_forward(p, x):
    # TODO(synk): whole-block fusion (conv1+conv2+conv3+residual in one
    # pallas_call / emit_pipeline) would amortize launch overhead for the
    # deep layers where M is tiny; left as separate fused conv kernels here.
    out = conv_bn_act(x, *p["conv1"], act="relu")
    out = conv_bn_act(out, *p["conv2"], stride=p["stride"], padding=1,
                      act="relu")
    if "downsample" in p:
        identity = conv_bn_act(x, *p["downsample"], stride=p["stride"],
                               act="none")
    else:
        identity = x
    return conv_bn_act(out, *p["conv3"], act="relu", residual=identity)


def make_detnet_bottleneck(pg, in_planes, planes, stride=1, block_type="A"):
    expansion = 1
    p = {
        "conv1": (pg.conv(planes, in_planes, 1, 1), *pg.bn(planes)),
        "conv2": (pg.conv(planes, planes, 3, 3), *pg.bn(planes)),
        "conv3": (pg.conv(expansion * planes, planes, 1, 1),
                  *pg.bn(expansion * planes)),
        "stride": stride,
    }
    if stride != 1 or in_planes != expansion * planes or block_type == "B":
        p["downsample"] = (pg.conv(expansion * planes, in_planes, 1, 1),
                           *pg.bn(expansion * planes))
    return p


def detnet_bottleneck_forward(p, x):
    out = conv_bn_act(x, *p["conv1"], act="relu")
    out = conv_bn_act(out, *p["conv2"], stride=p["stride"], padding=2,
                      dilation=2, act="relu")
    if "downsample" in p:
        identity = conv_bn_act(x, *p["downsample"], stride=p["stride"],
                               act="none")
    else:
        identity = x
    return conv_bn_act(out, *p["conv3"], act="relu", residual=identity)


def make_resnet50_backbone(pg):
    params = {"stem": (pg.conv(64, 3, 7, 7), *pg.bn(64))}
    layers = []
    in_planes = 64
    for planes, num_blocks, stride in ((64, 3, 1), (128, 4, 2),
                                       (256, 6, 2), (512, 3, 2)):
        blocks = []
        for b in range(num_blocks):
            blocks.append(make_resnet_bottleneck(
                pg, in_planes, planes, stride if b == 0 else 1))
            in_planes = planes * 4
        layers.append(blocks)
    params["layers"] = layers
    return params


def resnet50_backbone_forward(params, x):
    x = conv_bn_act(x, *params["stem"], stride=2, padding=3, act="relu")
    x = maxpool2d(x, kernel=3, stride=2, padding=1)
    for blocks in params["layers"]:
        for blk in blocks:
            x = resnet_bottleneck_forward(blk, x)
    return x


def make_yolov1(seed=0):
    pg = ParamGen(seed)
    backbone = make_resnet50_backbone(pg)
    head = {
        "det1": make_detnet_bottleneck(pg, 2048, 256),
        "det2": make_detnet_bottleneck(pg, 256, 256),
        "det3": make_detnet_bottleneck(pg, 256, 256),
        "final": (pg.conv(30, 256, 3, 3), *pg.bn(30)),
    }
    return {"backbone": backbone, "head": head}


def yolov1_forward(params, x_nchw):
    """x_nchw: (N, 3, H, W) float32, exactly like the PyTorch module input."""
    x = jnp.transpose(x_nchw, (0, 2, 3, 1))  # NCHW -> NHWC (internal layout)
    x = resnet50_backbone_forward(params["backbone"], x)
    h = params["head"]
    x = detnet_bottleneck_forward(h["det1"], x)
    x = detnet_bottleneck_forward(h["det2"], x)
    x = detnet_bottleneck_forward(h["det3"], x)
    x = conv_bn_act(x, *h["final"], stride=2, padding=1, act="sigmoid")
    # PyTorch ends with x.permute(0, 2, 3, 1) (NCHW -> NHWC); our tensor is
    # already NHWC, so the permute is a no-op here.
    return x


# ----------------------------------- main ------------------------------------

if __name__ == "__main__":
    key = jax.random.PRNGKey(0)
    x = jax.random.normal(key, (2, 3, 64, 64), jnp.float32)  # small NCHW input
    params = make_yolov1(seed=0)

    out = yolov1_forward(params, x)
    out = jax.block_until_ready(out)

    # Backbone: 64x64 -> /32 = 2x2 feature map; head final conv stride 2 -> 1x1.
    assert out.shape == (2, 1, 1, 30), out.shape
    assert out.dtype == jnp.float32
    assert bool(jnp.all(jnp.isfinite(out)))
    assert bool(jnp.all((out >= 0.0) & (out <= 1.0)))  # sigmoid output range
    print("KERNEL_OK")
</pallas_src>

<mosaic_0001>
module attributes {stable_mosaic.version = 11 : i64} {
  func.func @kernel(%arg0: i32, %arg1: i32, %arg2: memref<2048x256xbf16, #tpu.memory_space<vmem>>, %arg3: memref<256x128xbf16, #tpu.memory_space<vmem>>, %arg4: memref<1x128xf32, #tpu.memory_space<vmem>>, %arg5: memref<1x128xf32, #tpu.memory_space<vmem>>, %arg6: memref<2048x128xf32, #tpu.memory_space<vmem>>, %arg7: memref<2048x128xf32, #tpu.memory_space<vmem>>) attributes {dimension_semantics = [#tpu.dimension_semantics<parallel>, #tpu.dimension_semantics<arbitrary>], iteration_bounds = array<i64: 1, 1>, scalar_prefetch = 0 : i64, scratch_operands = 1 : i64, tpu.core_type = #tpu.core_type<tc>, window_params = [{transform_indices = @transform_0, window_bounds = array<i64: 2048, 256>}, {transform_indices = @transform_1, window_bounds = array<i64: 256, 128>}, {transform_indices = @transform_2, window_bounds = array<i64: 1, 128>}, {transform_indices = @transform_3, window_bounds = array<i64: 1, 128>}, {transform_indices = @transform_4, window_bounds = array<i64: 2048, 128>}]} {
    %c0_i32 = arith.constant 0 : i32
    %0 = arith.cmpi eq, %arg1, %c0_i32 : i32
    %1 = arith.extui %0 : i1 to i32
    %c0_i32_0 = arith.constant 0 : i32
    %2 = arith.cmpi ne, %1, %c0_i32_0 : i32
    scf.if %2 {
      %cst_10 = arith.constant 0.000000e+00 : f32
      %12 = vector.broadcast %cst_10 : f32 to vector<2048x128xf32>
      %c0_11 = arith.constant 0 : index
      %c0_12 = arith.constant 0 : index
      %13 = vector.load %arg7[%c0_11, %c0_12] : memref<2048x128xf32, #tpu.memory_space<vmem>>, vector<2048x128xf32>
      tpu.vector_store %arg7[%c0_11, %c0_12], %12 {strides = array<i32>} : memref<2048x128xf32, #tpu.memory_space<vmem>>, vector<2048x128xf32>,
    } else {
    }
    %c0 = arith.constant 0 : index
    %c0_1 = arith.constant 0 : index
    %3 = vector.load %arg7[%c0, %c0_1] : memref<2048x128xf32, #tpu.memory_space<vmem>>, vector<2048x128xf32>
    %c0_2 = arith.constant 0 : index
    %c0_3 = arith.constant 0 : index
    %4 = vector.load %arg2[%c0_2, %c0_3] : memref<2048x256xbf16, #tpu.memory_space<vmem>>, vector<2048x256xbf16>
    %c0_4 = arith.constant 0 : index
    %c0_5 = arith.constant 0 : index
    %5 = vector.load %arg3[%c0_4, %c0_5] : memref<256x128xbf16, #tpu.memory_space<vmem>>, vector<256x128xbf16>
    %cst = arith.constant dense<0.000000e+00> : vector<2048x128xf32>
    %6 = tpu.matmul %4, %5, %cst {dimension_numbers = #tpu.dot_dimension_numbers<[1], [0], [0], [1], [0, 0, 1, 1], [], []>} : vector<2048x256xbf16>, vector<256x128xbf16>, vector<2048x128xf32> -> vector<2048x128xf32>
    %7 = arith.addf %3, %6 : vector<2048x128xf32>
    %c0_6 = arith.constant 0 : index
    %c0_7 = arith.constant 0 : index
    %8 = vector.load %arg7[%c0_6, %c0_7] : memref<2048x128xf32, #tpu.memory_space<vmem>>, vector<2048x128xf32>
    tpu.vector_store %arg7[%c0_6, %c0_7], %7 {strides = array<i32>} : memref<2048x128xf32, #tpu.memory_space<vmem>>, vector<2048x128xf32>,
    %c0_i32_8 = arith.constant 0 : i32
    %9 = arith.cmpi eq, %arg1, %c0_i32_8 : i32
    %10 = arith.extui %9 : i1 to i32
    %c0_i32_9 = arith.constant 0 : i32
    %11 = arith.cmpi ne, %10, %c0_i32_9 : i32
    scf.if %11 {
      %c0_10 = arith.constant 0 : index
      %c0_11 = arith.constant 0 : index
      %12 = vector.load %arg7[%c0_10, %c0_11] : memref<2048x128xf32, #tpu.memory_space<vmem>>, vector<2048x128xf32>
      %cst_12 = arith.constant dense<0.000000e+00> : vector<128xf32>
      %13 = vector.multi_reduction <add>, %12, %cst_12 [0] : vector<2048x128xf32> to vector<128xf32>
      %14 = vector.shape_cast %13 : vector<128xf32> to vector<1x128xf32>
      %15 = arith.mulf %12, %12 : vector<2048x128xf32>
      %cst_13 = arith.constant dense<0.000000e+00> : vector<128xf32>
      %16 = vector.multi_reduction <add>, %15, %cst_13 [0] : vector<2048x128xf32> to vector<128xf32>
      %17 = vector.shape_cast %16 : vector<128xf32> to vector<1x128xf32>
      %cst_14 = arith.constant 4.8828125E-4 : f32
      %18 = vector.broadcast %cst_14 : f32 to vector<1x128xf32>
      %19 = arith.mulf %14, %18 : vector<1x128xf32>
      %cst_15 = arith.constant 4.8828125E-4 : f32
      %20 = vector.broadcast %cst_15 : f32 to vector<1x128xf32>
      %21 = arith.mulf %17, %20 : vector<1x128xf32>
      %22 = arith.mulf %19, %19 : vector<1x128xf32>
      %23 = arith.subf %21, %22 : vector<1x128xf32>
      %cst_16 = arith.constant 0.000000e+00 : f32
      %24 = vector.broadcast %cst_16 : f32 to vector<1x128xf32>
      %25 = arith.maximumf %23, %24 : vector<1x128xf32>
      %26 = vector.broadcast %19 : vector<1x128xf32> to vector<2048x128xf32>
      %27 = arith.subf %12, %26 : vector<2048x128xf32>
      %cst_17 = arith.constant 9.99999974E-6 : f32
      %28 = vector.broadcast %cst_17 : f32 to vector<1x128xf32>
      %29 = arith.addf %25, %28 : vector<1x128xf32>
      %30 = math.rsqrt %29 : vector<1x128xf32>
      %31 = vector.broadcast %30 : vector<1x128xf32> to vector<2048x128xf32>
      %32 = arith.mulf %27, %31 : vector<2048x128xf32>
      %c0_18 = arith.constant 0 : index
      %c0_19 = arith.constant 0 : index
      %33 = vector.load %arg4[%c0_18, %c0_19] : memref<1x128xf32, #tpu.memory_space<vmem>>, vector<1x128xf32>
      %34 = vector.broadcast %33 : vector<1x128xf32> to vector<2048x128xf32>
      %35 = arith.mulf %32, %34 : vector<2048x128xf32>
      %c0_20 = arith.constant 0 : index
      %c0_21 = arith.constant 0 : index
      %36 = vector.load %arg5[%c0_20, %c0_21] : memref<1x128xf32, #tpu.memory_space<vmem>>, vector<1x128xf32>
      %37 = vector.broadcast %36 : vector<1x128xf32> to vector<2048x128xf32>
      %38 = arith.addf %35, %37 : vector<2048x128xf32>
      %cst_22 = arith.constant 0.000000e+00 : f32
      %39 = vector.broadcast %cst_22 : f32 to vector<2048x128xf32>
      %40 = arith.maximumf %38, %39 : vector<2048x128xf32>
      %c0_23 = arith.constant 0 : index
      %c0_24 = arith.constant 0 : index
      %41 = vector.load %arg6[%c0_23, %c0_24] : memref<2048x128xf32, #tpu.memory_space<vmem>>, vector<2048x128xf32>
      tpu.vector_store %arg6[%c0_23, %c0_24], %40 {strides = array<i32>} : memref<2048x128xf32, #tpu.memory_space<vmem>>, vector<2048x128xf32>,
    } else {
    }
    return
  }
  func.func @transform_0(%arg0: i32, %arg1: i32) -> (i32, i32) {
    %c0_i32 = arith.constant 0 : i32
    %c0_i32_0 = arith.constant 0 : i32
    return %c0_i32, %arg1 : i32, i32
  }
  func.func @transform_1(%arg0: i32, %arg1: i32) -> (i32, i32) {
    %c0_i32 = arith.constant 0 : i32
    return %arg1, %arg0 : i32, i32
  }
  func.func @transform_2(%arg0: i32, %arg1: i32) -> (i32, i32) {
    %c0_i32 = arith.constant 0 : i32
    %c0_i32_0 = arith.constant 0 : i32
    return %c0_i32, %arg0 : i32, i32
  }
  func.func @transform_3(%arg0: i32, %arg1: i32) -> (i32, i32) {
    %c0_i32 = arith.constant 0 : i32
    %c0_i32_0 = arith.constant 0 : i32
    return %c0_i32, %arg0 : i32, i32
  }
  func.func @transform_4(%arg0: i32, %arg1: i32) -> (i32, i32) {
    %c0_i32 = arith.constant 0 : i32
    %c0_i32_0 = arith.constant 0 : i32
    return %c0_i32, %arg0 : i32, i32
  }
}

</mosaic_0001>

<bundles_post_ra>
// kernel: tpu_custom_call.1
= control target key start
LH: loop header
LB: loop body
LE: loop exit
PB: predicated region body
PF: predicated region fallthrough
CT: control target
= control target key end

     0   :  { %9 = vsyncpa [#allocation4], 0  ;;  %s12918_s0 = inlined_call_operand.hbm [shape: bf16[2048,256], index: 0, kind: input, shape index: {}]   ;;  %s12919_s1 = inlined_call_operand.hbm [shape: bf16[256,128], index: 1, kind: input, shape index: {}]   ;;  %s12920_s2 = inlined_call_operand.vmem [shape: f32[1,128], index: 2, kind: input, shape index: {}]   ;;  %s12921_s3 = inlined_call_operand.vmem [shape: f32[1,128], index: 3, kind: input, shape index: {}]   ;;  %s12922_s4 = inlined_call_operand.hbm [shape: f32[2048,128], index: 4, kind: output, shape index: {}]  }
   0x1   :  { %10 = vsyncpa [#allocation7], 0 }
   0x2   :  { %11 = vsyncpa [#allocation5], 0  ;;  %s7192_s15 = smov [#allocation3]  }
   0x3   :  { %s17_s16 = sshll.u32 %s7192_s15, 4  ;;  %s18_s16 = int_to_ptr.vmem [resolvable:$true] %s17_s16 }
   0x4   :  { %s7134_s17 = scalar_lea.vmem %s18_s16, 32768  ;;  %p7139_p1 = scmp.lt.s32.totalorder %s18_s16, %s18_s16 }
   0x5   :  { %p7135_p0 = scmp.ne.s32.totalorder %s18_s16, %s7134_s17  ;;  %p7140_p2 = scmp.lt.s32.totalorder %s7134_s17, %s7134_s17 }
   0x7   :  { %p7141_p3 = por %p7140_p2, %p7139_p1 }
   0x9   :  { %p7142_p4 = pnand %p7141_p3, %p7135_p0 }
   0xb   :  { %7145 = shalt.err (!%p7142_p4)
}
   0xc   :  { %s7193_s18 = smov 128   ;;  %s7194_s19 = smov 8  }
   0xd   :  { %23 = dma.hbm_to_vmem [thread:$0]  %s12918_s0, 32768, %s18_s16, [#allocation4], %s7193_s18, %s7193_s18, %s7194_s19  }
   0xe   :  { %s7195_s22 = smov [#allocation6]  }
   0xf   :  { %s29_s23 = sshll.u32 %s7195_s22, 4  ;;  %s30_s23 = int_to_ptr.vmem [resolvable:$true] %s29_s23 }
  0x10   :  { %s7154_s24 = scalar_lea.vmem %s30_s23, 2048  ;;  %p7159_p6 = scmp.lt.s32.totalorder %s30_s23, %s30_s23 }
  0x11   :  { %p7155_p5 = scmp.ne.s32.totalorder %s30_s23, %s7154_s24  ;;  %p7160_p7 = scmp.lt.s32.totalorder %s7154_s24, %s7154_s24 }
  0x13   :  { %p7161_p8 = por %p7160_p7, %p7159_p6 }
  0x15   :  { %p7162_p9 = pnand %p7161_p8, %p7155_p5 }
  0x17   :  { %7165 = shalt.err (!%p7162_p9)
}
  0x18   :  { %s7196_s25 = smov 64   ;;  %s7197_s26 = smov 4  }
  0x19   :  { %35 = dma.hbm_to_vmem [thread:$0]  %s12919_s1, 2048, %s30_s23, [#allocation7], %s7196_s25, %s7196_s25, %s7197_s26  }
  0x1a   :  { %7186 = dma.done.wait [#allocation4], 32768  }
  0x1b   :  { %7187 = vsyncadd [#allocation4], 4294934528 }
  0x1c   :  { %7188 = dma.done.wait [#allocation7], 2048  }
  0x1d   :  { %7189 = vsyncadd [#allocation7], 4294965248  ;;  %v7198_v0 = vmov 0   ;;  %v6722_v1 = vld [vmem:[#allocation6 + $0x38] sm:$0xff]   ;;  %v6723_v2 = vld [vmem:[#allocation6 + $0x30] sm:$0xff]  }
  0x1e   :  { %2227 = vmatprep.subr.bf16.mxu0 %v7198_v0  ;;  %6682 = vmatprep.subr.bf16.mxu1 %v7198_v0  ;;  %v6724_v3 = vld [vmem:[#allocation6 + $0x28] sm:$0xff]   ;;  %v6725_v4 = vld [vmem:[#allocation6 + $0x20] sm:$0xff]   ;;  %v6726_v5 = vld [vmem:[#allocation6 + $0x18] sm:$0xff]  }
  0x1f   :  { %2228 = vmatpush1.bf16.msra.mxu0 %v6722_v1  ;;  %6698 = vmatpush1.bf16.msra.mxu1 %v6722_v1  ;;  %v6740_v6 = vld [vmem:[#allocation3 + $0x4] ss:$8 sps:$4 sm:$0xff]   ;;  %v6727_v7 = vld [vmem:[#allocation6 + $0x10] sm:$0xff]   ;;  %v6730_v10 = vld [vmem:[#allocation6 + $0x78] sm:$0xff]  }
  0x20   :  { %2229 = vmatprep.subr.bf16.mxu0 %v7198_v0  ;;  %6683 = vmatprep.subr.bf16.mxu1 %v7198_v0  ;;  %v6728_v8 = vld [vmem:[#allocation6 + $0x8] sm:$0xff]   ;;  %v6729_v9 = vld [vmem:[#allocation6] sm:$0xff]   ;;  %v6731_v11 = vld [vmem:[#allocation6 + $0x70] sm:$0xff]  }
  0x21   :  { %2259 = vmatprep.mubr.bf16.mxu0 %v6740_v6  ;;  %v6732_v12 = vld [vmem:[#allocation6 + $0x68] sm:$0xff]   ;;  %v6733_v13 = vld [vmem:[#allocation6 + $0x60] sm:$0xff]   ;;  %v6734_v14 = vld [vmem:[#allocation6 + $0x58] sm:$0xff]  }
  0x22   :  { %v6735_v15 = vld [vmem:[#allocation6 + $0x50] sm:$0xff]   ;;  %v6736_v16 = vld [vmem:[#allocation6 + $0x48] sm:$0xff]   ;;  %v6737_v17 = vld [vmem:[#allocation6 + $0x40] sm:$0xff]  }
  0x23   :  { %2230 = vmatpush1.bf16.msra.mxu0 %v6723_v2  ;;  %6699 = vmatpush1.bf16.msra.mxu1 %v6723_v2  ;;  %v6738_v18 = vld [vmem:[#allocation3] ss:$8 sps:$4 sm:$0xff]   ;;  %v6741_v19 = vld [vmem:[#allocation3 + $0x14] ss:$8 sps:$4 sm:$0xff]   ;;  %v6743_v20 = vld [vmem:[#allocation3 + $0x10] ss:$8 sps:$4 sm:$0xff]  }
  0x24   :  { %2231 = vmatprep.subr.bf16.mxu0 %v7198_v0  ;;  %6684 = vmatprep.subr.bf16.mxu1 %v7198_v0  ;;  %v6744_v21 = vld [vmem:[#allocation3 + $0x24] ss:$8 sps:$4 sm:$0xff]   ;;  %v6746_v22 = vld [vmem:[#allocation3 + $0x20] ss:$8 sps:$4 sm:$0xff]   ;;  %v6747_v23 = vld [vmem:[#allocation3 + $0x34] ss:$8 sps:$4 sm:$0xff]  }
  0x25   :  { %v6749_v24 = vld [vmem:[#allocation3 + $0x30] ss:$8 sps:$4 sm:$0xff]   ;;  %v6750_v25 = vld [vmem:[#allocation3 + $0x44] ss:$8 sps:$4 sm:$0xff]   ;;  %v6752_v26 = vld [vmem:[#allocation3 + $0x40] ss:$8 sps:$4 sm:$0xff]  }
  0x26   :  { %v6753_v27 = vld [vmem:[#allocation3 + $0x54] ss:$8 sps:$4 sm:$0xff]   ;;  %v6755_v28 = vld [vmem:[#allocation3 + $0x50] ss:$8 sps:$4 sm:$0xff]   ;;  %v6756_v29 = vld [vmem:[#allocation3 + $0x64] ss:$8 sps:$4 sm:$0xff]  }
  0x27   :  { %2232 = vmatpush1.bf16.msra.mxu0 %v6724_v3  ;;  %6700 = vmatpush1.bf16.msra.mxu1 %v6724_v3  ;;  %v6758_v30 = vld [vmem:[#allocation3 + $0x60] ss:$8 sps:$4 sm:$0xff]   ;;  %v6759_v31 = vld [vmem:[#allocation3 + $0x74] ss:$8 sps:$4 sm:$0xff]   ;;  %v6761_v32 = vld [vmem:[#allocation3 + $0x70] ss:$8 sps:$4 sm:$0xff]  }
  0x28   :  { %2233 = vmatprep.subr.bf16.mxu0 %v7198_v0  ;;  %6685 = vmatprep.subr.bf16.mxu1 %v7198_v0  ;;  %v6762_v33 = vld [vmem:[#allocation3 + $0x84] ss:$8 sps:$4 sm:$0xff]   ;;  %v6764_v34 = vld [vmem:[#allocation3 + $0x80] ss:$8 sps:$4 sm:$0xff]   ;;  %v6765_v35 = vld [vmem:[#allocation3 + $0x94] ss:$8 sps:$4 sm:$0xff]  }
  0x29   :  { %v6767_v36 = vld [vmem:[#allocation3 + $0x90] ss:$8 sps:$4 sm:$0xff]   ;;  %v6768_v37 = vld [vmem:[#allocation3 + $0xa4] ss:$8 sps:$4 sm:$0xff]   ;;  %v6770_v38 = vld [vmem:[#allocation3 + $0xa0] ss:$8 sps:$4 sm:$0xff]  }
  0x2a   :  { %v6771_v39 = vld [vmem:[#allocation3 + $0xb4] ss:$8 sps:$4 sm:$0xff]   ;;  %v6773_v40 = vld [vmem:[#allocation3 + $0xb0] ss:$8 sps:$4 sm:$0xff]   ;;  %v6774_v41 = vld [vmem:[#allocation3 + $0xc4] ss:$8 sps:$4 sm:$0xff]  }
  0x2b   :  { %2234 = vmatpush1.bf16.msra.mxu0 %v6725_v4  ;;  %6701 = vmatpush1.bf16.msra.mxu1 %v6725_v4  ;;  %v6776_v42 = vld [vmem:[#allocation3 + $0xc0] ss:$8 sps:$4 sm:$0xff]   ;;  %v6777_v43 = vld [vmem:[#allocation3 + $0xd4] ss:$8 sps:$4 sm:$0xff]   ;;  %v6779_v44 = vld [vmem:[#allocation3 + $0xd0] ss:$8 sps:$4 sm:$0xff]  }
  0x2c   :  { %2235 = vmatprep.subr.bf16.mxu0 %v7198_v0  ;;  %6686 = vmatprep.subr.bf16.mxu1 %v7198_v0  ;;  %v6780_v45 = vld [vmem:[#allocation3 + $0xe4] ss:$8 sps:$4 sm:$0xff]   ;;  %v6782_v46 = vld [vmem:[#allocation3 + $0xe0] ss:$8 sps:$4 sm:$0xff]   ;;  %v6783_v47 = vld [vmem:[#allocation3 + $0xf4] ss:$8 sps:$4 sm:$0xff]  }
  0x2d   :  { %v6785_v48 = vld [vmem:[#allocation3 + $0xf0] ss:$8 sps:$4 sm:$0xff]   ;;  %v6786_v49 = vld [vmem:[#allocation3 + $0x104] ss:$8 sps:$4 sm:$0xff]   ;;  %v6834_v51 = vld [vmem:[#allocation3 + $0x400] ss:$8 sps:$4 sm:$0xff]  }
  0x2e   :  { %v6836_v50 = vld [vmem:[#allocation3 + $0x404] ss:$8 sps:$4 sm:$0xff]   ;;  %v6788_v52 = vld [vmem:[#allocation3 + $0x100] ss:$8 sps:$4 sm:$0xff]   ;;  %v6789_v53 = vld [vmem:[#allocation3 + $0x114] ss:$8 sps:$4 sm:$0xff]  }
  0x2f   :  { %2236 = vmatpush1.bf16.msra.mxu0 %v6726_v5  ;;  %6702 = vmatpush1.bf16.msra.mxu1 %v6726_v5  ;;  %v6840_v54 = vld [vmem:[#allocation3 + $0x414] ss:$8 sps:$4 sm:$0xff]   ;;  %v6842_v55 = vld [vmem:[#allocation3 + $0x410] ss:$8 sps:$4 sm:$0xff]   ;;  %v6792_v57 = vld [vmem:[#allocation3 + $0x124] ss:$8 sps:$4 sm:$0xff]  }
  0x30   :  { %2237 = vmatprep.subr.bf16.mxu0 %v7198_v0  ;;  %6687 = vmatprep.subr.bf16.mxu1 %v7198_v0  ;;  %v6791_v56 = vld [vmem:[#allocation3 + $0x110] ss:$8 sps:$4 sm:$0xff]   ;;  %v6846_v58 = vld [vmem:[#allocation3 + $0x424] ss:$8 sps:$4 sm:$0xff]   ;;  %v6848_v59 = vld [vmem:[#allocation3 + $0x420] ss:$8 sps:$4 sm:$0xff]  }
  0x31   :  { %2771 = vmatprep.mubr.bf16.mxu1 %v6836_v50  ;;  %v6794_v60 = vld [vmem:[#allocation3 + $0x120] ss:$8 sps:$4 sm:$0xff]   ;;  %v6795_v61 = vld [vmem:[#allocation3 + $0x134] ss:$8 sps:$4 sm:$0xff]   ;;  %v6854_v63 = vld [vmem:[#allocation3 + $0x430] ss:$8 sps:$4 sm:$0xff]  }
  0x32   :  { %v6852_v62 = vld [vmem:[#allocation3 + $0x434] ss:$8 sps:$4 sm:$0xff]   ;;  %v6798_v1 = vld [vmem:[#allocation3 + $0x144] ss:$8 sps:$4 sm:$0xff]   ;;  %v6860_v3 = vld [vmem:[#allocation3 + $0x440] ss:$8 sps:$4 sm:$0xff]  }
  0x33   :  { %2238 = vmatpush1.bf16.msra.mxu0 %v6727_v7  ;;  %6703 = vmatpush1.bf16.msra.mxu1 %v6727_v7  ;;  %v6858_v2 = vld [vmem:[#allocation3 + $0x444] ss:$8 sps:$4 sm:$0xff]   ;;  %v6800_v4 = vld [vmem:[#allocation3 + $0x140] ss:$8 sps:$4 sm:$0xff]   ;;  %v6801_v5 = vld [vmem:[#allocation3 + $0x154] ss:$8 sps:$4 sm:$0xff]  }
  0x34   :  { %2239 = vmatprep.subr.bf16.mxu0 %v7198_v0  ;;  %6688 = vmatprep.subr.bf16.mxu1 %v7198_v0  ;;  %v6864_v6 = vld [vmem:[#allocation3 + $0x454] ss:$8 sps:$4 sm:$0xff]   ;;  %v6866_v7 = vld [vmem:[#allocation3 + $0x450] ss:$8 sps:$4 sm:$0xff]  }
  0x37   :  { %2240 = vmatpush1.bf16.msra.mxu0 %v6728_v8  ;;  %6704 = vmatpush1.bf16.msra.mxu1 %v6728_v8  ;;  %v6803_v8 = vld [vmem:[#allocation3 + $0x150] ss:$8 sps:$4 sm:$0xff]  }
  0x38   :  { %2241 = vmatprep.subr.bf16.mxu0 %v7198_v0  ;;  %6689 = vmatprep.subr.bf16.mxu1 %v7198_v0 }
  0x3b   :  { %2242 = vmatpush1.bf16.msra.mxu0 %v6729_v9  ;;  %6705 = vmatpush1.bf16.msra.mxu1 %v6729_v9  ;;  %v6804_v9 = vld [vmem:[#allocation3 + $0x164] ss:$8 sps:$4 sm:$0xff]  }
  0x3c   :  { %2243 = vmatprep.subr.bf16.mxu0 %v7198_v0  ;;  %6690 = vmatprep.subr.bf16.mxu1 %v7198_v0 }
  0x3f   :  { %2244 = vmatpush2.bf16.msra.mxu0 %v6730_v10  ;;  %6706 = vmatpush2.bf16.msra.mxu1 %v6730_v10  ;;  %v6870_v10 = vld [vmem:[#allocation3 + $0x464] ss:$8 sps:$4 sm:$0xff]  }
  0x40   :  { %2245 = vmatprep.subr.bf16.mxu0 %v7198_v0  ;;  %6691 = vmatprep.subr.bf16.mxu1 %v7198_v0 }
  0x43   :  { %2246 = vmatpush2.bf16.msra.mxu0 %v6731_v11  ;;  %6707 = vmatpush2.bf16.msra.mxu1 %v6731_v11  ;;  %v6872_v11 = vld [vmem:[#allocation3 + $0x460] ss:$8 sps:$4 sm:$0xff]  }
  0x44   :  { %2247 = vmatprep.subr.bf16.mxu0 %v7198_v0  ;;  %6692 = vmatprep.subr.bf16.mxu1 %v7198_v0 }
  0x47   :  { %2248 = vmatpush2.bf16.msra.mxu0 %v6732_v12  ;;  %6708 = vmatpush2.bf16.msra.mxu1 %v6732_v12  ;;  %v6806_v12 = vld [vmem:[#allocation3 + $0x160] ss:$8 sps:$4 sm:$0xff]  }
  0x48   :  { %2249 = vmatprep.subr.bf16.mxu0 %v7198_v0  ;;  %6693 = vmatprep.subr.bf16.mxu1 %v7198_v0 }
  0x4b   :  { %2250 = vmatpush2.bf16.msra.mxu0 %v6733_v13  ;;  %6709 = vmatpush2.bf16.msra.mxu1 %v6733_v13  ;;  %v6807_v13 = vld [vmem:[#allocation3 + $0x174] ss:$8 sps:$4 sm:$0xff]  }
  0x4c   :  { %2251 = vmatprep.subr.bf16.mxu0 %v7198_v0  ;;  %6694 = vmatprep.subr.bf16.mxu1 %v7198_v0 }
  0x4f   :  { %2252 = vmatpush2.bf16.msra.mxu0 %v6734_v14  ;;  %6710 = vmatpush2.bf16.msra.mxu1 %v6734_v14  ;;  %v6876_v14 = vld [vmem:[#allocation3 + $0x474] ss:$8 sps:$4 sm:$0xff]  }
  0x50   :  { %2253 = vmatprep.subr.bf16.mxu0 %v7198_v0  ;;  %6695 = vmatprep.subr.bf16.mxu1 %v7198_v0 }
  0x53   :  { %2254 = vmatpush2.bf16.msra.mxu0 %v6735_v15  ;;  %6711 = vmatpush2.bf16.msra.mxu1 %v6735_v15  ;;  %v6878_v15 = vld [vmem:[#allocation3 + $0x470] ss:$8 sps:$4 sm:$0xff]  }
  0x54   :  { %2255 = vmatprep.subr.bf16.mxu0 %v7198_v0  ;;  %6696 = vmatprep.subr.bf16.mxu1 %v7198_v0 }
  0x57   :  { %2256 = vmatpush2.bf16.msra.mxu0 %v6736_v16  ;;  %6712 = vmatpush2.bf16.msra.mxu1 %v6736_v16  ;;  %v6809_v16 = vld [vmem:[#allocation3 + $0x170] ss:$8 sps:$4 sm:$0xff]  }
  0x58   :  { %2257 = vmatprep.subr.bf16.mxu0 %v7198_v0  ;;  %6697 = vmatprep.subr.bf16.mxu1 %v7198_v0  ;;  %v6797_v0 = vld [vmem:[#allocation3 + $0x130] ss:$8 sps:$4 sm:$0xff]  }
  0x5b   :  { %2258 = vmatpush2.bf16.msra.mxu0 %v6737_v17  ;;  %6713 = vmatpush2.bf16.msra.mxu1 %v6737_v17  ;;  %v6810_v17 = vld [vmem:[#allocation3 + $0x184] ss:$8 sps:$4 sm:$0xff]  }
  0x5e   :  { %2260 = vmatmul.mubr.bf16.vlgmr.msra.gmra.mxu0 %v6738_v18  ;;  %2772 = vmatmul.mubr.bf16.vlgmr.msra.gmra.mxu1 %v6834_v51  ;;  %v6882_v18 = vld [vmem:[#allocation3 + $0x484] ss:$8 sps:$4 sm:$0xff]   ;;  %v6822_v51 = vld [vmem:[#allocation3 + $0x1c0] ss:$8 sps:$4 sm:$0xff]  }
  0x5f   :  { %2267 = vmatprep.mubr.bf16.mxu0 %v6741_v19  ;;  %2779 = vmatprep.mubr.bf16.mxu1 %v6840_v54  ;;  %v6884_v19 = vld [vmem:[#allocation3 + $0x480] ss:$8 sps:$4 sm:$0xff]   ;;  %v6912_v54 = vld [vmem:[#allocation3 + $0x4d4] ss:$8 sps:$4 sm:$0xff]  }
  0x66   :  { %2268 = vmatmul.mubr.bf16.gmra.mxu0 %v6743_v20  ;;  %2780 = vmatmul.mubr.bf16.gmra.mxu1 %v6842_v55  ;;  %v6812_v20 = vld [vmem:[#allocation3 + $0x180] ss:$8 sps:$4 sm:$0xff]  }
  0x67   :  { %2275 = vmatprep.mubr.bf16.mxu0 %v6744_v21  ;;  %2787 = vmatprep.mubr.bf16.mxu1 %v6846_v58  ;;  %v6813_v21 = vld [vmem:[#allocation3 + $0x194] ss:$8 sps:$4 sm:$0xff]  }
  0x6e   :  { %2276 = vmatmul.mubr.bf16.gmra.mxu0 %v6746_v22  ;;  %2788 = vmatmul.mubr.bf16.gmra.mxu1 %v6848_v59  ;;  %v6888_v22 = vld [vmem:[#allocation3 + $0x494] ss:$8 sps:$4 sm:$0xff]   ;;  %v6825_v59 = vld [vmem:[#allocation3 + $0x1d0] ss:$8 sps:$4 sm:$0xff]  }
  0x6f   :  { %2283 = vmatprep.mubr.bf16.mxu0 %v6747_v23  ;;  %2795 = vmatprep.mubr.bf16.mxu1 %v6852_v62  ;;  %v6918_v62 = vld [vmem:[#allocation3 + $0x4e4] ss:$8 sps:$4 sm:$0xff]  }
  0x76   :  { %2284 = vmatmul.mubr.bf16.gmra.mxu0 %v6749_v24  ;;  %2796 = vmatmul.mubr.bf16.gmra.mxu1 %v6854_v63  ;;  %v6890_v24 = vld [vmem:[#allocation3 + $0x490] ss:$8 sps:$4 sm:$0xff]  }
  0x77   :  { %2291 = vmatprep.mubr.bf16.mxu0 %v6750_v25  ;;  %2803 = vmatprep.mubr.bf16.mxu1 %v6858_v2 }
  0x7e   :  { %2292 = vmatmul.mubr.bf16.gmra.mxu0 %v6752_v26  ;;  %2804 = vmatmul.mubr.bf16.gmra.mxu1 %v6860_v3  ;;  %v6828_v3 = vld [vmem:[#allocation3 + $0x1e0] ss:$8 sps:$4 sm:$0xff]  }
  0x7f   :  { %2299 = vmatprep.mubr.bf16.mxu0 %v6753_v27  ;;  %2811 = vmatprep.mubr.bf16.mxu1 %v6864_v6  ;;  %v6815_v27 = vld [vmem:[#allocation3 + $0x190] ss:$8 sps:$4 sm:$0xff]   ;;  %v6924_v6 = vld [vmem:[#allocation3 + $0x4f4] ss:$8 sps:$4 sm:$0xff]  }
  0x86   :  { %2300 = vmatmul.mubr.bf16.gmra.mxu0 %v6755_v28  ;;  %2812 = vmatmul.mubr.bf16.gmra.mxu1 %v6866_v7  ;;  %v6816_v28 = vld [vmem:[#allocation3 + $0x1a4] ss:$8 sps:$4 sm:$0xff]  }
  0x87   :  { %2307 = vmatprep.mubr.bf16.mxu0 %v6756_v29  ;;  %2819 = vmatprep.mubr.bf16.mxu1 %v6870_v10 }
  0x8e   :  { %2308 = vmatmul.mubr.bf16.gmra.mxu0 %v6758_v30  ;;  %2820 = vmatmul.mubr.bf16.gmra.mxu1 %v6872_v11  ;;  %v6894_v30 = vld [vmem:[#allocation3 + $0x4a4] ss:$8 sps:$4 sm:$0xff]   ;;  %v6831_v11 = vld [vmem:[#allocation3 + $0x1f0] ss:$8 sps:$4 sm:$0xff]  }
  0x8f   :  { %2315 = vmatprep.mubr.bf16.mxu0 %v6759_v31  ;;  %2827 = vmatprep.mubr.bf16.mxu1 %v6876_v14  ;;  %v6930_v14 = vld [vmem:[#allocation3 + $0x504] ss:$8 sps:$4 sm:$0xff]  }
  0x96   :  { %2316 = vmatmul.mubr.bf16.gmra.mxu0 %v6761_v32  ;;  %2828 = vmatmul.mubr.bf16.gmra.mxu1 %v6878_v15  ;;  %v6896_v32 = vld [vmem:[#allocation3 + $0x4a0] ss:$8 sps:$4 sm:$0xff]  }
  0x97   :  { %2323 = vmatprep.mubr.bf16.mxu0 %v6762_v33  ;;  %2835 = vmatprep.mubr.bf16.mxu1 %v6882_v18 }
  0x9e   :  { %2324 = vmatmul.mubr.bf16.gmra.mxu0 %v6764_v34  ;;  %2836 = vmatmul.mubr.bf16.gmra.mxu1 %v6884_v19  ;;  %v6837_v19 = vld [vmem:[#allocation3 + $0x200] ss:$8 sps:$4 sm:$0xff]  }
  0x9f   :  { %2331 = vmatprep.mubr.bf16.mxu0 %v6765_v35  ;;  %2843 = vmatprep.mubr.bf16.mxu1 %v6888_v22  ;;  %v6818_v35 = vld [vmem:[#allocation3 + $0x1a0] ss:$8 sps:$4 sm:$0xff]   ;;  %v6936_v22 = vld [vmem:[#allocation3 + $0x514] ss:$8 sps:$4 sm:$0xff]  }
  0xa6   :  { %2332 = vmatmul.mubr.bf16.gmra.mxu0 %v6767_v36  ;;  %2844 = vmatmul.mubr.bf16.gmra.mxu1 %v6890_v24  ;;  %v6819_v36 = vld [vmem:[#allocation3 + $0x1b4] ss:$8 sps:$4 sm:$0xff]  }
  0xa7   :  { %2339 = vmatprep.mubr.bf16.mxu0 %v6768_v37  ;;  %2851 = vmatprep.mubr.bf16.mxu1 %v6894_v30  ;;  %v6851_v30 = vld [vmem:[#allocation3 + $0x224] ss:$8 sps:$4 sm:$0xff]  }
  0xae   :  { %2340 = vmatmul.mubr.bf16.gmra.mxu0 %v6770_v38  ;;  %2852 = vmatmul.mubr.bf16.gmra.mxu1 %v6896_v32  ;;  %v6900_v38 = vld [vmem:[#allocation3 + $0x4b4] ss:$8 sps:$4 sm:$0xff]  }
  0xaf   :  { %2347 = vmatprep.mubr.bf16.mxu0 %v6771_v39  ;;  %2859 = vmatprep.mubr.bf16.mxu1 %v6900_v38 }
  0xb6   :  { %2348 = vmatmul.mubr.bf16.gmra.mxu0 %v6773_v40  ;;  %v6902_v40 = vld [vmem:[#allocation3 + $0x4b0] ss:$8 sps:$4 sm:$0xff]  }
  0xb7   :  { %2355 = vmatprep.mubr.bf16.mxu0 %v6774_v41  ;;  %2860 = vmatmul.mubr.bf16.gmra.mxu1 %v6902_v40  ;;  %v6849_v40 = vld [vmem:[#allocation3 + $0x220] ss:$8 sps:$4 sm:$0xff]  }
  0xbe   :  { %2356 = vmatmul.mubr.bf16.gmra.mxu0 %v6776_v42 }
  0xbf   :  { %2363 = vmatprep.mubr.bf16.mxu0 %v6777_v43  ;;  %v6821_v43 = vld [vmem:[#allocation3 + $0x1b0] ss:$8 sps:$4 sm:$0xff]  }
  0xc6   :  { %2364 = vmatmul.mubr.bf16.gmra.mxu0 %v6779_v44  ;;  %v6824_v44 = vld [vmem:[#allocation3 + $0x1c4] ss:$8 sps:$4 sm:$0xff]  }
  0xc7   :  { %2371 = vmatprep.mubr.bf16.mxu0 %v6780_v45 }
  0xce   :  { %2372 = vmatmul.mubr.bf16.gmra.mxu0 %v6782_v46  ;;  %v6906_v46 = vld [vmem:[#allocation3 + $0x4c4] ss:$8 sps:$4 sm:$0xff]  }
  0xcf   :  { %2379 = vmatprep.mubr.bf16.mxu0 %v6783_v47  ;;  %2867 = vmatprep.mubr.bf16.mxu1 %v6906_v46  ;;  %v6950_v46 = vld [vmem:[#allocation3 + $0x530] ss:$8 sps:$4 sm:$0xff]  }
  0xd6   :  { %2380 = vmatmul.mubr.bf16.gmra.mxu0 %v6785_v48  ;;  %v6908_v48 = vld [vmem:[#allocation3 + $0x4c0] ss:$8 sps:$4 sm:$0xff]  }
  0xd7   :  { %2387 = vmatprep.mubr.bf16.mxu0 %v6786_v49  ;;  %2868 = vmatmul.mubr.bf16.gmra.mxu1 %v6908_v48 }
  0xd8   :  { %2875 = vmatprep.mubr.bf16.mxu1 %v6912_v54  ;;  %v6954_v54 = vld [vmem:[#allocation3 + $0x544] ss:$8 sps:$4 sm:$0xff]  }
  0xde   :  { %2388 = vmatmul.mubr.bf16.gmra.mxu0 %v6788_v52  ;;  %v6827_v52 = vld [vmem:[#allocation3 + $0x1d4] ss:$8 sps:$4 sm:$0xff]  }
  0xdf   :  { %2395 = vmatprep.mubr.bf16.mxu0 %v6789_v53 }
  0xe6   :  { %2396 = vmatmul.mubr.bf16.gmra.mxu0 %v6791_v56  ;;  %v6914_v56 = vld [vmem:[#allocation3 + $0x4d0] ss:$8 sps:$4 sm:$0xff]  }
  0xe7   :  { %2403 = vmatprep.mubr.bf16.mxu0 %v6792_v57  ;;  %2876 = vmatmul.mubr.bf16.gmra.mxu1 %v6914_v56 }
  0xe8   :  { %2883 = vmatprep.mubr.bf16.mxu1 %v6918_v62  ;;  %v6869_v62 = vld [vmem:[#allocation3 + $0x254] ss:$8 sps:$4 sm:$0xff]  }
  0xee   :  { %2404 = vmatmul.mubr.bf16.gmra.mxu0 %v6794_v60  ;;  %v6830_v60 = vld [vmem:[#allocation3 + $0x1e4] ss:$8 sps:$4 sm:$0xff]  }
  0xef   :  { %2411 = vmatprep.mubr.bf16.mxu0 %v6795_v61 }
  0xf6   :  { %2412 = vmatmul.mubr.bf16.gmra.mxu0 %v6797_v0  ;;  %v6920_v0 = vld [vmem:[#allocation3 + $0x4e0] ss:$8 sps:$4 sm:$0xff]  }
  0xf7   :  { %2419 = vmatprep.mubr.bf16.mxu0 %v6798_v1  ;;  %2884 = vmatmul.mubr.bf16.gmra.mxu1 %v6920_v0 }
  0xf8   :  { %2891 = vmatprep.mubr.bf16.mxu1 %v6924_v6 }
  0xfe   :  { %2420 = vmatmul.mubr.bf16.gmra.mxu0 %v6800_v4  ;;  %v6833_v4 = vld [vmem:[#allocation3 + $0x1f4] ss:$8 sps:$4 sm:$0xff]  }
  0xff   :  { %2427 = vmatprep.mubr.bf16.mxu0 %v6801_v5 }
 0x106   :  { %2428 = vmatmul.mubr.bf16.gmra.mxu0 %v6803_v8  ;;  %v6926_v8 = vld [vmem:[#allocation3 + $0x4f0] ss:$8 sps:$4 sm:$0xff]  }
 0x107   :  { %2435 = vmatprep.mubr.bf16.mxu0 %v6804_v9  ;;  %2892 = vmatmul.mubr.bf16.gmra.mxu1 %v6926_v8  ;;  %v6867_v8 = vld [vmem:[#allocation3 + $0x250] ss:$8 sps:$4 sm:$0xff]  }
 0x108   :  { %2899 = vmatprep.mubr.bf16.mxu1 %v6930_v14  ;;  %v6968_v14 = vld [vmem:[#allocation3 + $0x560] ss:$8 sps:$4 sm:$0xff]  }
 0x10e   :  { %2436 = vmatmul.mubr.bf16.gmra.mxu0 %v6806_v12  ;;  %v6839_v12 = vld [vmem:[#allocation3 + $0x204] ss:$8 sps:$4 sm:$0xff]  }
 0x10f   :  { %2443 = vmatprep.mubr.bf16.mxu0 %v6807_v13 }
 0x116   :  { %2444 = vmatmul.mubr.bf16.gmra.mxu0 %v6809_v16  ;;  %v6932_v16 = vld [vmem:[#allocation3 + $0x500] ss:$8 sps:$4 sm:$0xff]  }
 0x117   :  { %2451 = vmatprep.mubr.bf16.mxu0 %v6810_v17  ;;  %2900 = vmatmul.mubr.bf16.gmra.mxu1 %v6932_v16 }
 0x118   :  { %2907 = vmatprep.mubr.bf16.mxu1 %v6936_v22  ;;  %v6972_v22 = vld [vmem:[#allocation3 + $0x574] ss:$8 sps:$4 sm:$0xff]  }
 0x11e   :  { %v7266_v23 = vpop.f32.mrf.mxu0  ;;  %2452 = vmatmul.mubr.bf16.gmra.mxu0 %v6812_v20  ;;  %v6845_v20 = vld [vmem:[#allocation3 + $0x214] ss:$8 sps:$4 sm:$0xff]  }
 0x11f   :  { %13371 = vst [vmem:[#allocation12_spill] sm:$0xff] %v7266_v23  ;;  %2459 = vmatprep.mubr.bf16.mxu0 %v6813_v21 }
 0x120   :  { %v2263_v25 = vpop.f32.mrf.mxu0 }
 0x121   :  { %v6938_v25 = vld [vmem:[#allocation3 + $0x510] ss:$8 sps:$4 sm:$0xff]  }
 0x122   :  { %v7268_v26 = vpop.f32.mrf.mxu0  ;;  %2908 = vmatmul.mubr.bf16.gmra.mxu1 %v6938_v25 }
 0x123   :  { %13372 = vst [vmem:[#allocation13_spill] sm:$0xff] %v7268_v26 }
 0x124   :  { %v2266_v29 = vpop.f32.mrf.mxu0 }
 0x125   :  { %v6843_v29 = vld [vmem:[#allocation3 + $0x210] ss:$8 sps:$4 sm:$0xff]  }
 0x126   :  { %v7270_v31 = vpop.f32.mrf.mxu0  ;;  %2460 = vmatmul.mubr.bf16.gmra.mxu0 %v6815_v27 }
 0x127   :  { %13373 = vst [vmem:[#allocation14_spill] sm:$0xff] %v7270_v31  ;;  %2467 = vmatprep.mubr.bf16.mxu0 %v6816_v28 }
 0x128   :  { %v2271_v33 = vpop.f32.mrf.mxu0 }
 0x129   :  { %v6942_v33 = vld [vmem:[#allocation3 + $0x524] ss:$8 sps:$4 sm:$0xff]  }
 0x12a   :  { %v7272_v34 = vpop.f32.mrf.mxu0  ;;  %2915 = vmatprep.mubr.bf16.mxu1 %v6942_v33  ;;  %v6887_v33 = vld [vmem:[#allocation3 + $0x284] ss:$8 sps:$4 sm:$0xff]  }
 0x12b   :  { %13374 = vst [vmem:[#allocation15_spill] sm:$0xff] %v7272_v34 }
 0x12c   :  { %v2274_v37 = vpop.f32.mrf.mxu0 }
 0x12e   :  { %v7274_v39 = vpop.f32.mrf.mxu0  ;;  %2468 = vmatmul.mubr.bf16.gmra.mxu0 %v6818_v35 }
 0x12f   :  { %13375 = vst [vmem:[#allocation16_spill] sm:$0xff] %v7274_v39  ;;  %2475 = vmatprep.mubr.bf16.mxu0 %v6819_v36  ;;  %v6944_v36 = vld [vmem:[#allocation3 + $0x520] ss:$8 sps:$4 sm:$0xff]  }
 0x130   :  { %v2279_v41 = vpop.f32.mrf.mxu0  ;;  %2916 = vmatmul.mubr.bf16.gmra.mxu1 %v6944_v36 }
 0x131   :  { %v6857_v41 = vld [vmem:[#allocation3 + $0x234] ss:$8 sps:$4 sm:$0xff]  }
 0x132   :  { %v7276_v42 = vpop.f32.mrf.mxu0 }
 0x133   :  { %13376 = vst [vmem:[#allocation17_spill] sm:$0xff] %v7276_v42 }
 0x134   :  { %v2282_v45 = vpop.f32.mrf.mxu0 }
 0x136   :  { %v7278_v47 = vpop.f32.mrf.mxu0  ;;  %2476 = vmatmul.mubr.bf16.gmra.mxu0 %v6821_v43 }
 0x137   :  { %13377 = vst [vmem:[#allocation18_spill] sm:$0xff] %v7278_v47  ;;  %2483 = vmatprep.mubr.bf16.mxu0 %v6824_v44  ;;  %v6948_v44 = vld [vmem:[#allocation3 + $0x534] ss:$8 sps:$4 sm:$0xff]  }
 0x138   :  { %v2287_v49 = vpop.f32.mrf.mxu0  ;;  %2923 = vmatprep.mubr.bf16.mxu1 %v6948_v44  ;;  %v7328_v44 = vpop.f32.mrf.mxu1 }
 0x139   :  { %2924 = vmatmul.mubr.bf16.gmra.mxu1 %v6950_v46  ;;  %13402 = vst [vmem:[#allocation43_spill] sm:$0xff] %v7328_v44 }
 0x13a   :  { %v7280_v50 = vpop.f32.mrf.mxu0  ;;  %2931 = vmatprep.mubr.bf16.mxu1 %v6954_v54 }
 0x13b   :  { %13378 = vst [vmem:[#allocation19_spill] sm:$0xff] %v7280_v50 }
 0x13c   :  { %v2290_v53 = vpop.f32.mrf.mxu0 }
 0x13e   :  { %v7282_v55 = vpop.f32.mrf.mxu0  ;;  %2484 = vmatmul.mubr.bf16.gmra.mxu0 %v6822_v51  ;;  %v6855_v51 = vld [vmem:[#allocation3 + $0x230] ss:$8 sps:$4 sm:$0xff]  }
 0x13f   :  { %13379 = vst [vmem:[#allocation20_spill] sm:$0xff] %v7282_v55  ;;  %2491 = vmatprep.mubr.bf16.mxu0 %v6827_v52  ;;  %v6863_v52 = vld [vmem:[#allocation3 + $0x244] ss:$8 sps:$4 sm:$0xff]  }
 0x140   :  { %v2295_v57 = vpop.f32.mrf.mxu0 }
 0x141   :  { %v6956_v57 = vld [vmem:[#allocation3 + $0x540] ss:$8 sps:$4 sm:$0xff]  }
 0x142   :  { %v7284_v58 = vpop.f32.mrf.mxu0  ;;  %2932 = vmatmul.mubr.bf16.gmra.mxu1 %v6956_v57  ;;  %v6984_v57 = vld [vmem:[#allocation3 + $0x594] ss:$8 sps:$4 sm:$0xff]  }
 0x143   :  { %13380 = vst [vmem:[#allocation21_spill] sm:$0xff] %v7284_v58 }
 0x144   :  { %v2298_v61 = vpop.f32.mrf.mxu0 }
 0x145   :  { %v6861_v61 = vld [vmem:[#allocation3 + $0x240] ss:$8 sps:$4 sm:$0xff]  }
 0x146   :  { %v7286_v63 = vpop.f32.mrf.mxu0  ;;  %2492 = vmatmul.mubr.bf16.gmra.mxu0 %v6825_v59 }
 0x147   :  { %13381 = vst [vmem:[#allocation22_spill] sm:$0xff] %v7286_v63  ;;  %2499 = vmatprep.mubr.bf16.mxu0 %v6830_v60 }
 0x148   :  { %v2303_v1 = vpop.f32.mrf.mxu0 }
 0x149   :  { %v6960_v1 = vld [vmem:[#allocation3 + $0x554] ss:$8 sps:$4 sm:$0xff]  }
 0x14a   :  { %v7288_v2 = vpop.f32.mrf.mxu0  ;;  %2939 = vmatprep.mubr.bf16.mxu1 %v6960_v1 }
 0x14b   :  { %13382 = vst [vmem:[#allocation23_spill] sm:$0xff] %v7288_v2 }
 0x14c   :  { %v2306_v5 = vpop.f32.mrf.mxu0 }
 0x14e   :  { %v7290_v7 = vpop.f32.mrf.mxu0  ;;  %2500 = vmatmul.mubr.bf16.gmra.mxu0 %v6828_v3 }
 0x14f   :  { %13383 = vst [vmem:[#allocation24_spill] sm:$0xff] %v7290_v7  ;;  %2507 = vmatprep.mubr.bf16.mxu0 %v6833_v4  ;;  %v6962_v4 = vld [vmem:[#allocation3 + $0x550] ss:$8 sps:$4 sm:$0xff]  }
 0x150   :  { %v2311_v9 = vpop.f32.mrf.mxu0  ;;  %2940 = vmatmul.mubr.bf16.gmra.mxu1 %v6962_v4 }
 0x151   :  { %v6875_v9 = vld [vmem:[#allocation3 + $0x264] ss:$8 sps:$4 sm:$0xff]  }
 0x152   :  { %v7292_v10 = vpop.f32.mrf.mxu0 }
 0x153   :  { %13384 = vst [vmem:[#allocation25_spill] sm:$0xff] %v7292_v10 }
 0x154   :  { %v2314_v13 = vpop.f32.mrf.mxu0 }
 0x156   :  { %v7294_v15 = vpop.f32.mrf.mxu0  ;;  %2508 = vmatmul.mubr.bf16.gmra.mxu0 %v6831_v11 }
 0x157   :  { %13385 = vst [vmem:[#allocation26_spill] sm:$0xff] %v7294_v15  ;;  %2515 = vmatprep.mubr.bf16.mxu0 %v6839_v12  ;;  %v6966_v12 = vld [vmem:[#allocation3 + $0x564] ss:$8 sps:$4 sm:$0xff]  }
 0x158   :  { %v2319_v17 = vpop.f32.mrf.mxu0  ;;  %2947 = vmatprep.mubr.bf16.mxu1 %v6966_v12 }
 0x159   :  { %2948 = vmatmul.mubr.bf16.gmra.mxu1 %v6968_v14  ;;  %v6990_v14 = vld [vmem:[#allocation3 + $0x5a4] ss:$8 sps:$4 sm:$0xff]  }
 0x15a   :  { %v7296_v18 = vpop.f32.mrf.mxu0  ;;  %2955 = vmatprep.mubr.bf16.mxu1 %v6972_v22 }
 0x15b   :  { %13386 = vst [vmem:[#allocation27_spill] sm:$0xff] %v7296_v18 }
 0x15c   :  { %v2322_v21 = vpop.f32.mrf.mxu0 }
 0x15e   :  { %v7298_v24 = vpop.f32.mrf.mxu0  ;;  %2516 = vmatmul.mubr.bf16.gmra.mxu0 %v6837_v19  ;;  %v6873_v19 = vld [vmem:[#allocation3 + $0x260] ss:$8 sps:$4 sm:$0xff]  }
 0x15f   :  { %13387 = vst [vmem:[#allocation28_spill] sm:$0xff] %v7298_v24  ;;  %2523 = vmatprep.mubr.bf16.mxu0 %v6845_v20  ;;  %v6881_v20 = vld [vmem:[#allocation3 + $0x274] ss:$8 sps:$4 sm:$0xff]  }
 0x160   :  { %v2327_v27 = vpop.f32.mrf.mxu0 }
 0x161   :  { %v6974_v27 = vld [vmem:[#allocation3 + $0x570] ss:$8 sps:$4 sm:$0xff]  }
 0x162   :  { %v7300_v28 = vpop.f32.mrf.mxu0  ;;  %2956 = vmatmul.mubr.bf16.gmra.mxu1 %v6974_v27 }
 0x163   :  { %13388 = vst [vmem:[#allocation29_spill] sm:$0xff] %v7300_v28 }
 0x164   :  { %v2330_v32 = vpop.f32.mrf.mxu0 }
 0x165   :  { %v6879_v32 = vld [vmem:[#allocation3 + $0x270] ss:$8 sps:$4 sm:$0xff]  }
 0x166   :  { %v7302_v35 = vpop.f32.mrf.mxu0  ;;  %2524 = vmatmul.mubr.bf16.gmra.mxu0 %v6843_v29 }
 0x167   :  { %13389 = vst [vmem:[#allocation30_spill] sm:$0xff] %v7302_v35  ;;  %2531 = vmatprep.mubr.bf16.mxu0 %v6851_v30 }
 0x168   :  { %v2335_v37 = vpop.f32.mrf.mxu0 }
 0x169   :  { %v6978_v37 = vld [vmem:[#allocation3 + $0x584] ss:$8 sps:$4 sm:$0xff]  }
 0x16a   :  { %v7304_v38 = vpop.f32.mrf.mxu0  ;;  %2963 = vmatprep.mubr.bf16.mxu1 %v6978_v37 }
 0x16b   :  { %13390 = vst [vmem:[#allocation31_spill] sm:$0xff] %v7304_v38 }
 0x16c   :  { %v2338_v43 = vpop.f32.mrf.mxu0 }
 0x16e   :  { %v7306_v45 = vpop.f32.mrf.mxu0  ;;  %2532 = vmatmul.mubr.bf16.gmra.mxu0 %v6849_v40 }
 0x16f   :  { %13391 = vst [vmem:[#allocation32_spill] sm:$0xff] %v7306_v45  ;;  %2539 = vmatprep.mubr.bf16.mxu0 %v6857_v41  ;;  %v6980_v41 = vld [vmem:[#allocation3 + $0x580] ss:$8 sps:$4 sm:$0xff]  }
 0x170   :  { %v2343_v48 = vpop.f32.mrf.mxu0  ;;  %2964 = vmatmul.mubr.bf16.gmra.mxu1 %v6980_v41  ;;  %v6996_v41 = vld [vmem:[#allocation3 + $0x5b4] ss:$8 sps:$4 sm:$0xff]  }
 0x171   :  { %v6885_v48 = vld [vmem:[#allocation3 + $0x280] ss:$8 sps:$4 sm:$0xff]   ;;  %2971 = vmatprep.mubr.bf16.mxu1 %v6984_v57 }
 0x172   :  { %v7308_v49 = vpop.f32.mrf.mxu0 }
 0x173   :  { %13392 = vst [vmem:[#allocation33_spill] sm:$0xff] %v7308_v49 }
 0x174   :  { %v2346_v53 = vpop.f32.mrf.mxu0 }
 0x176   :  { %v7310_v56 = vpop.f32.mrf.mxu0  ;;  %2540 = vmatmul.mubr.bf16.gmra.mxu0 %v6855_v51  ;;  %v2775_v51 = vpop.f32.mrf.mxu1 }
 0x177   :  { %13393 = vst [vmem:[#allocation34_spill] sm:$0xff] %v7310_v56  ;;  %2547 = vmatprep.mubr.bf16.mxu0 %v6863_v52  ;;  %v6893_v52 = vld [vmem:[#allocation3 + $0x294] ss:$8 sps:$4 sm:$0xff]   ;;  %v6998_v51 = vld [vmem:[#allocation3 + $0x5b0] ss:$8 sps:$4 sm:$0xff]  }
 0x178   :  { %v2351_v59 = vpop.f32.mrf.mxu0  ;;  %v7332_v54 = vpop.f32.mrf.mxu1 }
 0x179   :  { %13404 = vst [vmem:[#allocation45_spill] sm:$0xff] %v7332_v54 }
 0x17a   :  { %v7312_v60 = vpop.f32.mrf.mxu0 }
 0x17b   :  { %13394 = vst [vmem:[#allocation35_spill] sm:$0xff] %v7312_v60 }
 0x17c   :  { %v2354_v0 = vpop.f32.mrf.mxu0 }
 0x17e   :  { %v7314_v3 = vpop.f32.mrf.mxu0  ;;  %2548 = vmatmul.mubr.bf16.gmra.mxu0 %v6861_v61  ;;  %v2778_v61 = vpop.f32.mrf.mxu1 }
 0x17f   :  { %13395 = vst [vmem:[#allocation36_spill] sm:$0xff] %v7314_v3  ;;  %2555 = vmatprep.mubr.bf16.mxu0 %v6869_v62  ;;  %v6986_v62 = vld [vmem:[#allocation3 + $0x590] ss:$8 sps:$4 sm:$0xff]  }
 0x180   :  { %v2359_v5 = vpop.f32.mrf.mxu0  ;;  %v7336_v1 = vpop.f32.mrf.mxu1  ;;  %2972 = vmatmul.mubr.bf16.gmra.mxu1 %v6986_v62  ;;  %v6903_v61 = vld [vmem:[#allocation3 + $0x2b0] ss:$8 sps:$4 sm:$0xff]  }
 0x181   :  { %13406 = vst [vmem:[#allocation47_spill] sm:$0xff] %v7336_v1  ;;  %v6891_v5 = vld [vmem:[#allocation3 + $0x290] ss:$8 sps:$4 sm:$0xff]   ;;  %2979 = vmatprep.mubr.bf16.mxu1 %v6990_v14 }
 0x182   :  { %v7316_v6 = vpop.f32.mrf.mxu0 }
 0x183   :  { %13396 = vst [vmem:[#allocation37_spill] sm:$0xff] %v7316_v6 }
 0x184   :  { %v2362_v11 = vpop.f32.mrf.mxu0 }
 0x186   :  { %v7318_v13 = vpop.f32.mrf.mxu0  ;;  %2556 = vmatmul.mubr.bf16.gmra.mxu0 %v6867_v8  ;;  %v2783_v8 = vpop.f32.mrf.mxu1 }
 0x187   :  { %13397 = vst [vmem:[#allocation38_spill] sm:$0xff] %v7318_v13  ;;  %2563 = vmatprep.mubr.bf16.mxu0 %v6875_v9  ;;  %v6899_v9 = vld [vmem:[#allocation3 + $0x2a4] ss:$8 sps:$4 sm:$0xff]  }
 0x188   :  { %v2367_v16 = vpop.f32.mrf.mxu0  ;;  %v7340_v12 = vpop.f32.mrf.mxu1 }
 0x189   :  { %13408 = vst [vmem:[#allocation49_spill] sm:$0xff] %v7340_v12 }
 0x18a   :  { %v7320_v17 = vpop.f32.mrf.mxu0 }
 0x18b   :  { %13398 = vst [vmem:[#allocation39_spill] sm:$0xff] %v7320_v17 }
 0x18c   :  { %v2370_v21 = vpop.f32.mrf.mxu0 }
 0x18e   :  { %v7322_v25 = vpop.f32.mrf.mxu0  ;;  %2564 = vmatmul.mubr.bf16.gmra.mxu0 %v6873_v19  ;;  %v2786_v19 = vpop.f32.mrf.mxu1 }
 0x18f   :  { %13399 = vst [vmem:[#allocation40_spill] sm:$0xff] %v7322_v25  ;;  %2571 = vmatprep.mubr.bf16.mxu0 %v6881_v20  ;;  %v6992_v20 = vld [vmem:[#allocation3 + $0x5a0] ss:$8 sps:$4 sm:$0xff]  }
 0x190   :  { %v2375_v29 = vpop.f32.mrf.mxu0  ;;  %v7344_v22 = vpop.f32.mrf.mxu1  ;;  %2980 = vmatmul.mubr.bf16.gmra.mxu1 %v6992_v20  ;;  %v7002_v19 = vld [vmem:[#allocation3 + $0x5c0] ss:$8 sps:$4 sm:$0xff]  }
 0x191   :  { %13410 = vst [vmem:[#allocation51_spill] sm:$0xff] %v7344_v22  ;;  %v6897_v29 = vld [vmem:[#allocation3 + $0x2a0] ss:$8 sps:$4 sm:$0xff]   ;;  %2987 = vmatprep.mubr.bf16.mxu1 %v6996_v41 }
 0x192   :  { %v7324_v30 = vpop.f32.mrf.mxu0 }
 0x193   :  { %13400 = vst [vmem:[#allocation41_spill] sm:$0xff] %v7324_v30 }
 0x194   :  { %v2378_v36 = vpop.f32.mrf.mxu0 }
 0x196   :  { %v7326_v40 = vpop.f32.mrf.mxu0  ;;  %2572 = vmatmul.mubr.bf16.gmra.mxu0 %v6879_v32  ;;  %v2791_v32 = vpop.f32.mrf.mxu1 }
 0x197   :  { %13401 = vst [vmem:[#allocation42_spill] sm:$0xff] %v7326_v40  ;;  %2579 = vmatprep.mubr.bf16.mxu0 %v6887_v33  ;;  %v6905_v33 = vld [vmem:[#allocation3 + $0x2b4] ss:$8 sps:$4 sm:$0xff]   ;;  %v6909_v32 = vld [vmem:[#allocation3 + $0x2c0] ss:$8 sps:$4 sm:$0xff]  }
 0x198   :  { %v2383_v43 = vpop.f32.mrf.mxu0  ;;  %v7348_v37 = vpop.f32.mrf.mxu1  ;;  %2988 = vmatmul.mubr.bf16.gmra.mxu1 %v6998_v51  ;;  %v7010_v51 = vld [vmem:[#allocation3 + $0x5d4] ss:$8 sps:$4 sm:$0xff]  }
 0x199   :  { %13412 = vst [vmem:[#allocation53_spill] sm:$0xff] %v7348_v37 }
 0x19a   :  { %v7330_v46 = vpop.f32.mrf.mxu0 }
 0x19b   :  { %13403 = vst [vmem:[#allocation44_spill] sm:$0xff] %v7330_v46 }
 0x19c   :  { %v2386_v53 = vpop.f32.mrf.mxu0 }
 0x19e   :  { %v7334_v59 = vpop.f32.mrf.mxu0  ;;  %2580 = vmatmul.mubr.bf16.gmra.mxu0 %v6885_v48  ;;  %v2794_v48 = vpop.f32.mrf.mxu1 }
 0x19f   :  { %13405 = vst [vmem:[#allocation46_spill] sm:$0xff] %v7334_v59  ;;  %2587 = vmatprep.mubr.bf16.mxu0 %v6893_v52 }
 0x1a0   :  { %v2391_v0 = vpop.f32.mrf.mxu0  ;;  %v7352_v53 = vpop.f32.mrf.mxu1 }
 0x1a1   :  { %13414 = vst [vmem:[#allocation55_spill] sm:$0xff] %v7352_v53  ;;  %v6911_v0 = vld [vmem:[#allocation3 + $0x2c4] ss:$8 sps:$4 sm:$0xff]  }
 0x1a2   :  { %v7338_v4 = vpop.f32.mrf.mxu0  ;;  %v2799_v62 = vpop.f32.mrf.mxu1 }
 0x1a3   :  { %13407 = vst [vmem:[#allocation48_spill] sm:$0xff] %v7338_v4  ;;  %v7008_v62 = vld [vmem:[#allocation3 + $0x5d0] ss:$8 sps:$4 sm:$0xff]  }
 0x1a4   :  { %v2394_v11 = vpop.f32.mrf.mxu0  ;;  %v7356_v8 = vpop.f32.mrf.mxu1 }
 0x1a5   :  { %13416 = vst [vmem:[#allocation57_spill] sm:$0xff] %v7356_v8 }
 0x1a6   :  { %v7342_v16 = vpop.f32.mrf.mxu0  ;;  %2588 = vmatmul.mubr.bf16.gmra.mxu0 %v6891_v5  ;;  %v2802_v14 = vpop.f32.mrf.mxu1 }
 0x1a7   :  { %13409 = vst [vmem:[#allocation50_spill] sm:$0xff] %v7342_v16  ;;  %2595 = vmatprep.mubr.bf16.mxu0 %v6899_v9  ;;  %v7004_v9 = vld [vmem:[#allocation3 + $0x5c4] ss:$8 sps:$4 sm:$0xff]   ;;  %v6915_v14 = vld [vmem:[#allocation3 + $0x2d0] ss:$8 sps:$4 sm:$0xff]  }
 0x1a8   :  { %v2399_v21 = vpop.f32.mrf.mxu0  ;;  %2995 = vmatprep.mubr.bf16.mxu1 %v7004_v9 }
 0x1a9   :  { %v7360_v21 = vpop.f32.mrf.mxu1  ;;  %2996 = vmatmul.mubr.bf16.gmra.mxu1 %v7002_v19 }
 0x1aa   :  { %v7346_v27 = vpop.f32.mrf.mxu0  ;;  %13418 = vst [vmem:[#allocation59_spill] sm:$0xff] %v7360_v21  ;;  %3003 = vmatprep.mubr.bf16.mxu1 %v7010_v51 }
 0x1ab   :  { %13411 = vst [vmem:[#allocation52_spill] sm:$0xff] %v7346_v27 }
 0x1ac   :  { %v2402_v36 = vpop.f32.mrf.mxu0 }
 0x1ad   :  { %v6917_v36 = vld [vmem:[#allocation3 + $0x2d4] ss:$8 sps:$4 sm:$0xff]  }
 0x1ae   :  { %v7350_v43 = vpop.f32.mrf.mxu0  ;;  %2596 = vmatmul.mubr.bf16.gmra.mxu0 %v6897_v29 }
 0x1af   :  { %13413 = vst [vmem:[#allocation54_spill] sm:$0xff] %v7350_v43  ;;  %2603 = vmatprep.mubr.bf16.mxu0 %v6905_v33  ;;  %v2807_v33 = vpop.f32.mrf.mxu1 }
 0x1b0   :  { %v2407_v52 = vpop.f32.mrf.mxu0 }
 0x1b1   :  { %v7364_v48 = vpop.f32.mrf.mxu1  ;;  %3004 = vmatmul.mubr.bf16.gmra.mxu1 %v7008_v62 }
 0x1b2   :  { %v7354_v57 = vpop.f32.mrf.mxu0  ;;  %13420 = vst [vmem:[#allocation61_spill] sm:$0xff] %v7364_v48  ;;  %v7016_v48 = vld [vmem:[#allocation3 + $0x5e4] ss:$8 sps:$4 sm:$0xff]  }
 0x1b3   :  { %13415 = vst [vmem:[#allocation56_spill] sm:$0xff] %v7354_v57  ;;  %3011 = vmatprep.mubr.bf16.mxu1 %v7016_v48 }
 0x1b4   :  { %v2410_v5 = vpop.f32.mrf.mxu0 }
 0x1b6   :  { %v7358_v11 = vpop.f32.mrf.mxu0  ;;  %2604 = vmatmul.mubr.bf16.gmra.mxu0 %v6903_v61  ;;  %v2810_v61 = vpop.f32.mrf.mxu1 }
 0x1b7   :  { %13417 = vst [vmem:[#allocation58_spill] sm:$0xff] %v7358_v11  ;;  %2611 = vmatprep.mubr.bf16.mxu0 %v6911_v0  ;;  %v7014_v61 = vld [vmem:[#allocation3 + $0x5e0] ss:$8 sps:$4 sm:$0xff]  }
 0x1b8   :  { %v2415_v20 = vpop.f32.mrf.mxu0  ;;  %v7368_v5 = vpop.f32.mrf.mxu1 }
 0x1b9   :  { %13422 = vst [vmem:[#allocation63_spill] sm:$0xff] %v7368_v5  ;;  %v6923_v20 = vld [vmem:[#allocation3 + $0x2e4] ss:$8 sps:$4 sm:$0xff]   ;;  %3012 = vmatmul.mubr.bf16.gmra.mxu1 %v7014_v61  ;;  %v6929_v5 = vld [vmem:[#allocation3 + $0x2f4] ss:$8 sps:$4 sm:$0xff]  }
 0x1ba   :  { %v7362_v29 = vpop.f32.mrf.mxu0  ;;  %v2815_v19 = vpop.f32.mrf.mxu1 }
 0x1bb   :  { %13419 = vst [vmem:[#allocation60_spill] sm:$0xff] %v7362_v29 }
 0x1bc   :  { %v2418_v41 = vpop.f32.mrf.mxu0 }
 0x1bd   :  { %v7372_v41 = vpop.f32.mrf.mxu1 }
 0x1be   :  { %v7366_v52 = vpop.f32.mrf.mxu0  ;;  %2612 = vmatmul.mubr.bf16.gmra.mxu0 %v6909_v32  ;;  %13424 = vst [vmem:[#allocation65_spill] sm:$0xff] %v7372_v41  ;;  %v7022_v41 = vld [vmem:[#allocation3 + $0x5f4] ss:$8 sps:$4 sm:$0xff]  }
 0x1bf   :  { %13421 = vst [vmem:[#allocation62_spill] sm:$0xff] %v7366_v52  ;;  %2619 = vmatprep.mubr.bf16.mxu0 %v6917_v36  ;;  %v2818_v32 = vpop.f32.mrf.mxu1  ;;  %3019 = vmatprep.mubr.bf16.mxu1 %v7022_v41 }
 0x1c0   :  { %v2423_v0 = vpop.f32.mrf.mxu0  ;;  %v7020_v32 = vld [vmem:[#allocation3 + $0x5f0] ss:$8 sps:$4 sm:$0xff]  }
 0x1c1   :  { %v7376_v51 = vpop.f32.mrf.mxu1  ;;  %v6921_v0 = vld [vmem:[#allocation3 + $0x2e0] ss:$8 sps:$4 sm:$0xff]   ;;  %3020 = vmatmul.mubr.bf16.gmra.mxu1 %v7020_v32 }
 0x1c2   :  { %v7370_v9 = vpop.f32.mrf.mxu0  ;;  %13426 = vst [vmem:[#allocation67_spill] sm:$0xff] %v7376_v51  ;;  %v6935_v51 = vld [vmem:[#allocation3 + $0x304] ss:$8 sps:$4 sm:$0xff]  }
 0x1c3   :  { %13423 = vst [vmem:[#allocation64_spill] sm:$0xff] %v7370_v9  ;;  %v2823_v19 = vpop.f32.mrf.mxu1 }
 0x1c4   :  { %v2426_v33 = vpop.f32.mrf.mxu0 }
 0x1c5   :  { %v7380_v8 = vpop.f32.mrf.mxu1 }
 0x1c6   :  { %v7374_v21 = vpop.f32.mrf.mxu0  ;;  %2620 = vmatmul.mubr.bf16.gmra.mxu0 %v6915_v14  ;;  %13428 = vst [vmem:[#allocation69_spill] sm:$0xff] %v7380_v8  ;;  %v7028_v8 = vld [vmem:[#allocation3 + $0x604] ss:$8 sps:$4 sm:$0xff]  }
 0x1c7   :  { %13425 = vst [vmem:[#allocation66_spill] sm:$0xff] %v7374_v21  ;;  %2627 = vmatprep.mubr.bf16.mxu0 %v6923_v20  ;;  %v2826_v14 = vpop.f32.mrf.mxu1  ;;  %3027 = vmatprep.mubr.bf16.mxu1 %v7028_v8 }
 0x1c8   :  { %v2431_v36 = vpop.f32.mrf.mxu0  ;;  %v7026_v14 = vld [vmem:[#allocation3 + $0x600] ss:$8 sps:$4 sm:$0xff]  }
 0x1c9   :  { %v7384_v20 = vpop.f32.mrf.mxu1  ;;  %v6927_v36 = vld [vmem:[#allocation3 + $0x2f0] ss:$8 sps:$4 sm:$0xff]   ;;  %3028 = vmatmul.mubr.bf16.gmra.mxu1 %v7026_v14 }
 0x1ca   :  { %v7378_v62 = vpop.f32.mrf.mxu0  ;;  %13430 = vst [vmem:[#allocation71_spill] sm:$0xff] %v7384_v20  ;;  %v6941_v20 = vld [vmem:[#allocation3 + $0x314] ss:$8 sps:$4 sm:$0xff]  }
 0x1cb   :  { %13427 = vst [vmem:[#allocation68_spill] sm:$0xff] %v7378_v62  ;;  %v2831_v19 = vpop.f32.mrf.mxu1 }
 0x1cc   :  { %v2434_v33 = vpop.f32.mrf.mxu0 }
 0x1cd   :  { %v7388_v37 = vpop.f32.mrf.mxu1 }
 0x1ce   :  { %v7382_v53 = vpop.f32.mrf.mxu0  ;;  %2628 = vmatmul.mubr.bf16.gmra.mxu0 %v6921_v0  ;;  %13432 = vst [vmem:[#allocation73_spill] sm:$0xff] %v7388_v37  ;;  %v7031_v37 = vld [vmem:[#allocation3 + $0x614] ss:$8 sps:$4 sm:$0xff]  }
 0x1cf   :  { %13429 = vst [vmem:[#allocation70_spill] sm:$0xff] %v7382_v53  ;;  %2635 = vmatprep.mubr.bf16.mxu0 %v6929_v5  ;;  %v2834_v0 = vpop.f32.mrf.mxu1  ;;  %3035 = vmatprep.mubr.bf16.mxu1 %v7031_v37 }
 0x1d0   :  { %v2439_v48 = vpop.f32.mrf.mxu0  ;;  %v7029_v0 = vld [vmem:[#allocation3 + $0x610] ss:$8 sps:$4 sm:$0xff]  }
 0x1d1   :  { %v7392_v41 = vpop.f32.mrf.mxu1  ;;  %v6933_v48 = vld [vmem:[#allocation3 + $0x300] ss:$8 sps:$4 sm:$0xff]   ;;  %3036 = vmatmul.mubr.bf16.gmra.mxu1 %v7029_v0 }
 0x1d2   :  { %v7386_v61 = vpop.f32.mrf.mxu0  ;;  %13434 = vst [vmem:[#allocation75_spill] sm:$0xff] %v7392_v41  ;;  %v6947_v41 = vld [vmem:[#allocation3 + $0x324] ss:$8 sps:$4 sm:$0xff]  }
 0x1d3   :  { %13431 = vst [vmem:[#allocation72_spill] sm:$0xff] %v7386_v61  ;;  %v2839_v19 = vpop.f32.mrf.mxu1 }
 0x1d4   :  { %v2442_v33 = vpop.f32.mrf.mxu0 }
 0x1d5   :  { %v7396_v12 = vpop.f32.mrf.mxu1 }
 0x1d6   :  { %v7390_v22 = vpop.f32.mrf.mxu0  ;;  %2636 = vmatmul.mubr.bf16.gmra.mxu0 %v6927_v36  ;;  %13436 = vst [vmem:[#allocation77_spill] sm:$0xff] %v7396_v12  ;;  %v7034_v12 = vld [vmem:[#allocation3 + $0x624] ss:$8 sps:$4 sm:$0xff]  }
 0x1d7   :  { %13433 = vst [vmem:[#allocation74_spill] sm:$0xff] %v7390_v22  ;;  %2643 = vmatprep.mubr.bf16.mxu0 %v6935_v51  ;;  %v2842_v36 = vpop.f32.mrf.mxu1  ;;  %3043 = vmatprep.mubr.bf16.mxu1 %v7034_v12 }
 0x1d8   :  { %v2447_v5 = vpop.f32.mrf.mxu0  ;;  %v7032_v36 = vld [vmem:[#allocation3 + $0x620] ss:$8 sps:$4 sm:$0xff]  }
 0x1d9   :  { %v7400_v51 = vpop.f32.mrf.mxu1  ;;  %v6939_v5 = vld [vmem:[#allocation3 + $0x310] ss:$8 sps:$4 sm:$0xff]   ;;  %3044 = vmatmul.mubr.bf16.gmra.mxu1 %v7032_v36 }
 0x1da   :  { %v7394_v32 = vpop.f32.mrf.mxu0  ;;  %13438 = vst [vmem:[#allocation79_spill] sm:$0xff] %v7400_v51  ;;  %v6953_v51 = vld [vmem:[#allocation3 + $0x334] ss:$8 sps:$4 sm:$0xff]  }
 0x1db   :  { %13435 = vst [vmem:[#allocation76_spill] sm:$0xff] %v7394_v32  ;;  %v2847_v19 = vpop.f32.mrf.mxu1 }
 0x1dc   :  { %v2450_v33 = vpop.f32.mrf.mxu0 }
 0x1dd   :  { %v7404_v54 = vpop.f32.mrf.mxu1 }
 0x1de   :  { %v7398_v1 = vpop.f32.mrf.mxu0  ;;  %2644 = vmatmul.mubr.bf16.gmra.mxu0 %v6933_v48  ;;  %13440 = vst [vmem:[#allocation81_spill] sm:$0xff] %v7404_v54  ;;  %v7037_v54 = vld [vmem:[#allocation3 + $0x634] ss:$8 sps:$4 sm:$0xff]  }
 0x1df   :  { %13437 = vst [vmem:[#allocation78_spill] sm:$0xff] %v7398_v1  ;;  %2651 = vmatprep.mubr.bf16.mxu0 %v6941_v20  ;;  %v2850_v48 = vpop.f32.mrf.mxu1  ;;  %3051 = vmatprep.mubr.bf16.mxu1 %v7037_v54 }
 0x1e0   :  { %v2455_v8 = vpop.f32.mrf.mxu0  ;;  %v7035_v48 = vld [vmem:[#allocation3 + $0x630] ss:$8 sps:$4 sm:$0xff]  }
 0x1e1   :  { %v7408_v20 = vpop.f32.mrf.mxu1  ;;  %v6945_v8 = vld [vmem:[#allocation3 + $0x320] ss:$8 sps:$4 sm:$0xff]   ;;  %3052 = vmatmul.mubr.bf16.gmra.mxu1 %v7035_v48 }
 0x1e2   :  { %v7402_v14 = vpop.f32.mrf.mxu0  ;;  %13442 = vst [vmem:[#allocation83_spill] sm:$0xff] %v7408_v20  ;;  %v6959_v20 = vld [vmem:[#allocation3 + $0x344] ss:$8 sps:$4 sm:$0xff]  }
 0x1e3   :  { %13439 = vst [vmem:[#allocation80_spill] sm:$0xff] %v7402_v14  ;;  %v2855_v19 = vpop.f32.mrf.mxu1 }
 0x1e4   :  { %v2458_v33 = vpop.f32.mrf.mxu0 }
 0x1e5   :  { %v7412_v14 = vpop.f32.mrf.mxu1 }
 0x1e6   :  { %v7406_v44 = vpop.f32.mrf.mxu0  ;;  %2652 = vmatmul.mubr.bf16.gmra.mxu0 %v6939_v5  ;;  %13444 = vst [vmem:[#allocation85_spill] sm:$0xff] %v7412_v14  ;;  %v7040_v14 = vld [vmem:[#allocation3 + $0x644] ss:$8 sps:$4 sm:$0xff]  }
 0x1e7   :  { %13441 = vst [vmem:[#allocation82_spill] sm:$0xff] %v7406_v44  ;;  %2659 = vmatprep.mubr.bf16.mxu0 %v6947_v41  ;;  %v2858_v5 = vpop.f32.mrf.mxu1  ;;  %3059 = vmatprep.mubr.bf16.mxu1 %v7040_v14 }
 0x1e8   :  { %v2463_v37 = vpop.f32.mrf.mxu0  ;;  %v7038_v5 = vld [vmem:[#allocation3 + $0x640] ss:$8 sps:$4 sm:$0xff]  }
 0x1e9   :  { %v7416_v41 = vpop.f32.mrf.mxu1  ;;  %v6951_v37 = vld [vmem:[#allocation3 + $0x330] ss:$8 sps:$4 sm:$0xff]   ;;  %3060 = vmatmul.mubr.bf16.gmra.mxu1 %v7038_v5 }
 0x1ea   :  { %v7410_v0 = vpop.f32.mrf.mxu0  ;;  %13446 = vst [vmem:[#allocation87_spill] sm:$0xff] %v7416_v41  ;;  %v6965_v41 = vld [vmem:[#allocation3 + $0x354] ss:$8 sps:$4 sm:$0xff]  }
 0x1eb   :  { %13443 = vst [vmem:[#allocation84_spill] sm:$0xff] %v7410_v0  ;;  %v2863_v19 = vpop.f32.mrf.mxu1 }
 0x1ec   :  { %v2466_v33 = vpop.f32.mrf.mxu0 }
 0x1ed   :  { %v7420_v0 = vpop.f32.mrf.mxu1 }
 0x1ee   :  { %v7414_v1 = vpop.f32.mrf.mxu0  ;;  %2660 = vmatmul.mubr.bf16.gmra.mxu0 %v6945_v8  ;;  %13448 = vst [vmem:[#allocation89_spill] sm:$0xff] %v7420_v0  ;;  %v7043_v0 = vld [vmem:[#allocation3 + $0x654] ss:$8 sps:$4 sm:$0xff]  }
 0x1ef   :  { %13445 = vst [vmem:[#allocation86_spill] sm:$0xff] %v7414_v1  ;;  %2667 = vmatprep.mubr.bf16.mxu0 %v6953_v51  ;;  %v2866_v8 = vpop.f32.mrf.mxu1  ;;  %3067 = vmatprep.mubr.bf16.mxu1 %v7043_v0 }
 0x1f0   :  { %v2471_v12 = vpop.f32.mrf.mxu0  ;;  %v7041_v8 = vld [vmem:[#allocation3 + $0x650] ss:$8 sps:$4 sm:$0xff]  }
 0x1f1   :  { %v7424_v51 = vpop.f32.mrf.mxu1  ;;  %v6957_v12 = vld [vmem:[#allocation3 + $0x340] ss:$8 sps:$4 sm:$0xff]   ;;  %3068 = vmatmul.mubr.bf16.gmra.mxu1 %v7041_v8 }
 0x1f2   :  { %v7418_v36 = vpop.f32.mrf.mxu0  ;;  %13450 = vst [vmem:[#allocation91_spill] sm:$0xff] %v7424_v51  ;;  %v6971_v51 = vld [vmem:[#allocation3 + $0x364] ss:$8 sps:$4 sm:$0xff]  }
 0x1f3   :  { %13447 = vst [vmem:[#allocation88_spill] sm:$0xff] %v7418_v36  ;;  %v2871_v19 = vpop.f32.mrf.mxu1 }
 0x1f4   :  { %v2474_v33 = vpop.f32.mrf.mxu0 }
 0x1f5   :  { %v7428_v36 = vpop.f32.mrf.mxu1 }
 0x1f6   :  { %v7422_v44 = vpop.f32.mrf.mxu0  ;;  %2668 = vmatmul.mubr.bf16.gmra.mxu0 %v6951_v37  ;;  %13452 = vst [vmem:[#allocation93_spill] sm:$0xff] %v7428_v36  ;;  %v7046_v36 = vld [vmem:[#allocation3 + $0x664] ss:$8 sps:$4 sm:$0xff]  }
 0x1f7   :  { %13449 = vst [vmem:[#allocation90_spill] sm:$0xff] %v7422_v44  ;;  %2675 = vmatprep.mubr.bf16.mxu0 %v6959_v20  ;;  %v2874_v37 = vpop.f32.mrf.mxu1  ;;  %3075 = vmatprep.mubr.bf16.mxu1 %v7046_v36 }
 0x1f8   :  { %v2479_v54 = vpop.f32.mrf.mxu0  ;;  %v7044_v37 = vld [vmem:[#allocation3 + $0x660] ss:$8 sps:$4 sm:$0xff]  }
 0x1f9   :  { %v7432_v20 = vpop.f32.mrf.mxu1  ;;  %v6963_v54 = vld [vmem:[#allocation3 + $0x350] ss:$8 sps:$4 sm:$0xff]   ;;  %3076 = vmatmul.mubr.bf16.gmra.mxu1 %v7044_v37 }
 0x1fa   :  { %v7426_v48 = vpop.f32.mrf.mxu0  ;;  %13454 = vst [vmem:[#allocation95_spill] sm:$0xff] %v7432_v20  ;;  %v6977_v20 = vld [vmem:[#allocation3 + $0x374] ss:$8 sps:$4 sm:$0xff]  }
 0x1fb   :  { %13451 = vst [vmem:[#allocation92_spill] sm:$0xff] %v7426_v48  ;;  %v2879_v19 = vpop.f32.mrf.mxu1 }
 0x1fc   :  { %v2482_v33 = vpop.f32.mrf.mxu0 }
 0x1fd   :  { %v7436_v48 = vpop.f32.mrf.mxu1 }
 0x1fe   :  { %v7430_v1 = vpop.f32.mrf.mxu0  ;;  %2676 = vmatmul.mubr.bf16.gmra.mxu0 %v6957_v12  ;;  %13456 = vst [vmem:[#allocation97_spill] sm:$0xff] %v7436_v48  ;;  %v7049_v48 = vld [vmem:[#allocation3 + $0x674] ss:$8 sps:$4 sm:$0xff]  }
 0x1ff   :  { %13453 = vst [vmem:[#allocation94_spill] sm:$0xff] %v7430_v1  ;;  %2683 = vmatprep.mubr.bf16.mxu0 %v6965_v41  ;;  %v2882_v12 = vpop.f32.mrf.mxu1  ;;  %3083 = vmatprep.mubr.bf16.mxu1 %v7049_v48 }
 0x200   :  { %v2487_v14 = vpop.f32.mrf.mxu0  ;;  %v7047_v12 = vld [vmem:[#allocation3 + $0x670] ss:$8 sps:$4 sm:$0xff]  }
 0x201   :  { %v7440_v41 = vpop.f32.mrf.mxu1  ;;  %v6969_v14 = vld [vmem:[#allocation3 + $0x360] ss:$8 sps:$4 sm:$0xff]   ;;  %3084 = vmatmul.mubr.bf16.gmra.mxu1 %v7047_v12 }
 0x202   :  { %v7434_v5 = vpop.f32.mrf.mxu0  ;;  %13458 = vst [vmem:[#allocation99_spill] sm:$0xff] %v7440_v41  ;;  %v6983_v41 = vld [vmem:[#allocation3 + $0x384] ss:$8 sps:$4 sm:$0xff]  }
 0x203   :  { %13455 = vst [vmem:[#allocation96_spill] sm:$0xff] %v7434_v5  ;;  %v2887_v19 = vpop.f32.mrf.mxu1 }
 0x204   :  { %v2490_v33 = vpop.f32.mrf.mxu0 }
 0x205   :  { %v7444_v5 = vpop.f32.mrf.mxu1 }
 0x206   :  { %v7438_v44 = vpop.f32.mrf.mxu0  ;;  %2684 = vmatmul.mubr.bf16.gmra.mxu0 %v6963_v54  ;;  %13460 = vst [vmem:[#allocation101_spill] sm:$0xff] %v7444_v5  ;;  %v7052_v5 = vld [vmem:[#allocation3 + $0x684] ss:$8 sps:$4 sm:$0xff]  }
 0x207   :  { %13457 = vst [vmem:[#allocation98_spill] sm:$0xff] %v7438_v44  ;;  %2691 = vmatprep.mubr.bf16.mxu0 %v6971_v51  ;;  %v2890_v54 = vpop.f32.mrf.mxu1  ;;  %3091 = vmatprep.mubr.bf16.mxu1 %v7052_v5 }
 0x208   :  { %v2495_v0 = vpop.f32.mrf.mxu0  ;;  %v7050_v54 = vld [vmem:[#allocation3 + $0x680] ss:$8 sps:$4 sm:$0xff]  }
 0x209   :  { %v7448_v51 = vpop.f32.mrf.mxu1  ;;  %v6975_v0 = vld [vmem:[#allocation3 + $0x370] ss:$8 sps:$4 sm:$0xff]   ;;  %3092 = vmatmul.mubr.bf16.gmra.mxu1 %v7050_v54  ;;  %v4316_v54 = vmul.f32 %v7266_v23, %v7266_v23 }
 0x20a   :  { %v7442_v8 = vpop.f32.mrf.mxu0  ;;  %13462 = vst [vmem:[#allocation103_spill] sm:$0xff] %v7448_v51  ;;  %v6989_v51 = vld [vmem:[#allocation3 + $0x394] ss:$8 sps:$4 sm:$0xff]  }
 0x20b   :  { %13459 = vst [vmem:[#allocation100_spill] sm:$0xff] %v7442_v8  ;;  %v2895_v19 = vpop.f32.mrf.mxu1 }
 0x20c   :  { %v2498_v33 = vpop.f32.mrf.mxu0 }
 0x20d   :  { %v7452_v8 = vpop.f32.mrf.mxu1 }
 0x20e   :  { %v7446_v1 = vpop.f32.mrf.mxu0  ;;  %2692 = vmatmul.mubr.bf16.gmra.mxu0 %v6969_v14  ;;  %13464 = vst [vmem:[#allocation105_spill] sm:$0xff] %v7452_v8  ;;  %v4317_v8 = vmul.f32 %v7268_v26, %v7268_v26 }
 0x20f   :  { %13461 = vst [vmem:[#allocation102_spill] sm:$0xff] %v7446_v1  ;;  %2699 = vmatprep.mubr.bf16.mxu0 %v6977_v20  ;;  %v2898_v14 = vpop.f32.mrf.mxu1 }
 0x210   :  { %v2503_v36 = vpop.f32.mrf.mxu0 }
 0x211   :  { %v7456_v20 = vpop.f32.mrf.mxu1  ;;  %v6981_v36 = vld [vmem:[#allocation3 + $0x380] ss:$8 sps:$4 sm:$0xff]  }
 0x212   :  { %v7450_v37 = vpop.f32.mrf.mxu0  ;;  %13466 = vst [vmem:[#allocation107_spill] sm:$0xff] %v7456_v20  ;;  %v4572_v20 = vadd.f32 %v4317_v8, %v4316_v54  ;;  %v4321_v54 = vmul.f32 %v7276_v42, %v7276_v42 }
 0x213   :  { %13463 = vst [vmem:[#allocation104_spill] sm:$0xff] %v7450_v37  ;;  %v2903_v19 = vpop.f32.mrf.mxu1 }
 0x214   :  { %v2506_v33 = vpop.f32.mrf.mxu0  ;;  %v4318_v19 = vmul.f32 %v7270_v31, %v7270_v31 }
 0x215   :  { %v7460_v37 = vpop.f32.mrf.mxu1 }
 0x216   :  { %v7454_v44 = vpop.f32.mrf.mxu0  ;;  %2700 = vmatmul.mubr.bf16.gmra.mxu0 %v6975_v0  ;;  %13468 = vst [vmem:[#allocation109_spill] sm:$0xff] %v7460_v37  ;;  %v7055_v0 = vld [vmem:[#allocation3 + $0x694] ss:$8 sps:$4 sm:$0xff]  }
 0x217   :  { %13465 = vst [vmem:[#allocation106_spill] sm:$0xff] %v7454_v44  ;;  %2707 = vmatprep.mubr.bf16.mxu0 %v6983_v41  ;;  %v2906_v5 = vpop.f32.mrf.mxu1  ;;  %v7053_v41 = vld [vmem:[#allocation3 + $0x690] ss:$8 sps:$4 sm:$0xff]   ;;  %3099 = vmatprep.mubr.bf16.mxu1 %v7055_v0  ;;  %v6995_v0 = vld [vmem:[#allocation3 + $0x3a4] ss:$8 sps:$4 sm:$0xff]  }
 0x218   :  { %v2511_v48 = vpop.f32.mrf.mxu0  ;;  %3100 = vmatmul.mubr.bf16.gmra.mxu1 %v7053_v41  ;;  %v4319_v5 = vmul.f32 %v7272_v34, %v7272_v34 }
 0x219   :  { %v4055_v48 = vadd.f32 %v7268_v26, %v7266_v23  ;;  %v7472_v37 = vpop.f32.mrf.mxu1  ;;  %v4573_v26 = vadd.f32 %v4572_v20, %v4318_v19  ;;  %v7056_v20 = vld [vmem:[#allocation3 + $0x6a0] ss:$8 sps:$4 sm:$0xff]  }
 0x21a   :  { %v7458_v12 = vpop.f32.mrf.mxu0  ;;  %13470 = vst [vmem:[#allocation111_spill] sm:$0xff] %v7472_v37 }
 0x21b   :  { %13467 = vst [vmem:[#allocation108_spill] sm:$0xff] %v7458_v12  ;;  %v6987_v12 = vld [vmem:[#allocation3 + $0x390] ss:$8 sps:$4 sm:$0xff]   ;;  %v2911_v44 = vpop.f32.mrf.mxu1  ;;  %v4574_v8 = vadd.f32 %v4573_v26, %v4319_v5 }
 0x21c   :  { %v2514_v33 = vpop.f32.mrf.mxu0 }
 0x21d   :  { %v7482_v37 = vpop.f32.mrf.mxu1 }
 0x21e   :  { %v7464_v14 = vpop.f32.mrf.mxu0  ;;  %2708 = vmatmul.mubr.bf16.gmra.mxu0 %v6981_v36  ;;  %v4056_v36 = vadd.f32 %v4055_v48, %v7270_v31  ;;  %13472 = vst [vmem:[#allocation113_spill] sm:$0xff] %v7482_v37  ;;  %v7058_v48 = vld [vmem:[#allocation3 + $0x6a4] ss:$8 sps:$4 sm:$0xff]  }
 0x21f   :  { %13469 = vst [vmem:[#allocation110_spill] sm:$0xff] %v7464_v14  ;;  %2715 = vmatprep.mubr.bf16.mxu0 %v6989_v51  ;;  %v4320_v51 = vmul.f32 %v7274_v39, %v7274_v39  ;;  %v2914_v44 = vpop.f32.mrf.mxu1  ;;  %3107 = vmatprep.mubr.bf16.mxu1 %v7058_v48  ;;  %v7001_v48 = vld [vmem:[#allocation3 + $0x3b4] ss:$8 sps:$4 sm:$0xff]  }
 0x220   :  { %v2519_v33 = vpop.f32.mrf.mxu0  ;;  %v4057_v23 = vadd.f32 %v4056_v36, %v7272_v34  ;;  %3108 = vmatmul.mubr.bf16.gmra.mxu1 %v7056_v20 }
 0x221   :  { %v4575_v19 = vadd.f32 %v4574_v8, %v4320_v51  ;;  %v7492_v5 = vpop.f32.mrf.mxu1  ;;  %v6993_v51 = vld [vmem:[#allocation3 + $0x3a0] ss:$8 sps:$4 sm:$0xff]  }
 0x222   :  { %v7477_v14 = vpop.f32.mrf.mxu0  ;;  %v4058_v41 = vadd.f32 %v4057_v23, %v7274_v39  ;;  %13474 = vst [vmem:[#allocation115_spill] sm:$0xff] %v7492_v5 }
 0x223   :  { %13471 = vst [vmem:[#allocation112_spill] sm:$0xff] %v7477_v14  ;;  %v4576_v23 = vadd.f32 %v4575_v19, %v4321_v54  ;;  %v2919_v8 = vpop.f32.mrf.mxu1  ;;  %v4325_v19 = vmul.f32 %v7284_v58, %v7284_v58 }
 0x224   :  { %v2522_v33 = vpop.f32.mrf.mxu0  ;;  %v4059_v36 = vadd.f32 %v4058_v41, %v7276_v42 }
 0x225   :  { %v4322_v33 = vmul.f32 %v7278_v47, %v7278_v47  ;;  %v7502_v34 = vpop.f32.mrf.mxu1 }
 0x226   :  { %v7487_v31 = vpop.f32.mrf.mxu0  ;;  %2716 = vmatmul.mubr.bf16.gmra.mxu0 %v6987_v12  ;;  %v4060_v39 = vadd.f32 %v4059_v36, %v7278_v47  ;;  %v4323_v12 = vmul.f32 %v7280_v50, %v7280_v50  ;;  %13476 = vst [vmem:[#allocation117_spill] sm:$0xff] %v7502_v34  ;;  %v7061_v36 = vld [vmem:[#allocation3 + $0x6b4] ss:$8 sps:$4 sm:$0xff]  }
 0x227   :  { %13473 = vst [vmem:[#allocation114_spill] sm:$0xff] %v7487_v31  ;;  %2723 = vmatprep.mubr.bf16.mxu0 %v6995_v0  ;;  %v4577_v41 = vadd.f32 %v4576_v23, %v4322_v33  ;;  %v4324_v0 = vmul.f32 %v7282_v55, %v7282_v55  ;;  %v2922_v33 = vpop.f32.mrf.mxu1  ;;  %v7059_v23 = vld [vmem:[#allocation3 + $0x6b0] ss:$8 sps:$4 sm:$0xff]   ;;  %3115 = vmatprep.mubr.bf16.mxu1 %v7061_v36  ;;  %v7007_v36 = vld [vmem:[#allocation3 + $0x3c4] ss:$8 sps:$4 sm:$0xff]  }
 0x228   :  { %v2527_v26 = vpop.f32.mrf.mxu0  ;;  %v4061_v42 = vadd.f32 %v4060_v39, %v7280_v50  ;;  %3116 = vmatmul.mubr.bf16.gmra.mxu1 %v7059_v23 }
 0x229   :  { %v4578_v54 = vadd.f32 %v4577_v41, %v4323_v12  ;;  %v7512_v41 = vpop.f32.mrf.mxu1 }
 0x22a   :  { %v7497_v44 = vpop.f32.mrf.mxu0  ;;  %v4062_v20 = vadd.f32 %v4061_v42, %v7282_v55  ;;  %13478 = vst [vmem:[#allocation119_spill] sm:$0xff] %v7512_v41 }
 0x22b   :  { %13475 = vst [vmem:[#allocation116_spill] sm:$0xff] %v7497_v44  ;;  %v4579_v39 = vadd.f32 %v4578_v54, %v4324_v0  ;;  %v6999_v0 = vld [vmem:[#allocation3 + $0x3b0] ss:$8 sps:$4 sm:$0xff]   ;;  %v2927_v54 = vpop.f32.mrf.mxu1 }
 0x22c   :  { %v2530_v26 = vpop.f32.mrf.mxu0  ;;  %v4063_v8 = vadd.f32 %v4062_v20, %v7284_v58 }
 0x22d   :  { %v4326_v26 = vmul.f32 %v7286_v63, %v7286_v63  ;;  %v4580_v42 = vadd.f32 %v4579_v39, %v4325_v19  ;;  %v7522_v50 = vpop.f32.mrf.mxu1  ;;  %v4329_v39 = vmul.f32 %v7292_v10, %v7292_v10 }
 0x22e   :  { %v7507_v47 = vpop.f32.mrf.mxu0  ;;  %2724 = vmatmul.mubr.bf16.gmra.mxu0 %v6993_v51  ;;  %v4064_v55 = vadd.f32 %v4063_v8, %v7286_v63  ;;  %v4327_v51 = vmul.f32 %v7288_v2, %v7288_v2  ;;  %13480 = vst [vmem:[#allocation121_spill] sm:$0xff] %v7522_v50  ;;  %v7064_v8 = vld [vmem:[#allocation3 + $0x6c4] ss:$8 sps:$4 sm:$0xff]  }
 0x22f   :  { %13477 = vst [vmem:[#allocation118_spill] sm:$0xff] %v7507_v47  ;;  %2731 = vmatprep.mubr.bf16.mxu0 %v7001_v48  ;;  %v4581_v20 = vadd.f32 %v4580_v42, %v4326_v26  ;;  %v4328_v48 = vmul.f32 %v7290_v7, %v7290_v7  ;;  %v2930_v26 = vpop.f32.mrf.mxu1  ;;  %v7062_v42 = vld [vmem:[#allocation3 + $0x6c0] ss:$8 sps:$4 sm:$0xff]   ;;  %3123 = vmatprep.mubr.bf16.mxu1 %v7064_v8  ;;  %v7013_v8 = vld [vmem:[#allocation3 + $0x3d4] ss:$8 sps:$4 sm:$0xff]  }
 0x230   :  { %v2535_v12 = vpop.f32.mrf.mxu0  ;;  %v4065_v58 = vadd.f32 %v4064_v55, %v7288_v2  ;;  %3124 = vmatmul.mubr.bf16.gmra.mxu1 %v7062_v42 }
 0x231   :  { %v4582_v19 = vadd.f32 %v4581_v20, %v4327_v51  ;;  %v7532_v20 = vpop.f32.mrf.mxu1 }
 0x232   :  { %v7517_v33 = vpop.f32.mrf.mxu0  ;;  %v4066_v23 = vadd.f32 %v4065_v58, %v7290_v7  ;;  %13482 = vst [vmem:[#allocation123_spill] sm:$0xff] %v7532_v20 }
 0x233   :  { %13479 = vst [vmem:[#allocation120_spill] sm:$0xff] %v7517_v33  ;;  %v4583_v55 = vadd.f32 %v4582_v19, %v4328_v48  ;;  %v7005_v48 = vld [vmem:[#allocation3 + $0x3c0] ss:$8 sps:$4 sm:$0xff]   ;;  %v2935_v19 = vpop.f32.mrf.mxu1 }
 0x234   :  { %v2538_v12 = vpop.f32.mrf.mxu0  ;;  %v4067_v54 = vadd.f32 %v4066_v23, %v7292_v10 }
 0x235   :  { %v4330_v12 = vmul.f32 %v7294_v15, %v7294_v15  ;;  %v4584_v58 = vadd.f32 %v4583_v55, %v4329_v39  ;;  %v7542_v2 = vpop.f32.mrf.mxu1  ;;  %v4333_v55 = vmul.f32 %v7300_v28, %v7300_v28 }
 0x236   :  { %v7527_v63 = vpop.f32.mrf.mxu0  ;;  %2732 = vmatmul.mubr.bf16.gmra.mxu0 %v6999_v0  ;;  %v4068_v7 = vadd.f32 %v4067_v54, %v7294_v15  ;;  %v4331_v0 = vmul.f32 %v7296_v18, %v7296_v18  ;;  %13484 = vst [vmem:[#allocation125_spill] sm:$0xff] %v7542_v2  ;;  %v7067_v54 = vld [vmem:[#allocation3 + $0x6d4] ss:$8 sps:$4 sm:$0xff]  }
 0x237   :  { %13481 = vst [vmem:[#allocation122_spill] sm:$0xff] %v7527_v63  ;;  %2739 = vmatprep.mubr.bf16.mxu0 %v7007_v36  ;;  %v4585_v23 = vadd.f32 %v4584_v58, %v4330_v12  ;;  %v4332_v36 = vmul.f32 %v7298_v24, %v7298_v24  ;;  %v2938_v12 = vpop.f32.mrf.mxu1  ;;  %v7065_v58 = vld [vmem:[#allocation3 + $0x6d0] ss:$8 sps:$4 sm:$0xff]   ;;  %3131 = vmatprep.mubr.bf16.mxu1 %v7067_v54  ;;  %v7019_v54 = vld [vmem:[#allocation3 + $0x3e4] ss:$8 sps:$4 sm:$0xff]  }
 0x238   :  { %v2543_v51 = vpop.f32.mrf.mxu0  ;;  %v4069_v10 = vadd.f32 %v4068_v7, %v7296_v18  ;;  %3132 = vmatmul.mubr.bf16.gmra.mxu1 %v7065_v58 }
 0x239   :  { %v4586_v39 = vadd.f32 %v4585_v23, %v4331_v0  ;;  %v7552_v23 = vpop.f32.mrf.mxu1 }
 0x23a   :  { %v7537_v26 = vpop.f32.mrf.mxu0  ;;  %v4070_v42 = vadd.f32 %v4069_v10, %v7298_v24  ;;  %13486 = vst [vmem:[#allocation127_spill] sm:$0xff] %v7552_v23 }
 0x23b   :  { %13483 = vst [vmem:[#allocation124_spill] sm:$0xff] %v7537_v26  ;;  %v4587_v7 = vadd.f32 %v4586_v39, %v4332_v36  ;;  %v7011_v36 = vld [vmem:[#allocation3 + $0x3d0] ss:$8 sps:$4 sm:$0xff]   ;;  %v2943_v39 = vpop.f32.mrf.mxu1 }
 0x23c   :  { %v2546_v51 = vpop.f32.mrf.mxu0  ;;  %v4071_v19 = vadd.f32 %v4070_v42, %v7300_v28 }
 0x23d   :  { %v4334_v51 = vmul.f32 %v7302_v35, %v7302_v35  ;;  %v4588_v10 = vadd.f32 %v4587_v7, %v4333_v55  ;;  %v7562_v18 = vpop.f32.mrf.mxu1  ;;  %v4337_v7 = vmul.f32 %v7308_v49, %v7308_v49 }
 0x23e   :  { %v7547_v15 = vpop.f32.mrf.mxu0  ;;  %2740 = vmatmul.mubr.bf16.gmra.mxu0 %v7005_v48  ;;  %v4072_v24 = vadd.f32 %v4071_v19, %v7302_v35  ;;  %v4335_v48 = vmul.f32 %v7304_v38, %v7304_v38  ;;  %13488 = vst [vmem:[#allocation129_spill] sm:$0xff] %v7562_v18  ;;  %v7070_v19 = vld [vmem:[#allocation3 + $0x6e4] ss:$8 sps:$4 sm:$0xff]  }
 0x23f   :  { %13485 = vst [vmem:[#allocation126_spill] sm:$0xff] %v7547_v15  ;;  %2747 = vmatprep.mubr.bf16.mxu0 %v7013_v8  ;;  %v4589_v42 = vadd.f32 %v4588_v10, %v4334_v51  ;;  %v4336_v8 = vmul.f32 %v7306_v45, %v7306_v45  ;;  %v2946_v51 = vpop.f32.mrf.mxu1  ;;  %v7068_v10 = vld [vmem:[#allocation3 + $0x6e0] ss:$8 sps:$4 sm:$0xff]   ;;  %3139 = vmatprep.mubr.bf16.mxu1 %v7070_v19  ;;  %v7025_v19 = vld [vmem:[#allocation3 + $0x3f4] ss:$8 sps:$4 sm:$0xff]  }
 0x240   :  { %v2551_v0 = vpop.f32.mrf.mxu0  ;;  %v4073_v28 = vadd.f32 %v4072_v24, %v7304_v38  ;;  %3140 = vmatmul.mubr.bf16.gmra.mxu1 %v7068_v10 }
 0x241   :  { %v4590_v55 = vadd.f32 %v4589_v42, %v4335_v48  ;;  %v7572_v42 = vpop.f32.mrf.mxu1 }
 0x242   :  { %v7557_v12 = vpop.f32.mrf.mxu0  ;;  %v4074_v58 = vadd.f32 %v4073_v28, %v7306_v45  ;;  %13490 = vst [vmem:[#allocation131_spill] sm:$0xff] %v7572_v42 }
 0x243   :  { %13487 = vst [vmem:[#allocation128_spill] sm:$0xff] %v7557_v12  ;;  %v4591_v24 = vadd.f32 %v4590_v55, %v4336_v8  ;;  %v7017_v8 = vld [vmem:[#allocation3 + $0x3e0] ss:$8 sps:$4 sm:$0xff]   ;;  %v2951_v55 = vpop.f32.mrf.mxu1 }
 0x244   :  { %v2554_v0 = vpop.f32.mrf.mxu0  ;;  %v4075_v39 = vadd.f32 %v4074_v58, %v7308_v49 }
 0x245   :  { %v4338_v0 = vmul.f32 %v7310_v56, %v7310_v56  ;;  %v4592_v28 = vadd.f32 %v4591_v24, %v4337_v7  ;;  %v7582_v38 = vpop.f32.mrf.mxu1  ;;  %v4341_v24 = vmul.f32 %v7316_v6, %v7316_v6 }
 0x246   :  { %v7567_v35 = vpop.f32.mrf.mxu0  ;;  %2748 = vmatmul.mubr.bf16.gmra.mxu0 %v7011_v36  ;;  %v4076_v45 = vadd.f32 %v4075_v39, %v7310_v56  ;;  %v4339_v36 = vmul.f32 %v7312_v60, %v7312_v60  ;;  %13492 = vst [vmem:[#allocation133_spill] sm:$0xff] %v7582_v38  ;;  %v7073_v39 = vld [vmem:[#allocation3 + $0x6f4] ss:$8 sps:$4 sm:$0xff]  }
 0x247   :  { %13489 = vst [vmem:[#allocation130_spill] sm:$0xff] %v7567_v35  ;;  %2755 = vmatprep.mubr.bf16.mxu0 %v7019_v54  ;;  %v4593_v58 = vadd.f32 %v4592_v28, %v4338_v0  ;;  %v4340_v54 = vmul.f32 %v7314_v3, %v7314_v3  ;;  %v2954_v0 = vpop.f32.mrf.mxu1  ;;  %v7071_v28 = vld [vmem:[#allocation3 + $0x6f0] ss:$8 sps:$4 sm:$0xff]   ;;  %3147 = vmatprep.mubr.bf16.mxu1 %v7073_v39 }
 0x248   :  { %v2559_v48 = vpop.f32.mrf.mxu0  ;;  %v4077_v49 = vadd.f32 %v4076_v45, %v7312_v60  ;;  %3148 = vmatmul.mubr.bf16.gmra.mxu1 %v7071_v28 }
 0x249   :  { %v4594_v7 = vadd.f32 %v4593_v58, %v4339_v36  ;;  %v7592_v58 = vpop.f32.mrf.mxu1 }
 0x24a   :  { %v7577_v51 = vpop.f32.mrf.mxu0  ;;  %v4078_v10 = vadd.f32 %v4077_v49, %v7314_v3  ;;  %13494 = vst [vmem:[#allocation135_spill] sm:$0xff] %v7592_v58 }
 0x24b   :  { %13491 = vst [vmem:[#allocation132_spill] sm:$0xff] %v7577_v51  ;;  %v4595_v45 = vadd.f32 %v4594_v7, %v4340_v54  ;;  %v7023_v54 = vld [vmem:[#allocation3 + $0x3f0] ss:$8 sps:$4 sm:$0xff]   ;;  %v2959_v7 = vpop.f32.mrf.mxu1 }
 0x24c   :  { %v2562_v48 = vpop.f32.mrf.mxu0  ;;  %v4079_v55 = vadd.f32 %v4078_v10, %v7316_v6 }
 0x24d   :  { %v4342_v48 = vmul.f32 %v7318_v13, %v7318_v13  ;;  %v4596_v49 = vadd.f32 %v4595_v45, %v4341_v24  ;;  %v4345_v45 = vmul.f32 %v7324_v30, %v7324_v30 }
 0x24e   :  { %v7587_v56 = vpop.f32.mrf.mxu0  ;;  %2756 = vmatmul.mubr.bf16.gmra.mxu0 %v7017_v8  ;;  %v4080_v3 = vadd.f32 %v4079_v55, %v7318_v13  ;;  %v4343_v8 = vmul.f32 %v7320_v17, %v7320_v17  ;;  %v7076_v55 = vld [vmem:[#allocation3 + $0x704] ss:$8 sps:$4 sm:$0xff]  }
 0x24f   :  { %13493 = vst [vmem:[#allocation134_spill] sm:$0xff] %v7587_v56  ;;  %2763 = vmatprep.mubr.bf16.mxu0 %v7025_v19  ;;  %v4597_v10 = vadd.f32 %v4596_v49, %v4342_v48  ;;  %v4344_v19 = vmul.f32 %v7322_v25, %v7322_v25  ;;  %v7074_v48 = vld [vmem:[#allocation3 + $0x700] ss:$8 sps:$4 sm:$0xff]   ;;  %3155 = vmatprep.mubr.bf16.mxu1 %v7076_v55 }
 0x250   :  { %v2567_v36 = vpop.f32.mrf.mxu0  ;;  %v4081_v6 = vadd.f32 %v4080_v3, %v7320_v17  ;;  %3156 = vmatmul.mubr.bf16.gmra.mxu1 %v7074_v48  ;;  %v4349_v48 = vmul.f32 %v7338_v4, %v7338_v4 }
 0x251   :  { %v7602_v36 = vpop.f32.mrf.mxu1  ;;  %v4598_v28 = vadd.f32 %v4597_v10, %v4343_v8 }
 0x252   :  { %v7597_v0 = vpop.f32.mrf.mxu0  ;;  %13496 = vst [vmem:[#allocation137_spill] sm:$0xff] %v7602_v36  ;;  %v4082_v24 = vadd.f32 %v4081_v6, %v7322_v25  ;;  %v4347_v25 = vmul.f32 %v7330_v46, %v7330_v46 }
 0x253   :  { %13495 = vst [vmem:[#allocation136_spill] sm:$0xff] %v7597_v0  ;;  %v2962_v7 = vpop.f32.mrf.mxu1  ;;  %v4599_v49 = vadd.f32 %v4598_v28, %v4344_v19 }
 0x254   :  { %v2570_v39 = vpop.f32.mrf.mxu0  ;;  %v4083_v3 = vadd.f32 %v4082_v24, %v7324_v30  ;;  %v4348_v24 = vmul.f32 %v7334_v59, %v7334_v59 }
 0x255   :  { %v4346_v39 = vmul.f32 %v7326_v40, %v7326_v40  ;;  %v7612_v8 = vpop.f32.mrf.mxu1  ;;  %v4600_v6 = vadd.f32 %v4599_v49, %v4345_v45  ;;  %v7079_v49 = vld [vmem:[#allocation3 + $0x714] ss:$8 sps:$4 sm:$0xff]  }
 0x256   :  { %v7607_v13 = vpop.f32.mrf.mxu0  ;;  %2764 = vmatmul.mubr.bf16.gmra.mxu0 %v7023_v54  ;;  %13498 = vst [vmem:[#allocation139_spill] sm:$0xff] %v7612_v8  ;;  %v4084_v10 = vadd.f32 %v4083_v3, %v7326_v40  ;;  %3163 = vmatprep.mubr.bf16.mxu1 %v7079_v49 }
 0x257   :  { %13497 = vst [vmem:[#allocation138_spill] sm:$0xff] %v7607_v13  ;;  %v2967_v7 = vpop.f32.mrf.mxu1  ;;  %v4601_v19 = vadd.f32 %v4600_v6, %v4346_v39 }
 0x258   :  { %v2575_v17 = vpop.f32.mrf.mxu0  ;;  %v4085_v28 = vadd.f32 %v4084_v10, %v7330_v46  ;;  %v7077_v7 = vld [vmem:[#allocation3 + $0x710] ss:$8 sps:$4 sm:$0xff]   ;;  %v4350_v10 = vmul.f32 %v7342_v16, %v7342_v16 }
 0x259   :  { %v7622_v17 = vpop.f32.mrf.mxu1  ;;  %v4602_v30 = vadd.f32 %v4601_v19, %v4347_v25  ;;  %3164 = vmatmul.mubr.bf16.gmra.mxu1 %v7077_v7  ;;  %v4353_v7 = vmul.f32 %v7354_v57, %v7354_v57 }
 0x25a   :  { %v7617_v54 = vpop.f32.mrf.mxu0  ;;  %13500 = vst [vmem:[#allocation141_spill] sm:$0xff] %v7622_v17  ;;  %v4086_v45 = vadd.f32 %v4085_v28, %v7334_v59  ;;  %v4351_v28 = vmul.f32 %v7346_v27, %v7346_v27 }
 0x25b   :  { %13499 = vst [vmem:[#allocation140_spill] sm:$0xff] %v7617_v54  ;;  %v2970_v40 = vpop.f32.mrf.mxu1  ;;  %v4603_v39 = vadd.f32 %v4602_v30, %v4348_v24 }
 0x25c   :  { %v2578_v55 = vpop.f32.mrf.mxu0  ;;  %v4087_v6 = vadd.f32 %v4086_v45, %v7338_v4  ;;  %v4352_v45 = vmul.f32 %v7350_v43, %v7350_v43 }
 0x25d   :  { %v7632_v46 = vpop.f32.mrf.mxu1  ;;  %v4604_v25 = vadd.f32 %v4603_v39, %v4349_v48  ;;  %v7082_v39 = vld [vmem:[#allocation3 + $0x724] ss:$8 sps:$4 sm:$0xff]  }
 0x25e   :  { %v7627_v3 = vpop.f32.mrf.mxu0  ;;  %13502 = vst [vmem:[#allocation143_spill] sm:$0xff] %v7632_v46  ;;  %v4088_v19 = vadd.f32 %v4087_v6, %v7342_v16  ;;  %3171 = vmatprep.mubr.bf16.mxu1 %v7082_v39 }
 0x25f   :  { %13501 = vst [vmem:[#allocation142_spill] sm:$0xff] %v7627_v3  ;;  %v2975_v40 = vpop.f32.mrf.mxu1  ;;  %v4605_v30 = vadd.f32 %v4604_v25, %v4350_v10 }
 0x260   :  { %v2583_v55 = vpop.f32.mrf.mxu0  ;;  %v4089_v24 = vadd.f32 %v4088_v19, %v7346_v27  ;;  %v7080_v40 = vld [vmem:[#allocation3 + $0x720] ss:$8 sps:$4 sm:$0xff]   ;;  %v4354_v19 = vmul.f32 %v7358_v11, %v7358_v11 }
 0x261   :  { %v7642_v55 = vpop.f32.mrf.mxu1  ;;  %v4606_v4 = vadd.f32 %v4605_v30, %v4351_v28  ;;  %3172 = vmatmul.mubr.bf16.gmra.mxu1 %v7080_v40  ;;  %v4357_v40 = vmul.f32 %v7370_v9, %v7370_v9 }
 0x262   :  { %v7637_v59 = vpop.f32.mrf.mxu0  ;;  %13504 = vst [vmem:[#allocation145_spill] sm:$0xff] %v7642_v55  ;;  %v4090_v48 = vadd.f32 %v4089_v24, %v7350_v43  ;;  %v4355_v24 = vmul.f32 %v7362_v29, %v7362_v29 }
 0x263   :  { %13503 = vst [vmem:[#allocation144_spill] sm:$0xff] %v7637_v59  ;;  %v2978_v16 = vpop.f32.mrf.mxu1  ;;  %v4607_v10 = vadd.f32 %v4606_v4, %v4352_v45 }
 0x264   :  { %v2586_v49 = vpop.f32.mrf.mxu0  ;;  %v4091_v25 = vadd.f32 %v4090_v48, %v7354_v57  ;;  %v4356_v48 = vmul.f32 %v7366_v52, %v7366_v52 }
 0x265   :  { %v7652_v27 = vpop.f32.mrf.mxu1  ;;  %v4608_v28 = vadd.f32 %v4607_v10, %v4353_v7  ;;  %v7085_v10 = vld [vmem:[#allocation3 + $0x734] ss:$8 sps:$4 sm:$0xff]  }
 0x266   :  { %v7647_v6 = vpop.f32.mrf.mxu0  ;;  %13506 = vst [vmem:[#allocation147_spill] sm:$0xff] %v7652_v27  ;;  %v4092_v30 = vadd.f32 %v4091_v25, %v7358_v11  ;;  %3179 = vmatprep.mubr.bf16.mxu1 %v7085_v10 }
 0x267   :  { %13505 = vst [vmem:[#allocation146_spill] sm:$0xff] %v7647_v6  ;;  %v2983_v16 = vpop.f32.mrf.mxu1  ;;  %v4609_v4 = vadd.f32 %v4608_v28, %v4354_v19 }
 0x268   :  { %v2591_v49 = vpop.f32.mrf.mxu0  ;;  %v4093_v45 = vadd.f32 %v4092_v30, %v7362_v29  ;;  %v7083_v16 = vld [vmem:[#allocation3 + $0x730] ss:$8 sps:$4 sm:$0xff]   ;;  %v4358_v30 = vmul.f32 %v7374_v21, %v7374_v21 }
 0x269   :  { %v7662_v49 = vpop.f32.mrf.mxu1  ;;  %v4610_v57 = vadd.f32 %v4609_v4, %v4355_v24  ;;  %3180 = vmatmul.mubr.bf16.gmra.mxu1 %v7083_v16  ;;  %v4361_v16 = vmul.f32 %v7386_v61, %v7386_v61 }
 0x26a   :  { %v7657_v43 = vpop.f32.mrf.mxu0  ;;  %13508 = vst [vmem:[#allocation149_spill] sm:$0xff] %v7662_v49  ;;  %v4094_v7 = vadd.f32 %v4093_v45, %v7366_v52  ;;  %v4359_v45 = vmul.f32 %v7378_v62, %v7378_v62 }
 0x26b   :  { %13507 = vst [vmem:[#allocation148_spill] sm:$0xff] %v7657_v43  ;;  %v2986_v11 = vpop.f32.mrf.mxu1  ;;  %v4611_v19 = vadd.f32 %v4610_v57, %v4356_v48 }
 0x26c   :  { %v2594_v39 = vpop.f32.mrf.mxu0  ;;  %v4095_v28 = vadd.f32 %v4094_v7, %v7370_v9  ;;  %v4360_v7 = vmul.f32 %v7382_v53, %v7382_v53 }
 0x26d   :  { %v7672_v29 = vpop.f32.mrf.mxu1  ;;  %v4612_v24 = vadd.f32 %v4611_v19, %v4357_v40  ;;  %v7088_v19 = vld [vmem:[#allocation3 + $0x744] ss:$8 sps:$4 sm:$0xff]  }
 0x26e   :  { %v7667_v25 = vpop.f32.mrf.mxu0  ;;  %13510 = vst [vmem:[#allocation151_spill] sm:$0xff] %v7672_v29  ;;  %v4096_v4 = vadd.f32 %v4095_v28, %v7374_v21  ;;  %3187 = vmatprep.mubr.bf16.mxu1 %v7088_v19 }
 0x26f   :  { %13509 = vst [vmem:[#allocation150_spill] sm:$0xff] %v7667_v25  ;;  %v2991_v11 = vpop.f32.mrf.mxu1  ;;  %v4613_v57 = vadd.f32 %v4612_v24, %v4358_v30 }
 0x270   :  { %v2599_v39 = vpop.f32.mrf.mxu0  ;;  %v4097_v48 = vadd.f32 %v4096_v4, %v7378_v62  ;;  %v7086_v11 = vld [vmem:[#allocation3 + $0x740] ss:$8 sps:$4 sm:$0xff]   ;;  %v4362_v4 = vmul.f32 %v7390_v22, %v7390_v22 }
 0x271   :  { %v7682_v39 = vpop.f32.mrf.mxu1  ;;  %v4614_v9 = vadd.f32 %v4613_v57, %v4359_v45  ;;  %3188 = vmatmul.mubr.bf16.gmra.mxu1 %v7086_v11  ;;  %v13518_v11 = vld [vmem:[#allocation80_spill] sm:$0xff] }
 0x272   :  { %v7677_v52 = vpop.f32.mrf.mxu0  ;;  %13512 = vst [vmem:[#allocation153_spill] sm:$0xff] %v7682_v39  ;;  %v4098_v40 = vadd.f32 %v4097_v48, %v7382_v53  ;;  %v4363_v48 = vmul.f32 %v7394_v32, %v7394_v32 }
 0x273   :  { %13511 = vst [vmem:[#allocation152_spill] sm:$0xff] %v7677_v52  ;;  %v2994_v21 = vpop.f32.mrf.mxu1  ;;  %v4615_v30 = vadd.f32 %v4614_v9, %v4360_v7 }
 0x274   :  { %v2602_v10 = vpop.f32.mrf.mxu0  ;;  %v4099_v24 = vadd.f32 %v4098_v40, %v7386_v61  ;;  %v13516_v40 = vld [vmem:[#allocation78_spill] sm:$0xff] }
 0x275   :  { %v7692_v62 = vpop.f32.mrf.mxu1  ;;  %v4616_v45 = vadd.f32 %v4615_v30, %v4361_v16  ;;  %v4364_v61 = vmul.f32 %v13516_v40, %v13516_v40  ;;  %v4365_v30 = vmul.f32 %v13518_v11, %v13518_v11 }
 0x276   :  { %v7687_v28 = vpop.f32.mrf.mxu0  ;;  %13514 = vst [vmem:[#allocation155_spill] sm:$0xff] %v7692_v62  ;;  %v4100_v57 = vadd.f32 %v4099_v24, %v7390_v22  ;;  %v7091_v24 = vld [vmem:[#allocation3 + $0x754] ss:$8 sps:$4 sm:$0xff]  }
 0x277   :  { %13513 = vst [vmem:[#allocation154_spill] sm:$0xff] %v7687_v28  ;;  %v2999_v21 = vpop.f32.mrf.mxu1  ;;  %v4617_v9 = vadd.f32 %v4616_v45, %v4362_v4  ;;  %3195 = vmatprep.mubr.bf16.mxu1 %v7091_v24 }
 0x278   :  { %v2607_v10 = vpop.f32.mrf.mxu0  ;;  %v4101_v7 = vadd.f32 %v4100_v57, %v7394_v32  ;;  %v7089_v21 = vld [vmem:[#allocation3 + $0x750] ss:$8 sps:$4 sm:$0xff]  }
 0x279   :  { %v7702_v10 = vpop.f32.mrf.mxu1  ;;  %v4618_v60 = vadd.f32 %v4617_v9, %v4363_v48  ;;  %v13520_v57 = vld [vmem:[#allocation82_spill] sm:$0xff]  ;;  %3196 = vmatmul.mubr.bf16.gmra.mxu1 %v7089_v21  ;;  %v13526_v21 = vld [vmem:[#allocation88_spill] sm:$0xff] }
 0x27a   :  { %v7697_v53 = vpop.f32.mrf.mxu0  ;;  %13517 = vst [vmem:[#allocation157_spill] sm:$0xff] %v7702_v10  ;;  %v4102_v16 = vadd.f32 %v4101_v7, %v13516_v40  ;;  %v4366_v32 = vmul.f32 %v13520_v57, %v13520_v57  ;;  %v13522_v7 = vld [vmem:[#allocation84_spill] sm:$0xff] }
 0x27b   :  { %13515 = vst [vmem:[#allocation156_spill] sm:$0xff] %v7697_v53  ;;  %v3002_v62 = vpop.f32.mrf.mxu1  ;;  %v4619_v4 = vadd.f32 %v4618_v60, %v4364_v61  ;;  %v4367_v40 = vmul.f32 %v13522_v7, %v13522_v7 }
 0x27c   :  { %v2610_v19 = vpop.f32.mrf.mxu0  ;;  %v4103_v45 = vadd.f32 %v4102_v16, %v13518_v11  ;;  %v13524_v16 = vld [vmem:[#allocation86_spill] sm:$0xff] }
 0x27d   :  { %v7712_v10 = vpop.f32.mrf.mxu1  ;;  %v4620_v48 = vadd.f32 %v4619_v4, %v4365_v30  ;;  %v4368_v11 = vmul.f32 %v13524_v16, %v13524_v16  ;;  %v4369_v4 = vmul.f32 %v13526_v21, %v13526_v21 }
 0x27e   :  { %v7707_v22 = vpop.f32.mrf.mxu0  ;;  %13521 = vst [vmem:[#allocation159_spill] sm:$0xff] %v7712_v10  ;;  %v4104_v9 = vadd.f32 %v4103_v45, %v13520_v57  ;;  %v7094_v45 = vld [vmem:[#allocation3 + $0x764] ss:$8 sps:$4 sm:$0xff]  }
 0x27f   :  { %13519 = vst [vmem:[#allocation158_spill] sm:$0xff] %v7707_v22  ;;  %v3007_v62 = vpop.f32.mrf.mxu1  ;;  %v4621_v60 = vadd.f32 %v4620_v48, %v4366_v32  ;;  %3203 = vmatprep.mubr.bf16.mxu1 %v7094_v45 }
 0x280   :  { %v2615_v19 = vpop.f32.mrf.mxu0  ;;  %v4105_v61 = vadd.f32 %v4104_v9, %v13522_v7  ;;  %v7092_v62 = vld [vmem:[#allocation3 + $0x760] ss:$8 sps:$4 sm:$0xff]   ;;  %v13528_v9 = vld [vmem:[#allocation90_spill] sm:$0xff] }
 0x281   :  { %v7722_v19 = vpop.f32.mrf.mxu1  ;;  %v4622_v10 = vadd.f32 %v4621_v60, %v4367_v40  ;;  %v4370_v7 = vmul.f32 %v13528_v9, %v13528_v9  ;;  %3204 = vmatmul.mubr.bf16.gmra.mxu1 %v7092_v62  ;;  %v13534_v62 = vld [vmem:[#allocation96_spill] sm:$0xff] }
 0x282   :  { %v7717_v39 = vpop.f32.mrf.mxu0  ;;  %13525 = vst [vmem:[#allocation161_spill] sm:$0xff] %v7722_v19  ;;  %v4106_v30 = vadd.f32 %v4105_v61, %v13524_v16  ;;  %v13530_v61 = vld [vmem:[#allocation92_spill] sm:$0xff] }
 0x283   :  { %13523 = vst [vmem:[#allocation160_spill] sm:$0xff] %v7717_v39  ;;  %v3010_v29 = vpop.f32.mrf.mxu1  ;;  %v4623_v32 = vadd.f32 %v4622_v10, %v4368_v11  ;;  %v4371_v16 = vmul.f32 %v13530_v61, %v13530_v61 }
 0x284   :  { %v2618_v24 = vpop.f32.mrf.mxu0  ;;  %v4107_v48 = vadd.f32 %v4106_v30, %v13526_v21  ;;  %v13532_v30 = vld [vmem:[#allocation94_spill] sm:$0xff] }
 0x285   :  { %v7732_v19 = vpop.f32.mrf.mxu1  ;;  %v4624_v40 = vadd.f32 %v4623_v32, %v4369_v4  ;;  %v4372_v21 = vmul.f32 %v13532_v30, %v13532_v30  ;;  %v4373_v32 = vmul.f32 %v13534_v62, %v13534_v62 }
 0x286   :  { %v7727_v57 = vpop.f32.mrf.mxu0  ;;  %13529 = vst [vmem:[#allocation163_spill] sm:$0xff] %v7732_v19  ;;  %v4108_v60 = vadd.f32 %v4107_v48, %v13528_v9  ;;  %v7097_v48 = vld [vmem:[#allocation3 + $0x774] ss:$8 sps:$4 sm:$0xff]  }
 0x287   :  { %13527 = vst [vmem:[#allocation162_spill] sm:$0xff] %v7727_v57  ;;  %v3015_v29 = vpop.f32.mrf.mxu1  ;;  %v4625_v10 = vadd.f32 %v4624_v40, %v4370_v7  ;;  %3211 = vmatprep.mubr.bf16.mxu1 %v7097_v48 }
 0x288   :  { %v2623_v24 = vpop.f32.mrf.mxu0  ;;  %v4109_v11 = vadd.f32 %v4108_v60, %v13530_v61  ;;  %v7095_v29 = vld [vmem:[#allocation3 + $0x770] ss:$8 sps:$4 sm:$0xff]  }
 0x289   :  { %v7742_v24 = vpop.f32.mrf.mxu1  ;;  %v4626_v19 = vadd.f32 %v4625_v10, %v4371_v16  ;;  %v13536_v60 = vld [vmem:[#allocation98_spill] sm:$0xff]  ;;  %3212 = vmatmul.mubr.bf16.gmra.mxu1 %v7095_v29  ;;  %v13541_v29 = vld [vmem:[#allocation104_spill] sm:$0xff] }
 0x28a   :  { %v7737_v49 = vpop.f32.mrf.mxu0  ;;  %13533 = vst [vmem:[#allocation165_spill] sm:$0xff] %v7742_v24  ;;  %v4110_v4 = vadd.f32 %v4109_v11, %v13532_v30  ;;  %v4374_v61 = vmul.f32 %v13536_v60, %v13536_v60  ;;  %v13538_v11 = vld [vmem:[#allocation100_spill] sm:$0xff] }
 0x28b   :  { %13531 = vst [vmem:[#allocation164_spill] sm:$0xff] %v7737_v49  ;;  %v3018_v27 = vpop.f32.mrf.mxu1  ;;  %v4627_v7 = vadd.f32 %v4626_v19, %v4372_v21  ;;  %v4375_v30 = vmul.f32 %v13538_v11, %v13538_v11 }
 0x28c   :  { %v2626_v45 = vpop.f32.mrf.mxu0  ;;  %v4111_v40 = vadd.f32 %v4110_v4, %v13534_v62  ;;  %v4376_v4 = vmul.f32 %v7446_v1, %v7446_v1 }
 0x28d   :  { %v7752_v24 = vpop.f32.mrf.mxu1  ;;  %v4628_v16 = vadd.f32 %v4627_v7, %v4373_v32  ;;  %v4377_v7 = vmul.f32 %v13541_v29, %v13541_v29 }
 0x28e   :  { %v7747_v9 = vpop.f32.mrf.mxu0  ;;  %13537 = vst [vmem:[#allocation167_spill] sm:$0xff] %v7752_v24  ;;  %v4112_v10 = vadd.f32 %v4111_v40, %v13536_v60  ;;  %v7100_v40 = vld [vmem:[#allocation3 + $0x784] ss:$8 sps:$4 sm:$0xff]  }
 0x28f   :  { %13535 = vst [vmem:[#allocation166_spill] sm:$0xff] %v7747_v9  ;;  %v3023_v27 = vpop.f32.mrf.mxu1  ;;  %v4629_v19 = vadd.f32 %v4628_v16, %v4374_v61  ;;  %3219 = vmatprep.mubr.bf16.mxu1 %v7100_v40 }
 0x290   :  { %v2631_v45 = vpop.f32.mrf.mxu0  ;;  %v4113_v21 = vadd.f32 %v4112_v10, %v13538_v11  ;;  %v7098_v27 = vld [vmem:[#allocation3 + $0x780] ss:$8 sps:$4 sm:$0xff]   ;;  %v13543_v10 = vld [vmem:[#allocation106_spill] sm:$0xff] }
 0x291   :  { %v7762_v45 = vpop.f32.mrf.mxu1  ;;  %v4630_v62 = vadd.f32 %v4629_v19, %v4375_v30  ;;  %v4378_v11 = vmul.f32 %v13543_v10, %v13543_v10  ;;  %3220 = vmatmul.mubr.bf16.gmra.mxu1 %v7098_v27  ;;  %v4381_v27 = vmul.f32 %v7477_v14, %v7477_v14 }
 0x292   :  { %v7757_v55 = vpop.f32.mrf.mxu0  ;;  %13540 = vst [vmem:[#allocation169_spill] sm:$0xff] %v7762_v45  ;;  %v4114_v32 = vadd.f32 %v4113_v21, %v7446_v1  ;;  %v13545_v21 = vld [vmem:[#allocation108_spill] sm:$0xff] }
 0x293   :  { %13539 = vst [vmem:[#allocation168_spill] sm:$0xff] %v7757_v55  ;;  %v3026_v24 = vpop.f32.mrf.mxu1  ;;  %v4631_v61 = vadd.f32 %v4630_v62, %v4376_v4  ;;  %v4379_v1 = vmul.f32 %v13545_v21, %v13545_v21 }
 0x294   :  { %v2634_v48 = vpop.f32.mrf.mxu0  ;;  %v4115_v16 = vadd.f32 %v4114_v32, %v13541_v29  ;;  %v13547_v32 = vld [vmem:[#allocation110_spill] sm:$0xff] }
 0x295   :  { %v7772_v45 = vpop.f32.mrf.mxu1  ;;  %v4632_v30 = vadd.f32 %v4631_v61, %v4377_v7  ;;  %v4380_v29 = vmul.f32 %v13547_v32, %v13547_v32  ;;  %v7103_v61 = vld [vmem:[#allocation3 + $0x794] ss:$8 sps:$4 sm:$0xff]  }
 0x296   :  { %v7767_v60 = vpop.f32.mrf.mxu0  ;;  %13544 = vst [vmem:[#allocation171_spill] sm:$0xff] %v7772_v45  ;;  %v4116_v19 = vadd.f32 %v4115_v16, %v13543_v10  ;;  %3227 = vmatprep.mubr.bf16.mxu1 %v7103_v61 }
 0x297   :  { %13542 = vst [vmem:[#allocation170_spill] sm:$0xff] %v7767_v60  ;;  %v3031_v24 = vpop.f32.mrf.mxu1  ;;  %v4633_v62 = vadd.f32 %v4632_v30, %v4378_v11 }
 0x298   :  { %v2639_v48 = vpop.f32.mrf.mxu0  ;;  %v4117_v4 = vadd.f32 %v4116_v19, %v13545_v21  ;;  %v7101_v24 = vld [vmem:[#allocation3 + $0x790] ss:$8 sps:$4 sm:$0xff]   ;;  %v4382_v19 = vmul.f32 %v7487_v31, %v7487_v31 }
 0x299   :  { %v7782_v48 = vpop.f32.mrf.mxu1  ;;  %v4634_v45 = vadd.f32 %v4633_v62, %v4379_v1  ;;  %3228 = vmatmul.mubr.bf16.gmra.mxu1 %v7101_v24  ;;  %v4385_v24 = vmul.f32 %v7517_v33, %v7517_v33 }
 0x29a   :  { %v7777_v46 = vpop.f32.mrf.mxu0  ;;  %v4118_v7 = vadd.f32 %v4117_v4, %v13547_v32  ;;  %v4383_v4 = vmul.f32 %v7497_v44, %v7497_v44 }
 0x29b   :  { %13546 = vst [vmem:[#allocation172_spill] sm:$0xff] %v7777_v46  ;;  %v3034_v10 = vpop.f32.mrf.mxu1  ;;  %v4635_v11 = vadd.f32 %v4634_v45, %v4380_v29 }
 0x29c   :  { %v2642_v40 = vpop.f32.mrf.mxu0  ;;  %v4119_v30 = vadd.f32 %v4118_v7, %v7477_v14  ;;  %v4384_v7 = vmul.f32 %v7507_v47, %v7507_v47 }
 0x29d   :  { %v7792_v21 = vpop.f32.mrf.mxu1  ;;  %v4636_v1 = vadd.f32 %v4635_v11, %v4381_v27  ;;  %v7106_v11 = vld [vmem:[#allocation3 + $0x7a4] ss:$8 sps:$4 sm:$0xff]  }
 0x29e   :  { %v7787_v16 = vpop.f32.mrf.mxu0  ;;  %v4120_v62 = vadd.f32 %v4119_v30, %v7487_v31  ;;  %3235 = vmatprep.mubr.bf16.mxu1 %v7106_v11 }
 0x29f   :  { %13548 = vst [vmem:[#allocation173_spill] sm:$0xff] %v7787_v16  ;;  %v3039_v10 = vpop.f32.mrf.mxu1  ;;  %v4637_v45 = vadd.f32 %v4636_v1, %v4382_v19 }
 0x2a0   :  { %v2647_v40 = vpop.f32.mrf.mxu0  ;;  %v4121_v29 = vadd.f32 %v4120_v62, %v7497_v44  ;;  %v7104_v10 = vld [vmem:[#allocation3 + $0x7a0] ss:$8 sps:$4 sm:$0xff]   ;;  %v4386_v62 = vmul.f32 %v7527_v63, %v7527_v63 }
 0x2a1   :  { %v7802_v40 = vpop.f32.mrf.mxu1  ;;  %v4638_v14 = vadd.f32 %v4637_v45, %v4383_v4  ;;  %3236 = vmatmul.mubr.bf16.gmra.mxu1 %v7104_v10  ;;  %v4389_v10 = vmul.f32 %v7557_v12, %v7557_v12 }
 0x2a2   :  { %v7797_v32 = vpop.f32.mrf.mxu0  ;;  %v4122_v27 = vadd.f32 %v4121_v29, %v7507_v47  ;;  %v4387_v29 = vmul.f32 %v7537_v26, %v7537_v26 }
 0x2a3   :  { %13549 = vst [vmem:[#allocation174_spill] sm:$0xff] %v7797_v32  ;;  %v3042_v31 = vpop.f32.mrf.mxu1  ;;  %v4639_v19 = vadd.f32 %v4638_v14, %v4384_v7 }
 0x2a4   :  { %v2650_v61 = vpop.f32.mrf.mxu0  ;;  %v4123_v1 = vadd.f32 %v4122_v27, %v7517_v33  ;;  %v4388_v27 = vmul.f32 %v7547_v15, %v7547_v15 }
 0x2a5   :  { %v7812_v44 = vpop.f32.mrf.mxu1  ;;  %v4640_v4 = vadd.f32 %v4639_v19, %v4385_v24  ;;  %v7109_v19 = vld [vmem:[#allocation3 + $0x7b4] ss:$8 sps:$4 sm:$0xff]  }
 0x2a6   :  { %v7807_v30 = vpop.f32.mrf.mxu0  ;;  %v4124_v45 = vadd.f32 %v4123_v1, %v7527_v63  ;;  %3243 = vmatprep.mubr.bf16.mxu1 %v7109_v19 }
 0x2a7   :  { %13550 = vst [vmem:[#allocation175_spill] sm:$0xff] %v7807_v30  ;;  %v3047_v31 = vpop.f32.mrf.mxu1  ;;  %v4641_v14 = vadd.f32 %v4640_v4, %v4386_v62 }
 0x2a8   :  { %v2655_v61 = vpop.f32.mrf.mxu0  ;;  %v4125_v7 = vadd.f32 %v4124_v45, %v7537_v26  ;;  %v7107_v31 = vld [vmem:[#allocation3 + $0x7b0] ss:$8 sps:$4 sm:$0xff]   ;;  %v4390_v45 = vmul.f32 %v7567_v35, %v7567_v35 }
 0x2a9   :  { %v7822_v61 = vpop.f32.mrf.mxu1  ;;  %v4642_v33 = vadd.f32 %v4641_v14, %v4387_v29  ;;  %3244 = vmatmul.mubr.bf16.gmra.mxu1 %v7107_v31  ;;  %v4393_v31 = vmul.f32 %v7597_v0, %v7597_v0 }
 0x2aa   :  { %v7817_v47 = vpop.f32.mrf.mxu0  ;;  %v4126_v24 = vadd.f32 %v4125_v7, %v7547_v15  ;;  %v4391_v7 = vmul.f32 %v7577_v51, %v7577_v51 }
 0x2ab   :  { %13551 = vst [vmem:[#allocation176_spill] sm:$0xff] %v7817_v47  ;;  %v3050_v63 = vpop.f32.mrf.mxu1  ;;  %v4643_v62 = vadd.f32 %v4642_v33, %v4388_v27 }
 0x2ac   :  { %v2658_v11 = vpop.f32.mrf.mxu0  ;;  %v4127_v4 = vadd.f32 %v4126_v24, %v7557_v12  ;;  %v4392_v24 = vmul.f32 %v7587_v56, %v7587_v56 }
 0x2ad   :  { %v7832_v26 = vpop.f32.mrf.mxu1  ;;  %v4644_v29 = vadd.f32 %v4643_v62, %v4389_v10  ;;  %v7112_v62 = vld [vmem:[#allocation3 + $0x7c4] ss:$8 sps:$4 sm:$0xff]  }
 0x2ae   :  { %v7827_v1 = vpop.f32.mrf.mxu0  ;;  %v4128_v14 = vadd.f32 %v4127_v4, %v7567_v35  ;;  %3251 = vmatprep.mubr.bf16.mxu1 %v7112_v62 }
 0x2af   :  { %13552 = vst [vmem:[#allocation177_spill] sm:$0xff] %v7827_v1  ;;  %v3055_v63 = vpop.f32.mrf.mxu1  ;;  %v4645_v33 = vadd.f32 %v4644_v29, %v4390_v45 }
 0x2b0   :  { %v2663_v11 = vpop.f32.mrf.mxu0  ;;  %v4129_v27 = vadd.f32 %v4128_v14, %v7577_v51  ;;  %v7110_v63 = vld [vmem:[#allocation3 + $0x7c0] ss:$8 sps:$4 sm:$0xff]   ;;  %v4394_v14 = vmul.f32 %v7607_v13, %v7607_v13 }
 0x2b1   :  { %v7842_v11 = vpop.f32.mrf.mxu1  ;;  %v4646_v12 = vadd.f32 %v4645_v33, %v4391_v7  ;;  %3252 = vmatmul.mubr.bf16.gmra.mxu1 %v7110_v63  ;;  %v4397_v63 = vmul.f32 %v7637_v59, %v7637_v59 }
 0x2b2   :  { %v7837_v15 = vpop.f32.mrf.mxu0  ;;  %v4130_v10 = vadd.f32 %v4129_v27, %v7587_v56  ;;  %v4395_v27 = vmul.f32 %v7617_v54, %v7617_v54 }
 0x2b3   :  { %13553 = vst [vmem:[#allocation178_spill] sm:$0xff] %v7837_v15  ;;  %v3058_v35 = vpop.f32.mrf.mxu1  ;;  %v4647_v45 = vadd.f32 %v4646_v12, %v4392_v24 }
 0x2b4   :  { %v2666_v19 = vpop.f32.mrf.mxu0  ;;  %v4131_v29 = vadd.f32 %v4130_v10, %v7597_v0  ;;  %v4396_v10 = vmul.f32 %v7627_v3, %v7627_v3 }
 0x2b5   :  { %v7852_v51 = vpop.f32.mrf.mxu1  ;;  %v4648_v7 = vadd.f32 %v4647_v45, %v4393_v31  ;;  %v7115_v45 = vld [vmem:[#allocation3 + $0x7d4] ss:$8 sps:$4 sm:$0xff]  }
 0x2b6   :  { %v7847_v4 = vpop.f32.mrf.mxu0  ;;  %v4132_v33 = vadd.f32 %v4131_v29, %v7607_v13  ;;  %3259 = vmatprep.mubr.bf16.mxu1 %v7115_v45 }
 0x2b7   :  { %13554 = vst [vmem:[#allocation179_spill] sm:$0xff] %v7847_v4  ;;  %v3063_v35 = vpop.f32.mrf.mxu1  ;;  %v4649_v12 = vadd.f32 %v4648_v7, %v4394_v14 }
 0x2b8   :  { %v2671_v19 = vpop.f32.mrf.mxu0  ;;  %v4133_v24 = vadd.f32 %v4132_v33, %v7617_v54  ;;  %v7113_v35 = vld [vmem:[#allocation3 + $0x7d0] ss:$8 sps:$4 sm:$0xff]   ;;  %v4398_v33 = vmul.f32 %v7647_v6, %v7647_v6 }
 0x2b9   :  { %v7862_v19 = vpop.f32.mrf.mxu1  ;;  %v4650_v0 = vadd.f32 %v4649_v12, %v4395_v27  ;;  %3260 = vmatmul.mubr.bf16.gmra.mxu1 %v7113_v35  ;;  %v4401_v35 = vmul.f32 %v7677_v52, %v7677_v52 }
 0x2ba   :  { %v7857_v56 = vpop.f32.mrf.mxu0  ;;  %v4134_v31 = vadd.f32 %v4133_v24, %v7627_v3  ;;  %v4399_v24 = vmul.f32 %v7657_v43, %v7657_v43 }
 0x2bb   :  { %13555 = vst [vmem:[#allocation180_spill] sm:$0xff] %v7857_v56  ;;  %v3066_v13 = vpop.f32.mrf.mxu1  ;;  %v4651_v14 = vadd.f32 %v4650_v0, %v4396_v10 }
 0x2bc   :  { %v2674_v62 = vpop.f32.mrf.mxu0  ;;  %v4135_v7 = vadd.f32 %v4134_v31, %v7637_v59  ;;  %v4400_v31 = vmul.f32 %v7667_v25, %v7667_v25 }
 0x2bd   :  { %v7872_v54 = vpop.f32.mrf.mxu1  ;;  %v4652_v27 = vadd.f32 %v4651_v14, %v4397_v63  ;;  %v7118_v14 = vld [vmem:[#allocation3 + $0x7e4] ss:$8 sps:$4 sm:$0xff]  }
 0x2be   :  { %v7867_v29 = vpop.f32.mrf.mxu0  ;;  %v4136_v12 = vadd.f32 %v4135_v7, %v7647_v6  ;;  %3267 = vmatprep.mubr.bf16.mxu1 %v7118_v14 }
 0x2bf   :  { %13556 = vst [vmem:[#allocation181_spill] sm:$0xff] %v7867_v29  ;;  %v3071_v13 = vpop.f32.mrf.mxu1  ;;  %v4653_v0 = vadd.f32 %v4652_v27, %v4398_v33 }
 0x2c0   :  { %v2679_v62 = vpop.f32.mrf.mxu0  ;;  %v4137_v10 = vadd.f32 %v4136_v12, %v7657_v43  ;;  %v7116_v13 = vld [vmem:[#allocation3 + $0x7e0] ss:$8 sps:$4 sm:$0xff]   ;;  %v4402_v12 = vmul.f32 %v7687_v28, %v7687_v28 }
 0x2c1   :  { %v7882_v62 = vpop.f32.mrf.mxu1  ;;  %v4654_v59 = vadd.f32 %v4653_v0, %v4399_v24  ;;  %3268 = vmatmul.mubr.bf16.gmra.mxu1 %v7116_v13  ;;  %v4405_v13 = vmul.f32 %v7717_v39, %v7717_v39 }
 0x2c2   :  { %v7877_v3 = vpop.f32.mrf.mxu0  ;;  %v4138_v63 = vadd.f32 %v4137_v10, %v7667_v25  ;;  %v4403_v10 = vmul.f32 %v7697_v53, %v7697_v53 }
 0x2c3   :  { %13557 = vst [vmem:[#allocation182_spill] sm:$0xff] %v7877_v3  ;;  %v3074_v6 = vpop.f32.mrf.mxu1  ;;  %v4655_v33 = vadd.f32 %v4654_v59, %v4400_v31 }
 0x2c4   :  { %v2682_v45 = vpop.f32.mrf.mxu0  ;;  %v4139_v27 = vadd.f32 %v4138_v63, %v7677_v52  ;;  %v4404_v63 = vmul.f32 %v7707_v22, %v7707_v22 }
 0x2c5   :  { %v7892_v43 = vpop.f32.mrf.mxu1  ;;  %v4656_v24 = vadd.f32 %v4655_v33, %v4401_v35  ;;  %v7121_v33 = vld [vmem:[#allocation3 + $0x7f4] ss:$8 sps:$4 sm:$0xff]  }
 0x2c6   :  { %v7887_v7 = vpop.f32.mrf.mxu0  ;;  %v4140_v0 = vadd.f32 %v4139_v27, %v7687_v28  ;;  %3275 = vmatprep.mubr.bf16.mxu1 %v7121_v33 }
 0x2c7   :  { %13558 = vst [vmem:[#allocation183_spill] sm:$0xff] %v7887_v7  ;;  %v3079_v6 = vpop.f32.mrf.mxu1  ;;  %v4657_v59 = vadd.f32 %v4656_v24, %v4402_v12 }
 0x2c8   :  { %v2687_v45 = vpop.f32.mrf.mxu0  ;;  %v4141_v31 = vadd.f32 %v4140_v0, %v7697_v53  ;;  %v7119_v6 = vld [vmem:[#allocation3 + $0x7f0] ss:$8 sps:$4 sm:$0xff]   ;;  %v4406_v0 = vmul.f32 %v7727_v57, %v7727_v57 }
 0x2c9   :  { %v7902_v45 = vpop.f32.mrf.mxu1  ;;  %v4658_v52 = vadd.f32 %v4657_v59, %v4403_v10  ;;  %3276 = vmatmul.mubr.bf16.gmra.mxu1 %v7119_v6  ;;  %v4409_v6 = vmul.f32 %v7757_v55, %v7757_v55 }
 0x2ca   :  { %v7897_v25 = vpop.f32.mrf.mxu0  ;;  %v4142_v35 = vadd.f32 %v4141_v31, %v7707_v22  ;;  %v4407_v31 = vmul.f32 %v7737_v49, %v7737_v49 }
 0x2cb   :  { %13559 = vst [vmem:[#allocation184_spill] sm:$0xff] %v7897_v25  ;;  %v3082_v28 = vpop.f32.mrf.mxu1  ;;  %v4659_v12 = vadd.f32 %v4658_v52, %v4404_v63 }
 0x2cc   :  { %v2690_v14 = vpop.f32.mrf.mxu0  ;;  %v4143_v24 = vadd.f32 %v4142_v35, %v7717_v39  ;;  %v4408_v35 = vmul.f32 %v7747_v9, %v7747_v9 }
 0x2cd   :  { %v7912_v53 = vpop.f32.mrf.mxu1  ;;  %v4660_v10 = vadd.f32 %v4659_v12, %v4405_v13 }
 0x2ce   :  { %v7907_v27 = vpop.f32.mrf.mxu0  ;;  %v4144_v59 = vadd.f32 %v4143_v24, %v7727_v57 }
 0x2cf   :  { %13560 = vst [vmem:[#allocation185_spill] sm:$0xff] %v7907_v27  ;;  %v3087_v28 = vpop.f32.mrf.mxu1  ;;  %v4661_v52 = vadd.f32 %v4660_v10, %v4406_v0  ;;  %v4410_v10 = vmul.f32 %v7767_v60, %v7767_v60 }
 0x2d0   :  { %v2695_v14 = vpop.f32.mrf.mxu0  ;;  %v4145_v63 = vadd.f32 %v4144_v59, %v7737_v49 }
 0x2d1   :  { %v7922_v14 = vpop.f32.mrf.mxu1  ;;  %v4662_v39 = vadd.f32 %v4661_v52, %v4407_v31  ;;  %v4411_v52 = vmul.f32 %v7777_v46, %v7777_v46 }
 0x2d2   :  { %v7917_v22 = vpop.f32.mrf.mxu0  ;;  %v4146_v13 = vadd.f32 %v4145_v63, %v7747_v9 }
 0x2d3   :  { %13561 = vst [vmem:[#allocation186_spill] sm:$0xff] %v7917_v22  ;;  %v3090_v24 = vpop.f32.mrf.mxu1  ;;  %v4663_v57 = vadd.f32 %v4662_v39, %v4408_v35  ;;  %v4412_v35 = vmul.f32 %v7787_v16, %v7787_v16 }
 0x2d4   :  { %v2698_v33 = vpop.f32.mrf.mxu0  ;;  %v4147_v0 = vadd.f32 %v4146_v13, %v7757_v55 }
 0x2d5   :  { %v7932_v28 = vpop.f32.mrf.mxu1  ;;  %v4664_v33 = vadd.f32 %v4663_v57, %v4409_v6  ;;  %v4413_v6 = vmul.f32 %v7797_v32, %v7797_v32 }
 0x2d6   :  { %v7927_v12 = vpop.f32.mrf.mxu0  ;;  %v4148_v31 = vadd.f32 %v4147_v0, %v7767_v60 }
 0x2d7   :  { %13562 = vst [vmem:[#allocation187_spill] sm:$0xff] %v7927_v12  ;;  %v3095_v9 = vpop.f32.mrf.mxu1  ;;  %v4665_v49 = vadd.f32 %v4664_v33, %v4410_v10  ;;  %v4414_v10 = vmul.f32 %v7807_v30, %v7807_v30 }
 0x2d8   :  { %v2703_v59 = vpop.f32.mrf.mxu0  ;;  %v4149_v39 = vadd.f32 %v4148_v31, %v7777_v46 }
 0x2d9   :  { %v7942_v24 = vpop.f32.mrf.mxu1  ;;  %v4666_v59 = vadd.f32 %v4665_v49, %v4411_v52  ;;  %v4415_v52 = vmul.f32 %v7817_v47, %v7817_v47 }
 0x2da   :  { %v7937_v63 = vpop.f32.mrf.mxu0  ;;  %v4150_v57 = vadd.f32 %v4149_v39, %v7787_v16 }
 0x2db   :  { %13563 = vst [vmem:[#allocation188_spill] sm:$0xff] %v7937_v63  ;;  %v3098_v60 = vpop.f32.mrf.mxu1  ;;  %v4667_v55 = vadd.f32 %v4666_v59, %v4412_v35  ;;  %v4416_v35 = vmul.f32 %v7827_v1, %v7827_v1 }
 0x2dc   :  { %v2706_v13 = vpop.f32.mrf.mxu0  ;;  %v4151_v9 = vadd.f32 %v4150_v57, %v7797_v32 }
 0x2dd   :  { %v7952_v31 = vpop.f32.mrf.mxu1  ;;  %v4668_v13 = vadd.f32 %v4667_v55, %v4413_v6  ;;  %v4417_v6 = vmul.f32 %v7837_v15, %v7837_v15 }
 0x2de   :  { %v7947_v0 = vpop.f32.mrf.mxu0  ;;  %v4152_v49 = vadd.f32 %v4151_v9, %v7807_v30 }
 0x2df   :  { %13564 = vst [vmem:[#allocation189_spill] sm:$0xff] %v7947_v0  ;;  %v3103_v16 = vpop.f32.mrf.mxu1  ;;  %v4669_v46 = vadd.f32 %v4668_v13, %v4414_v10  ;;  %v4418_v10 = vmul.f32 %v7847_v4, %v7847_v4 }
 0x2e0   :  { %v2711_v33 = vpop.f32.mrf.mxu0  ;;  %v4153_v60 = vadd.f32 %v4152_v49, %v7817_v47 }
 0x2e1   :  { %v7962_v57 = vpop.f32.mrf.mxu1  ;;  %v4670_v33 = vadd.f32 %v4669_v46, %v4415_v52  ;;  %v4419_v52 = vmul.f32 %v7857_v56, %v7857_v56 }
 0x2e2   :  { %v7957_v39 = vpop.f32.mrf.mxu0  ;;  %v4154_v55 = vadd.f32 %v4153_v60, %v7827_v1 }
 0x2e3   :  { %13565 = vst [vmem:[#allocation190_spill] sm:$0xff] %v7957_v39  ;;  %v3106_v30 = vpop.f32.mrf.mxu1  ;;  %v4671_v32 = vadd.f32 %v4670_v33, %v4416_v35  ;;  %v4420_v35 = vmul.f32 %v7867_v29, %v7867_v29 }
 0x2e4   :  { %v2714_v59 = vpop.f32.mrf.mxu0  ;;  %v4155_v16 = vadd.f32 %v4154_v55, %v7837_v15 }
 0x2e5   :  { %v7972_v49 = vpop.f32.mrf.mxu1  ;;  %v4672_v59 = vadd.f32 %v4671_v32, %v4417_v6  ;;  %v4421_v6 = vmul.f32 %v7877_v3, %v7877_v3 }
 0x2e6   :  { %v7967_v9 = vpop.f32.mrf.mxu0  ;;  %v4156_v46 = vadd.f32 %v4155_v16, %v7847_v4 }
 0x2e7   :  { %13566 = vst [vmem:[#allocation191_spill] sm:$0xff] %v7967_v9  ;;  %v3111_v1 = vpop.f32.mrf.mxu1  ;;  %v4673_v47 = vadd.f32 %v4672_v59, %v4418_v10  ;;  %v4422_v10 = vmul.f32 %v7887_v7, %v7887_v7 }
 0x2e8   :  { %v2719_v13 = vpop.f32.mrf.mxu0  ;;  %v4157_v30 = vadd.f32 %v4156_v46, %v7857_v56 }
 0x2e9   :  { %v7982_v55 = vpop.f32.mrf.mxu1  ;;  %v4674_v13 = vadd.f32 %v4673_v47, %v4419_v52  ;;  %v4423_v52 = vmul.f32 %v7897_v25, %v7897_v25 }
 0x2ea   :  { %v7977_v60 = vpop.f32.mrf.mxu0  ;;  %v4158_v32 = vadd.f32 %v4157_v30, %v7867_v29 }
 0x2eb   :  { %13567 = vst [vmem:[#allocation192_spill] sm:$0xff] %v7977_v60  ;;  %v3114_v4 = vpop.f32.mrf.mxu1  ;;  %v4675_v15 = vadd.f32 %v4674_v13, %v4420_v35  ;;  %v4424_v35 = vmul.f32 %v7907_v27, %v7907_v27 }
 0x2ec   :  { %v2722_v33 = vpop.f32.mrf.mxu0  ;;  %v4159_v1 = vadd.f32 %v4158_v32, %v7877_v3 }
 0x2ed   :  { %v7992_v46 = vpop.f32.mrf.mxu1  ;;  %v4676_v33 = vadd.f32 %v4675_v15, %v4421_v6  ;;  %v4425_v6 = vmul.f32 %v7917_v22, %v7917_v22 }
 0x2ee   :  { %v7987_v16 = vpop.f32.mrf.mxu0  ;;  %13569 = vst [vmem:[#allocation194_spill] sm:$0xff] %v7992_v46  ;;  %v4160_v47 = vadd.f32 %v4159_v1, %v7887_v7 }
 0x2ef   :  { %13568 = vst [vmem:[#allocation193_spill] sm:$0xff] %v7987_v16  ;;  %v3119_v29 = vpop.f32.mrf.mxu1  ;;  %v4677_v56 = vadd.f32 %v4676_v33, %v4422_v10  ;;  %v4426_v10 = vmul.f32 %v7927_v12, %v7927_v12 }
 0x2f0   :  { %v2727_v59 = vpop.f32.mrf.mxu0  ;;  %v4161_v4 = vadd.f32 %v4160_v47, %v7897_v25 }
 0x2f1   :  { %v8002_v32 = vpop.f32.mrf.mxu1  ;;  %v4678_v59 = vadd.f32 %v4677_v56, %v4423_v52  ;;  %v4427_v52 = vmul.f32 %v7937_v63, %v7937_v63 }
 0x2f2   :  { %v7997_v30 = vpop.f32.mrf.mxu0  ;;  %13571 = vst [vmem:[#allocation196_spill] sm:$0xff] %v8002_v32  ;;  %v4162_v15 = vadd.f32 %v4161_v4, %v7907_v27 }
 0x2f3   :  { %13570 = vst [vmem:[#allocation195_spill] sm:$0xff] %v7997_v30  ;;  %v3122_v7 = vpop.f32.mrf.mxu1  ;;  %v4679_v3 = vadd.f32 %v4678_v59, %v4424_v35  ;;  %v4428_v35 = vmul.f32 %v7947_v0, %v7947_v0 }
 0x2f4   :  { %v2730_v13 = vpop.f32.mrf.mxu0  ;;  %v4163_v29 = vadd.f32 %v4162_v15, %v7917_v22 }
 0x2f5   :  { %v8012_v47 = vpop.f32.mrf.mxu1  ;;  %v4680_v13 = vadd.f32 %v4679_v3, %v4425_v6  ;;  %v4429_v6 = vmul.f32 %v7957_v39, %v7957_v39 }
 0x2f6   :  { %v8007_v1 = vpop.f32.mrf.mxu0  ;;  %13573 = vst [vmem:[#allocation198_spill] sm:$0xff] %v8012_v47  ;;  %v4164_v56 = vadd.f32 %v4163_v29, %v7927_v12 }
 0x2f7   :  { %13572 = vst [vmem:[#allocation197_spill] sm:$0xff] %v8007_v1  ;;  %v3127_v27 = vpop.f32.mrf.mxu1  ;;  %v4681_v25 = vadd.f32 %v4680_v13, %v4426_v10  ;;  %v4430_v10 = vmul.f32 %v7967_v9, %v7967_v9 }
 0x2f8   :  { %v2735_v33 = vpop.f32.mrf.mxu0  ;;  %v4165_v7 = vadd.f32 %v4164_v56, %v7937_v63 }
 0x2f9   :  { %v8022_v15 = vpop.f32.mrf.mxu1  ;;  %v4682_v33 = vadd.f32 %v4681_v25, %v4427_v52  ;;  %v4431_v52 = vmul.f32 %v7977_v60, %v7977_v60 }
 0x2fa   :  { %v8017_v4 = vpop.f32.mrf.mxu0  ;;  %13575 = vst [vmem:[#allocation200_spill] sm:$0xff] %v8022_v15  ;;  %v4166_v3 = vadd.f32 %v4165_v7, %v7947_v0 }
 0x2fb   :  { %13574 = vst [vmem:[#allocation199_spill] sm:$0xff] %v8017_v4  ;;  %v3130_v12 = vpop.f32.mrf.mxu1  ;;  %v4683_v22 = vadd.f32 %v4682_v33, %v4428_v35  ;;  %v4432_v35 = vmul.f32 %v7987_v16, %v7987_v16 }
 0x2fc   :  { %v2738_v59 = vpop.f32.mrf.mxu0  ;;  %v4167_v27 = vadd.f32 %v4166_v3, %v7957_v39 }
 0x2fd   :  { %v8032_v56 = vpop.f32.mrf.mxu1  ;;  %v4684_v59 = vadd.f32 %v4683_v22, %v4429_v6  ;;  %v4433_v6 = vmul.f32 %v7997_v30, %v7997_v30 }
 0x2fe   :  { %v8027_v29 = vpop.f32.mrf.mxu0  ;;  %13577 = vst [vmem:[#allocation202_spill] sm:$0xff] %v8032_v56  ;;  %v4168_v25 = vadd.f32 %v4167_v27, %v7967_v9 }
 0x2ff   :  { %13576 = vst [vmem:[#allocation201_spill] sm:$0xff] %v8027_v29  ;;  %v3135_v0 = vpop.f32.mrf.mxu1  ;;  %v4685_v63 = vadd.f32 %v4684_v59, %v4430_v10  ;;  %v4434_v10 = vmul.f32 %v8007_v1, %v8007_v1 }
 0x300   :  { %v2743_v13 = vpop.f32.mrf.mxu0  ;;  %v4169_v12 = vadd.f32 %v4168_v25, %v7977_v60 }
 0x301   :  { %v8042_v3 = vpop.f32.mrf.mxu1  ;;  %v4686_v13 = vadd.f32 %v4685_v63, %v4431_v52  ;;  %v4435_v52 = vmul.f32 %v8017_v4, %v8017_v4 }
 0x302   :  { %v8037_v7 = vpop.f32.mrf.mxu0  ;;  %13579 = vst [vmem:[#allocation204_spill] sm:$0xff] %v8042_v3  ;;  %v4170_v22 = vadd.f32 %v4169_v12, %v7987_v16 }
 0x303   :  { %13578 = vst [vmem:[#allocation203_spill] sm:$0xff] %v8037_v7  ;;  %v3138_v9 = vpop.f32.mrf.mxu1  ;;  %v4687_v39 = vadd.f32 %v4686_v13, %v4432_v35  ;;  %v4436_v35 = vmul.f32 %v8027_v29, %v8027_v29 }
 0x304   :  { %v2746_v33 = vpop.f32.mrf.mxu0  ;;  %v4171_v0 = vadd.f32 %v4170_v22, %v7997_v30 }
 0x305   :  { %v8052_v25 = vpop.f32.mrf.mxu1  ;;  %v4688_v33 = vadd.f32 %v4687_v39, %v4433_v6  ;;  %v4437_v6 = vmul.f32 %v8037_v7, %v8037_v7 }
 0x306   :  { %v8047_v27 = vpop.f32.mrf.mxu0  ;;  %13581 = vst [vmem:[#allocation206_spill] sm:$0xff] %v8052_v25  ;;  %v4172_v63 = vadd.f32 %v4171_v0, %v8007_v1 }
 0x307   :  { %13580 = vst [vmem:[#allocation205_spill] sm:$0xff] %v8047_v27  ;;  %v3143_v16 = vpop.f32.mrf.mxu1  ;;  %v4689_v60 = vadd.f32 %v4688_v33, %v4434_v10  ;;  %v4438_v10 = vmul.f32 %v8047_v27, %v8047_v27 }
 0x308   :  { %v2751_v59 = vpop.f32.mrf.mxu0  ;;  %v4173_v9 = vadd.f32 %v4172_v63, %v8017_v4 }
 0x309   :  { %v8062_v22 = vpop.f32.mrf.mxu1  ;;  %v4690_v59 = vadd.f32 %v4689_v60, %v4435_v52 }
 0x30a   :  { %v8057_v12 = vpop.f32.mrf.mxu0  ;;  %13583 = vst [vmem:[#allocation208_spill] sm:$0xff] %v8062_v22  ;;  %v4174_v39 = vadd.f32 %v4173_v9, %v8027_v29 }
 0x30b   :  { %13582 = vst [vmem:[#allocation207_spill] sm:$0xff] %v8057_v12  ;;  %v3146_v1 = vpop.f32.mrf.mxu1  ;;  %v4691_v30 = vadd.f32 %v4690_v59, %v4436_v35  ;;  %v4439_v52 = vmul.f32 %v8057_v12, %v8057_v12 }
 0x30c   :  { %v2754_v13 = vpop.f32.mrf.mxu0  ;;  %v4175_v16 = vadd.f32 %v4174_v39, %v8037_v7 }
 0x30d   :  { %v8072_v63 = vpop.f32.mrf.mxu1  ;;  %v4692_v13 = vadd.f32 %v4691_v30, %v4437_v6 }
 0x30e   :  { %v8067_v0 = vpop.f32.mrf.mxu0  ;;  %13585 = vst [vmem:[#allocation210_spill] sm:$0xff] %v8072_v63  ;;  %v4176_v60 = vadd.f32 %v4175_v16, %v8047_v27 }
 0x30f   :  { %13584 = vst [vmem:[#allocation209_spill] sm:$0xff] %v8067_v0  ;;  %v3151_v29 = vpop.f32.mrf.mxu1  ;;  %v4693_v4 = vadd.f32 %v4692_v13, %v4438_v10  ;;  %v4440_v35 = vmul.f32 %v8067_v0, %v8067_v0 }
 0x310   :  { %v2759_v33 = vpop.f32.mrf.mxu0  ;;  %v4177_v1 = vadd.f32 %v4176_v60, %v8057_v12 }
 0x311   :  { %v8082_v39 = vpop.f32.mrf.mxu1  ;;  %v4694_v33 = vadd.f32 %v4693_v4, %v4439_v52 }
 0x312   :  { %v8077_v9 = vpop.f32.mrf.mxu0  ;;  %13587 = vst [vmem:[#allocation212_spill] sm:$0xff] %v8082_v39  ;;  %v4178_v30 = vadd.f32 %v4177_v1, %v8067_v0  ;;  %v13596_v39 = vld [vmem:[#allocation49_spill] sm:$0xff] }
 0x313   :  { %13586 = vst [vmem:[#allocation211_spill] sm:$0xff] %v8077_v9  ;;  %v4441_v6 = vmul.f32 %v8077_v9, %v8077_v9  ;;  %v3154_v27 = vpop.f32.mrf.mxu1  ;;  %v4695_v7 = vadd.f32 %v4694_v33, %v4440_v35 }
 0x314   :  { %v2762_v59 = vpop.f32.mrf.mxu0  ;;  %v4179_v29 = vadd.f32 %v4178_v30, %v8077_v9  ;;  %v13592_v30 = vld [vmem:[#allocation43_spill] sm:$0xff] }
 0x315   :  { %v8092_v60 = vpop.f32.mrf.mxu1  ;;  %v4696_v59 = vadd.f32 %v4695_v7, %v4441_v6 }
 0x316   :  { %v8087_v16 = vpop.f32.mrf.mxu0  ;;  %13589 = vst [vmem:[#allocation214_spill] sm:$0xff] %v8092_v60 }
 0x317   :  { %13588 = vst [vmem:[#allocation213_spill] sm:$0xff] %v8087_v16  ;;  %v4442_v10 = vmul.f32 %v8087_v16, %v8087_v16  ;;  %v4180_v4 = vadd.f32 %v4179_v29, %v8087_v16  ;;  %v3159_v1 = vpop.f32.mrf.mxu1  ;;  %v13593_v29 = vld [vmem:[#allocation45_spill] sm:$0xff] }
 0x318   :  { %v2767_v13 = vpop.f32.mrf.mxu0  ;;  %v4445_v16 = vmul.f32 %v13593_v29, %v13593_v29  ;;  %v13595_v1 = vld [vmem:[#allocation47_spill] sm:$0xff] }
 0x319   :  { %v4697_v0 = vadd.f32 %v4696_v59, %v4442_v10  ;;  %v8100_v33 = vpop.f32.mrf.mxu1  ;;  %v4444_v13 = vmul.f32 %v13592_v30, %v13592_v30 }
 0x31a   :  { %v8095_v52 = vpop.f32.mrf.mxu0  ;;  %13591 = vst [vmem:[#allocation216_spill] sm:$0xff] %v8100_v33 }
 0x31b   :  { %13590 = vst [vmem:[#allocation215_spill] sm:$0xff] %v8095_v52  ;;  %v4181_v12 = vadd.f32 %v4180_v4, %v8095_v52  ;;  %v4443_v27 = vmul.f32 %v8095_v52, %v8095_v52  ;;  %v3162_v6 = vpop.f32.mrf.mxu1 }
 0x31c   :  { %v2770_v35 = vpop.f32.mrf.mxu0 }
 0x31d   :  { %v4182_v9 = vadd.f32 %v4181_v12, %v13592_v30  ;;  %v4698_v7 = vadd.f32 %v4697_v0, %v4443_v27  ;;  %v8108_v4 = vpop.f32.mrf.mxu1  ;;  %v4446_v35 = vmul.f32 %v13595_v1, %v13595_v1  ;;  %v4447_v12 = vmul.f32 %v13596_v39, %v13596_v39  ;;  %v13598_v30 = vld [vmem:[#allocation51_spill] sm:$0xff] }
 0x31e   :  { %13594 = vst [vmem:[#allocation217_spill] sm:$0xff] %v8108_v4  ;;  %v13599_v4 = vld [vmem:[#allocation53_spill] sm:$0xff] }
 0x31f   :  { %v4183_v10 = vadd.f32 %v4182_v9, %v13593_v29  ;;  %v4699_v59 = vadd.f32 %v4698_v7, %v4444_v13  ;;  %v3167_v60 = vpop.f32.mrf.mxu1  ;;  %v4448_v9 = vmul.f32 %v13598_v30, %v13598_v30 }
 0x321   :  { %v4184_v52 = vadd.f32 %v4183_v10, %v13595_v1  ;;  %v4700_v33 = vadd.f32 %v4699_v59, %v4445_v16  ;;  %v8116_v6 = vpop.f32.mrf.mxu1  ;;  %v4449_v10 = vmul.f32 %v13599_v4, %v13599_v4  ;;  %v13601_v1 = vld [vmem:[#allocation55_spill] sm:$0xff] }
 0x322   :  { %13597 = vst [vmem:[#allocation218_spill] sm:$0xff] %v8116_v6  ;;  %v13602_v6 = vld [vmem:[#allocation57_spill] sm:$0xff] }
 0x323   :  { %v4185_v0 = vadd.f32 %v4184_v52, %v13596_v39  ;;  %v4701_v27 = vadd.f32 %v4700_v33, %v4446_v35  ;;  %v3170_v29 = vpop.f32.mrf.mxu1  ;;  %v4450_v52 = vmul.f32 %v13601_v1, %v13601_v1 }
 0x325   :  { %v4186_v13 = vadd.f32 %v4185_v0, %v13598_v30  ;;  %v4702_v7 = vadd.f32 %v4701_v27, %v4447_v12  ;;  %v8124_v59 = vpop.f32.mrf.mxu1  ;;  %v4451_v0 = vmul.f32 %v13602_v6, %v13602_v6  ;;  %v13604_v30 = vld [vmem:[#allocation59_spill] sm:$0xff] }
 0x326   :  { %13600 = vst [vmem:[#allocation219_spill] sm:$0xff] %v8124_v59  ;;  %v13605_v59 = vld [vmem:[#allocation61_spill] sm:$0xff] }
 0x327   :  { %v4187_v16 = vadd.f32 %v4186_v13, %v13599_v4  ;;  %v4703_v60 = vadd.f32 %v4702_v7, %v4448_v9  ;;  %v3175_v39 = vpop.f32.mrf.mxu1  ;;  %v4452_v9 = vmul.f32 %v13604_v30, %v13604_v30 }
 0x329   :  { %v4188_v33 = vadd.f32 %v4187_v16, %v13601_v1  ;;  %v4704_v35 = vadd.f32 %v4703_v60, %v4449_v10  ;;  %v8132_v27 = vpop.f32.mrf.mxu1  ;;  %v4453_v16 = vmul.f32 %v13605_v59, %v13605_v59  ;;  %v13607_v1 = vld [vmem:[#allocation63_spill] sm:$0xff] }
 0x32a   :  { %13603 = vst [vmem:[#allocation220_spill] sm:$0xff] %v8132_v27  ;;  %v13608_v27 = vld [vmem:[#allocation65_spill] sm:$0xff] }
 0x32b   :  { %v4189_v29 = vadd.f32 %v4188_v33, %v13602_v6  ;;  %v4705_v12 = vadd.f32 %v4704_v35, %v4450_v52  ;;  %v3178_v4 = vpop.f32.mrf.mxu1  ;;  %v4454_v52 = vmul.f32 %v13607_v1, %v13607_v1 }
 0x32d   :  { %v4190_v13 = vadd.f32 %v4189_v29, %v13604_v30  ;;  %v4706_v7 = vadd.f32 %v4705_v12, %v4451_v0  ;;  %v8140_v60 = vpop.f32.mrf.mxu1  ;;  %v4455_v29 = vmul.f32 %v13608_v27, %v13608_v27  ;;  %v13610_v30 = vld [vmem:[#allocation67_spill] sm:$0xff] }
 0x32e   :  { %13606 = vst [vmem:[#allocation221_spill] sm:$0xff] %v8140_v60  ;;  %v13611_v60 = vld [vmem:[#allocation69_spill] sm:$0xff] }
 0x32f   :  { %v4191_v39 = vadd.f32 %v4190_v13, %v13605_v59  ;;  %v4707_v10 = vadd.f32 %v4706_v7, %v4452_v9  ;;  %v3183_v6 = vpop.f32.mrf.mxu1  ;;  %v4456_v9 = vmul.f32 %v13610_v30, %v13610_v30 }
 0x331   :  { %v4192_v33 = vadd.f32 %v4191_v39, %v13607_v1  ;;  %v4708_v35 = vadd.f32 %v4707_v10, %v4453_v16  ;;  %v8148_v12 = vpop.f32.mrf.mxu1  ;;  %v4457_v39 = vmul.f32 %v13611_v60, %v13611_v60  ;;  %v13613_v1 = vld [vmem:[#allocation71_spill] sm:$0xff] }
 0x332   :  { %13609 = vst [vmem:[#allocation222_spill] sm:$0xff] %v8148_v12  ;;  %v13614_v12 = vld [vmem:[#allocation73_spill] sm:$0xff] }
 0x333   :  { %v4193_v4 = vadd.f32 %v4192_v33, %v13608_v27  ;;  %v4709_v0 = vadd.f32 %v4708_v35, %v4454_v52  ;;  %v3186_v59 = vpop.f32.mrf.mxu1  ;;  %v4458_v52 = vmul.f32 %v13613_v1, %v13613_v1 }
 0x335   :  { %v4194_v13 = vadd.f32 %v4193_v4, %v13610_v30  ;;  %v4710_v7 = vadd.f32 %v4709_v0, %v4455_v29  ;;  %v8156_v10 = vpop.f32.mrf.mxu1  ;;  %v4459_v4 = vmul.f32 %v13614_v12, %v13614_v12  ;;  %v13616_v30 = vld [vmem:[#allocation75_spill] sm:$0xff] }
 0x336   :  { %13612 = vst [vmem:[#allocation223_spill] sm:$0xff] %v8156_v10  ;;  %v13617_v10 = vld [vmem:[#allocation77_spill] sm:$0xff] }
 0x337   :  { %v4195_v6 = vadd.f32 %v4194_v13, %v13611_v60  ;;  %v4711_v16 = vadd.f32 %v4710_v7, %v4456_v9  ;;  %v3191_v27 = vpop.f32.mrf.mxu1  ;;  %v4460_v9 = vmul.f32 %v13616_v30, %v13616_v30 }
 0x339   :  { %v4196_v33 = vadd.f32 %v4195_v6, %v13613_v1  ;;  %v4712_v35 = vadd.f32 %v4711_v16, %v4457_v39  ;;  %v8164_v0 = vpop.f32.mrf.mxu1  ;;  %v4461_v6 = vmul.f32 %v13617_v10, %v13617_v10  ;;  %v13619_v1 = vld [vmem:[#allocation79_spill] sm:$0xff] }
 0x33a   :  { %13615 = vst [vmem:[#allocation224_spill] sm:$0xff] %v8164_v0  ;;  %v13620_v0 = vld [vmem:[#allocation81_spill] sm:$0xff] }
 0x33b   :  { %v4197_v59 = vadd.f32 %v4196_v33, %v13614_v12  ;;  %v4713_v29 = vadd.f32 %v4712_v35, %v4458_v52  ;;  %v3194_v60 = vpop.f32.mrf.mxu1  ;;  %v4462_v52 = vmul.f32 %v13619_v1, %v13619_v1 }
 0x33d   :  { %v4198_v13 = vadd.f32 %v4197_v59, %v13616_v30  ;;  %v4714_v7 = vadd.f32 %v4713_v29, %v4459_v4  ;;  %v8172_v16 = vpop.f32.mrf.mxu1  ;;  %v4463_v59 = vmul.f32 %v13620_v0, %v13620_v0  ;;  %v13622_v30 = vld [vmem:[#allocation83_spill] sm:$0xff] }
 0x33e   :  { %13618 = vst [vmem:[#allocation225_spill] sm:$0xff] %v8172_v16  ;;  %v13623_v16 = vld [vmem:[#allocation85_spill] sm:$0xff] }
 0x33f   :  { %v4199_v27 = vadd.f32 %v4198_v13, %v13617_v10  ;;  %v4715_v39 = vadd.f32 %v4714_v7, %v4460_v9  ;;  %v3199_v12 = vpop.f32.mrf.mxu1  ;;  %v4464_v9 = vmul.f32 %v13622_v30, %v13622_v30 }
 0x341   :  { %v4200_v33 = vadd.f32 %v4199_v27, %v13619_v1  ;;  %v4716_v35 = vadd.f32 %v4715_v39, %v4461_v6  ;;  %v8180_v29 = vpop.f32.mrf.mxu1  ;;  %v4465_v27 = vmul.f32 %v13623_v16, %v13623_v16  ;;  %v13625_v1 = vld [vmem:[#allocation87_spill] sm:$0xff] }
 0x342   :  { %13621 = vst [vmem:[#allocation226_spill] sm:$0xff] %v8180_v29  ;;  %v13626_v29 = vld [vmem:[#allocation89_spill] sm:$0xff] }
 0x343   :  { %v4201_v60 = vadd.f32 %v4200_v33, %v13620_v0  ;;  %v4717_v4 = vadd.f32 %v4716_v35, %v4462_v52  ;;  %v3202_v10 = vpop.f32.mrf.mxu1  ;;  %v4466_v52 = vmul.f32 %v13625_v1, %v13625_v1 }
 0x345   :  { %v4202_v13 = vadd.f32 %v4201_v60, %v13622_v30  ;;  %v4718_v7 = vadd.f32 %v4717_v4, %v4463_v59  ;;  %v8188_v39 = vpop.f32.mrf.mxu1  ;;  %v4467_v60 = vmul.f32 %v13626_v29, %v13626_v29  ;;  %v13628_v30 = vld [vmem:[#allocation91_spill] sm:$0xff] }
 0x346   :  { %13624 = vst [vmem:[#allocation227_spill] sm:$0xff] %v8188_v39  ;;  %v13629_v39 = vld [vmem:[#allocation93_spill] sm:$0xff] }
 0x347   :  { %v4203_v12 = vadd.f32 %v4202_v13, %v13623_v16  ;;  %v4719_v6 = vadd.f32 %v4718_v7, %v4464_v9  ;;  %v3207_v0 = vpop.f32.mrf.mxu1  ;;  %v4468_v9 = vmul.f32 %v13628_v30, %v13628_v30 }
 0x349   :  { %v4204_v33 = vadd.f32 %v4203_v12, %v13625_v1  ;;  %v4720_v35 = vadd.f32 %v4719_v6, %v4465_v27  ;;  %v8196_v4 = vpop.f32.mrf.mxu1  ;;  %v4469_v12 = vmul.f32 %v13629_v39, %v13629_v39  ;;  %v13631_v1 = vld [vmem:[#allocation95_spill] sm:$0xff] }
 0x34a   :  { %13627 = vst [vmem:[#allocation228_spill] sm:$0xff] %v8196_v4  ;;  %v13632_v4 = vld [vmem:[#allocation97_spill] sm:$0xff] }
 0x34b   :  { %v4205_v10 = vadd.f32 %v4204_v33, %v13626_v29  ;;  %v4721_v59 = vadd.f32 %v4720_v35, %v4466_v52  ;;  %v3210_v16 = vpop.f32.mrf.mxu1  ;;  %v4470_v52 = vmul.f32 %v13631_v1, %v13631_v1 }
 0x34d   :  { %v4206_v13 = vadd.f32 %v4205_v10, %v13628_v30  ;;  %v4722_v7 = vadd.f32 %v4721_v59, %v4467_v60  ;;  %v8204_v6 = vpop.f32.mrf.mxu1  ;;  %v4471_v10 = vmul.f32 %v13632_v4, %v13632_v4  ;;  %v13634_v30 = vld [vmem:[#allocation99_spill] sm:$0xff] }
 0x34e   :  { %13630 = vst [vmem:[#allocation229_spill] sm:$0xff] %v8204_v6  ;;  %v13635_v6 = vld [vmem:[#allocation101_spill] sm:$0xff] }
 0x34f   :  { %v4207_v0 = vadd.f32 %v4206_v13, %v13629_v39  ;;  %v4723_v27 = vadd.f32 %v4722_v7, %v4468_v9  ;;  %v3215_v29 = vpop.f32.mrf.mxu1  ;;  %v4472_v9 = vmul.f32 %v13634_v30, %v13634_v30 }
 0x351   :  { %v4208_v33 = vadd.f32 %v4207_v0, %v13631_v1  ;;  %v4724_v35 = vadd.f32 %v4723_v27, %v4469_v12  ;;  %v8212_v59 = vpop.f32.mrf.mxu1  ;;  %v4473_v0 = vmul.f32 %v13635_v6, %v13635_v6  ;;  %v13637_v1 = vld [vmem:[#allocation103_spill] sm:$0xff] }
 0x352   :  { %13633 = vst [vmem:[#allocation230_spill] sm:$0xff] %v8212_v59  ;;  %v13638_v59 = vld [vmem:[#allocation105_spill] sm:$0xff] }
 0x353   :  { %v4209_v16 = vadd.f32 %v4208_v33, %v13632_v4  ;;  %v4725_v60 = vadd.f32 %v4724_v35, %v4470_v52  ;;  %v3218_v39 = vpop.f32.mrf.mxu1  ;;  %v4474_v52 = vmul.f32 %v13637_v1, %v13637_v1 }
 0x355   :  { %v4210_v13 = vadd.f32 %v4209_v16, %v13634_v30  ;;  %v4726_v7 = vadd.f32 %v4725_v60, %v4471_v10  ;;  %v8220_v27 = vpop.f32.mrf.mxu1  ;;  %v4475_v16 = vmul.f32 %v13638_v59, %v13638_v59  ;;  %v13640_v30 = vld [vmem:[#allocation107_spill] sm:$0xff] }
 0x356   :  { %13636 = vst [vmem:[#allocation231_spill] sm:$0xff] %v8220_v27  ;;  %v13641_v27 = vld [vmem:[#allocation109_spill] sm:$0xff] }
 0x357   :  { %v4211_v29 = vadd.f32 %v4210_v13, %v13635_v6  ;;  %v4727_v12 = vadd.f32 %v4726_v7, %v4472_v9  ;;  %v3223_v4 = vpop.f32.mrf.mxu1  ;;  %v4476_v9 = vmul.f32 %v13640_v30, %v13640_v30 }
 0x359   :  { %v4212_v33 = vadd.f32 %v4211_v29, %v13637_v1  ;;  %v4728_v35 = vadd.f32 %v4727_v12, %v4473_v0  ;;  %v8228_v60 = vpop.f32.mrf.mxu1  ;;  %v4477_v29 = vmul.f32 %v13641_v27, %v13641_v27  ;;  %v13643_v1 = vld [vmem:[#allocation111_spill] sm:$0xff] }
 0x35a   :  { %13639 = vst [vmem:[#allocation232_spill] sm:$0xff] %v8228_v60 }
 0x35b   :  { %v4213_v39 = vadd.f32 %v4212_v33, %v13638_v59  ;;  %v4729_v10 = vadd.f32 %v4728_v35, %v4474_v52  ;;  %v3226_v6 = vpop.f32.mrf.mxu1  ;;  %v4478_v52 = vmul.f32 %v13643_v1, %v13643_v1 }
 0x35d   :  { %v4214_v13 = vadd.f32 %v4213_v39, %v13640_v30  ;;  %v4730_v7 = vadd.f32 %v4729_v10, %v4475_v16  ;;  %v8236_v12 = vpop.f32.mrf.mxu1  ;;  %v4479_v39 = vmul.f32 %v7482_v37, %v7482_v37 }
 0x35e   :  { %13642 = vst [vmem:[#allocation233_spill] sm:$0xff] %v8236_v12 }
 0x35f   :  { %v4215_v4 = vadd.f32 %v4214_v13, %v13641_v27  ;;  %v4731_v0 = vadd.f32 %v4730_v7, %v4476_v9  ;;  %v3231_v59 = vpop.f32.mrf.mxu1  ;;  %v4480_v9 = vmul.f32 %v7492_v5, %v7492_v5 }
 0x361   :  { %v4216_v33 = vadd.f32 %v4215_v4, %v13643_v1  ;;  %v4732_v35 = vadd.f32 %v4731_v0, %v4477_v29  ;;  %v8244_v10 = vpop.f32.mrf.mxu1  ;;  %v4481_v4 = vmul.f32 %v7502_v34, %v7502_v34  ;;  %v13667_v1 = vld [vmem:[#allocation165_spill] sm:$0xff] }
 0x362   :  { %13644 = vst [vmem:[#allocation234_spill] sm:$0xff] %v8244_v10 }
 0x363   :  { %v4217_v6 = vadd.f32 %v4216_v33, %v7482_v37  ;;  %v4733_v16 = vadd.f32 %v4732_v35, %v4478_v52  ;;  %v3234_v27 = vpop.f32.mrf.mxu1  ;;  %v4482_v52 = vmul.f32 %v7512_v41, %v7512_v41 }
 0x365   :  { %v4218_v13 = vadd.f32 %v4217_v6, %v7492_v5  ;;  %v4734_v7 = vadd.f32 %v4733_v16, %v4479_v39  ;;  %v8252_v0 = vpop.f32.mrf.mxu1  ;;  %v4483_v6 = vmul.f32 %v7522_v50, %v7522_v50  ;;  %v13665_v5 = vld [vmem:[#allocation161_spill] sm:$0xff] }
 0x366   :  { %13645 = vst [vmem:[#allocation235_spill] sm:$0xff] %v8252_v0 }
 0x367   :  { %v4219_v59 = vadd.f32 %v4218_v13, %v7502_v34  ;;  %v4735_v29 = vadd.f32 %v4734_v7, %v4480_v9  ;;  %v3239_v37 = vpop.f32.mrf.mxu1  ;;  %v4484_v9 = vmul.f32 %v7532_v20, %v7532_v20 }
 0x369   :  { %v4220_v33 = vadd.f32 %v4219_v59, %v7512_v41  ;;  %v4736_v35 = vadd.f32 %v4735_v29, %v4481_v4  ;;  %v8260_v16 = vpop.f32.mrf.mxu1  ;;  %v4485_v59 = vmul.f32 %v7542_v2, %v7542_v2  ;;  %v13662_v41 = vld [vmem:[#allocation157_spill] sm:$0xff] }
 0x36a   :  { %13646 = vst [vmem:[#allocation236_spill] sm:$0xff] %v8260_v16 }
 0x36b   :  { %v4221_v27 = vadd.f32 %v4220_v33, %v7522_v50  ;;  %v4737_v39 = vadd.f32 %v4736_v35, %v4482_v52  ;;  %v3242_v34 = vpop.f32.mrf.mxu1  ;;  %v4486_v52 = vmul.f32 %v7552_v23, %v7552_v23 }
 0x36d   :  { %v4222_v13 = vadd.f32 %v4221_v27, %v7532_v20  ;;  %v4738_v7 = vadd.f32 %v4737_v39, %v4483_v6  ;;  %v8268_v29 = vpop.f32.mrf.mxu1  ;;  %v4487_v27 = vmul.f32 %v7562_v18, %v7562_v18  ;;  %v13659_v20 = vld [vmem:[#allocation153_spill] sm:$0xff] }
 0x36e   :  { %13647 = vst [vmem:[#allocation237_spill] sm:$0xff] %v8268_v29 }
 0x36f   :  { %v4223_v37 = vadd.f32 %v4222_v13, %v7542_v2  ;;  %v4739_v4 = vadd.f32 %v4738_v7, %v4484_v9  ;;  %v3247_v50 = vpop.f32.mrf.mxu1  ;;  %v4488_v9 = vmul.f32 %v7572_v42, %v7572_v42 }
 0x371   :  { %v4224_v33 = vadd.f32 %v4223_v37, %v7552_v23  ;;  %v4740_v35 = vadd.f32 %v4739_v4, %v4485_v59  ;;  %v8276_v39 = vpop.f32.mrf.mxu1  ;;  %v4489_v37 = vmul.f32 %v7582_v38, %v7582_v38  ;;  %v13656_v23 = vld [vmem:[#allocation149_spill] sm:$0xff] }
 0x372   :  { %13648 = vst [vmem:[#allocation238_spill] sm:$0xff] %v8276_v39 }
 0x373   :  { %v4225_v34 = vadd.f32 %v4224_v33, %v7562_v18  ;;  %v4741_v6 = vadd.f32 %v4740_v35, %v4486_v52  ;;  %v3250_v2 = vpop.f32.mrf.mxu1  ;;  %v4490_v52 = vmul.f32 %v7592_v58, %v7592_v58 }
 0x375   :  { %v4226_v13 = vadd.f32 %v4225_v34, %v7572_v42  ;;  %v4742_v7 = vadd.f32 %v4741_v6, %v4487_v27  ;;  %v8284_v4 = vpop.f32.mrf.mxu1  ;;  %v4491_v34 = vmul.f32 %v7602_v36, %v7602_v36  ;;  %v13653_v42 = vld [vmem:[#allocation145_spill] sm:$0xff] }
 0x376   :  { %13649 = vst [vmem:[#allocation239_spill] sm:$0xff] %v8284_v4 }
 0x377   :  { %v4227_v50 = vadd.f32 %v4226_v13, %v7582_v38  ;;  %v4743_v59 = vadd.f32 %v4742_v7, %v4488_v9  ;;  %v3255_v18 = vpop.f32.mrf.mxu1  ;;  %v4492_v9 = vmul.f32 %v7612_v8, %v7612_v8 }
 0x379   :  { %v4228_v33 = vadd.f32 %v4227_v50, %v7592_v58  ;;  %v4744_v35 = vadd.f32 %v4743_v59, %v4489_v37  ;;  %v8292_v6 = vpop.f32.mrf.mxu1  ;;  %v4493_v50 = vmul.f32 %v7622_v17, %v7622_v17  ;;  %v13652_v58 = vld [vmem:[#allocation143_spill] sm:$0xff] }
 0x37a   :  { %13650 = vst [vmem:[#allocation240_spill] sm:$0xff] %v8292_v6 }
 0x37b   :  { %v4229_v2 = vadd.f32 %v4228_v33, %v7602_v36  ;;  %v4745_v27 = vadd.f32 %v4744_v35, %v4490_v52  ;;  %v3258_v38 = vpop.f32.mrf.mxu1  ;;  %v4494_v52 = vmul.f32 %v13652_v58, %v13652_v58 }
 0x37d   :  { %v4230_v13 = vadd.f32 %v4229_v2, %v7612_v8  ;;  %v4746_v7 = vadd.f32 %v4745_v27, %v4491_v34  ;;  %v8300_v59 = vpop.f32.mrf.mxu1  ;;  %v4495_v2 = vmul.f32 %v13653_v42, %v13653_v42 }
 0x37e   :  { %13651 = vst [vmem:[#allocation241_spill] sm:$0xff] %v8300_v59 }
 0x37f   :  { %v4747_v37 = vadd.f32 %v4746_v7, %v4492_v9  ;;  %v4231_v18 = vadd.f32 %v4230_v13, %v7622_v17  ;;  %v3263_v36 = vpop.f32.mrf.mxu1  ;;  %v13655_v9 = vld [vmem:[#allocation147_spill] sm:$0xff] }
 0x380   :  { %v4496_v13 = vmul.f32 %v13655_v9, %v13655_v9 }
 0x381   :  { %v4232_v33 = vadd.f32 %v4231_v18, %v13652_v58  ;;  %v4748_v35 = vadd.f32 %v4747_v37, %v4493_v50  ;;  %v8308_v27 = vpop.f32.mrf.mxu1  ;;  %v4497_v18 = vmul.f32 %v13656_v23, %v13656_v23  ;;  %v13658_v58 = vld [vmem:[#allocation151_spill] sm:$0xff] }
 0x382   :  { %13654 = vst [vmem:[#allocation242_spill] sm:$0xff] %v8308_v27 }
 0x383   :  { %v4233_v38 = vadd.f32 %v4232_v33, %v13653_v42  ;;  %v4749_v34 = vadd.f32 %v4748_v35, %v4494_v52  ;;  %v3266_v8 = vpop.f32.mrf.mxu1  ;;  %v4498_v52 = vmul.f32 %v13658_v58, %v13658_v58 }
 0x385   :  { %v4234_v7 = vadd.f32 %v4233_v38, %v13655_v9  ;;  %v4750_v17 = vadd.f32 %v4749_v34, %v4495_v2  ;;  %v8316_v37 = vpop.f32.mrf.mxu1  ;;  %v4499_v38 = vmul.f32 %v13659_v20, %v13659_v20  ;;  %v13661_v9 = vld [vmem:[#allocation155_spill] sm:$0xff] }
 0x386   :  { %13657 = vst [vmem:[#allocation243_spill] sm:$0xff] %v8316_v37 }
 0x387   :  { %v4235_v36 = vadd.f32 %v4234_v7, %v13656_v23  ;;  %v4751_v50 = vadd.f32 %v4750_v17, %v4496_v13  ;;  %v3271_v42 = vpop.f32.mrf.mxu1  ;;  %v4500_v17 = vmul.f32 %v13661_v9, %v13661_v9 }
 0x389   :  { %v4236_v33 = vadd.f32 %v4235_v36, %v13658_v58  ;;  %v4752_v35 = vadd.f32 %v4751_v50, %v4497_v18  ;;  %v8324_v34 = vpop.f32.mrf.mxu1  ;;  %v4501_v36 = vmul.f32 %v13662_v41, %v13662_v41  ;;  %v13664_v58 = vld [vmem:[#allocation159_spill] sm:$0xff] }
 0x38a   :  { %13660 = vst [vmem:[#allocation244_spill] sm:$0xff] %v8324_v34 }
 0x38b   :  { %v4237_v8 = vadd.f32 %v4236_v33, %v13659_v20  ;;  %v4753_v2 = vadd.f32 %v4752_v35, %v4498_v52  ;;  %v3274_v23 = vpop.f32.mrf.mxu1  ;;  %v4502_v52 = vmul.f32 %v13664_v58, %v13664_v58 }
 0x38d   :  { %v4238_v13 = vadd.f32 %v4237_v8, %v13661_v9  ;;  %v4754_v7 = vadd.f32 %v4753_v2, %v4499_v38  ;;  %v8332_v50 = vpop.f32.mrf.mxu1  ;;  %v4503_v8 = vmul.f32 %v13665_v5, %v13665_v5  ;;  %v13666_v9 = vld [vmem:[#allocation163_spill] sm:$0xff] }
 0x38e   :  { %13663 = vst [vmem:[#allocation245_spill] sm:$0xff] %v8332_v50 }
 0x38f   :  { %v4239_v42 = vadd.f32 %v4238_v13, %v13662_v41  ;;  %v4755_v18 = vadd.f32 %v4754_v7, %v4500_v17  ;;  %v3279_v20 = vpop.f32.mrf.mxu1  ;;  %v4504_v17 = vmul.f32 %v13666_v9, %v13666_v9 }
 0x391   :  { %v4240_v33 = vadd.f32 %v4239_v42, %v13664_v58  ;;  %v4756_v35 = vadd.f32 %v4755_v18, %v4501_v36  ;;  %v8340_v2 = vpop.f32.mrf.mxu1  ;;  %v4505_v42 = vmul.f32 %v13667_v1, %v13667_v1  ;;  %v13668_v18 = vld [vmem:[#allocation167_spill] sm:$0xff] }
 0x392   :  { %v4506_v58 = vmul.f32 %v13668_v18, %v13668_v18 }
 0x393   :  { %v4241_v23 = vadd.f32 %v4240_v33, %v13665_v5  ;;  %v4757_v38 = vadd.f32 %v4756_v35, %v4502_v52  ;;  %v3282_v41 = vpop.f32.mrf.mxu1  ;;  %v13669_v35 = vld [vmem:[#allocation169_spill] sm:$0xff] }
 0x394   :  { %v4507_v5 = vmul.f32 %v13669_v35, %v13669_v35 }
 0x395   :  { %v4242_v13 = vadd.f32 %v4241_v23, %v13666_v9  ;;  %v4758_v7 = vadd.f32 %v4757_v38, %v4503_v8  ;;  %v13670_v8 = vld [vmem:[#allocation171_spill] sm:$0xff] }
 0x396   :  { %v4508_v41 = vmul.f32 %v13670_v8, %v13670_v8 }
 0x397   :  { %v4243_v20 = vadd.f32 %v4242_v13, %v13667_v1  ;;  %v4759_v36 = vadd.f32 %v4758_v7, %v4504_v17  ;;  %v4509_v13 = vmul.f32 %v7782_v48, %v7782_v48 }
 0x399   :  { %v4244_v52 = vadd.f32 %v4243_v20, %v13668_v18  ;;  %v4760_v33 = vadd.f32 %v4759_v36, %v4505_v42  ;;  %v4510_v36 = vmul.f32 %v7792_v21, %v7792_v21 }
 0x39b   :  { %v4245_v30 = vadd.f32 %v4244_v52, %v13669_v35  ;;  %v4761_v23 = vadd.f32 %v4760_v33, %v4506_v58  ;;  %v4511_v33 = vmul.f32 %v7802_v40, %v7802_v40 }
 0x39d   :  { %v4246_v38 = vadd.f32 %v4245_v30, %v13670_v8  ;;  %v4762_v9 = vadd.f32 %v4761_v23, %v4507_v5  ;;  %v4512_v23 = vmul.f32 %v7812_v44, %v7812_v44 }
 0x39f   :  { %v4247_v17 = vadd.f32 %v4246_v38, %v7782_v48  ;;  %v4763_v7 = vadd.f32 %v4762_v9, %v4508_v41  ;;  %v4513_v41 = vmul.f32 %v7822_v61, %v7822_v61 }
 0x3a1   :  { %v4764_v20 = vadd.f32 %v4763_v7, %v4509_v13  ;;  %v4248_v42 = vadd.f32 %v4247_v17, %v7792_v21  ;;  %v4514_v7 = vmul.f32 %v7832_v26, %v7832_v26 }
 0x3a3   :  { %v4765_v52 = vadd.f32 %v4764_v20, %v4510_v36  ;;  %v4249_v58 = vadd.f32 %v4248_v42, %v7802_v40  ;;  %v4515_v36 = vmul.f32 %v7842_v11, %v7842_v11 }
 0x3a5   :  { %v4766_v30 = vadd.f32 %v4765_v52, %v4511_v33  ;;  %v4250_v5 = vadd.f32 %v4249_v58, %v7812_v44  ;;  %v4516_v33 = vmul.f32 %v7852_v51, %v7852_v51 }
 0x3a7   :  { %v4767_v38 = vadd.f32 %v4766_v30, %v4512_v23  ;;  %v4251_v9 = vadd.f32 %v4250_v5, %v7822_v61  ;;  %v4517_v23 = vmul.f32 %v7862_v19, %v7862_v19 }
 0x3a9   :  { %v4768_v17 = vadd.f32 %v4767_v38, %v4513_v41  ;;  %v4252_v13 = vadd.f32 %v4251_v9, %v7832_v26  ;;  %v4518_v41 = vmul.f32 %v7872_v54, %v7872_v54 }
 0x3ab   :  { %v4769_v20 = vadd.f32 %v4768_v17, %v4514_v7  ;;  %v4253_v42 = vadd.f32 %v4252_v13, %v7842_v11  ;;  %v4519_v7 = vmul.f32 %v7882_v62, %v7882_v62 }
 0x3ad   :  { %v4770_v52 = vadd.f32 %v4769_v20, %v4515_v36  ;;  %v4254_v58 = vadd.f32 %v4253_v42, %v7852_v51  ;;  %v4520_v36 = vmul.f32 %v7892_v43, %v7892_v43 }
 0x3af   :  { %v4771_v30 = vadd.f32 %v4770_v52, %v4516_v33  ;;  %v4255_v5 = vadd.f32 %v4254_v58, %v7862_v19  ;;  %v4521_v33 = vmul.f32 %v7902_v45, %v7902_v45 }
 0x3b1   :  { %v4772_v38 = vadd.f32 %v4771_v30, %v4517_v23  ;;  %v4256_v9 = vadd.f32 %v4255_v5, %v7872_v54  ;;  %v4522_v23 = vmul.f32 %v7912_v53, %v7912_v53 }
 0x3b3   :  { %v4773_v17 = vadd.f32 %v4772_v38, %v4518_v41  ;;  %v4257_v13 = vadd.f32 %v4256_v9, %v7882_v62  ;;  %v4523_v41 = vmul.f32 %v7922_v14, %v7922_v14 }
 0x3b5   :  { %v4774_v20 = vadd.f32 %v4773_v17, %v4519_v7  ;;  %v4258_v42 = vadd.f32 %v4257_v13, %v7892_v43  ;;  %v4524_v7 = vmul.f32 %v7932_v28, %v7932_v28 }
 0x3b7   :  { %v4775_v52 = vadd.f32 %v4774_v20, %v4520_v36  ;;  %v4259_v58 = vadd.f32 %v4258_v42, %v7902_v45  ;;  %v4525_v36 = vmul.f32 %v7942_v24, %v7942_v24 }
 0x3b9   :  { %v4776_v30 = vadd.f32 %v4775_v52, %v4521_v33  ;;  %v4260_v5 = vadd.f32 %v4259_v58, %v7912_v53  ;;  %v4526_v33 = vmul.f32 %v7952_v31, %v7952_v31 }
 0x3bb   :  { %v4777_v38 = vadd.f32 %v4776_v30, %v4522_v23  ;;  %v4261_v9 = vadd.f32 %v4260_v5, %v7922_v14  ;;  %v4527_v23 = vmul.f32 %v7962_v57, %v7962_v57 }
 0x3bd   :  { %v4778_v17 = vadd.f32 %v4777_v38, %v4523_v41  ;;  %v4262_v13 = vadd.f32 %v4261_v9, %v7932_v28  ;;  %v4528_v41 = vmul.f32 %v7972_v49, %v7972_v49 }
 0x3bf   :  { %v4779_v20 = vadd.f32 %v4778_v17, %v4524_v7  ;;  %v4263_v42 = vadd.f32 %v4262_v13, %v7942_v24  ;;  %v4529_v7 = vmul.f32 %v7982_v55, %v7982_v55 }
 0x3c1   :  { %v4780_v52 = vadd.f32 %v4779_v20, %v4525_v36  ;;  %v4264_v58 = vadd.f32 %v4263_v42, %v7952_v31  ;;  %v4530_v36 = vmul.f32 %v7992_v46, %v7992_v46 }
 0x3c3   :  { %v4781_v30 = vadd.f32 %v4780_v52, %v4526_v33  ;;  %v4265_v5 = vadd.f32 %v4264_v58, %v7962_v57  ;;  %v4531_v33 = vmul.f32 %v8002_v32, %v8002_v32 }
 0x3c5   :  { %v4782_v38 = vadd.f32 %v4781_v30, %v4527_v23  ;;  %v4266_v9 = vadd.f32 %v4265_v5, %v7972_v49  ;;  %v4532_v23 = vmul.f32 %v8012_v47, %v8012_v47 }
 0x3c7   :  { %v4783_v17 = vadd.f32 %v4782_v38, %v4528_v41  ;;  %v4267_v13 = vadd.f32 %v4266_v9, %v7982_v55  ;;  %v4533_v41 = vmul.f32 %v8022_v15, %v8022_v15 }
 0x3c9   :  { %v4784_v20 = vadd.f32 %v4783_v17, %v4529_v7  ;;  %v4268_v42 = vadd.f32 %v4267_v13, %v7992_v46  ;;  %v4534_v7 = vmul.f32 %v8032_v56, %v8032_v56  ;;  %v13897_v46 = vld [vmem:[#allocation240_spill] sm:$0xff] }
 0x3cb   :  { %v4785_v52 = vadd.f32 %v4784_v20, %v4530_v36  ;;  %v4269_v58 = vadd.f32 %v4268_v42, %v8002_v32  ;;  %v4535_v36 = vmul.f32 %v8042_v3, %v8042_v3  ;;  %v13898_v32 = vld [vmem:[#allocation241_spill] sm:$0xff] }
 0x3cd   :  { %v4786_v30 = vadd.f32 %v4785_v52, %v4531_v33  ;;  %v4270_v5 = vadd.f32 %v4269_v58, %v8012_v47  ;;  %v4536_v33 = vmul.f32 %v8052_v25, %v8052_v25  ;;  %v13889_v47 = vld [vmem:[#allocation221_spill] sm:$0xff] }
 0x3cf   :  { %v4787_v38 = vadd.f32 %v4786_v30, %v4532_v23  ;;  %v4271_v9 = vadd.f32 %v4270_v5, %v8022_v15  ;;  %v4537_v23 = vmul.f32 %v8062_v22, %v8062_v22  ;;  %v13890_v15 = vld [vmem:[#allocation222_spill] sm:$0xff] }
 0x3d1   :  { %v4788_v17 = vadd.f32 %v4787_v38, %v4533_v41  ;;  %v4272_v13 = vadd.f32 %v4271_v9, %v8032_v56  ;;  %v4538_v41 = vmul.f32 %v8072_v63, %v8072_v63  ;;  %v13891_v56 = vld [vmem:[#allocation223_spill] sm:$0xff] }
 0x3d3   :  { %v4789_v20 = vadd.f32 %v4788_v17, %v4534_v7  ;;  %v4273_v42 = vadd.f32 %v4272_v13, %v8042_v3  ;;  %v13671_v13 = vld [vmem:[#allocation212_spill] sm:$0xff] }
 0x3d4   :  { %v13892_v3 = vld [vmem:[#allocation224_spill] sm:$0xff] }
 0x3d5   :  { %v4790_v52 = vadd.f32 %v4789_v20, %v4535_v36  ;;  %v4274_v58 = vadd.f32 %v4273_v42, %v8052_v25  ;;  %v4539_v20 = vmul.f32 %v13671_v13, %v13671_v13  ;;  %v13672_v36 = vld [vmem:[#allocation214_spill] sm:$0xff]  ;;  %v13893_v25 = vld [vmem:[#allocation225_spill] sm:$0xff] }
 0x3d7   :  { %v4791_v30 = vadd.f32 %v4790_v52, %v4536_v33  ;;  %v4275_v5 = vadd.f32 %v4274_v58, %v8062_v22  ;;  %v4540_v58 = vmul.f32 %v13672_v36, %v13672_v36  ;;  %v13673_v22 = vld [vmem:[#allocation216_spill] sm:$0xff] }
 0x3d9   :  { %v4792_v38 = vadd.f32 %v4791_v30, %v4537_v23  ;;  %v4276_v9 = vadd.f32 %v4275_v5, %v8072_v63  ;;  %v4541_v5 = vmul.f32 %v13673_v22, %v13673_v22  ;;  %v13674_v63 = vld [vmem:[#allocation217_spill] sm:$0xff] }
 0x3db   :  { %v4793_v17 = vadd.f32 %v4792_v38, %v4538_v41  ;;  %v4277_v7 = vadd.f32 %v4276_v9, %v13671_v13  ;;  %v4542_v9 = vmul.f32 %v13674_v63, %v13674_v63  ;;  %v13675_v13 = vld [vmem:[#allocation218_spill] sm:$0xff] }
 0x3dd   :  { %v4794_v42 = vadd.f32 %v4793_v17, %v4539_v20  ;;  %v4278_v52 = vadd.f32 %v4277_v7, %v13672_v36  ;;  %v4543_v7 = vmul.f32 %v13675_v13, %v13675_v13  ;;  %v13676_v36 = vld [vmem:[#allocation219_spill] sm:$0xff] }
 0x3df   :  { %v4795_v33 = vadd.f32 %v4794_v42, %v4540_v58  ;;  %v4279_v30 = vadd.f32 %v4278_v52, %v13673_v22  ;;  %v4544_v52 = vmul.f32 %v13676_v36, %v13676_v36  ;;  %v13677_v22 = vld [vmem:[#allocation220_spill] sm:$0xff] }
 0x3e1   :  { %v4796_v23 = vadd.f32 %v4795_v33, %v4541_v5  ;;  %v4280_v38 = vadd.f32 %v4279_v30, %v13674_v63  ;;  %v4545_v30 = vmul.f32 %v13677_v22, %v13677_v22  ;;  %v13678_v63 = vld [vmem:[#allocation221_spill] sm:$0xff] }
 0x3e3   :  { %v4797_v41 = vadd.f32 %v4796_v23, %v4542_v9  ;;  %v4281_v17 = vadd.f32 %v4280_v38, %v13675_v13  ;;  %v4546_v38 = vmul.f32 %v13678_v63, %v13678_v63  ;;  %v13679_v13 = vld [vmem:[#allocation222_spill] sm:$0xff] }
 0x3e5   :  { %v4798_v20 = vadd.f32 %v4797_v41, %v4543_v7  ;;  %v4282_v42 = vadd.f32 %v4281_v17, %v13676_v36  ;;  %v4547_v17 = vmul.f32 %v13679_v13, %v13679_v13  ;;  %v13680_v36 = vld [vmem:[#allocation223_spill] sm:$0xff] }
 0x3e7   :  { %v4799_v58 = vadd.f32 %v4798_v20, %v4544_v52  ;;  %v4283_v33 = vadd.f32 %v4282_v42, %v13677_v22  ;;  %v4548_v42 = vmul.f32 %v13680_v36, %v13680_v36  ;;  %v13681_v22 = vld [vmem:[#allocation224_spill] sm:$0xff] }
 0x3e9   :  { %v4800_v5 = vadd.f32 %v4799_v58, %v4545_v30  ;;  %v4284_v23 = vadd.f32 %v4283_v33, %v13678_v63  ;;  %v4549_v33 = vmul.f32 %v13681_v22, %v13681_v22  ;;  %v13682_v63 = vld [vmem:[#allocation225_spill] sm:$0xff] }
 0x3eb   :  { %v4801_v9 = vadd.f32 %v4800_v5, %v4546_v38  ;;  %v4285_v41 = vadd.f32 %v4284_v23, %v13679_v13  ;;  %v4550_v23 = vmul.f32 %v13682_v63, %v13682_v63  ;;  %v13683_v13 = vld [vmem:[#allocation226_spill] sm:$0xff] }
 0x3ed   :  { %v4802_v7 = vadd.f32 %v4801_v9, %v4547_v17  ;;  %v4286_v20 = vadd.f32 %v4285_v41, %v13680_v36  ;;  %v4551_v41 = vmul.f32 %v13683_v13, %v13683_v13  ;;  %v13684_v36 = vld [vmem:[#allocation227_spill] sm:$0xff] }
 0x3ef   :  { %v4803_v52 = vadd.f32 %v4802_v7, %v4548_v42  ;;  %v4287_v58 = vadd.f32 %v4286_v20, %v13681_v22  ;;  %v4552_v20 = vmul.f32 %v13684_v36, %v13684_v36  ;;  %v13685_v22 = vld [vmem:[#allocation228_spill] sm:$0xff] }
 0x3f1   :  { %v4804_v30 = vadd.f32 %v4803_v52, %v4549_v33  ;;  %v4288_v5 = vadd.f32 %v4287_v58, %v13682_v63  ;;  %v4553_v58 = vmul.f32 %v13685_v22, %v13685_v22  ;;  %v13686_v63 = vld [vmem:[#allocation229_spill] sm:$0xff] }
 0x3f3   :  { %v4805_v38 = vadd.f32 %v4804_v30, %v4550_v23  ;;  %v4289_v9 = vadd.f32 %v4288_v5, %v13683_v13  ;;  %v4554_v5 = vmul.f32 %v13686_v63, %v13686_v63  ;;  %v13687_v13 = vld [vmem:[#allocation230_spill] sm:$0xff] }
 0x3f5   :  { %v4806_v17 = vadd.f32 %v4805_v38, %v4551_v41  ;;  %v4290_v7 = vadd.f32 %v4289_v9, %v13684_v36  ;;  %v4555_v9 = vmul.f32 %v13687_v13, %v13687_v13  ;;  %v13688_v36 = vld [vmem:[#allocation231_spill] sm:$0xff] }
 0x3f7   :  { %v4807_v42 = vadd.f32 %v4806_v17, %v4552_v20  ;;  %v4291_v52 = vadd.f32 %v4290_v7, %v13685_v22  ;;  %v4556_v7 = vmul.f32 %v13688_v36, %v13688_v36 }
 0x3f9   :  { %v4808_v33 = vadd.f32 %v4807_v42, %v4553_v58  ;;  %v4292_v30 = vadd.f32 %v4291_v52, %v13686_v63  ;;  %v4557_v52 = vmul.f32 %v8228_v60, %v8228_v60 }
 0x3fb   :  { %v4809_v23 = vadd.f32 %v4808_v33, %v4554_v5  ;;  %v4293_v38 = vadd.f32 %v4292_v30, %v13687_v13  ;;  %v4558_v30 = vmul.f32 %v8236_v12, %v8236_v12 }
 0x3fd   :  { %v4810_v41 = vadd.f32 %v4809_v23, %v4555_v9  ;;  %v4294_v17 = vadd.f32 %v4293_v38, %v13688_v36  ;;  %v4559_v38 = vmul.f32 %v8244_v10, %v8244_v10 }
 0x3ff   :  { %v4811_v20 = vadd.f32 %v4810_v41, %v4556_v7  ;;  %v4295_v42 = vadd.f32 %v4294_v17, %v8228_v60  ;;  %v4560_v17 = vmul.f32 %v8252_v0, %v8252_v0 }
 0x401   :  { %v4812_v58 = vadd.f32 %v4811_v20, %v4557_v52  ;;  %v4296_v33 = vadd.f32 %v4295_v42, %v8236_v12  ;;  %v4561_v42 = vmul.f32 %v8260_v16, %v8260_v16 }
 0x403   :  { %v4813_v5 = vadd.f32 %v4812_v58, %v4558_v30  ;;  %v4297_v23 = vadd.f32 %v4296_v33, %v8244_v10  ;;  %v4562_v33 = vmul.f32 %v8268_v29, %v8268_v29 }
 0x405   :  { %v4814_v9 = vadd.f32 %v4813_v5, %v4559_v38  ;;  %v4298_v41 = vadd.f32 %v4297_v23, %v8252_v0  ;;  %v4563_v23 = vmul.f32 %v8276_v39, %v8276_v39 }
 0x407   :  { %v4815_v7 = vadd.f32 %v4814_v9, %v4560_v17  ;;  %v4299_v20 = vadd.f32 %v4298_v41, %v8260_v16  ;;  %v4564_v41 = vmul.f32 %v8284_v4, %v8284_v4 }
 0x409   :  { %v4816_v52 = vadd.f32 %v4815_v7, %v4561_v42  ;;  %v4300_v58 = vadd.f32 %v4299_v20, %v8268_v29  ;;  %v4565_v20 = vmul.f32 %v8292_v6, %v8292_v6 }
 0x40b   :  { %v4817_v30 = vadd.f32 %v4816_v52, %v4562_v33  ;;  %v4301_v5 = vadd.f32 %v4300_v58, %v8276_v39  ;;  %v4566_v58 = vmul.f32 %v8300_v59, %v8300_v59 }
 0x40d   :  { %v4818_v38 = vadd.f32 %v4817_v30, %v4563_v23  ;;  %v4302_v9 = vadd.f32 %v4301_v5, %v8284_v4  ;;  %v4567_v5 = vmul.f32 %v8308_v27, %v8308_v27 }
 0x40f   :  { %v4819_v17 = vadd.f32 %v4818_v38, %v4564_v41  ;;  %v4303_v7 = vadd.f32 %v4302_v9, %v8292_v6  ;;  %v4568_v9 = vmul.f32 %v8316_v37, %v8316_v37 }
 0x411   :  { %v4820_v42 = vadd.f32 %v4819_v17, %v4565_v20  ;;  %v4304_v52 = vadd.f32 %v4303_v7, %v8300_v59  ;;  %v4569_v7 = vmul.f32 %v8324_v34, %v8324_v34 }
 0x413   :  { %v4821_v33 = vadd.f32 %v4820_v42, %v4566_v58  ;;  %v4305_v30 = vadd.f32 %v4304_v52, %v8308_v27  ;;  %v4570_v52 = vmul.f32 %v8332_v50, %v8332_v50 }
 0x415   :  { %v4822_v23 = vadd.f32 %v4821_v33, %v4567_v5  ;;  %v4306_v38 = vadd.f32 %v4305_v30, %v8316_v37  ;;  %v4571_v30 = vmul.f32 %v8340_v2, %v8340_v2 }
 0x417   :  { %v4823_v41 = vadd.f32 %v4822_v23, %v4568_v9  ;;  %v4307_v17 = vadd.f32 %v4306_v38, %v8324_v34 }
 0x419   :  { %v4824_v20 = vadd.f32 %v4823_v41, %v4569_v7  ;;  %v4308_v42 = vadd.f32 %v4307_v17, %v8332_v50 }
 0x41b   :  { %v4825_v58 = vadd.f32 %v4824_v20, %v4570_v52  ;;  %v4309_v33 = vadd.f32 %v4308_v42, %v8340_v2 }
 0x41d   :  { %v4310_v5 = vrot.slane %v4309_v33, 4  ;;  %v4826_v37 = vadd.f32 %v4825_v58, %v4571_v30  ;;  %v13689_v58 = vld [vmem:[#allocation12_spill] sm:$0xff] }
 0x41e   :  { %v8711_v30 = vld [vmem:[%s12920_s2] ss:$0 sm:$0xff] }
 0x41f   :  { %v4311_v23 = vadd.f32 %v4310_v5, %v4309_v33  ;;  %v4827_v9 = vrot.slane %v4826_v37, 4  ;;  %13766 = vst [vmem:[#allocation165_spill] sm:$0xff] %v8711_v30  ;;  %v13878_v33 = vld [vmem:[#allocation161_spill] sm:$0xff] }
 0x421   :  { %v4312_v38 = vrot.slane %v4311_v23, 2  ;;  %v4828_v27 = vadd.f32 %v4827_v9, %v4826_v37  ;;  %v13690_v37 = vld [vmem:[#allocation13_spill] sm:$0xff]  ;;  %v13900_v9 = vld [vmem:[#allocation243_spill] sm:$0xff] }
 0x423   :  { %v4313_v59 = vadd.f32 %v4312_v38, %v4311_v23  ;;  %v4829_v34 = vrot.slane %v4828_v27, 2  ;;  %v13907_v38 = vld [vmem:[#allocation14_spill] sm:$0xff] }
 0x425   :  { %v4314_v41 = vrot.slane %v4313_v59, 1  ;;  %v4830_v7 = vadd.f32 %v4829_v34, %v4828_v27  ;;  %v13874_v34 = vld [vmem:[#allocation153_spill] sm:$0xff]  ;;  %v13875_v27 = vld [vmem:[#allocation155_spill] sm:$0xff] }
 0x427   :  { %v4315_v17 = vadd.f32 %v4314_v41, %v4313_v59  ;;  %v4831_v6 = vrot.slane %v4830_v7, 1  ;;  %v13894_v59 = vld [vmem:[#allocation226_spill] sm:$0xff] }
 0x429   :  { %v4832_v4 = vadd.f32 %v4831_v6, %v4830_v7  ;;  %v8546_v50 = vmul.f32 0.00048828125, %v4315_v17  ;;  %v13877_v6 = vld [vmem:[#allocation159_spill] sm:$0xff] }
 0x42b   :  { %v4834_v20 = vmul.f32 0.00048828125, %v4832_v4  ;;  %v4835_v42 = vmul.f32 %v8546_v50, %v8546_v50  ;;  %v13771_v7 = vsub.f32 %v8340_v2, %v8546_v50  ;;  %v13879_v4 = vld [vmem:[#allocation163_spill] sm:$0xff]  ;;  %v13903_v60 = vsub.f32 %v13689_v58, %v8546_v50 }
 0x42c   :  { %v13905_v10 = vsub.f32 %v13690_v37, %v8546_v50  ;;  %v13908_v16 = vsub.f32 %v13907_v38, %v8546_v50  ;;  %v13910_v2 = vld [vmem:[#allocation15_spill] sm:$0xff] }
 0x42d   :  { %v4836_v23 = vsub.f32 %v4834_v20, %v4835_v42  ;;  %v13873_v42 = vld [vmem:[#allocation151_spill] sm:$0xff]  ;;  %v13911_v39 = vsub.f32 %v13910_v2, %v8546_v50 }
 0x42f   :  { %v4837_v5 = vmax.f32 %v4836_v23, 0.0  ;;  %v13895_v23 = vld [vmem:[#allocation227_spill] sm:$0xff] }
 0x431   :  { %v5094_v20 = vadd.f32 1e-05, %v4837_v5 }
 0x433   :  { %7122 = vrsqrt.f32 %v5094_v20  ;;  %v6681_v20 = vld [vmem:[%s12921_s3] ss:$0 sm:$0xff] }
 0x440   :  { %v8706_v5 = vpop.eup %7122 }
 0x441   :  { %v5351_v41 = vmul.f32 %v8706_v5, %v13771_v7  ;;  %v13902_v7 = vld [vmem:[#allocation245_spill] sm:$0xff]  ;;  %v9081_v12 = vmul.f32 %v8706_v5, %v13903_v60  ;;  %v9087_v0 = vmul.f32 %v8706_v5, %v13905_v10  ;;  %v9093_v29 = vmul.f32 %v8706_v5, %v13908_v16  ;;  %v13913_v60 = vld [vmem:[#allocation16_spill] sm:$0xff]  ;;  %v13919_v16 = vld [vmem:[#allocation18_spill] sm:$0xff] }
 0x442   :  { %v9099_v58 = vmul.f32 %v8706_v5, %v13911_v39  ;;  %v13916_v10 = vld [vmem:[#allocation17_spill] sm:$0xff]  ;;  %v13922_v39 = vld [vmem:[#allocation19_spill] sm:$0xff] }
 0x443   :  { %v5614_v17 = vmul.f32 %v8711_v30, %v5351_v41  ;;  %v13785_v41 = vld [vmem:[#allocation170_spill] sm:$0xff]  ;;  %13904 = vst [vmem:[#allocation167_spill] sm:$0xff] %v9081_v12  ;;  %13906 = vst [vmem:[#allocation169_spill] sm:$0xff] %v9087_v0  ;;  %v13914_v12 = vsub.f32 %v13913_v60, %v8546_v50  ;;  %v13917_v0 = vsub.f32 %v13916_v10, %v8546_v50 }
 0x444   :  { %13909 = vst [vmem:[#allocation171_spill] sm:$0xff] %v9093_v29  ;;  %13912 = vst [vmem:[#allocation228_spill] sm:$0xff] %v9099_v58  ;;  %v13920_v29 = vsub.f32 %v13919_v16, %v8546_v50  ;;  %v13923_v58 = vsub.f32 %v13922_v39, %v8546_v50 }
 0x445   :  { %v5877_v52 = vadd.f32 %v6681_v20, %v5614_v17  ;;  %v13792_v17 = vld [vmem:[#allocation178_spill] sm:$0xff]  ;;  %v13896_v20 = vld [vmem:[#allocation239_spill] sm:$0xff]  ;;  %v9105_v37 = vmul.f32 %v8706_v5, %v13914_v12  ;;  %v9111_v38 = vmul.f32 %v8706_v5, %v13917_v0  ;;  %v13925_v12 = vld [vmem:[#allocation20_spill] sm:$0xff] }
 0x446   :  { %v9117_v2 = vmul.f32 %v8706_v5, %v13920_v29  ;;  %v9123_v60 = vmul.f32 %v8706_v5, %v13923_v58  ;;  %v13928_v0 = vld [vmem:[#allocation21_spill] sm:$0xff]  ;;  %v13931_v29 = vld [vmem:[#allocation22_spill] sm:$0xff]  ;;  %v13934_v58 = vld [vmem:[#allocation23_spill] sm:$0xff] }
 0x447   :  { %v6133_v30 = vmax.f32 %v5877_v52, 0.0  ;;  %v13799_v52 = vld [vmem:[#allocation185_spill] sm:$0xff]  ;;  %13915 = vst [vmem:[#allocation229_spill] sm:$0xff] %v9105_v37  ;;  %13918 = vst [vmem:[#allocation230_spill] sm:$0xff] %v9111_v38  ;;  %v13926_v37 = vsub.f32 %v13925_v12, %v8546_v50  ;;  %v13929_v38 = vsub.f32 %v13928_v0, %v8546_v50 }
 0x448   :  { %13921 = vst [vmem:[#allocation231_spill] sm:$0xff] %v9117_v2  ;;  %13924 = vst [vmem:[#allocation12_spill] sm:$0xff] %v9123_v60  ;;  %v13932_v2 = vsub.f32 %v13931_v29, %v8546_v50  ;;  %v13935_v60 = vsub.f32 %v13934_v58, %v8546_v50 }
 0x449   :  { %6389 = vst [vmem:[#allocation8 + $0x7f8] sm:$0xff] %v6133_v30  ;;  %v13876_v30 = vld [vmem:[#allocation157_spill] sm:$0xff]  ;;  %v9129_v10 = vmul.f32 %v8706_v5, %v13926_v37  ;;  %v9135_v16 = vmul.f32 %v8706_v5, %v13929_v38  ;;  %v13937_v37 = vld [vmem:[#allocation24_spill] sm:$0xff] }
 0x44a   :  { %v9141_v39 = vmul.f32 %v8706_v5, %v13932_v2  ;;  %v9147_v12 = vmul.f32 %v8706_v5, %v13935_v60  ;;  %v13940_v38 = vld [vmem:[#allocation25_spill] sm:$0xff]  ;;  %v13943_v2 = vld [vmem:[#allocation26_spill] sm:$0xff]  ;;  %v13946_v60 = vld [vmem:[#allocation27_spill] sm:$0xff] }
 0x44b   :  { %13927 = vst [vmem:[#allocation13_spill] sm:$0xff] %v9129_v10  ;;  %13930 = vst [vmem:[#allocation170_spill] sm:$0xff] %v9135_v16  ;;  %v13938_v10 = vsub.f32 %v13937_v37, %v8546_v50  ;;  %v13941_v16 = vsub.f32 %v13940_v38, %v8546_v50 }
 0x44c   :  { %13933 = vst [vmem:[#allocation178_spill] sm:$0xff] %v9141_v39  ;;  %13936 = vst [vmem:[#allocation185_spill] sm:$0xff] %v9147_v12  ;;  %v13944_v39 = vsub.f32 %v13943_v2, %v8546_v50  ;;  %v13947_v12 = vsub.f32 %v13946_v60, %v8546_v50 }
 0x44d   :  { %v9153_v0 = vmul.f32 %v8706_v5, %v13938_v10  ;;  %v9159_v29 = vmul.f32 %v8706_v5, %v13941_v16  ;;  %v13949_v10 = vld [vmem:[#allocation28_spill] sm:$0xff]  ;;  %v13952_v16 = vld [vmem:[#allocation29_spill] sm:$0xff] }
 0x44e   :  { %v9165_v58 = vmul.f32 %v8706_v5, %v13944_v39  ;;  %v9171_v37 = vmul.f32 %v8706_v5, %v13947_v12  ;;  %v13955_v39 = vld [vmem:[#allocation30_spill] sm:$0xff]  ;;  %v13958_v12 = vld [vmem:[#allocation31_spill] sm:$0xff] }
 0x44f   :  { %13939 = vst [vmem:[#allocation151_spill] sm:$0xff] %v9153_v0  ;;  %13942 = vst [vmem:[#allocation153_spill] sm:$0xff] %v9159_v29  ;;  %v13950_v0 = vsub.f32 %v13949_v10, %v8546_v50  ;;  %v13953_v29 = vsub.f32 %v13952_v16, %v8546_v50 }
 0x450   :  { %13945 = vst [vmem:[#allocation155_spill] sm:$0xff] %v9165_v58  ;;  %13948 = vst [vmem:[#allocation157_spill] sm:$0xff] %v9171_v37  ;;  %v13956_v58 = vsub.f32 %v13955_v39, %v8546_v50  ;;  %v13959_v37 = vsub.f32 %v13958_v12, %v8546_v50 }
 0x451   :  { %v9177_v38 = vmul.f32 %v8706_v5, %v13950_v0  ;;  %v9183_v2 = vmul.f32 %v8706_v5, %v13953_v29  ;;  %v13961_v0 = vld [vmem:[#allocation32_spill] sm:$0xff]  ;;  %v13964_v29 = vld [vmem:[#allocation33_spill] sm:$0xff] }
 0x452   :  { %v9189_v60 = vmul.f32 %v8706_v5, %v13956_v58  ;;  %v9195_v10 = vmul.f32 %v8706_v5, %v13959_v37  ;;  %v13967_v58 = vld [vmem:[#allocation34_spill] sm:$0xff]  ;;  %v13970_v37 = vld [vmem:[#allocation35_spill] sm:$0xff] }
 0x453   :  { %13951 = vst [vmem:[#allocation159_spill] sm:$0xff] %v9177_v38  ;;  %13954 = vst [vmem:[#allocation161_spill] sm:$0xff] %v9183_v2  ;;  %v13962_v38 = vsub.f32 %v13961_v0, %v8546_v50  ;;  %v13965_v2 = vsub.f32 %v13964_v29, %v8546_v50 }
 0x454   :  { %13957 = vst [vmem:[#allocation163_spill] sm:$0xff] %v9189_v60  ;;  %13960 = vst [vmem:[#allocation221_spill] sm:$0xff] %v9195_v10  ;;  %v13968_v60 = vsub.f32 %v13967_v58, %v8546_v50  ;;  %v13971_v10 = vsub.f32 %v13970_v37, %v8546_v50 }
 0x455   :  { %v9201_v16 = vmul.f32 %v8706_v5, %v13962_v38  ;;  %v9207_v39 = vmul.f32 %v8706_v5, %v13965_v2  ;;  %v13973_v38 = vld [vmem:[#allocation36_spill] sm:$0xff]  ;;  %v13976_v2 = vld [vmem:[#allocation37_spill] sm:$0xff] }
 0x456   :  { %v9213_v12 = vmul.f32 %v8706_v5, %v13968_v60  ;;  %v9219_v0 = vmul.f32 %v8706_v5, %v13971_v10  ;;  %v13979_v60 = vld [vmem:[#allocation38_spill] sm:$0xff]  ;;  %v13982_v10 = vld [vmem:[#allocation39_spill] sm:$0xff] }
 0x457   :  { %13963 = vst [vmem:[#allocation222_spill] sm:$0xff] %v9201_v16  ;;  %13966 = vst [vmem:[#allocation223_spill] sm:$0xff] %v9207_v39  ;;  %v13974_v16 = vsub.f32 %v13973_v38, %v8546_v50  ;;  %v13977_v39 = vsub.f32 %v13976_v2, %v8546_v50 }
 0x458   :  { %13969 = vst [vmem:[#allocation224_spill] sm:$0xff] %v9213_v12  ;;  %13972 = vst [vmem:[#allocation225_spill] sm:$0xff] %v9219_v0  ;;  %v13980_v12 = vsub.f32 %v13979_v60, %v8546_v50  ;;  %v13983_v0 = vsub.f32 %v13982_v10, %v8546_v50 }
 0x459   :  { %v9225_v29 = vmul.f32 %v8706_v5, %v13974_v16  ;;  %v9231_v58 = vmul.f32 %v8706_v5, %v13977_v39  ;;  %v13985_v16 = vld [vmem:[#allocation40_spill] sm:$0xff]  ;;  %v13988_v39 = vld [vmem:[#allocation41_spill] sm:$0xff] }
 0x45a   :  { %v9237_v37 = vmul.f32 %v8706_v5, %v13980_v12  ;;  %v9243_v38 = vmul.f32 %v8706_v5, %v13983_v0  ;;  %v13991_v12 = vld [vmem:[#allocation42_spill] sm:$0xff]  ;;  %v13994_v0 = vld [vmem:[#allocation44_spill] sm:$0xff] }
 0x45b   :  { %13975 = vst [vmem:[#allocation226_spill] sm:$0xff] %v9225_v29  ;;  %13978 = vst [vmem:[#allocation227_spill] sm:$0xff] %v9231_v58  ;;  %v13986_v29 = vsub.f32 %v13985_v16, %v8546_v50  ;;  %v13989_v58 = vsub.f32 %v13988_v39, %v8546_v50 }
 0x45c   :  { %13981 = vst [vmem:[#allocation239_spill] sm:$0xff] %v9237_v37  ;;  %13984 = vst [vmem:[#allocation240_spill] sm:$0xff] %v9243_v38  ;;  %v13992_v37 = vsub.f32 %v13991_v12, %v8546_v50  ;;  %v13995_v38 = vsub.f32 %v13994_v0, %v8546_v50 }
 0x45d   :  { %v9249_v2 = vmul.f32 %v8706_v5, %v13986_v29  ;;  %v9255_v60 = vmul.f32 %v8706_v5, %v13989_v58  ;;  %v13997_v29 = vld [vmem:[#allocation46_spill] sm:$0xff]  ;;  %v14000_v58 = vld [vmem:[#allocation48_spill] sm:$0xff] }
 0x45e   :  { %v9261_v10 = vmul.f32 %v8706_v5, %v13992_v37  ;;  %v9267_v16 = vmul.f32 %v8706_v5, %v13995_v38  ;;  %v14003_v37 = vld [vmem:[#allocation50_spill] sm:$0xff]  ;;  %v14006_v38 = vld [vmem:[#allocation52_spill] sm:$0xff] }
 0x45f   :  { %13987 = vst [vmem:[#allocation241_spill] sm:$0xff] %v9249_v2  ;;  %13990 = vst [vmem:[#allocation243_spill] sm:$0xff] %v9255_v60  ;;  %v13998_v2 = vsub.f32 %v13997_v29, %v8546_v50  ;;  %v14001_v60 = vsub.f32 %v14000_v58, %v8546_v50 }
 0x460   :  { %13993 = vst [vmem:[#allocation245_spill] sm:$0xff] %v9261_v10  ;;  %13996 = vst [vmem:[#allocation14_spill] sm:$0xff] %v9267_v16  ;;  %v14004_v10 = vsub.f32 %v14003_v37, %v8546_v50  ;;  %v14007_v16 = vsub.f32 %v14006_v38, %v8546_v50 }
 0x461   :  { %v9273_v39 = vmul.f32 %v8706_v5, %v13998_v2  ;;  %v9279_v12 = vmul.f32 %v8706_v5, %v14001_v60  ;;  %v14009_v2 = vld [vmem:[#allocation54_spill] sm:$0xff]  ;;  %v14012_v60 = vld [vmem:[#allocation56_spill] sm:$0xff] }
 0x462   :  { %v9285_v0 = vmul.f32 %v8706_v5, %v14004_v10  ;;  %v9291_v29 = vmul.f32 %v8706_v5, %v14007_v16  ;;  %v14015_v10 = vld [vmem:[#allocation58_spill] sm:$0xff]  ;;  %v14018_v16 = vld [vmem:[#allocation60_spill] sm:$0xff] }
 0x463   :  { %13999 = vst [vmem:[#allocation15_spill] sm:$0xff] %v9273_v39  ;;  %14002 = vst [vmem:[#allocation16_spill] sm:$0xff] %v9279_v12  ;;  %v14010_v39 = vsub.f32 %v14009_v2, %v8546_v50  ;;  %v14013_v12 = vsub.f32 %v14012_v60, %v8546_v50 }
 0x464   :  { %14005 = vst [vmem:[#allocation17_spill] sm:$0xff] %v9285_v0  ;;  %14008 = vst [vmem:[#allocation18_spill] sm:$0xff] %v9291_v29  ;;  %v14016_v0 = vsub.f32 %v14015_v10, %v8546_v50  ;;  %v14019_v29 = vsub.f32 %v14018_v16, %v8546_v50 }
 0x465   :  { %v9297_v58 = vmul.f32 %v8706_v5, %v14010_v39  ;;  %v9303_v37 = vmul.f32 %v8706_v5, %v14013_v12  ;;  %v14021_v39 = vld [vmem:[#allocation62_spill] sm:$0xff]  ;;  %v14024_v12 = vld [vmem:[#allocation64_spill] sm:$0xff] }
 0x466   :  { %v9309_v38 = vmul.f32 %v8706_v5, %v14016_v0  ;;  %v9315_v2 = vmul.f32 %v8706_v5, %v14019_v29  ;;  %v14027_v0 = vld [vmem:[#allocation66_spill] sm:$0xff]  ;;  %v14030_v29 = vld [vmem:[#allocation68_spill] sm:$0xff] }
 0x467   :  { %14011 = vst [vmem:[#allocation19_spill] sm:$0xff] %v9297_v58  ;;  %14014 = vst [vmem:[#allocation20_spill] sm:$0xff] %v9303_v37  ;;  %v14022_v58 = vsub.f32 %v14021_v39, %v8546_v50  ;;  %v14025_v37 = vsub.f32 %v14024_v12, %v8546_v50 }
 0x468   :  { %14017 = vst [vmem:[#allocation21_spill] sm:$0xff] %v9309_v38  ;;  %14020 = vst [vmem:[#allocation22_spill] sm:$0xff] %v9315_v2  ;;  %v14028_v38 = vsub.f32 %v14027_v0, %v8546_v50  ;;  %v14031_v2 = vsub.f32 %v14030_v29, %v8546_v50 }
 0x469   :  { %v9321_v60 = vmul.f32 %v8706_v5, %v14022_v58  ;;  %v9327_v10 = vmul.f32 %v8706_v5, %v14025_v37  ;;  %v14033_v58 = vld [vmem:[#allocation70_spill] sm:$0xff]  ;;  %v14036_v37 = vld [vmem:[#allocation72_spill] sm:$0xff] }
 0x46a   :  { %v9333_v16 = vmul.f32 %v8706_v5, %v14028_v38  ;;  %v9339_v39 = vmul.f32 %v8706_v5, %v14031_v2  ;;  %v14039_v38 = vld [vmem:[#allocation74_spill] sm:$0xff]  ;;  %v14042_v2 = vld [vmem:[#allocation76_spill] sm:$0xff] }
 0x46b   :  { %14023 = vst [vmem:[#allocation23_spill] sm:$0xff] %v9321_v60  ;;  %14026 = vst [vmem:[#allocation24_spill] sm:$0xff] %v9327_v10  ;;  %v14034_v60 = vsub.f32 %v14033_v58, %v8546_v50  ;;  %v14037_v10 = vsub.f32 %v14036_v37, %v8546_v50 }
 0x46c   :  { %14029 = vst [vmem:[#allocation25_spill] sm:$0xff] %v9333_v16  ;;  %14032 = vst [vmem:[#allocation26_spill] sm:$0xff] %v9339_v39  ;;  %v14040_v16 = vsub.f32 %v14039_v38, %v8546_v50  ;;  %v14043_v39 = vsub.f32 %v14042_v2, %v8546_v50 }
 0x46d   :  { %v9345_v12 = vmul.f32 %v8706_v5, %v14034_v60  ;;  %v9351_v0 = vmul.f32 %v8706_v5, %v14037_v10  ;;  %v14045_v60 = vld [vmem:[#allocation78_spill] sm:$0xff]  ;;  %v14048_v10 = vld [vmem:[#allocation80_spill] sm:$0xff] }
 0x46e   :  { %v9357_v29 = vmul.f32 %v8706_v5, %v14040_v16  ;;  %v9363_v58 = vmul.f32 %v8706_v5, %v14043_v39  ;;  %v14051_v16 = vld [vmem:[#allocation82_spill] sm:$0xff]  ;;  %v14054_v39 = vld [vmem:[#allocation84_spill] sm:$0xff] }
 0x46f   :  { %14035 = vst [vmem:[#allocation27_spill] sm:$0xff] %v9345_v12  ;;  %14038 = vst [vmem:[#allocation28_spill] sm:$0xff] %v9351_v0  ;;  %v14046_v12 = vsub.f32 %v14045_v60, %v8546_v50  ;;  %v14049_v0 = vsub.f32 %v14048_v10, %v8546_v50 }
 0x470   :  { %14041 = vst [vmem:[#allocation29_spill] sm:$0xff] %v9357_v29  ;;  %14044 = vst [vmem:[#allocation30_spill] sm:$0xff] %v9363_v58  ;;  %v14052_v29 = vsub.f32 %v14051_v16, %v8546_v50  ;;  %v14055_v58 = vsub.f32 %v14054_v39, %v8546_v50 }
 0x471   :  { %v9369_v37 = vmul.f32 %v8706_v5, %v14046_v12  ;;  %v9375_v38 = vmul.f32 %v8706_v5, %v14049_v0  ;;  %v14057_v12 = vld [vmem:[#allocation86_spill] sm:$0xff]  ;;  %v14060_v0 = vld [vmem:[#allocation88_spill] sm:$0xff] }
 0x472   :  { %v9381_v2 = vmul.f32 %v8706_v5, %v14052_v29  ;;  %v9387_v60 = vmul.f32 %v8706_v5, %v14055_v58  ;;  %v14063_v29 = vld [vmem:[#allocation90_spill] sm:$0xff]  ;;  %v14066_v58 = vld [vmem:[#allocation92_spill] sm:$0xff] }
 0x473   :  { %14047 = vst [vmem:[#allocation31_spill] sm:$0xff] %v9369_v37  ;;  %14050 = vst [vmem:[#allocation32_spill] sm:$0xff] %v9375_v38  ;;  %v14058_v37 = vsub.f32 %v14057_v12, %v8546_v50  ;;  %v14061_v38 = vsub.f32 %v14060_v0, %v8546_v50 }
 0x474   :  { %14053 = vst [vmem:[#allocation33_spill] sm:$0xff] %v9381_v2  ;;  %14056 = vst [vmem:[#allocation34_spill] sm:$0xff] %v9387_v60  ;;  %v14064_v2 = vsub.f32 %v14063_v29, %v8546_v50  ;;  %v14067_v60 = vsub.f32 %v14066_v58, %v8546_v50 }
 0x475   :  { %v9393_v10 = vmul.f32 %v8706_v5, %v14058_v37  ;;  %v9399_v16 = vmul.f32 %v8706_v5, %v14061_v38  ;;  %v14069_v37 = vld [vmem:[#allocation94_spill] sm:$0xff]  ;;  %v14072_v38 = vld [vmem:[#allocation96_spill] sm:$0xff] }
 0x476   :  { %v9405_v39 = vmul.f32 %v8706_v5, %v14064_v2  ;;  %v9411_v12 = vmul.f32 %v8706_v5, %v14067_v60  ;;  %v14075_v2 = vld [vmem:[#allocation98_spill] sm:$0xff]  ;;  %v14078_v60 = vld [vmem:[#allocation100_spill] sm:$0xff] }
 0x477   :  { %14059 = vst [vmem:[#allocation35_spill] sm:$0xff] %v9393_v10  ;;  %14062 = vst [vmem:[#allocation36_spill] sm:$0xff] %v9399_v16  ;;  %v14070_v10 = vsub.f32 %v14069_v37, %v8546_v50  ;;  %v14073_v16 = vsub.f32 %v14072_v38, %v8546_v50 }
 0x478   :  { %14065 = vst [vmem:[#allocation37_spill] sm:$0xff] %v9405_v39  ;;  %14068 = vst [vmem:[#allocation38_spill] sm:$0xff] %v9411_v12  ;;  %v14076_v39 = vsub.f32 %v14075_v2, %v8546_v50  ;;  %v14079_v12 = vsub.f32 %v14078_v60, %v8546_v50 }
 0x479   :  { %v9417_v0 = vmul.f32 %v8706_v5, %v14070_v10  ;;  %v9423_v29 = vmul.f32 %v8706_v5, %v14073_v16  ;;  %v14081_v10 = vld [vmem:[#allocation102_spill] sm:$0xff]  ;;  %v14084_v16 = vld [vmem:[#allocation104_spill] sm:$0xff] }
 0x47a   :  { %v9429_v58 = vmul.f32 %v8706_v5, %v14076_v39  ;;  %v9435_v37 = vmul.f32 %v8706_v5, %v14079_v12  ;;  %v14087_v39 = vld [vmem:[#allocation106_spill] sm:$0xff]  ;;  %v14090_v12 = vld [vmem:[#allocation108_spill] sm:$0xff] }
 0x47b   :  { %14071 = vst [vmem:[#allocation39_spill] sm:$0xff] %v9417_v0  ;;  %14074 = vst [vmem:[#allocation40_spill] sm:$0xff] %v9423_v29  ;;  %v14082_v0 = vsub.f32 %v14081_v10, %v8546_v50  ;;  %v14085_v29 = vsub.f32 %v14084_v16, %v8546_v50 }
 0x47c   :  { %14077 = vst [vmem:[#allocation41_spill] sm:$0xff] %v9429_v58  ;;  %14080 = vst [vmem:[#allocation42_spill] sm:$0xff] %v9435_v37  ;;  %v14088_v58 = vsub.f32 %v14087_v39, %v8546_v50  ;;  %v14091_v37 = vsub.f32 %v14090_v12, %v8546_v50 }
 0x47d   :  { %v9441_v38 = vmul.f32 %v8706_v5, %v14082_v0  ;;  %v9447_v2 = vmul.f32 %v8706_v5, %v14085_v29  ;;  %v14093_v0 = vld [vmem:[#allocation110_spill] sm:$0xff]  ;;  %v14096_v29 = vld [vmem:[#allocation112_spill] sm:$0xff] }
 0x47e   :  { %v9453_v60 = vmul.f32 %v8706_v5, %v14088_v58  ;;  %v9459_v10 = vmul.f32 %v8706_v5, %v14091_v37  ;;  %v14099_v58 = vld [vmem:[#allocation114_spill] sm:$0xff]  ;;  %v14102_v37 = vld [vmem:[#allocation116_spill] sm:$0xff] }
 0x47f   :  { %14083 = vst [vmem:[#allocation44_spill] sm:$0xff] %v9441_v38  ;;  %14086 = vst [vmem:[#allocation46_spill] sm:$0xff] %v9447_v2  ;;  %v14094_v38 = vsub.f32 %v14093_v0, %v8546_v50  ;;  %v14097_v2 = vsub.f32 %v14096_v29, %v8546_v50 }
 0x480   :  { %14089 = vst [vmem:[#allocation48_spill] sm:$0xff] %v9453_v60  ;;  %14092 = vst [vmem:[#allocation50_spill] sm:$0xff] %v9459_v10  ;;  %v14100_v60 = vsub.f32 %v14099_v58, %v8546_v50  ;;  %v14103_v10 = vsub.f32 %v14102_v37, %v8546_v50 }
 0x481   :  { %v9465_v16 = vmul.f32 %v8706_v5, %v14094_v38  ;;  %v9471_v39 = vmul.f32 %v8706_v5, %v14097_v2  ;;  %v14105_v38 = vld [vmem:[#allocation118_spill] sm:$0xff]  ;;  %v14108_v2 = vld [vmem:[#allocation120_spill] sm:$0xff] }
 0x482   :  { %v9477_v12 = vmul.f32 %v8706_v5, %v14100_v60  ;;  %v9483_v0 = vmul.f32 %v8706_v5, %v14103_v10  ;;  %v14111_v60 = vld [vmem:[#allocation122_spill] sm:$0xff]  ;;  %v14114_v10 = vld [vmem:[#allocation124_spill] sm:$0xff] }
 0x483   :  { %14095 = vst [vmem:[#allocation52_spill] sm:$0xff] %v9465_v16  ;;  %14098 = vst [vmem:[#allocation54_spill] sm:$0xff] %v9471_v39  ;;  %v14106_v16 = vsub.f32 %v14105_v38, %v8546_v50  ;;  %v14109_v39 = vsub.f32 %v14108_v2, %v8546_v50 }
 0x484   :  { %14101 = vst [vmem:[#allocation56_spill] sm:$0xff] %v9477_v12  ;;  %14104 = vst [vmem:[#allocation58_spill] sm:$0xff] %v9483_v0  ;;  %v14112_v12 = vsub.f32 %v14111_v60, %v8546_v50  ;;  %v14115_v0 = vsub.f32 %v14114_v10, %v8546_v50 }
 0x485   :  { %v9489_v29 = vmul.f32 %v8706_v5, %v14106_v16  ;;  %v9495_v58 = vmul.f32 %v8706_v5, %v14109_v39  ;;  %v14117_v16 = vld [vmem:[#allocation126_spill] sm:$0xff]  ;;  %v14120_v39 = vld [vmem:[#allocation128_spill] sm:$0xff] }
 0x486   :  { %v9501_v37 = vmul.f32 %v8706_v5, %v14112_v12  ;;  %v9507_v38 = vmul.f32 %v8706_v5, %v14115_v0  ;;  %v14123_v12 = vld [vmem:[#allocation130_spill] sm:$0xff]  ;;  %v14126_v0 = vld [vmem:[#allocation132_spill] sm:$0xff] }
 0x487   :  { %14107 = vst [vmem:[#allocation60_spill] sm:$0xff] %v9489_v29  ;;  %14110 = vst [vmem:[#allocation62_spill] sm:$0xff] %v9495_v58  ;;  %v14118_v29 = vsub.f32 %v14117_v16, %v8546_v50  ;;  %v14121_v58 = vsub.f32 %v14120_v39, %v8546_v50 }
 0x488   :  { %14113 = vst [vmem:[#allocation64_spill] sm:$0xff] %v9501_v37  ;;  %14116 = vst [vmem:[#allocation66_spill] sm:$0xff] %v9507_v38  ;;  %v14124_v37 = vsub.f32 %v14123_v12, %v8546_v50  ;;  %v14127_v38 = vsub.f32 %v14126_v0, %v8546_v50 }
 0x489   :  { %v9513_v2 = vmul.f32 %v8706_v5, %v14118_v29  ;;  %v9519_v60 = vmul.f32 %v8706_v5, %v14121_v58  ;;  %v14129_v29 = vld [vmem:[#allocation134_spill] sm:$0xff]  ;;  %v14132_v58 = vld [vmem:[#allocation136_spill] sm:$0xff] }
 0x48a   :  { %v9525_v10 = vmul.f32 %v8706_v5, %v14124_v37  ;;  %v9531_v16 = vmul.f32 %v8706_v5, %v14127_v38  ;;  %v14135_v37 = vld [vmem:[#allocation138_spill] sm:$0xff]  ;;  %v14138_v38 = vld [vmem:[#allocation140_spill] sm:$0xff] }
 0x48b   :  { %14119 = vst [vmem:[#allocation68_spill] sm:$0xff] %v9513_v2  ;;  %14122 = vst [vmem:[#allocation70_spill] sm:$0xff] %v9519_v60  ;;  %v14130_v2 = vsub.f32 %v14129_v29, %v8546_v50  ;;  %v14133_v60 = vsub.f32 %v14132_v58, %v8546_v50 }
 0x48c   :  { %14125 = vst [vmem:[#allocation72_spill] sm:$0xff] %v9525_v10  ;;  %14128 = vst [vmem:[#allocation74_spill] sm:$0xff] %v9531_v16  ;;  %v14136_v10 = vsub.f32 %v14135_v37, %v8546_v50  ;;  %v14139_v16 = vsub.f32 %v14138_v38, %v8546_v50 }
 0x48d   :  { %v9537_v39 = vmul.f32 %v8706_v5, %v14130_v2  ;;  %v9543_v12 = vmul.f32 %v8706_v5, %v14133_v60  ;;  %v14141_v2 = vld [vmem:[#allocation142_spill] sm:$0xff]  ;;  %v14144_v60 = vld [vmem:[#allocation144_spill] sm:$0xff] }
 0x48e   :  { %v9549_v0 = vmul.f32 %v8706_v5, %v14136_v10  ;;  %v9555_v29 = vmul.f32 %v8706_v5, %v14139_v16  ;;  %v14147_v10 = vld [vmem:[#allocation146_spill] sm:$0xff]  ;;  %v14150_v16 = vld [vmem:[#allocation148_spill] sm:$0xff] }
 0x48f   :  { %14131 = vst [vmem:[#allocation76_spill] sm:$0xff] %v9537_v39  ;;  %14134 = vst [vmem:[#allocation78_spill] sm:$0xff] %v9543_v12  ;;  %v14142_v39 = vsub.f32 %v14141_v2, %v8546_v50  ;;  %v14145_v12 = vsub.f32 %v14144_v60, %v8546_v50 }
 0x490   :  { %14137 = vst [vmem:[#allocation80_spill] sm:$0xff] %v9549_v0  ;;  %14140 = vst [vmem:[#allocation82_spill] sm:$0xff] %v9555_v29  ;;  %v14148_v0 = vsub.f32 %v14147_v10, %v8546_v50  ;;  %v14151_v29 = vsub.f32 %v14150_v16, %v8546_v50 }
 0x491   :  { %v9561_v58 = vmul.f32 %v8706_v5, %v14142_v39  ;;  %v9567_v37 = vmul.f32 %v8706_v5, %v14145_v12  ;;  %v14153_v39 = vld [vmem:[#allocation150_spill] sm:$0xff]  ;;  %v14156_v12 = vld [vmem:[#allocation152_spill] sm:$0xff] }
 0x492   :  { %v9573_v38 = vmul.f32 %v8706_v5, %v14148_v0  ;;  %v9579_v2 = vmul.f32 %v8706_v5, %v14151_v29  ;;  %v14159_v0 = vld [vmem:[#allocation154_spill] sm:$0xff]  ;;  %v14162_v29 = vld [vmem:[#allocation156_spill] sm:$0xff] }
 0x493   :  { %14143 = vst [vmem:[#allocation84_spill] sm:$0xff] %v9561_v58  ;;  %14146 = vst [vmem:[#allocation86_spill] sm:$0xff] %v9567_v37  ;;  %v14154_v58 = vsub.f32 %v14153_v39, %v8546_v50  ;;  %v14157_v37 = vsub.f32 %v14156_v12, %v8546_v50 }
 0x494   :  { %14149 = vst [vmem:[#allocation88_spill] sm:$0xff] %v9573_v38  ;;  %14152 = vst [vmem:[#allocation90_spill] sm:$0xff] %v9579_v2  ;;  %v14160_v38 = vsub.f32 %v14159_v0, %v8546_v50  ;;  %v14163_v2 = vsub.f32 %v14162_v29, %v8546_v50 }
 0x495   :  { %v9585_v60 = vmul.f32 %v8706_v5, %v14154_v58  ;;  %v9591_v10 = vmul.f32 %v8706_v5, %v14157_v37  ;;  %v14165_v58 = vld [vmem:[#allocation158_spill] sm:$0xff]  ;;  %v14168_v37 = vld [vmem:[#allocation160_spill] sm:$0xff] }
 0x496   :  { %v9597_v16 = vmul.f32 %v8706_v5, %v14160_v38  ;;  %v9603_v39 = vmul.f32 %v8706_v5, %v14163_v2  ;;  %v14171_v38 = vld [vmem:[#allocation162_spill] sm:$0xff]  ;;  %v14173_v2 = vld [vmem:[#allocation164_spill] sm:$0xff] }
 0x497   :  { %14155 = vst [vmem:[#allocation92_spill] sm:$0xff] %v9585_v60  ;;  %14158 = vst [vmem:[#allocation94_spill] sm:$0xff] %v9591_v10  ;;  %v14166_v60 = vsub.f32 %v14165_v58, %v8546_v50  ;;  %v14169_v10 = vsub.f32 %v14168_v37, %v8546_v50 }
 0x498   :  { %14161 = vst [vmem:[#allocation96_spill] sm:$0xff] %v9597_v16  ;;  %14164 = vst [vmem:[#allocation98_spill] sm:$0xff] %v9603_v39  ;;  %v14172_v16 = vsub.f32 %v14171_v38, %v8546_v50  ;;  %v14174_v39 = vsub.f32 %v14173_v2, %v8546_v50 }
 0x499   :  { %v9609_v12 = vmul.f32 %v8706_v5, %v14166_v60  ;;  %v9615_v0 = vmul.f32 %v8706_v5, %v14169_v10  ;;  %v14176_v60 = vld [vmem:[#allocation166_spill] sm:$0xff]  ;;  %v14179_v10 = vld [vmem:[#allocation168_spill] sm:$0xff] }
 0x49a   :  { %v9621_v29 = vmul.f32 %v8706_v5, %v14172_v16  ;;  %v9627_v58 = vmul.f32 %v8706_v5, %v14174_v39  ;;  %v14182_v16 = vsub.f32 %v13785_v41, %v8546_v50  ;;  %v14184_v39 = vld [vmem:[#allocation172_spill] sm:$0xff] }
 0x49b   :  { %14167 = vst [vmem:[#allocation100_spill] sm:$0xff] %v9609_v12  ;;  %14170 = vst [vmem:[#allocation102_spill] sm:$0xff] %v9615_v0  ;;  %v14177_v12 = vsub.f32 %v14176_v60, %v8546_v50  ;;  %v14180_v0 = vsub.f32 %v14179_v10, %v8546_v50 }
 0x49c   :  { %14175 = vst [vmem:[#allocation104_spill] sm:$0xff] %v9627_v58  ;;  %v9645_v2 = vmul.f32 %v8706_v5, %v14182_v16  ;;  %v14185_v58 = vsub.f32 %v14184_v39, %v8546_v50  ;;  %v14192_v16 = vld [vmem:[#allocation175_spill] sm:$0xff] }
 0x49d   :  { %v9633_v37 = vmul.f32 %v8706_v5, %v14177_v12  ;;  %v9639_v38 = vmul.f32 %v8706_v5, %v14180_v0  ;;  %v14187_v12 = vld [vmem:[#allocation173_spill] sm:$0xff]  ;;  %v14190_v0 = vld [vmem:[#allocation174_spill] sm:$0xff] }
 0x49e   :  { %14183 = vst [vmem:[#allocation110_spill] sm:$0xff] %v9645_v2  ;;  %v9651_v60 = vmul.f32 %v8706_v5, %v14185_v58  ;;  %v14193_v2 = vsub.f32 %v14192_v16, %v8546_v50  ;;  %v14195_v58 = vld [vmem:[#allocation176_spill] sm:$0xff] }
 0x49f   :  { %14178 = vst [vmem:[#allocation106_spill] sm:$0xff] %v9633_v37  ;;  %14181 = vst [vmem:[#allocation108_spill] sm:$0xff] %v9639_v38  ;;  %v14188_v37 = vsub.f32 %v14187_v12, %v8546_v50  ;;  %v14191_v38 = vsub.f32 %v14190_v0, %v8546_v50 }
 0x4a0   :  { %14186 = vst [vmem:[#allocation112_spill] sm:$0xff] %v9651_v60  ;;  %v9669_v39 = vmul.f32 %v8706_v5, %v14193_v2  ;;  %v14196_v60 = vsub.f32 %v14195_v58, %v8546_v50  ;;  %v14203_v2 = vld [vmem:[#allocation179_spill] sm:$0xff] }
 0x4a1   :  { %v9657_v10 = vmul.f32 %v8706_v5, %v14188_v37  ;;  %v9663_v41 = vmul.f32 %v8706_v5, %v14191_v38  ;;  %v14198_v37 = vld [vmem:[#allocation177_spill] sm:$0xff]  ;;  %v14201_v38 = vsub.f32 %v13792_v17, %v8546_v50 }
 0x4a2   :  { %14194 = vst [vmem:[#allocation116_spill] sm:$0xff] %v9669_v39  ;;  %v9675_v12 = vmul.f32 %v8706_v5, %v14196_v60  ;;  %v14204_v39 = vsub.f32 %v14203_v2, %v8546_v50  ;;  %v14206_v60 = vld [vmem:[#allocation180_spill] sm:$0xff] }
 0x4a3   :  { %14189 = vst [vmem:[#allocation114_spill] sm:$0xff] %v9657_v10  ;;  %v14199_v10 = vsub.f32 %v14198_v37, %v8546_v50  ;;  %v9687_v16 = vmul.f32 %v8706_v5, %v14201_v38  ;;  %v14211_v38 = vld [vmem:[#allocation182_spill] sm:$0xff] }
 0x4a4   :  { %14197 = vst [vmem:[#allocation118_spill] sm:$0xff] %v9675_v12  ;;  %v9693_v58 = vmul.f32 %v8706_v5, %v14204_v39  ;;  %v14207_v12 = vsub.f32 %v14206_v60, %v8546_v50  ;;  %v14214_v39 = vld [vmem:[#allocation183_spill] sm:$0xff] }
 0x4a5   :  { %v9681_v0 = vmul.f32 %v8706_v5, %v14199_v10  ;;  %14202 = vst [vmem:[#allocation122_spill] sm:$0xff] %v9687_v16  ;;  %v14209_v10 = vld [vmem:[#allocation181_spill] sm:$0xff]  ;;  %v14212_v16 = vsub.f32 %v14211_v38, %v8546_v50 }
 0x4a6   :  { %14205 = vst [vmem:[#allocation124_spill] sm:$0xff] %v9693_v58  ;;  %v9699_v37 = vmul.f32 %v8706_v5, %v14207_v12  ;;  %v14215_v58 = vsub.f32 %v14214_v39, %v8546_v50  ;;  %v14217_v12 = vld [vmem:[#allocation184_spill] sm:$0xff] }
 0x4a7   :  { %14200 = vst [vmem:[#allocation120_spill] sm:$0xff] %v9681_v0  ;;  %v14210_v0 = vsub.f32 %v14209_v10, %v8546_v50  ;;  %v9711_v2 = vmul.f32 %v8706_v5, %v14212_v16  ;;  %v14222_v16 = vld [vmem:[#allocation186_spill] sm:$0xff] }
 0x4a8   :  { %14208 = vst [vmem:[#allocation126_spill] sm:$0xff] %v9699_v37  ;;  %v9717_v60 = vmul.f32 %v8706_v5, %v14215_v58  ;;  %v14218_v37 = vsub.f32 %v14217_v12, %v8546_v50  ;;  %v14225_v58 = vld [vmem:[#allocation187_spill] sm:$0xff] }
 0x4a9   :  { %v9705_v17 = vmul.f32 %v8706_v5, %v14210_v0  ;;  %14213 = vst [vmem:[#allocation128_spill] sm:$0xff] %v9711_v2  ;;  %v14220_v0 = vsub.f32 %v13799_v52, %v8546_v50  ;;  %v14223_v2 = vsub.f32 %v14222_v16, %v8546_v50 }
 0x4aa   :  { %14216 = vst [vmem:[#allocation130_spill] sm:$0xff] %v9717_v60  ;;  %v9723_v10 = vmul.f32 %v8706_v5, %v14218_v37  ;;  %v14226_v60 = vsub.f32 %v14225_v58, %v8546_v50  ;;  %v14228_v37 = vld [vmem:[#allocation188_spill] sm:$0xff] }
 0x4ab   :  { %v9729_v38 = vmul.f32 %v8706_v5, %v14220_v0  ;;  %v9735_v39 = vmul.f32 %v8706_v5, %v14223_v2  ;;  %v14231_v0 = vld [vmem:[#allocation189_spill] sm:$0xff]  ;;  %v14234_v2 = vld [vmem:[#allocation190_spill] sm:$0xff] }
 0x4ac   :  { %14219 = vst [vmem:[#allocation132_spill] sm:$0xff] %v9723_v10  ;;  %v9741_v12 = vmul.f32 %v8706_v5, %v14226_v60  ;;  %v14229_v10 = vsub.f32 %v14228_v37, %v8546_v50  ;;  %v14237_v60 = vld [vmem:[#allocation191_spill] sm:$0xff] }
 0x4ad   :  { %14221 = vst [vmem:[#allocation134_spill] sm:$0xff] %v9729_v38  ;;  %14224 = vst [vmem:[#allocation136_spill] sm:$0xff] %v9735_v39  ;;  %v14232_v38 = vsub.f32 %v14231_v0, %v8546_v50  ;;  %v14235_v39 = vsub.f32 %v14234_v2, %v8546_v50 }
 0x4ae   :  { %14227 = vst [vmem:[#allocation138_spill] sm:$0xff] %v9741_v12  ;;  %v9747_v52 = vmul.f32 %v8706_v5, %v14229_v10  ;;  %v14238_v12 = vsub.f32 %v14237_v60, %v8546_v50  ;;  %v14240_v10 = vld [vmem:[#allocation192_spill] sm:$0xff] }
 0x4af   :  { %v9753_v16 = vmul.f32 %v8706_v5, %v14232_v38  ;;  %v9759_v58 = vmul.f32 %v8706_v5, %v14235_v39  ;;  %v14243_v38 = vld [vmem:[#allocation193_spill] sm:$0xff]  ;;  %v14246_v39 = vld [vmem:[#allocation195_spill] sm:$0xff] }
 0x4b0   :  { %14230 = vst [vmem:[#allocation140_spill] sm:$0xff] %v9747_v52  ;;  %v9765_v37 = vmul.f32 %v8706_v5, %v14238_v12  ;;  %v14241_v52 = vsub.f32 %v14240_v10, %v8546_v50  ;;  %v14249_v12 = vld [vmem:[#allocation197_spill] sm:$0xff] }
 0x4b1   :  { %14233 = vst [vmem:[#allocation142_spill] sm:$0xff] %v9753_v16  ;;  %14236 = vst [vmem:[#allocation144_spill] sm:$0xff] %v9759_v58  ;;  %v14244_v16 = vsub.f32 %v14243_v38, %v8546_v50  ;;  %v14247_v58 = vsub.f32 %v14246_v39, %v8546_v50 }
 0x4b2   :  { %14239 = vst [vmem:[#allocation146_spill] sm:$0xff] %v9765_v37  ;;  %v9771_v0 = vmul.f32 %v8706_v5, %v14241_v52  ;;  %v14250_v37 = vsub.f32 %v14249_v12, %v8546_v50  ;;  %v14252_v52 = vld [vmem:[#allocation199_spill] sm:$0xff] }
 0x4b3   :  { %v9777_v2 = vmul.f32 %v8706_v5, %v14244_v16  ;;  %v9783_v60 = vmul.f32 %v8706_v5, %v14247_v58  ;;  %v14255_v16 = vld [vmem:[#allocation201_spill] sm:$0xff]  ;;  %v14258_v58 = vld [vmem:[#allocation203_spill] sm:$0xff] }
 0x4b4   :  { %14242 = vst [vmem:[#allocation148_spill] sm:$0xff] %v9771_v0  ;;  %v9789_v10 = vmul.f32 %v8706_v5, %v14250_v37  ;;  %v14253_v0 = vsub.f32 %v14252_v52, %v8546_v50  ;;  %v14261_v37 = vld [vmem:[#allocation205_spill] sm:$0xff] }
 0x4b5   :  { %14245 = vst [vmem:[#allocation150_spill] sm:$0xff] %v9777_v2  ;;  %14248 = vst [vmem:[#allocation152_spill] sm:$0xff] %v9783_v60  ;;  %v14256_v2 = vsub.f32 %v14255_v16, %v8546_v50  ;;  %v14259_v60 = vsub.f32 %v14258_v58, %v8546_v50 }
 0x4b6   :  { %14251 = vst [vmem:[#allocation154_spill] sm:$0xff] %v9789_v10  ;;  %v9795_v38 = vmul.f32 %v8706_v5, %v14253_v0  ;;  %v14262_v10 = vsub.f32 %v14261_v37, %v8546_v50  ;;  %v14264_v0 = vld [vmem:[#allocation207_spill] sm:$0xff] }
 0x4b7   :  { %v9801_v39 = vmul.f32 %v8706_v5, %v14256_v2  ;;  %v9807_v12 = vmul.f32 %v8706_v5, %v14259_v60  ;;  %v14267_v2 = vld [vmem:[#allocation209_spill] sm:$0xff]  ;;  %v14270_v60 = vld [vmem:[#allocation211_spill] sm:$0xff] }
 0x4b8   :  { %14254 = vst [vmem:[#allocation156_spill] sm:$0xff] %v9795_v38  ;;  %v9813_v52 = vmul.f32 %v8706_v5, %v14262_v10  ;;  %v14265_v38 = vsub.f32 %v14264_v0, %v8546_v50  ;;  %v14273_v10 = vld [vmem:[#allocation213_spill] sm:$0xff] }
 0x4b9   :  { %14257 = vst [vmem:[#allocation158_spill] sm:$0xff] %v9801_v39  ;;  %14260 = vst [vmem:[#allocation160_spill] sm:$0xff] %v9807_v12  ;;  %v14268_v39 = vsub.f32 %v14267_v2, %v8546_v50  ;;  %v14271_v12 = vsub.f32 %v14270_v60, %v8546_v50 }
 0x4ba   :  { %14263 = vst [vmem:[#allocation162_spill] sm:$0xff] %v9813_v52  ;;  %v9819_v16 = vmul.f32 %v8706_v5, %v14265_v38  ;;  %v14274_v52 = vsub.f32 %v14273_v10, %v8546_v50  ;;  %v14276_v38 = vld [vmem:[#allocation215_spill] sm:$0xff] }
 0x4bb   :  { %v9825_v58 = vmul.f32 %v8706_v5, %v14268_v39  ;;  %v9831_v37 = vmul.f32 %v8706_v5, %v14271_v12  ;;  %v14279_v39 = vld [vmem:[#allocation43_spill] sm:$0xff]  ;;  %v14282_v12 = vld [vmem:[#allocation45_spill] sm:$0xff] }
 0x4bc   :  { %14266 = vst [vmem:[#allocation164_spill] sm:$0xff] %v9819_v16  ;;  %v9837_v0 = vmul.f32 %v8706_v5, %v14274_v52  ;;  %v14277_v16 = vsub.f32 %v14276_v38, %v8546_v50  ;;  %v14285_v52 = vld [vmem:[#allocation47_spill] sm:$0xff] }
 0x4bd   :  { %14269 = vst [vmem:[#allocation166_spill] sm:$0xff] %v9825_v58  ;;  %14272 = vst [vmem:[#allocation168_spill] sm:$0xff] %v9831_v37  ;;  %v14280_v58 = vsub.f32 %v14279_v39, %v8546_v50  ;;  %v14283_v37 = vsub.f32 %v14282_v12, %v8546_v50 }
 0x4be   :  { %14275 = vst [vmem:[#allocation172_spill] sm:$0xff] %v9837_v0  ;;  %v9843_v2 = vmul.f32 %v8706_v5, %v14277_v16  ;;  %v14286_v0 = vsub.f32 %v14285_v52, %v8546_v50  ;;  %v14288_v16 = vld [vmem:[#allocation49_spill] sm:$0xff] }
 0x4bf   :  { %v9849_v60 = vmul.f32 %v8706_v5, %v14280_v58  ;;  %v9855_v10 = vmul.f32 %v8706_v5, %v14283_v37  ;;  %v14291_v58 = vld [vmem:[#allocation51_spill] sm:$0xff]  ;;  %v14294_v37 = vld [vmem:[#allocation53_spill] sm:$0xff] }
 0x4c0   :  { %14278 = vst [vmem:[#allocation173_spill] sm:$0xff] %v9843_v2  ;;  %v9861_v38 = vmul.f32 %v8706_v5, %v14286_v0  ;;  %v14289_v2 = vsub.f32 %v14288_v16, %v8546_v50  ;;  %v14297_v0 = vld [vmem:[#allocation55_spill] sm:$0xff] }
 0x4c1   :  { %14281 = vst [vmem:[#allocation174_spill] sm:$0xff] %v9849_v60  ;;  %14284 = vst [vmem:[#allocation175_spill] sm:$0xff] %v9855_v10  ;;  %v14292_v60 = vsub.f32 %v14291_v58, %v8546_v50  ;;  %v14295_v10 = vsub.f32 %v14294_v37, %v8546_v50 }
 0x4c2   :  { %14287 = vst [vmem:[#allocation176_spill] sm:$0xff] %v9861_v38  ;;  %v9867_v39 = vmul.f32 %v8706_v5, %v14289_v2  ;;  %v14298_v38 = vsub.f32 %v14297_v0, %v8546_v50  ;;  %v14300_v2 = vld [vmem:[#allocation57_spill] sm:$0xff] }
 0x4c3   :  { %v9873_v12 = vmul.f32 %v8706_v5, %v14292_v60  ;;  %v9879_v52 = vmul.f32 %v8706_v5, %v14295_v10  ;;  %v14303_v60 = vld [vmem:[#allocation59_spill] sm:$0xff]  ;;  %v14306_v10 = vld [vmem:[#allocation61_spill] sm:$0xff] }
 0x4c4   :  { %14290 = vst [vmem:[#allocation177_spill] sm:$0xff] %v9867_v39  ;;  %v9885_v16 = vmul.f32 %v8706_v5, %v14298_v38  ;;  %v14301_v39 = vsub.f32 %v14300_v2, %v8546_v50  ;;  %v14309_v38 = vld [vmem:[#allocation63_spill] sm:$0xff] }
 0x4c5   :  { %14293 = vst [vmem:[#allocation179_spill] sm:$0xff] %v9873_v12  ;;  %14296 = vst [vmem:[#allocation180_spill] sm:$0xff] %v9879_v52  ;;  %v14304_v12 = vsub.f32 %v14303_v60, %v8546_v50  ;;  %v14307_v52 = vsub.f32 %v14306_v10, %v8546_v50 }
 0x4c6   :  { %14299 = vst [vmem:[#allocation181_spill] sm:$0xff] %v9885_v16  ;;  %v9891_v58 = vmul.f32 %v8706_v5, %v14301_v39  ;;  %v14310_v16 = vsub.f32 %v14309_v38, %v8546_v50  ;;  %v14312_v39 = vld [vmem:[#allocation65_spill] sm:$0xff] }
 0x4c7   :  { %v9897_v37 = vmul.f32 %v8706_v5, %v14304_v12  ;;  %v9903_v0 = vmul.f32 %v8706_v5, %v14307_v52  ;;  %v14315_v12 = vld [vmem:[#allocation67_spill] sm:$0xff]  ;;  %v14318_v52 = vld [vmem:[#allocation69_spill] sm:$0xff] }
 0x4c8   :  { %14302 = vst [vmem:[#allocation182_spill] sm:$0xff] %v9891_v58  ;;  %v9909_v2 = vmul.f32 %v8706_v5, %v14310_v16  ;;  %v14313_v58 = vsub.f32 %v14312_v39, %v8546_v50  ;;  %v14321_v16 = vld [vmem:[#allocation71_spill] sm:$0xff] }
 0x4c9   :  { %14305 = vst [vmem:[#allocation183_spill] sm:$0xff] %v9897_v37  ;;  %14308 = vst [vmem:[#allocation184_spill] sm:$0xff] %v9903_v0  ;;  %v14316_v37 = vsub.f32 %v14315_v12, %v8546_v50  ;;  %v14319_v0 = vsub.f32 %v14318_v52, %v8546_v50 }
 0x4ca   :  { %14311 = vst [vmem:[#allocation186_spill] sm:$0xff] %v9909_v2  ;;  %v9915_v60 = vmul.f32 %v8706_v5, %v14313_v58  ;;  %v14322_v2 = vsub.f32 %v14321_v16, %v8546_v50  ;;  %v14324_v58 = vld [vmem:[#allocation73_spill] sm:$0xff] }
 0x4cb   :  { %v9921_v10 = vmul.f32 %v8706_v5, %v14316_v37  ;;  %v9927_v38 = vmul.f32 %v8706_v5, %v14319_v0  ;;  %v14327_v37 = vld [vmem:[#allocation75_spill] sm:$0xff]  ;;  %v14330_v0 = vld [vmem:[#allocation77_spill] sm:$0xff] }
 0x4cc   :  { %14314 = vst [vmem:[#allocation187_spill] sm:$0xff] %v9915_v60  ;;  %v9933_v39 = vmul.f32 %v8706_v5, %v14322_v2  ;;  %v14325_v60 = vsub.f32 %v14324_v58, %v8546_v50  ;;  %v14333_v2 = vld [vmem:[#allocation79_spill] sm:$0xff] }
 0x4cd   :  { %14317 = vst [vmem:[#allocation188_spill] sm:$0xff] %v9921_v10  ;;  %14320 = vst [vmem:[#allocation189_spill] sm:$0xff] %v9927_v38  ;;  %v14328_v10 = vsub.f32 %v14327_v37, %v8546_v50  ;;  %v14331_v38 = vsub.f32 %v14330_v0, %v8546_v50 }
 0x4ce   :  { %14323 = vst [vmem:[#allocation190_spill] sm:$0xff] %v9933_v39  ;;  %v9939_v12 = vmul.f32 %v8706_v5, %v14325_v60  ;;  %v14334_v39 = vsub.f32 %v14333_v2, %v8546_v50  ;;  %v14336_v60 = vld [vmem:[#allocation81_spill] sm:$0xff] }
 0x4cf   :  { %v9945_v52 = vmul.f32 %v8706_v5, %v14328_v10  ;;  %v9951_v16 = vmul.f32 %v8706_v5, %v14331_v38  ;;  %v14339_v10 = vld [vmem:[#allocation83_spill] sm:$0xff]  ;;  %v14342_v38 = vld [vmem:[#allocation85_spill] sm:$0xff] }
 0x4d0   :  { %14326 = vst [vmem:[#allocation191_spill] sm:$0xff] %v9939_v12  ;;  %v9957_v58 = vmul.f32 %v8706_v5, %v14334_v39  ;;  %v14337_v12 = vsub.f32 %v14336_v60, %v8546_v50  ;;  %v14345_v39 = vld [vmem:[#allocation87_spill] sm:$0xff] }
 0x4d1   :  { %14329 = vst [vmem:[#allocation192_spill] sm:$0xff] %v9945_v52  ;;  %14332 = vst [vmem:[#allocation193_spill] sm:$0xff] %v9951_v16  ;;  %v14340_v52 = vsub.f32 %v14339_v10, %v8546_v50  ;;  %v14343_v16 = vsub.f32 %v14342_v38, %v8546_v50 }
 0x4d2   :  { %14335 = vst [vmem:[#allocation195_spill] sm:$0xff] %v9957_v58  ;;  %v9963_v37 = vmul.f32 %v8706_v5, %v14337_v12  ;;  %v14346_v58 = vsub.f32 %v14345_v39, %v8546_v50  ;;  %v14348_v12 = vld [vmem:[#allocation89_spill] sm:$0xff] }
 0x4d3   :  { %v9969_v0 = vmul.f32 %v8706_v5, %v14340_v52  ;;  %v9975_v2 = vmul.f32 %v8706_v5, %v14343_v16  ;;  %v14351_v52 = vld [vmem:[#allocation91_spill] sm:$0xff]  ;;  %v14354_v16 = vld [vmem:[#allocation93_spill] sm:$0xff] }
 0x4d4   :  { %14338 = vst [vmem:[#allocation197_spill] sm:$0xff] %v9963_v37  ;;  %v9981_v60 = vmul.f32 %v8706_v5, %v14346_v58  ;;  %v14349_v37 = vsub.f32 %v14348_v12, %v8546_v50  ;;  %v14357_v58 = vld [vmem:[#allocation95_spill] sm:$0xff] }
 0x4d5   :  { %14341 = vst [vmem:[#allocation199_spill] sm:$0xff] %v9969_v0  ;;  %14344 = vst [vmem:[#allocation201_spill] sm:$0xff] %v9975_v2  ;;  %v14352_v0 = vsub.f32 %v14351_v52, %v8546_v50  ;;  %v14355_v2 = vsub.f32 %v14354_v16, %v8546_v50 }
 0x4d6   :  { %14347 = vst [vmem:[#allocation203_spill] sm:$0xff] %v9981_v60  ;;  %v9987_v10 = vmul.f32 %v8706_v5, %v14349_v37  ;;  %v14358_v60 = vsub.f32 %v14357_v58, %v8546_v50  ;;  %v14360_v37 = vld [vmem:[#allocation97_spill] sm:$0xff] }
 0x4d7   :  { %v9993_v38 = vmul.f32 %v8706_v5, %v14352_v0  ;;  %v9999_v39 = vmul.f32 %v8706_v5, %v14355_v2  ;;  %v14363_v0 = vld [vmem:[#allocation99_spill] sm:$0xff]  ;;  %v14366_v2 = vld [vmem:[#allocation101_spill] sm:$0xff] }
 0x4d8   :  { %14350 = vst [vmem:[#allocation205_spill] sm:$0xff] %v9987_v10  ;;  %v10005_v12 = vmul.f32 %v8706_v5, %v14358_v60  ;;  %v14361_v10 = vsub.f32 %v14360_v37, %v8546_v50  ;;  %v14369_v60 = vld [vmem:[#allocation103_spill] sm:$0xff] }
 0x4d9   :  { %14353 = vst [vmem:[#allocation207_spill] sm:$0xff] %v9993_v38  ;;  %14356 = vst [vmem:[#allocation209_spill] sm:$0xff] %v9999_v39  ;;  %v14364_v38 = vsub.f32 %v14363_v0, %v8546_v50  ;;  %v14367_v39 = vsub.f32 %v14366_v2, %v8546_v50 }
 0x4da   :  { %14359 = vst [vmem:[#allocation211_spill] sm:$0xff] %v10005_v12  ;;  %v10011_v52 = vmul.f32 %v8706_v5, %v14361_v10  ;;  %v14370_v12 = vsub.f32 %v14369_v60, %v8546_v50  ;;  %v14372_v10 = vld [vmem:[#allocation105_spill] sm:$0xff] }
 0x4db   :  { %v10017_v16 = vmul.f32 %v8706_v5, %v14364_v38  ;;  %v10023_v58 = vmul.f32 %v8706_v5, %v14367_v39  ;;  %v14375_v38 = vld [vmem:[#allocation107_spill] sm:$0xff]  ;;  %v14378_v39 = vld [vmem:[#allocation109_spill] sm:$0xff] }
 0x4dc   :  { %14362 = vst [vmem:[#allocation213_spill] sm:$0xff] %v10011_v52  ;;  %v10029_v37 = vmul.f32 %v8706_v5, %v14370_v12  ;;  %v14373_v52 = vsub.f32 %v14372_v10, %v8546_v50  ;;  %v14381_v12 = vld [vmem:[#allocation111_spill] sm:$0xff] }
 0x4dd   :  { %14365 = vst [vmem:[#allocation215_spill] sm:$0xff] %v10017_v16  ;;  %14368 = vst [vmem:[#allocation43_spill] sm:$0xff] %v10023_v58  ;;  %v14376_v16 = vsub.f32 %v14375_v38, %v8546_v50  ;;  %v14379_v58 = vsub.f32 %v14378_v39, %v8546_v50 }
 0x4de   :  { %14371 = vst [vmem:[#allocation45_spill] sm:$0xff] %v10029_v37  ;;  %v10035_v0 = vmul.f32 %v8706_v5, %v14373_v52  ;;  %v14382_v37 = vsub.f32 %v14381_v12, %v8546_v50  ;;  %v14384_v52 = vld [vmem:[#allocation113_spill] sm:$0xff] }
 0x4df   :  { %v10041_v2 = vmul.f32 %v8706_v5, %v14376_v16  ;;  %v10047_v60 = vmul.f32 %v8706_v5, %v14379_v58  ;;  %v14387_v16 = vld [vmem:[#allocation115_spill] sm:$0xff]  ;;  %v14390_v58 = vld [vmem:[#allocation117_spill] sm:$0xff] }
 0x4e0   :  { %14374 = vst [vmem:[#allocation47_spill] sm:$0xff] %v10035_v0  ;;  %v10053_v10 = vmul.f32 %v8706_v5, %v14382_v37  ;;  %v14385_v0 = vsub.f32 %v14384_v52, %v8546_v50  ;;  %v14393_v37 = vld [vmem:[#allocation119_spill] sm:$0xff] }
 0x4e1   :  { %14377 = vst [vmem:[#allocation49_spill] sm:$0xff] %v10041_v2  ;;  %14380 = vst [vmem:[#allocation51_spill] sm:$0xff] %v10047_v60  ;;  %v14388_v2 = vsub.f32 %v14387_v16, %v8546_v50  ;;  %v14391_v60 = vsub.f32 %v14390_v58, %v8546_v50 }
 0x4e2   :  { %14383 = vst [vmem:[#allocation53_spill] sm:$0xff] %v10053_v10  ;;  %v10059_v38 = vmul.f32 %v8706_v5, %v14385_v0  ;;  %v14394_v10 = vsub.f32 %v14393_v37, %v8546_v50  ;;  %v14396_v0 = vld [vmem:[#allocation121_spill] sm:$0xff] }
 0x4e3   :  { %v10065_v39 = vmul.f32 %v8706_v5, %v14388_v2  ;;  %v10071_v12 = vmul.f32 %v8706_v5, %v14391_v60  ;;  %v14399_v2 = vld [vmem:[#allocation123_spill] sm:$0xff]  ;;  %v14402_v60 = vld [vmem:[#allocation125_spill] sm:$0xff] }
 0x4e4   :  { %14386 = vst [vmem:[#allocation55_spill] sm:$0xff] %v10059_v38  ;;  %v10077_v52 = vmul.f32 %v8706_v5, %v14394_v10  ;;  %v14397_v38 = vsub.f32 %v14396_v0, %v8546_v50  ;;  %v14405_v10 = vld [vmem:[#allocation127_spill] sm:$0xff] }
 0x4e5   :  { %14389 = vst [vmem:[#allocation57_spill] sm:$0xff] %v10065_v39  ;;  %14392 = vst [vmem:[#allocation59_spill] sm:$0xff] %v10071_v12  ;;  %v14400_v39 = vsub.f32 %v14399_v2, %v8546_v50  ;;  %v14403_v12 = vsub.f32 %v14402_v60, %v8546_v50 }
 0x4e6   :  { %14395 = vst [vmem:[#allocation61_spill] sm:$0xff] %v10077_v52  ;;  %v10083_v16 = vmul.f32 %v8706_v5, %v14397_v38  ;;  %v14406_v52 = vsub.f32 %v14405_v10, %v8546_v50  ;;  %v14408_v38 = vld [vmem:[#allocation129_spill] sm:$0xff] }
 0x4e7   :  { %v10089_v58 = vmul.f32 %v8706_v5, %v14400_v39  ;;  %v10095_v37 = vmul.f32 %v8706_v5, %v14403_v12  ;;  %v14411_v39 = vld [vmem:[#allocation131_spill] sm:$0xff]  ;;  %v14414_v12 = vld [vmem:[#allocation133_spill] sm:$0xff] }
 0x4e8   :  { %14398 = vst [vmem:[#allocation63_spill] sm:$0xff] %v10083_v16  ;;  %v10101_v0 = vmul.f32 %v8706_v5, %v14406_v52  ;;  %v14409_v16 = vsub.f32 %v14408_v38, %v8546_v50  ;;  %v14417_v52 = vld [vmem:[#allocation135_spill] sm:$0xff] }
 0x4e9   :  { %14401 = vst [vmem:[#allocation65_spill] sm:$0xff] %v10089_v58  ;;  %14404 = vst [vmem:[#allocation67_spill] sm:$0xff] %v10095_v37  ;;  %v14412_v58 = vsub.f32 %v14411_v39, %v8546_v50  ;;  %v14415_v37 = vsub.f32 %v14414_v12, %v8546_v50 }
 0x4ea   :  { %14407 = vst [vmem:[#allocation69_spill] sm:$0xff] %v10101_v0  ;;  %v10107_v2 = vmul.f32 %v8706_v5, %v14409_v16  ;;  %v14418_v0 = vsub.f32 %v14417_v52, %v8546_v50  ;;  %v14420_v16 = vld [vmem:[#allocation137_spill] sm:$0xff] }
 0x4eb   :  { %v10113_v60 = vmul.f32 %v8706_v5, %v14412_v58  ;;  %v10119_v10 = vmul.f32 %v8706_v5, %v14415_v37  ;;  %v14423_v58 = vld [vmem:[#allocation139_spill] sm:$0xff]  ;;  %v14426_v37 = vld [vmem:[#allocation141_spill] sm:$0xff] }
 0x4ec   :  { %14410 = vst [vmem:[#allocation71_spill] sm:$0xff] %v10107_v2  ;;  %v10125_v38 = vmul.f32 %v8706_v5, %v14418_v0  ;;  %v14421_v2 = vsub.f32 %v14420_v16, %v8546_v50  ;;  %v14429_v0 = vld [vmem:[#allocation143_spill] sm:$0xff] }
 0x4ed   :  { %14413 = vst [vmem:[#allocation73_spill] sm:$0xff] %v10113_v60  ;;  %14416 = vst [vmem:[#allocation75_spill] sm:$0xff] %v10119_v10  ;;  %v14424_v60 = vsub.f32 %v14423_v58, %v8546_v50  ;;  %v14427_v10 = vsub.f32 %v14426_v37, %v8546_v50 }
 0x4ee   :  { %14419 = vst [vmem:[#allocation77_spill] sm:$0xff] %v10125_v38  ;;  %v10131_v39 = vmul.f32 %v8706_v5, %v14421_v2  ;;  %v14430_v38 = vsub.f32 %v14429_v0, %v8546_v50  ;;  %v14431_v2 = vld [vmem:[#allocation145_spill] sm:$0xff] }
 0x4ef   :  { %v10137_v12 = vmul.f32 %v8706_v5, %v14424_v60  ;;  %v10143_v52 = vmul.f32 %v8706_v5, %v14427_v10  ;;  %v14433_v60 = vld [vmem:[#allocation147_spill] sm:$0xff]  ;;  %v14435_v10 = vld [vmem:[#allocation149_spill] sm:$0xff] }
 0x4f0   :  { %14422 = vst [vmem:[#allocation79_spill] sm:$0xff] %v10131_v39  ;;  %v10149_v16 = vmul.f32 %v8706_v5, %v14430_v38  ;;  %v14432_v39 = vsub.f32 %v14431_v2, %v8546_v50  ;;  %v14437_v38 = vsub.f32 %v13873_v42, %v8546_v50 }
 0x4f1   :  { %14425 = vst [vmem:[#allocation81_spill] sm:$0xff] %v10137_v12  ;;  %14428 = vst [vmem:[#allocation83_spill] sm:$0xff] %v10143_v52  ;;  %v14434_v12 = vsub.f32 %v14433_v60, %v8546_v50  ;;  %v14436_v52 = vsub.f32 %v14435_v10, %v8546_v50 }
 0x4f2   :  { %v10155_v58 = vmul.f32 %v8706_v5, %v14432_v39  ;;  %v10173_v2 = vmul.f32 %v8706_v5, %v14437_v38  ;;  %v14438_v39 = vsub.f32 %v13874_v34, %v8546_v50  ;;  %v14441_v38 = vsub.f32 %v13877_v6, %v8546_v50 }
 0x4f3   :  { %v10161_v37 = vmul.f32 %v8706_v5, %v14434_v12  ;;  %v10167_v0 = vmul.f32 %v8706_v5, %v14436_v52  ;;  %v14439_v12 = vsub.f32 %v13875_v27, %v8546_v50  ;;  %v14440_v52 = vsub.f32 %v13876_v30, %v8546_v50 }
 0x4f4   :  { %v10179_v60 = vmul.f32 %v8706_v5, %v14438_v39  ;;  %v10197_v34 = vmul.f32 %v8706_v5, %v14441_v38  ;;  %v14442_v39 = vsub.f32 %v13878_v33, %v8546_v50  ;;  %v14445_v38 = vsub.f32 %v13668_v18, %v8546_v50 }
 0x4f5   :  { %v10185_v10 = vmul.f32 %v8706_v5, %v14439_v12  ;;  %v10191_v42 = vmul.f32 %v8706_v5, %v14440_v52  ;;  %v14443_v12 = vsub.f32 %v13879_v4, %v8546_v50  ;;  %v14444_v52 = vsub.f32 %v13667_v1, %v8546_v50 }
 0x4f6   :  { %v10203_v27 = vmul.f32 %v8706_v5, %v14442_v39  ;;  %v10221_v33 = vmul.f32 %v8706_v5, %v14445_v38  ;;  %v14446_v39 = vsub.f32 %v13669_v35, %v8546_v50  ;;  %v14449_v38 = vsub.f32 %v7792_v21, %v8546_v50 }
 0x4f7   :  { %v10209_v30 = vmul.f32 %v8706_v5, %v14443_v12  ;;  %v10215_v6 = vmul.f32 %v8706_v5, %v14444_v52  ;;  %v14447_v12 = vsub.f32 %v13670_v8, %v8546_v50  ;;  %v14448_v52 = vsub.f32 %v7782_v48, %v8546_v50 }
 0x4f8   :  { %v10227_v4 = vmul.f32 %v8706_v5, %v14446_v39  ;;  %v10245_v35 = vmul.f32 %v8706_v5, %v14449_v38  ;;  %v14450_v39 = vsub.f32 %v7802_v40, %v8546_v50  ;;  %v14453_v38 = vsub.f32 %v7832_v26, %v8546_v50 }
 0x4f9   :  { %v10233_v1 = vmul.f32 %v8706_v5, %v14447_v12  ;;  %v10239_v18 = vmul.f32 %v8706_v5, %v14448_v52  ;;  %v14451_v12 = vsub.f32 %v7812_v44, %v8546_v50  ;;  %v14452_v52 = vsub.f32 %v7822_v61, %v8546_v50 }
 0x4fa   :  { %v10251_v8 = vmul.f32 %v8706_v5, %v14450_v39  ;;  %v10269_v40 = vmul.f32 %v8706_v5, %v14453_v38  ;;  %v14454_v39 = vsub.f32 %v7842_v11, %v8546_v50  ;;  %v14457_v38 = vsub.f32 %v7872_v54, %v8546_v50 }
 0x4fb   :  { %v10257_v48 = vmul.f32 %v8706_v5, %v14451_v12  ;;  %v10263_v21 = vmul.f32 %v8706_v5, %v14452_v52  ;;  %v14455_v12 = vsub.f32 %v7852_v51, %v8546_v50  ;;  %v14456_v52 = vsub.f32 %v7862_v19, %v8546_v50 }
 0x4fc   :  { %v10275_v44 = vmul.f32 %v8706_v5, %v14454_v39  ;;  %v10293_v11 = vmul.f32 %v8706_v5, %v14457_v38  ;;  %v14458_v39 = vsub.f32 %v7882_v62, %v8546_v50  ;;  %v14461_v38 = vsub.f32 %v7912_v53, %v8546_v50 }
 0x4fd   :  { %v10281_v61 = vmul.f32 %v8706_v5, %v14455_v12  ;;  %v10287_v26 = vmul.f32 %v8706_v5, %v14456_v52  ;;  %v14459_v12 = vsub.f32 %v7892_v43, %v8546_v50  ;;  %v14460_v52 = vsub.f32 %v7902_v45, %v8546_v50 }
 0x4fe   :  { %v10299_v51 = vmul.f32 %v8706_v5, %v14458_v39  ;;  %v10317_v62 = vmul.f32 %v8706_v5, %v14461_v38  ;;  %v14462_v39 = vsub.f32 %v7922_v14, %v8546_v50  ;;  %v14465_v38 = vsub.f32 %v7952_v31, %v8546_v50 }
 0x4ff   :  { %v10305_v19 = vmul.f32 %v8706_v5, %v14459_v12  ;;  %v10311_v54 = vmul.f32 %v8706_v5, %v14460_v52  ;;  %v14463_v12 = vsub.f32 %v7932_v28, %v8546_v50  ;;  %v14464_v52 = vsub.f32 %v7942_v24, %v8546_v50 }
 0x500   :  { %v10323_v43 = vmul.f32 %v8706_v5, %v14462_v39  ;;  %v10341_v14 = vmul.f32 %v8706_v5, %v14465_v38  ;;  %v14467_v39 = vsub.f32 %v7962_v57, %v8546_v50  ;;  %v14473_v38 = vld [vmem:[#allocation194_spill] sm:$0xff] }
 0x501   :  { %v10329_v45 = vmul.f32 %v8706_v5, %v14463_v12  ;;  %v10335_v53 = vmul.f32 %v8706_v5, %v14464_v52  ;;  %v14469_v12 = vsub.f32 %v7972_v49, %v8546_v50  ;;  %v14471_v52 = vsub.f32 %v7982_v55, %v8546_v50 }
 0x502   :  { %14466 = vst [vmem:[#allocation85_spill] sm:$0xff] %v10341_v14  ;;  %v10347_v28 = vmul.f32 %v8706_v5, %v14467_v39  ;;  %v14474_v14 = vsub.f32 %v14473_v38, %v8546_v50  ;;  %v14476_v39 = vld [vmem:[#allocation196_spill] sm:$0xff] }
 0x503   :  { %v10353_v24 = vmul.f32 %v8706_v5, %v14469_v12  ;;  %v10359_v31 = vmul.f32 %v8706_v5, %v14471_v52  ;;  %v14479_v12 = vld [vmem:[#allocation198_spill] sm:$0xff]  ;;  %v14482_v52 = vld [vmem:[#allocation200_spill] sm:$0xff] }
 0x504   :  { %14468 = vst [vmem:[#allocation87_spill] sm:$0xff] %v10347_v28  ;;  %v10365_v57 = vmul.f32 %v8706_v5, %v14474_v14  ;;  %v14477_v28 = vsub.f32 %v14476_v39, %v8546_v50  ;;  %v14485_v14 = vld [vmem:[#allocation202_spill] sm:$0xff] }
 0x505   :  { %14470 = vst [vmem:[#allocation89_spill] sm:$0xff] %v10353_v24  ;;  %14472 = vst [vmem:[#allocation91_spill] sm:$0xff] %v10359_v31  ;;  %v14480_v24 = vsub.f32 %v14479_v12, %v8546_v50  ;;  %v14483_v31 = vsub.f32 %v14482_v52, %v8546_v50 }
 0x506   :  { %14475 = vst [vmem:[#allocation93_spill] sm:$0xff] %v10365_v57  ;;  %v10371_v49 = vmul.f32 %v8706_v5, %v14477_v28  ;;  %v14486_v57 = vsub.f32 %v14485_v14, %v8546_v50  ;;  %v14488_v28 = vld [vmem:[#allocation204_spill] sm:$0xff] }
 0x507   :  { %v10377_v55 = vmul.f32 %v8706_v5, %v14480_v24  ;;  %v10383_v38 = vmul.f32 %v8706_v5, %v14483_v31  ;;  %v14491_v24 = vld [vmem:[#allocation206_spill] sm:$0xff]  ;;  %v14494_v31 = vld [vmem:[#allocation208_spill] sm:$0xff] }
 0x508   :  { %14478 = vst [vmem:[#allocation95_spill] sm:$0xff] %v10371_v49  ;;  %v10389_v39 = vmul.f32 %v8706_v5, %v14486_v57  ;;  %v14489_v49 = vsub.f32 %v14488_v28, %v8546_v50  ;;  %v14497_v57 = vld [vmem:[#allocation210_spill] sm:$0xff] }
 0x509   :  { %14481 = vst [vmem:[#allocation97_spill] sm:$0xff] %v10377_v55  ;;  %14484 = vst [vmem:[#allocation99_spill] sm:$0xff] %v10383_v38  ;;  %v14492_v55 = vsub.f32 %v14491_v24, %v8546_v50  ;;  %v14495_v38 = vsub.f32 %v14494_v31, %v8546_v50 }
 0x50a   :  { %14487 = vst [vmem:[#allocation101_spill] sm:$0xff] %v10389_v39  ;;  %v10395_v12 = vmul.f32 %v8706_v5, %v14489_v49  ;;  %v14498_v39 = vsub.f32 %v14497_v57, %v8546_v50  ;;  %v14500_v49 = vld [vmem:[#allocation212_spill] sm:$0xff] }
 0x50b   :  { %v10401_v52 = vmul.f32 %v8706_v5, %v14492_v55  ;;  %v10407_v14 = vmul.f32 %v8706_v5, %v14495_v38  ;;  %v14503_v55 = vld [vmem:[#allocation214_spill] sm:$0xff]  ;;  %v14506_v38 = vld [vmem:[#allocation216_spill] sm:$0xff] }
 0x50c   :  { %14490 = vst [vmem:[#allocation103_spill] sm:$0xff] %v10395_v12  ;;  %v10413_v28 = vmul.f32 %v8706_v5, %v14498_v39  ;;  %v14501_v12 = vsub.f32 %v14500_v49, %v8546_v50  ;;  %v14509_v39 = vld [vmem:[#allocation217_spill] sm:$0xff] }
 0x50d   :  { %14493 = vst [vmem:[#allocation105_spill] sm:$0xff] %v10401_v52  ;;  %14496 = vst [vmem:[#allocation107_spill] sm:$0xff] %v10407_v14  ;;  %v14504_v52 = vsub.f32 %v14503_v55, %v8546_v50  ;;  %v14507_v14 = vsub.f32 %v14506_v38, %v8546_v50 }
 0x50e   :  { %14499 = vst [vmem:[#allocation109_spill] sm:$0xff] %v10413_v28  ;;  %v10419_v24 = vmul.f32 %v8706_v5, %v14501_v12  ;;  %v14510_v28 = vsub.f32 %v14509_v39, %v8546_v50  ;;  %v14511_v12 = vld [vmem:[#allocation218_spill] sm:$0xff] }
 0x50f   :  { %v10425_v31 = vmul.f32 %v8706_v5, %v14504_v52  ;;  %v10431_v57 = vmul.f32 %v8706_v5, %v14507_v14  ;;  %v14513_v52 = vld [vmem:[#allocation219_spill] sm:$0xff]  ;;  %v14515_v14 = vld [vmem:[#allocation220_spill] sm:$0xff] }
 0x510   :  { %14502 = vst [vmem:[#allocation111_spill] sm:$0xff] %v10419_v24  ;;  %v10437_v49 = vmul.f32 %v8706_v5, %v14510_v28  ;;  %v14512_v24 = vsub.f32 %v14511_v12, %v8546_v50  ;;  %v14517_v28 = vsub.f32 %v13889_v47, %v8546_v50 }
 0x511   :  { %14505 = vst [vmem:[#allocation113_spill] sm:$0xff] %v10425_v31  ;;  %14508 = vst [vmem:[#allocation115_spill] sm:$0xff] %v10431_v57  ;;  %v14514_v31 = vsub.f32 %v14513_v52, %v8546_v50  ;;  %v14516_v57 = vsub.f32 %v14515_v14, %v8546_v50 }
 0x512   :  { %v10443_v55 = vmul.f32 %v8706_v5, %v14512_v24  ;;  %v10461_v12 = vmul.f32 %v8706_v5, %v14517_v28  ;;  %v14518_v24 = vsub.f32 %v13890_v15, %v8546_v50  ;;  %v14521_v28 = vsub.f32 %v13893_v25, %v8546_v50 }
 0x513   :  { %v10449_v38 = vmul.f32 %v8706_v5, %v14514_v31  ;;  %v10455_v39 = vmul.f32 %v8706_v5, %v14516_v57  ;;  %v14519_v31 = vsub.f32 %v13891_v56, %v8546_v50  ;;  %v14520_v57 = vsub.f32 %v13892_v3, %v8546_v50 }
 0x514   :  { %v10467_v52 = vmul.f32 %v8706_v5, %v14518_v24  ;;  %v10485_v15 = vmul.f32 %v8706_v5, %v14521_v28  ;;  %v14522_v24 = vsub.f32 %v13894_v59, %v8546_v50  ;;  %v14526_v28 = vsub.f32 %v13686_v63, %v8546_v50 }
 0x515   :  { %v10473_v14 = vmul.f32 %v8706_v5, %v14519_v31  ;;  %v10479_v47 = vmul.f32 %v8706_v5, %v14520_v57  ;;  %v14523_v31 = vsub.f32 %v13895_v23, %v8546_v50  ;;  %v14524_v57 = vsub.f32 %v13685_v22, %v8546_v50 }
 0x516   :  { %v10491_v56 = vmul.f32 %v8706_v5, %v14522_v24  ;;  %v10509_v59 = vmul.f32 %v8706_v5, %v14526_v28  ;;  %v14528_v24 = vsub.f32 %v13687_v13, %v8546_v50  ;;  %v14535_v28 = vld [vmem:[#allocation233_spill] sm:$0xff] }
 0x517   :  { %v10497_v3 = vmul.f32 %v8706_v5, %v14523_v31  ;;  %v10503_v25 = vmul.f32 %v8706_v5, %v14524_v57  ;;  %v14530_v31 = vsub.f32 %v13688_v36, %v8546_v50  ;;  %v14532_v57 = vld [vmem:[#allocation232_spill] sm:$0xff] }
 0x518   :  { %14527 = vst [vmem:[#allocation119_spill] sm:$0xff] %v10509_v59  ;;  %v10515_v23 = vmul.f32 %v8706_v5, %v14528_v24  ;;  %v14536_v59 = vsub.f32 %v14535_v28, %v8546_v50  ;;  %v14538_v24 = vld [vmem:[#allocation234_spill] sm:$0xff] }
 0x519   :  { %14525 = vst [vmem:[#allocation117_spill] sm:$0xff] %v10503_v25  ;;  %v10521_v22 = vmul.f32 %v8706_v5, %v14530_v31  ;;  %v14533_v25 = vsub.f32 %v14532_v57, %v8546_v50  ;;  %v14541_v31 = vld [vmem:[#allocation235_spill] sm:$0xff] }
 0x51a   :  { %14529 = vst [vmem:[#allocation121_spill] sm:$0xff] %v10515_v23  ;;  %v10533_v13 = vmul.f32 %v8706_v5, %v14536_v59  ;;  %v14539_v23 = vsub.f32 %v14538_v24, %v8546_v50  ;;  %v14545_v59 = vld [vmem:[#allocation237_spill] sm:$0xff] }
 0x51b   :  { %14531 = vst [vmem:[#allocation123_spill] sm:$0xff] %v10521_v22  ;;  %v10527_v63 = vmul.f32 %v8706_v5, %v14533_v25  ;;  %v14542_v22 = vsub.f32 %v14541_v31, %v8546_v50  ;;  %v14543_v25 = vld [vmem:[#allocation236_spill] sm:$0xff] }
 0x51c   :  { %14537 = vst [vmem:[#allocation127_spill] sm:$0xff] %v10533_v13  ;;  %v10539_v36 = vmul.f32 %v8706_v5, %v14539_v23  ;;  %v14546_v13 = vsub.f32 %v14545_v59, %v8546_v50  ;;  %v14547_v23 = vld [vmem:[#allocation238_spill] sm:$0xff] }
 0x51d   :  { %14534 = vst [vmem:[#allocation125_spill] sm:$0xff] %v10527_v63  ;;  %v10545_v57 = vmul.f32 %v8706_v5, %v14542_v22  ;;  %v14544_v63 = vsub.f32 %v14543_v25, %v8546_v50  ;;  %v14550_v22 = vsub.f32 %v13896_v20, %v8546_v50 }
 0x51e   :  { %14540 = vst [vmem:[#allocation129_spill] sm:$0xff] %v10539_v36  ;;  %v10557_v24 = vmul.f32 %v8706_v5, %v14546_v13  ;;  %v14548_v36 = vsub.f32 %v14547_v23, %v8546_v50  ;;  %v14553_v13 = vsub.f32 %v13898_v32, %v8546_v50 }
 0x51f   :  { %v10551_v28 = vmul.f32 %v8706_v5, %v14544_v63  ;;  %v10569_v25 = vmul.f32 %v8706_v5, %v14550_v22  ;;  %v14551_v63 = vsub.f32 %v13897_v46, %v8546_v50  ;;  %v14558_v22 = vsub.f32 %v13900_v9, %v8546_v50  ;;  %v14566_v9 = vld [vmem:[#allocation169_spill] sm:$0xff] }
 0x520   :  { %v10563_v31 = vmul.f32 %v8706_v5, %v14548_v36  ;;  %v10581_v23 = vmul.f32 %v8706_v5, %v14553_v13  ;;  %v14555_v36 = vld [vmem:[#allocation242_spill] sm:$0xff]  ;;  %v14563_v13 = vsub.f32 %v13902_v7, %v8546_v50 }
 0x521   :  { %v10575_v59 = vmul.f32 %v8706_v5, %v14551_v63  ;;  %v10593_v46 = vmul.f32 %v8706_v5, %v14558_v22  ;;  %v14560_v63 = vld [vmem:[#allocation244_spill] sm:$0xff]  ;;  %v14574_v7 = vld [vmem:[#allocation230_spill] sm:$0xff] }
 0x522   :  { %14549 = vst [vmem:[#allocation131_spill] sm:$0xff] %v10563_v31  ;;  %14554 = vst [vmem:[#allocation135_spill] sm:$0xff] %v10581_v23  ;;  %v14556_v31 = vsub.f32 %v14555_v36, %v8546_v50  ;;  %v10605_v36 = vmul.f32 %v8706_v5, %v14563_v13 }
 0x523   :  { %14552 = vst [vmem:[#allocation133_spill] sm:$0xff] %v10575_v59  ;;  %14559 = vst [vmem:[#allocation139_spill] sm:$0xff] %v10593_v46  ;;  %v14561_v59 = vsub.f32 %v14560_v63, %v8546_v50  ;;  %v14568_v46 = vld [vmem:[#allocation171_spill] sm:$0xff]  ;;  %v14572_v50 = vld [vmem:[#allocation229_spill] sm:$0xff] }
 0x524   :  { %v10587_v20 = vmul.f32 %v8706_v5, %v14556_v31  ;;  %v14564_v31 = vld [vmem:[#allocation167_spill] sm:$0xff] }
 0x525   :  { %v10599_v32 = vmul.f32 %v8706_v5, %v14561_v59  ;;  %v14570_v59 = vld [vmem:[#allocation228_spill] sm:$0xff] }
 0x526   :  { %14557 = vst [vmem:[#allocation137_spill] sm:$0xff] %v10587_v20  ;;  %v14565_v20 = vld [vmem:[#allocation165_spill] sm:$0xff] }
 0x527   :  { %14562 = vst [vmem:[#allocation141_spill] sm:$0xff] %v10599_v32  ;;  %v10609_v23 = vmul.f32 %v14565_v20, %v14564_v31  ;;  %v10613_v22 = vmul.f32 %v14565_v20, %v14566_v9  ;;  %v10617_v63 = vmul.f32 %v14565_v20, %v14568_v46  ;;  %v10621_v32 = vmul.f32 %v14565_v20, %v14570_v59  ;;  %v14576_v31 = vld [vmem:[#allocation231_spill] sm:$0xff] }
 0x528   :  { %v10625_v5 = vmul.f32 %v14565_v20, %v14572_v50  ;;  %v10629_v13 = vmul.f32 %v14565_v20, %v14574_v7  ;;  %v10633_v9 = vmul.f32 %v14565_v20, %v14576_v31 }
 0x529   :  { %14567 = vst [vmem:[#allocation143_spill] sm:$0xff] %v10613_v22  ;;  %14569 = vst [vmem:[#allocation145_spill] sm:$0xff] %v10617_v63  ;;  %v14578_v22 = vld [vmem:[#allocation12_spill] sm:$0xff]  ;;  %v14580_v63 = vld [vmem:[#allocation13_spill] sm:$0xff] }
 0x52a   :  { %14571 = vst [vmem:[#allocation147_spill] sm:$0xff] %v10621_v32  ;;  %14573 = vst [vmem:[#allocation149_spill] sm:$0xff] %v10625_v5  ;;  %v10637_v46 = vmul.f32 %v14565_v20, %v14578_v22  ;;  %v10641_v59 = vmul.f32 %v14565_v20, %v14580_v63  ;;  %v14582_v32 = vld [vmem:[#allocation170_spill] sm:$0xff] }
 0x52b   :  { %14575 = vst [vmem:[#allocation194_spill] sm:$0xff] %v10629_v13  ;;  %14577 = vst [vmem:[#allocation196_spill] sm:$0xff] %v10633_v9  ;;  %v10645_v50 = vmul.f32 %v14565_v20, %v14582_v32  ;;  %v14584_v5 = vld [vmem:[#allocation178_spill] sm:$0xff]  ;;  %v14586_v13 = vld [vmem:[#allocation185_spill] sm:$0xff] }
 0x52c   :  { %14579 = vst [vmem:[#allocation198_spill] sm:$0xff] %v10637_v46  ;;  %14581 = vst [vmem:[#allocation200_spill] sm:$0xff] %v10641_v59  ;;  %v10649_v7 = vmul.f32 %v14565_v20, %v14584_v5  ;;  %v10653_v31 = vmul.f32 %v14565_v20, %v14586_v13  ;;  %v14588_v9 = vld [vmem:[#allocation151_spill] sm:$0xff]  ;;  %v14590_v46 = vld [vmem:[#allocation153_spill] sm:$0xff] }
 0x52d   :  { %14583 = vst [vmem:[#allocation202_spill] sm:$0xff] %v10645_v50  ;;  %v10657_v22 = vmul.f32 %v14565_v20, %v14588_v9  ;;  %v10661_v63 = vmul.f32 %v14565_v20, %v14590_v46  ;;  %v14592_v59 = vld [vmem:[#allocation155_spill] sm:$0xff]  ;;  %v14594_v50 = vld [vmem:[#allocation157_spill] sm:$0xff] }
 0x52e   :  { %14585 = vst [vmem:[#allocation204_spill] sm:$0xff] %v10649_v7  ;;  %14587 = vst [vmem:[#allocation206_spill] sm:$0xff] %v10653_v31  ;;  %v10665_v32 = vmul.f32 %v14565_v20, %v14592_v59  ;;  %v10669_v5 = vmul.f32 %v14565_v20, %v14594_v50  ;;  %v14596_v7 = vld [vmem:[#allocation159_spill] sm:$0xff]  ;;  %v14598_v31 = vld [vmem:[#allocation161_spill] sm:$0xff] }
 0x52f   :  { %14589 = vst [vmem:[#allocation208_spill] sm:$0xff] %v10657_v22  ;;  %14591 = vst [vmem:[#allocation210_spill] sm:$0xff] %v10661_v63  ;;  %v10673_v13 = vmul.f32 %v14565_v20, %v14596_v7  ;;  %v10677_v9 = vmul.f32 %v14565_v20, %v14598_v31  ;;  %v14600_v22 = vld [vmem:[#allocation163_spill] sm:$0xff]  ;;  %v14602_v63 = vld [vmem:[#allocation221_spill] sm:$0xff] }
 0x530   :  { %14593 = vst [vmem:[#allocation212_spill] sm:$0xff] %v10665_v32  ;;  %14595 = vst [vmem:[#allocation214_spill] sm:$0xff] %v10669_v5  ;;  %v10681_v46 = vmul.f32 %v14565_v20, %v14600_v22  ;;  %v10685_v59 = vmul.f32 %v14565_v20, %v14602_v63  ;;  %v14604_v32 = vld [vmem:[#allocation222_spill] sm:$0xff]  ;;  %v14606_v5 = vld [vmem:[#allocation223_spill] sm:$0xff] }
 0x531   :  { %14597 = vst [vmem:[#allocation216_spill] sm:$0xff] %v10673_v13  ;;  %14599 = vst [vmem:[#allocation217_spill] sm:$0xff] %v10677_v9  ;;  %v10689_v50 = vmul.f32 %v14565_v20, %v14604_v32  ;;  %v10693_v7 = vmul.f32 %v14565_v20, %v14606_v5  ;;  %v14608_v13 = vld [vmem:[#allocation224_spill] sm:$0xff]  ;;  %v14610_v9 = vld [vmem:[#allocation225_spill] sm:$0xff] }
 0x532   :  { %14601 = vst [vmem:[#allocation218_spill] sm:$0xff] %v10681_v46  ;;  %14603 = vst [vmem:[#allocation219_spill] sm:$0xff] %v10685_v59  ;;  %v10697_v31 = vmul.f32 %v14565_v20, %v14608_v13  ;;  %v10701_v22 = vmul.f32 %v14565_v20, %v14610_v9  ;;  %v14612_v46 = vld [vmem:[#allocation226_spill] sm:$0xff]  ;;  %v14614_v59 = vld [vmem:[#allocation227_spill] sm:$0xff] }
 0x533   :  { %14605 = vst [vmem:[#allocation220_spill] sm:$0xff] %v10689_v50  ;;  %14607 = vst [vmem:[#allocation232_spill] sm:$0xff] %v10693_v7  ;;  %v10705_v63 = vmul.f32 %v14565_v20, %v14612_v46  ;;  %v10709_v32 = vmul.f32 %v14565_v20, %v14614_v59  ;;  %v14616_v50 = vld [vmem:[#allocation239_spill] sm:$0xff]  ;;  %v14618_v7 = vld [vmem:[#allocation240_spill] sm:$0xff] }
 0x534   :  { %14609 = vst [vmem:[#allocation233_spill] sm:$0xff] %v10697_v31  ;;  %14611 = vst [vmem:[#allocation234_spill] sm:$0xff] %v10701_v22  ;;  %v10713_v5 = vmul.f32 %v14565_v20, %v14616_v50  ;;  %v10717_v13 = vmul.f32 %v14565_v20, %v14618_v7  ;;  %v14620_v31 = vld [vmem:[#allocation241_spill] sm:$0xff]  ;;  %v14622_v22 = vld [vmem:[#allocation243_spill] sm:$0xff] }
 0x535   :  { %14613 = vst [vmem:[#allocation235_spill] sm:$0xff] %v10705_v63  ;;  %14615 = vst [vmem:[#allocation236_spill] sm:$0xff] %v10709_v32  ;;  %v10721_v9 = vmul.f32 %v14565_v20, %v14620_v31  ;;  %v10725_v46 = vmul.f32 %v14565_v20, %v14622_v22  ;;  %v14624_v63 = vld [vmem:[#allocation245_spill] sm:$0xff]  ;;  %v14626_v32 = vld [vmem:[#allocation14_spill] sm:$0xff] }
 0x536   :  { %14617 = vst [vmem:[#allocation237_spill] sm:$0xff] %v10713_v5  ;;  %14619 = vst [vmem:[#allocation238_spill] sm:$0xff] %v10717_v13  ;;  %v10729_v59 = vmul.f32 %v14565_v20, %v14624_v63  ;;  %v10733_v50 = vmul.f32 %v14565_v20, %v14626_v32  ;;  %v14628_v5 = vld [vmem:[#allocation15_spill] sm:$0xff]  ;;  %v14630_v13 = vld [vmem:[#allocation16_spill] sm:$0xff] }
 0x537   :  { %14621 = vst [vmem:[#allocation242_spill] sm:$0xff] %v10721_v9  ;;  %14623 = vst [vmem:[#allocation244_spill] sm:$0xff] %v10725_v46  ;;  %v10737_v7 = vmul.f32 %v14565_v20, %v14628_v5  ;;  %v10741_v31 = vmul.f32 %v14565_v20, %v14630_v13  ;;  %v14632_v9 = vld [vmem:[#allocation17_spill] sm:$0xff]  ;;  %v14634_v46 = vld [vmem:[#allocation18_spill] sm:$0xff] }
 0x538   :  { %14625 = vst [vmem:[#allocation167_spill] sm:$0xff] %v10729_v59  ;;  %14627 = vst [vmem:[#allocation165_spill] sm:$0xff] %v10733_v50  ;;  %v10745_v22 = vmul.f32 %v14565_v20, %v14632_v9  ;;  %v10749_v63 = vmul.f32 %v14565_v20, %v14634_v46  ;;  %v14636_v59 = vld [vmem:[#allocation19_spill] sm:$0xff]  ;;  %v14638_v50 = vld [vmem:[#allocation20_spill] sm:$0xff] }
 0x539   :  { %14629 = vst [vmem:[#allocation169_spill] sm:$0xff] %v10737_v7  ;;  %14631 = vst [vmem:[#allocation171_spill] sm:$0xff] %v10741_v31  ;;  %v10753_v32 = vmul.f32 %v14565_v20, %v14636_v59  ;;  %v10757_v5 = vmul.f32 %v14565_v20, %v14638_v50  ;;  %v14640_v7 = vld [vmem:[#allocation21_spill] sm:$0xff]  ;;  %v14642_v31 = vld [vmem:[#allocation22_spill] sm:$0xff] }
 0x53a   :  { %14633 = vst [vmem:[#allocation228_spill] sm:$0xff] %v10745_v22  ;;  %14635 = vst [vmem:[#allocation229_spill] sm:$0xff] %v10749_v63  ;;  %v10761_v13 = vmul.f32 %v14565_v20, %v14640_v7  ;;  %v10765_v9 = vmul.f32 %v14565_v20, %v14642_v31  ;;  %v14644_v22 = vld [vmem:[#allocation23_spill] sm:$0xff]  ;;  %v14646_v63 = vld [vmem:[#allocation24_spill] sm:$0xff] }
 0x53b   :  { %14637 = vst [vmem:[#allocation230_spill] sm:$0xff] %v10753_v32  ;;  %14639 = vst [vmem:[#allocation231_spill] sm:$0xff] %v10757_v5  ;;  %v10769_v46 = vmul.f32 %v14565_v20, %v14644_v22  ;;  %v10773_v59 = vmul.f32 %v14565_v20, %v14646_v63  ;;  %v14648_v32 = vld [vmem:[#allocation25_spill] sm:$0xff]  ;;  %v14650_v5 = vld [vmem:[#allocation26_spill] sm:$0xff] }
 0x53c   :  { %14641 = vst [vmem:[#allocation12_spill] sm:$0xff] %v10761_v13  ;;  %14643 = vst [vmem:[#allocation13_spill] sm:$0xff] %v10765_v9  ;;  %v10777_v50 = vmul.f32 %v14565_v20, %v14648_v32  ;;  %v10781_v7 = vmul.f32 %v14565_v20, %v14650_v5  ;;  %v14652_v13 = vld [vmem:[#allocation27_spill] sm:$0xff]  ;;  %v14654_v9 = vld [vmem:[#allocation28_spill] sm:$0xff] }
 0x53d   :  { %14645 = vst [vmem:[#allocation170_spill] sm:$0xff] %v10769_v46  ;;  %14647 = vst [vmem:[#allocation178_spill] sm:$0xff] %v10773_v59  ;;  %v10785_v31 = vmul.f32 %v14565_v20, %v14652_v13  ;;  %v10789_v22 = vmul.f32 %v14565_v20, %v14654_v9  ;;  %v14656_v46 = vld [vmem:[#allocation29_spill] sm:$0xff]  ;;  %v14658_v59 = vld [vmem:[#allocation30_spill] sm:$0xff] }
 0x53e   :  { %14649 = vst [vmem:[#allocation185_spill] sm:$0xff] %v10777_v50  ;;  %14651 = vst [vmem:[#allocation151_spill] sm:$0xff] %v10781_v7  ;;  %v10793_v63 = vmul.f32 %v14565_v20, %v14656_v46  ;;  %v10797_v32 = vmul.f32 %v14565_v20, %v14658_v59  ;;  %v14660_v50 = vld [vmem:[#allocation31_spill] sm:$0xff]  ;;  %v14662_v7 = vld [vmem:[#allocation32_spill] sm:$0xff] }
 0x53f   :  { %14653 = vst [vmem:[#allocation153_spill] sm:$0xff] %v10785_v31  ;;  %14655 = vst [vmem:[#allocation155_spill] sm:$0xff] %v10789_v22  ;;  %v10801_v5 = vmul.f32 %v14565_v20, %v14660_v50  ;;  %v10805_v13 = vmul.f32 %v14565_v20, %v14662_v7  ;;  %v14664_v31 = vld [vmem:[#allocation33_spill] sm:$0xff]  ;;  %v14666_v22 = vld [vmem:[#allocation34_spill] sm:$0xff] }
 0x540   :  { %14657 = vst [vmem:[#allocation157_spill] sm:$0xff] %v10793_v63  ;;  %14659 = vst [vmem:[#allocation159_spill] sm:$0xff] %v10797_v32  ;;  %v10809_v9 = vmul.f32 %v14565_v20, %v14664_v31  ;;  %v10813_v46 = vmul.f32 %v14565_v20, %v14666_v22  ;;  %v14668_v63 = vld [vmem:[#allocation35_spill] sm:$0xff]  ;;  %v14670_v32 = vld [vmem:[#allocation36_spill] sm:$0xff] }
 0x541   :  { %14661 = vst [vmem:[#allocation161_spill] sm:$0xff] %v10801_v5  ;;  %14663 = vst [vmem:[#allocation163_spill] sm:$0xff] %v10805_v13  ;;  %v10817_v59 = vmul.f32 %v14565_v20, %v14668_v63  ;;  %v10821_v50 = vmul.f32 %v14565_v20, %v14670_v32  ;;  %v14672_v5 = vld [vmem:[#allocation37_spill] sm:$0xff]  ;;  %v14674_v13 = vld [vmem:[#allocation38_spill] sm:$0xff] }
 0x542   :  { %14665 = vst [vmem:[#allocation221_spill] sm:$0xff] %v10809_v9  ;;  %14667 = vst [vmem:[#allocation222_spill] sm:$0xff] %v10813_v46  ;;  %v10825_v7 = vmul.f32 %v14565_v20, %v14672_v5  ;;  %v10829_v31 = vmul.f32 %v14565_v20, %v14674_v13  ;;  %v14676_v9 = vld [vmem:[#allocation39_spill] sm:$0xff]  ;;  %v14678_v46 = vld [vmem:[#allocation40_spill] sm:$0xff] }
 0x543   :  { %14669 = vst [vmem:[#allocation223_spill] sm:$0xff] %v10817_v59  ;;  %14671 = vst [vmem:[#allocation224_spill] sm:$0xff] %v10821_v50  ;;  %v10833_v22 = vmul.f32 %v14565_v20, %v14676_v9  ;;  %v10837_v63 = vmul.f32 %v14565_v20, %v14678_v46  ;;  %v14680_v59 = vld [vmem:[#allocation41_spill] sm:$0xff]  ;;  %v14682_v50 = vld [vmem:[#allocation42_spill] sm:$0xff] }
 0x544   :  { %14673 = vst [vmem:[#allocation225_spill] sm:$0xff] %v10825_v7  ;;  %14675 = vst [vmem:[#allocation226_spill] sm:$0xff] %v10829_v31  ;;  %v10841_v32 = vmul.f32 %v14565_v20, %v14680_v59  ;;  %v10845_v5 = vmul.f32 %v14565_v20, %v14682_v50  ;;  %v14684_v7 = vld [vmem:[#allocation44_spill] sm:$0xff]  ;;  %v14686_v31 = vld [vmem:[#allocation46_spill] sm:$0xff] }
 0x545   :  { %14677 = vst [vmem:[#allocation227_spill] sm:$0xff] %v10833_v22  ;;  %14679 = vst [vmem:[#allocation239_spill] sm:$0xff] %v10837_v63  ;;  %v10849_v13 = vmul.f32 %v14565_v20, %v14684_v7  ;;  %v10853_v9 = vmul.f32 %v14565_v20, %v14686_v31  ;;  %v14688_v22 = vld [vmem:[#allocation48_spill] sm:$0xff]  ;;  %v14690_v63 = vld [vmem:[#allocation50_spill] sm:$0xff] }
 0x546   :  { %14681 = vst [vmem:[#allocation240_spill] sm:$0xff] %v10841_v32  ;;  %14683 = vst [vmem:[#allocation241_spill] sm:$0xff] %v10845_v5  ;;  %v10857_v46 = vmul.f32 %v14565_v20, %v14688_v22  ;;  %v10861_v59 = vmul.f32 %v14565_v20, %v14690_v63  ;;  %v14692_v32 = vld [vmem:[#allocation52_spill] sm:$0xff]  ;;  %v14694_v5 = vld [vmem:[#allocation54_spill] sm:$0xff] }
 0x547   :  { %14685 = vst [vmem:[#allocation243_spill] sm:$0xff] %v10849_v13  ;;  %14687 = vst [vmem:[#allocation245_spill] sm:$0xff] %v10853_v9  ;;  %v10865_v50 = vmul.f32 %v14565_v20, %v14692_v32  ;;  %v10869_v7 = vmul.f32 %v14565_v20, %v14694_v5  ;;  %v14696_v13 = vld [vmem:[#allocation56_spill] sm:$0xff]  ;;  %v14698_v9 = vld [vmem:[#allocation58_spill] sm:$0xff] }
 0x548   :  { %14689 = vst [vmem:[#allocation14_spill] sm:$0xff] %v10857_v46  ;;  %14691 = vst [vmem:[#allocation15_spill] sm:$0xff] %v10861_v59  ;;  %v10873_v31 = vmul.f32 %v14565_v20, %v14696_v13  ;;  %v10877_v22 = vmul.f32 %v14565_v20, %v14698_v9  ;;  %v14700_v46 = vld [vmem:[#allocation60_spill] sm:$0xff]  ;;  %v14702_v59 = vld [vmem:[#allocation62_spill] sm:$0xff] }
 0x549   :  { %14693 = vst [vmem:[#allocation16_spill] sm:$0xff] %v10865_v50  ;;  %14695 = vst [vmem:[#allocation17_spill] sm:$0xff] %v10869_v7  ;;  %v10881_v63 = vmul.f32 %v14565_v20, %v14700_v46  ;;  %v10885_v32 = vmul.f32 %v14565_v20, %v14702_v59  ;;  %v14704_v50 = vld [vmem:[#allocation64_spill] sm:$0xff]  ;;  %v14706_v7 = vld [vmem:[#allocation66_spill] sm:$0xff] }
 0x54a   :  { %14697 = vst [vmem:[#allocation18_spill] sm:$0xff] %v10873_v31  ;;  %14699 = vst [vmem:[#allocation19_spill] sm:$0xff] %v10877_v22  ;;  %v10889_v5 = vmul.f32 %v14565_v20, %v14704_v50  ;;  %v10893_v13 = vmul.f32 %v14565_v20, %v14706_v7  ;;  %v10898_v9 = vld [vmem:[%s12920_s2] ss:$0 sm:$0xff]  ;;  %v14718_v31 = vld [vmem:[#allocation78_spill] sm:$0xff] }
 0x54b   :  { %14701 = vst [vmem:[#allocation20_spill] sm:$0xff] %v10881_v63  ;;  %14703 = vst [vmem:[#allocation21_spill] sm:$0xff] %v10885_v32  ;;  %v14708_v22 = vld [vmem:[#allocation68_spill] sm:$0xff]  ;;  %v14710_v63 = vld [vmem:[#allocation70_spill] sm:$0xff] }
 0x54c   :  { %14705 = vst [vmem:[#allocation22_spill] sm:$0xff] %v10889_v5  ;;  %14707 = vst [vmem:[#allocation23_spill] sm:$0xff] %v10893_v13  ;;  %v10902_v46 = vmul.f32 %v10898_v9, %v14708_v22  ;;  %v10906_v59 = vmul.f32 %v10898_v9, %v14710_v63  ;;  %v14712_v32 = vld [vmem:[#allocation72_spill] sm:$0xff]  ;;  %v14714_v5 = vld [vmem:[#allocation74_spill] sm:$0xff]  ;;  %v10922_v22 = vmul.f32 %v10898_v9, %v14718_v31 }
 0x54d   :  { %v10910_v50 = vmul.f32 %v10898_v9, %v14712_v32  ;;  %v10914_v20 = vmul.f32 %v10898_v9, %v14714_v5  ;;  %v14716_v7 = vld [vmem:[#allocation76_spill] sm:$0xff] }
 0x54e   :  { %14709 = vst [vmem:[#allocation24_spill] sm:$0xff] %v10902_v46  ;;  %14711 = vst [vmem:[#allocation25_spill] sm:$0xff] %v10906_v59  ;;  %v10918_v13 = vmul.f32 %v10898_v9, %v14716_v7  ;;  %v14720_v46 = vld [vmem:[#allocation80_spill] sm:$0xff]  ;;  %v14722_v59 = vld [vmem:[#allocation82_spill] sm:$0xff] }
 0x54f   :  { %14713 = vst [vmem:[#allocation26_spill] sm:$0xff] %v10910_v50  ;;  %14715 = vst [vmem:[#allocation27_spill] sm:$0xff] %v10914_v20  ;;  %v10926_v63 = vmul.f32 %v10898_v9, %v14720_v46  ;;  %v10930_v32 = vmul.f32 %v10898_v9, %v14722_v59  ;;  %v14724_v50 = vld [vmem:[#allocation84_spill] sm:$0xff]  ;;  %v14726_v20 = vld [vmem:[#allocation86_spill] sm:$0xff] }
 0x550   :  { %14717 = vst [vmem:[#allocation28_spill] sm:$0xff] %v10918_v13  ;;  %14719 = vst [vmem:[#allocation29_spill] sm:$0xff] %v10922_v22  ;;  %v10934_v5 = vmul.f32 %v10898_v9, %v14724_v50  ;;  %v10938_v7 = vmul.f32 %v10898_v9, %v14726_v20  ;;  %v14728_v13 = vld [vmem:[#allocation88_spill] sm:$0xff]  ;;  %v14730_v22 = vld [vmem:[#allocation90_spill] sm:$0xff] }
 0x551   :  { %14721 = vst [vmem:[#allocation30_spill] sm:$0xff] %v10926_v63  ;;  %14723 = vst [vmem:[#allocation31_spill] sm:$0xff] %v10930_v32  ;;  %v10942_v31 = vmul.f32 %v10898_v9, %v14728_v13  ;;  %v10946_v46 = vmul.f32 %v10898_v9, %v14730_v22  ;;  %v14732_v63 = vld [vmem:[#allocation92_spill] sm:$0xff]  ;;  %v14733_v32 = vld [vmem:[#allocation94_spill] sm:$0xff] }
 0x552   :  { %14725 = vst [vmem:[#allocation32_spill] sm:$0xff] %v10934_v5  ;;  %14727 = vst [vmem:[#allocation33_spill] sm:$0xff] %v10938_v7  ;;  %v10950_v59 = vmul.f32 %v10898_v9, %v14732_v63  ;;  %v10954_v50 = vmul.f32 %v10898_v9, %v14733_v32  ;;  %v14735_v5 = vld [vmem:[#allocation96_spill] sm:$0xff]  ;;  %v14737_v7 = vld [vmem:[#allocation98_spill] sm:$0xff]  ;;  %v10974_v32 = vmul.f32 %v10898_v9, %v9621_v29 }
 0x553   :  { %14729 = vst [vmem:[#allocation34_spill] sm:$0xff] %v10942_v31  ;;  %14731 = vst [vmem:[#allocation35_spill] sm:$0xff] %v10946_v46  ;;  %v10958_v20 = vmul.f32 %v10898_v9, %v14735_v5  ;;  %v10962_v13 = vmul.f32 %v10898_v9, %v14737_v7  ;;  %v14739_v31 = vld [vmem:[#allocation100_spill] sm:$0xff]  ;;  %v14741_v46 = vld [vmem:[#allocation102_spill] sm:$0xff] }
 0x554   :  { %14734 = vst [vmem:[#allocation36_spill] sm:$0xff] %v10954_v50  ;;  %v10966_v22 = vmul.f32 %v10898_v9, %v14739_v31  ;;  %v10970_v63 = vmul.f32 %v10898_v9, %v14741_v46  ;;  %14743 = vst [vmem:[#allocation41_spill] sm:$0xff] %v10974_v32  ;;  %v14744_v50 = vld [vmem:[#allocation104_spill] sm:$0xff]  ;;  %v14753_v32 = vld [vmem:[#allocation114_spill] sm:$0xff] }
 0x555   :  { %14736 = vst [vmem:[#allocation37_spill] sm:$0xff] %v10958_v20  ;;  %14738 = vst [vmem:[#allocation38_spill] sm:$0xff] %v10962_v13  ;;  %v10978_v5 = vmul.f32 %v10898_v9, %v14744_v50  ;;  %v14745_v20 = vld [vmem:[#allocation106_spill] sm:$0xff]  ;;  %v14747_v13 = vld [vmem:[#allocation108_spill] sm:$0xff]  ;;  %v10998_v50 = vmul.f32 %v10898_v9, %v14753_v32 }
 0x556   :  { %14740 = vst [vmem:[#allocation39_spill] sm:$0xff] %v10966_v22  ;;  %14742 = vst [vmem:[#allocation40_spill] sm:$0xff] %v10970_v63  ;;  %v10982_v7 = vmul.f32 %v10898_v9, %v14745_v20  ;;  %v10986_v31 = vmul.f32 %v10898_v9, %v14747_v13  ;;  %v14749_v22 = vld [vmem:[#allocation110_spill] sm:$0xff]  ;;  %v14751_v63 = vld [vmem:[#allocation112_spill] sm:$0xff]  ;;  %v11002_v20 = vmul.f32 %v10898_v9, %v9663_v41 }
 0x557   :  { %v10990_v46 = vmul.f32 %v10898_v9, %v14749_v22  ;;  %v10994_v29 = vmul.f32 %v10898_v9, %v14751_v63  ;;  %14754 = vst [vmem:[#allocation50_spill] sm:$0xff] %v10998_v50  ;;  %v14763_v50 = vld [vmem:[#allocation124_spill] sm:$0xff] }
 0x558   :  { %14746 = vst [vmem:[#allocation42_spill] sm:$0xff] %v10982_v7  ;;  %14748 = vst [vmem:[#allocation44_spill] sm:$0xff] %v10986_v31  ;;  %v14756_v7 = vld [vmem:[#allocation116_spill] sm:$0xff]  ;;  %v14757_v31 = vld [vmem:[#allocation118_spill] sm:$0xff]  ;;  %v11022_v41 = vmul.f32 %v10898_v9, %v14763_v50 }
 0x559   :  { %14750 = vst [vmem:[#allocation46_spill] sm:$0xff] %v10990_v46  ;;  %14752 = vst [vmem:[#allocation48_spill] sm:$0xff] %v10994_v29  ;;  %v11006_v13 = vmul.f32 %v10898_v9, %v14756_v7  ;;  %v11010_v22 = vmul.f32 %v10898_v9, %v14757_v31  ;;  %v14759_v46 = vld [vmem:[#allocation120_spill] sm:$0xff]  ;;  %v14761_v29 = vld [vmem:[#allocation122_spill] sm:$0xff]  ;;  %v11030_v31 = vmul.f32 %v10898_v9, %v9705_v17 }
 0x55a   :  { %14755 = vst [vmem:[#allocation52_spill] sm:$0xff] %v11002_v20  ;;  %v11014_v63 = vmul.f32 %v10898_v9, %v14759_v46  ;;  %v11018_v32 = vmul.f32 %v10898_v9, %v14761_v29  ;;  %14764 = vst [vmem:[#allocation60_spill] sm:$0xff] %v11022_v41  ;;  %v14765_v20 = vld [vmem:[#allocation126_spill] sm:$0xff] }
 0x55b   :  { %14758 = vst [vmem:[#allocation54_spill] sm:$0xff] %v11010_v22  ;;  %v11026_v7 = vmul.f32 %v10898_v9, %v14765_v20  ;;  %14767 = vst [vmem:[#allocation64_spill] sm:$0xff] %v11030_v31  ;;  %v14768_v22 = vld [vmem:[#allocation128_spill] sm:$0xff]  ;;  %v14774_v41 = vld [vmem:[#allocation134_spill] sm:$0xff] }
 0x55c   :  { %14760 = vst [vmem:[#allocation56_spill] sm:$0xff] %v11014_v63  ;;  %14762 = vst [vmem:[#allocation58_spill] sm:$0xff] %v11018_v32  ;;  %v11034_v46 = vmul.f32 %v10898_v9, %v14768_v22  ;;  %v14770_v63 = vld [vmem:[#allocation130_spill] sm:$0xff]  ;;  %v14772_v32 = vld [vmem:[#allocation132_spill] sm:$0xff]  ;;  %v11046_v20 = vmul.f32 %v10898_v9, %v14774_v41 }
 0x55d   :  { %14766 = vst [vmem:[#allocation62_spill] sm:$0xff] %v11026_v7  ;;  %v11038_v29 = vmul.f32 %v10898_v9, %v14770_v63  ;;  %v11042_v50 = vmul.f32 %v10898_v9, %v14772_v32  ;;  %v14776_v7 = vld [vmem:[#allocation136_spill] sm:$0xff]  ;;  %v14778_v31 = vld [vmem:[#allocation138_spill] sm:$0xff] }
 0x55e   :  { %14769 = vst [vmem:[#allocation66_spill] sm:$0xff] %v11034_v46  ;;  %14775 = vst [vmem:[#allocation72_spill] sm:$0xff] %v11046_v20  ;;  %v11050_v17 = vmul.f32 %v10898_v9, %v14776_v7  ;;  %v11054_v22 = vmul.f32 %v10898_v9, %v14778_v31  ;;  %v14780_v46 = vld [vmem:[#allocation140_spill] sm:$0xff]  ;;  %v14786_v20 = vld [vmem:[#allocation146_spill] sm:$0xff] }
 0x55f   :  { %14771 = vst [vmem:[#allocation68_spill] sm:$0xff] %v11038_v29  ;;  %14773 = vst [vmem:[#allocation70_spill] sm:$0xff] %v11042_v50  ;;  %v11058_v63 = vmul.f32 %v10898_v9, %v14780_v46  ;;  %v14782_v29 = vld [vmem:[#allocation142_spill] sm:$0xff]  ;;  %v14784_v50 = vld [vmem:[#allocation144_spill] sm:$0xff]  ;;  %v11070_v7 = vmul.f32 %v10898_v9, %v14786_v20 }
 0x560   :  { %14777 = vst [vmem:[#allocation74_spill] sm:$0xff] %v11050_v17  ;;  %14779 = vst [vmem:[#allocation76_spill] sm:$0xff] %v11054_v22  ;;  %v11062_v32 = vmul.f32 %v10898_v9, %v14782_v29  ;;  %v11066_v41 = vmul.f32 %v10898_v9, %v14784_v50  ;;  %v14788_v17 = vld [vmem:[#allocation148_spill] sm:$0xff]  ;;  %v14790_v22 = vld [vmem:[#allocation150_spill] sm:$0xff] }
 0x561   :  { %14781 = vst [vmem:[#allocation78_spill] sm:$0xff] %v11058_v63  ;;  %14787 = vst [vmem:[#allocation84_spill] sm:$0xff] %v11070_v7  ;;  %v11074_v31 = vmul.f32 %v10898_v9, %v14788_v17  ;;  %v11078_v46 = vmul.f32 %v10898_v9, %v14790_v22  ;;  %v14792_v63 = vld [vmem:[#allocation152_spill] sm:$0xff]  ;;  %v14798_v7 = vld [vmem:[#allocation158_spill] sm:$0xff] }
 0x562   :  { %14783 = vst [vmem:[#allocation80_spill] sm:$0xff] %v11062_v32  ;;  %14785 = vst [vmem:[#allocation82_spill] sm:$0xff] %v11066_v41  ;;  %v11082_v29 = vmul.f32 %v10898_v9, %v14792_v63  ;;  %v14794_v32 = vld [vmem:[#allocation154_spill] sm:$0xff]  ;;  %v14796_v41 = vld [vmem:[#allocation156_spill] sm:$0xff]  ;;  %v11094_v17 = vmul.f32 %v10898_v9, %v14798_v7 }
 0x563   :  { %14789 = vst [vmem:[#allocation86_spill] sm:$0xff] %v11074_v31  ;;  %14791 = vst [vmem:[#allocation88_spill] sm:$0xff] %v11078_v46  ;;  %v11086_v50 = vmul.f32 %v10898_v9, %v14794_v32  ;;  %v11090_v20 = vmul.f32 %v10898_v9, %v14796_v41  ;;  %v14800_v31 = vld [vmem:[#allocation160_spill] sm:$0xff]  ;;  %v14802_v46 = vld [vmem:[#allocation162_spill] sm:$0xff] }
 0x564   :  { %14793 = vst [vmem:[#allocation90_spill] sm:$0xff] %v11082_v29  ;;  %14799 = vst [vmem:[#allocation96_spill] sm:$0xff] %v11094_v17  ;;  %v11098_v22 = vmul.f32 %v10898_v9, %v14800_v31  ;;  %v11102_v63 = vmul.f32 %v10898_v9, %v14802_v46  ;;  %v14804_v29 = vld [vmem:[#allocation164_spill] sm:$0xff] }
 0x565   :  { %14795 = vst [vmem:[#allocation92_spill] sm:$0xff] %v11086_v50  ;;  %14797 = vst [vmem:[#allocation94_spill] sm:$0xff] %v11090_v20  ;;  %v11106_v32 = vmul.f32 %v10898_v9, %v14804_v29  ;;  %v14806_v50 = vld [vmem:[#allocation166_spill] sm:$0xff]  ;;  %v14808_v20 = vld [vmem:[#allocation168_spill] sm:$0xff] }
 0x566   :  { %14801 = vst [vmem:[#allocation98_spill] sm:$0xff] %v11098_v22  ;;  %14803 = vst [vmem:[#allocation100_spill] sm:$0xff] %v11102_v63  ;;  %v11110_v41 = vmul.f32 %v10898_v9, %v14806_v50  ;;  %v11114_v7 = vmul.f32 %v10898_v9, %v14808_v20  ;;  %v14810_v17 = vld [vmem:[#allocation172_spill] sm:$0xff]  ;;  %v14812_v22 = vld [vmem:[#allocation173_spill] sm:$0xff] }
 0x567   :  { %14805 = vst [vmem:[#allocation102_spill] sm:$0xff] %v11106_v32  ;;  %v11118_v31 = vmul.f32 %v10898_v9, %v14810_v17  ;;  %v11122_v46 = vmul.f32 %v10898_v9, %v14812_v22  ;;  %v14814_v63 = vld [vmem:[#allocation174_spill] sm:$0xff]  ;;  %v14816_v32 = vld [vmem:[#allocation175_spill] sm:$0xff] }
 0x568   :  { %14807 = vst [vmem:[#allocation104_spill] sm:$0xff] %v11110_v41  ;;  %14809 = vst [vmem:[#allocation106_spill] sm:$0xff] %v11114_v7  ;;  %v11126_v29 = vmul.f32 %v10898_v9, %v14814_v63  ;;  %v11130_v50 = vmul.f32 %v10898_v9, %v14816_v32  ;;  %v14818_v41 = vld [vmem:[#allocation176_spill] sm:$0xff]  ;;  %v14820_v7 = vld [vmem:[#allocation177_spill] sm:$0xff] }
 0x569   :  { %14811 = vst [vmem:[#allocation108_spill] sm:$0xff] %v11118_v31  ;;  %14813 = vst [vmem:[#allocation110_spill] sm:$0xff] %v11122_v46  ;;  %v11134_v20 = vmul.f32 %v10898_v9, %v14818_v41  ;;  %v11138_v17 = vmul.f32 %v10898_v9, %v14820_v7  ;;  %v14822_v31 = vld [vmem:[#allocation179_spill] sm:$0xff]  ;;  %v14824_v46 = vld [vmem:[#allocation180_spill] sm:$0xff] }
 0x56a   :  { %14815 = vst [vmem:[#allocation112_spill] sm:$0xff] %v11126_v29  ;;  %14817 = vst [vmem:[#allocation114_spill] sm:$0xff] %v11130_v50  ;;  %v11142_v22 = vmul.f32 %v10898_v9, %v14822_v31  ;;  %v11146_v63 = vmul.f32 %v10898_v9, %v14824_v46  ;;  %v14826_v29 = vld [vmem:[#allocation181_spill] sm:$0xff]  ;;  %v14828_v50 = vld [vmem:[#allocation182_spill] sm:$0xff] }
 0x56b   :  { %14819 = vst [vmem:[#allocation116_spill] sm:$0xff] %v11134_v20  ;;  %14821 = vst [vmem:[#allocation118_spill] sm:$0xff] %v11138_v17  ;;  %v11150_v32 = vmul.f32 %v10898_v9, %v14826_v29  ;;  %v11154_v41 = vmul.f32 %v10898_v9, %v14828_v50  ;;  %v14830_v20 = vld [vmem:[#allocation183_spill] sm:$0xff]  ;;  %v14832_v17 = vld [vmem:[#allocation184_spill] sm:$0xff] }
 0x56c   :  { %14823 = vst [vmem:[#allocation120_spill] sm:$0xff] %v11142_v22  ;;  %14825 = vst [vmem:[#allocation122_spill] sm:$0xff] %v11146_v63  ;;  %v11158_v7 = vmul.f32 %v10898_v9, %v14830_v20  ;;  %v11162_v31 = vmul.f32 %v10898_v9, %v14832_v17  ;;  %v14834_v22 = vld [vmem:[#allocation186_spill] sm:$0xff]  ;;  %v14836_v63 = vld [vmem:[#allocation187_spill] sm:$0xff] }
 0x56d   :  { %14827 = vst [vmem:[#allocation124_spill] sm:$0xff] %v11150_v32  ;;  %14829 = vst [vmem:[#allocation126_spill] sm:$0xff] %v11154_v41  ;;  %v11166_v46 = vmul.f32 %v10898_v9, %v14834_v22  ;;  %v11170_v29 = vmul.f32 %v10898_v9, %v14836_v63  ;;  %v14838_v32 = vld [vmem:[#allocation188_spill] sm:$0xff]  ;;  %v14840_v41 = vld [vmem:[#allocation189_spill] sm:$0xff] }
 0x56e   :  { %14831 = vst [vmem:[#allocation128_spill] sm:$0xff] %v11158_v7  ;;  %14833 = vst [vmem:[#allocation130_spill] sm:$0xff] %v11162_v31  ;;  %v11174_v50 = vmul.f32 %v10898_v9, %v14838_v32  ;;  %v11178_v20 = vmul.f32 %v10898_v9, %v14840_v41  ;;  %v14842_v7 = vld [vmem:[#allocation190_spill] sm:$0xff]  ;;  %v14844_v31 = vld [vmem:[#allocation191_spill] sm:$0xff] }
 0x56f   :  { %14835 = vst [vmem:[#allocation132_spill] sm:$0xff] %v11166_v46  ;;  %14837 = vst [vmem:[#allocation134_spill] sm:$0xff] %v11170_v29  ;;  %v11182_v17 = vmul.f32 %v10898_v9, %v14842_v7  ;;  %v11186_v22 = vmul.f32 %v10898_v9, %v14844_v31  ;;  %v14846_v46 = vld [vmem:[#allocation192_spill] sm:$0xff]  ;;  %v14848_v29 = vld [vmem:[#allocation193_spill] sm:$0xff] }
 0x570   :  { %14839 = vst [vmem:[#allocation136_spill] sm:$0xff] %v11174_v50  ;;  %14841 = vst [vmem:[#allocation138_spill] sm:$0xff] %v11178_v20  ;;  %v11190_v63 = vmul.f32 %v10898_v9, %v14846_v46  ;;  %v11194_v32 = vmul.f32 %v10898_v9, %v14848_v29  ;;  %v14850_v50 = vld [vmem:[#allocation195_spill] sm:$0xff]  ;;  %v14852_v20 = vld [vmem:[#allocation197_spill] sm:$0xff] }
 0x571   :  { %14843 = vst [vmem:[#allocation140_spill] sm:$0xff] %v11182_v17  ;;  %14845 = vst [vmem:[#allocation142_spill] sm:$0xff] %v11186_v22  ;;  %v11198_v41 = vmul.f32 %v10898_v9, %v14850_v50  ;;  %v11202_v7 = vmul.f32 %v10898_v9, %v14852_v20  ;;  %v14854_v17 = vld [vmem:[#allocation199_spill] sm:$0xff]  ;;  %v14856_v22 = vld [vmem:[#allocation201_spill] sm:$0xff] }
 0x572   :  { %14847 = vst [vmem:[#allocation144_spill] sm:$0xff] %v11190_v63  ;;  %14849 = vst [vmem:[#allocation146_spill] sm:$0xff] %v11194_v32  ;;  %v11206_v31 = vmul.f32 %v10898_v9, %v14854_v17  ;;  %v11210_v46 = vmul.f32 %v10898_v9, %v14856_v22  ;;  %v14858_v63 = vld [vmem:[#allocation203_spill] sm:$0xff]  ;;  %v14860_v32 = vld [vmem:[#allocation205_spill] sm:$0xff] }
 0x573   :  { %14851 = vst [vmem:[#allocation148_spill] sm:$0xff] %v11198_v41  ;;  %14853 = vst [vmem:[#allocation150_spill] sm:$0xff] %v11202_v7  ;;  %v11214_v29 = vmul.f32 %v10898_v9, %v14858_v63  ;;  %v11218_v50 = vmul.f32 %v10898_v9, %v14860_v32  ;;  %v14862_v41 = vld [vmem:[#allocation207_spill] sm:$0xff]  ;;  %v14864_v7 = vld [vmem:[#allocation209_spill] sm:$0xff] }
 0x574   :  { %14855 = vst [vmem:[#allocation152_spill] sm:$0xff] %v11206_v31  ;;  %14857 = vst [vmem:[#allocation154_spill] sm:$0xff] %v11210_v46  ;;  %v11222_v20 = vmul.f32 %v10898_v9, %v14862_v41  ;;  %v11226_v17 = vmul.f32 %v10898_v9, %v14864_v7  ;;  %v14866_v31 = vld [vmem:[#allocation211_spill] sm:$0xff]  ;;  %v14868_v46 = vld [vmem:[#allocation213_spill] sm:$0xff] }
 0x575   :  { %14859 = vst [vmem:[#allocation156_spill] sm:$0xff] %v11214_v29  ;;  %14861 = vst [vmem:[#allocation158_spill] sm:$0xff] %v11218_v50  ;;  %v11230_v22 = vmul.f32 %v10898_v9, %v14866_v31  ;;  %v11234_v63 = vmul.f32 %v10898_v9, %v14868_v46  ;;  %v14870_v29 = vld [vmem:[#allocation215_spill] sm:$0xff] }
 0x576   :  { %14863 = vst [vmem:[#allocation160_spill] sm:$0xff] %v11222_v20  ;;  %14865 = vst [vmem:[#allocation162_spill] sm:$0xff] %v11226_v17  ;;  %v11238_v32 = vmul.f32 %v10898_v9, %v14870_v29  ;;  %v14872_v50 = vld [vmem:[#allocation43_spill] sm:$0xff]  ;;  %v14874_v20 = vld [vmem:[#allocation45_spill] sm:$0xff] }
 0x577   :  { %14867 = vst [vmem:[#allocation164_spill] sm:$0xff] %v11230_v22  ;;  %14869 = vst [vmem:[#allocation166_spill] sm:$0xff] %v11234_v63  ;;  %v11242_v41 = vmul.f32 %v10898_v9, %v14872_v50  ;;  %v11246_v7 = vmul.f32 %v10898_v9, %v14874_v20  ;;  %v14876_v17 = vld [vmem:[#allocation47_spill] sm:$0xff]  ;;  %v14878_v22 = vld [vmem:[#allocation49_spill] sm:$0xff] }
 0x578   :  { %14871 = vst [vmem:[#allocation168_spill] sm:$0xff] %v11238_v32  ;;  %v11250_v31 = vmul.f32 %v10898_v9, %v14876_v17  ;;  %v11254_v46 = vmul.f32 %v10898_v9, %v14878_v22  ;;  %v14880_v63 = vld [vmem:[#allocation51_spill] sm:$0xff]  ;;  %v14882_v32 = vld [vmem:[#allocation53_spill] sm:$0xff] }
 0x579   :  { %14873 = vst [vmem:[#allocation172_spill] sm:$0xff] %v11242_v41  ;;  %14875 = vst [vmem:[#allocation173_spill] sm:$0xff] %v11246_v7  ;;  %v11258_v29 = vmul.f32 %v10898_v9, %v14880_v63  ;;  %v11262_v50 = vmul.f32 %v10898_v9, %v14882_v32  ;;  %v14884_v41 = vld [vmem:[#allocation55_spill] sm:$0xff]  ;;  %v14886_v7 = vld [vmem:[#allocation57_spill] sm:$0xff] }
 0x57a   :  { %14877 = vst [vmem:[#allocation174_spill] sm:$0xff] %v11250_v31  ;;  %14879 = vst [vmem:[#allocation175_spill] sm:$0xff] %v11254_v46  ;;  %v11266_v20 = vmul.f32 %v10898_v9, %v14884_v41  ;;  %v11270_v17 = vmul.f32 %v10898_v9, %v14886_v7  ;;  %v14888_v31 = vld [vmem:[#allocation59_spill] sm:$0xff]  ;;  %v14890_v46 = vld [vmem:[#allocation61_spill] sm:$0xff] }
 0x57b   :  { %14881 = vst [vmem:[#allocation176_spill] sm:$0xff] %v11258_v29  ;;  %14883 = vst [vmem:[#allocation177_spill] sm:$0xff] %v11262_v50  ;;  %v11274_v22 = vmul.f32 %v10898_v9, %v14888_v31  ;;  %v11278_v63 = vmul.f32 %v10898_v9, %v14890_v46  ;;  %v14892_v29 = vld [vmem:[#allocation63_spill] sm:$0xff]  ;;  %v14894_v50 = vld [vmem:[#allocation65_spill] sm:$0xff] }
 0x57c   :  { %14885 = vst [vmem:[#allocation179_spill] sm:$0xff] %v11266_v20  ;;  %14887 = vst [vmem:[#allocation180_spill] sm:$0xff] %v11270_v17  ;;  %v11282_v32 = vmul.f32 %v10898_v9, %v14892_v29  ;;  %v11286_v41 = vmul.f32 %v10898_v9, %v14894_v50  ;;  %v14896_v20 = vld [vmem:[#allocation67_spill] sm:$0xff]  ;;  %v14898_v17 = vld [vmem:[#allocation69_spill] sm:$0xff] }
 0x57d   :  { %14889 = vst [vmem:[#allocation181_spill] sm:$0xff] %v11274_v22  ;;  %14891 = vst [vmem:[#allocation182_spill] sm:$0xff] %v11278_v63  ;;  %v11290_v7 = vmul.f32 %v10898_v9, %v14896_v20  ;;  %v11294_v31 = vmul.f32 %v10898_v9, %v14898_v17  ;;  %v14900_v22 = vld [vmem:[#allocation71_spill] sm:$0xff]  ;;  %v14902_v63 = vld [vmem:[#allocation73_spill] sm:$0xff] }
 0x57e   :  { %14893 = vst [vmem:[#allocation183_spill] sm:$0xff] %v11282_v32  ;;  %14895 = vst [vmem:[#allocation184_spill] sm:$0xff] %v11286_v41  ;;  %v11298_v46 = vmul.f32 %v10898_v9, %v14900_v22  ;;  %v11302_v29 = vmul.f32 %v10898_v9, %v14902_v63  ;;  %v14903_v32 = vld [vmem:[#allocation75_spill] sm:$0xff]  ;;  %v14904_v41 = vld [vmem:[#allocation77_spill] sm:$0xff] }
 0x57f   :  { %14897 = vst [vmem:[#allocation186_spill] sm:$0xff] %v11290_v7  ;;  %14899 = vst [vmem:[#allocation187_spill] sm:$0xff] %v11294_v31  ;;  %v11306_v50 = vmul.f32 %v10898_v9, %v14903_v32  ;;  %v11310_v20 = vmul.f32 %v10898_v9, %v14904_v41  ;;  %v14905_v7 = vld [vmem:[#allocation79_spill] sm:$0xff]  ;;  %v14906_v31 = vld [vmem:[#allocation81_spill] sm:$0xff]  ;;  %v11326_v32 = vmul.f32 %v10898_v9, %v10149_v16 }
 0x580   :  { %14901 = vst [vmem:[#allocation188_spill] sm:$0xff] %v11298_v46  ;;  %v11314_v17 = vmul.f32 %v10898_v9, %v14905_v7  ;;  %v11318_v22 = vmul.f32 %v10898_v9, %v14906_v31  ;;  %v14907_v46 = vld [vmem:[#allocation83_spill] sm:$0xff]  ;;  %v11330_v41 = vmul.f32 %v10898_v9, %v10155_v58  ;;  %v11334_v7 = vmul.f32 %v10898_v9, %v10161_v37 }
 0x581   :  { %v11322_v63 = vmul.f32 %v10898_v9, %v14907_v46  ;;  %v11338_v31 = vmul.f32 %v10898_v9, %v10167_v0  ;;  %v11342_v46 = vmul.f32 %v10898_v9, %v10173_v2  ;;  %v11346_v16 = vmul.f32 %v10898_v9, %v10179_v60 }
 0x582   :  { %v11350_v58 = vmul.f32 %v10898_v9, %v10185_v10  ;;  %v11354_v37 = vmul.f32 %v10898_v9, %v10191_v42  ;;  %v11358_v0 = vmul.f32 %v10898_v9, %v10197_v34  ;;  %v11362_v2 = vmul.f32 %v10898_v9, %v10203_v27 }
 0x583   :  { %v11366_v60 = vmul.f32 %v10898_v9, %v10209_v30  ;;  %v11370_v10 = vmul.f32 %v10898_v9, %v10215_v6  ;;  %v11374_v42 = vmul.f32 %v10898_v9, %v10221_v33  ;;  %v11378_v34 = vmul.f32 %v10898_v9, %v10227_v4 }
 0x584   :  { %v11382_v27 = vmul.f32 %v10898_v9, %v10233_v1  ;;  %v11386_v30 = vmul.f32 %v10898_v9, %v10239_v18  ;;  %v11390_v6 = vmul.f32 %v10898_v9, %v10245_v35  ;;  %v11394_v33 = vmul.f32 %v10898_v9, %v10251_v8 }
 0x585   :  { %v11398_v4 = vmul.f32 %v10898_v9, %v10257_v48  ;;  %v11402_v1 = vmul.f32 %v10898_v9, %v10263_v21  ;;  %v11406_v18 = vmul.f32 %v10898_v9, %v10269_v40  ;;  %v11410_v35 = vmul.f32 %v10898_v9, %v10275_v44 }
 0x586   :  { %v11414_v8 = vmul.f32 %v10898_v9, %v10281_v61  ;;  %v11418_v48 = vmul.f32 %v10898_v9, %v10287_v26  ;;  %v11422_v21 = vmul.f32 %v10898_v9, %v10293_v11  ;;  %v11426_v40 = vmul.f32 %v10898_v9, %v10299_v51 }
 0x587   :  { %v11430_v44 = vmul.f32 %v10898_v9, %v10305_v19  ;;  %v11434_v61 = vmul.f32 %v10898_v9, %v10311_v54  ;;  %v11438_v26 = vmul.f32 %v10898_v9, %v10317_v62  ;;  %v11442_v11 = vmul.f32 %v10898_v9, %v10323_v43 }
 0x588   :  { %v11446_v51 = vmul.f32 %v10898_v9, %v10329_v45  ;;  %v11450_v19 = vmul.f32 %v10898_v9, %v10335_v53 }
 0x589   :  { %14908 = vst [vmem:[#allocation189_spill] sm:$0xff] %v11430_v44  ;;  %14909 = vst [vmem:[#allocation190_spill] sm:$0xff] %v11434_v61  ;;  %v14914_v44 = vld [vmem:[#allocation85_spill] sm:$0xff]  ;;  %v14916_v61 = vld [vmem:[#allocation87_spill] sm:$0xff] }
 0x58a   :  { %14910 = vst [vmem:[#allocation191_spill] sm:$0xff] %v11438_v26  ;;  %14911 = vst [vmem:[#allocation192_spill] sm:$0xff] %v11442_v11  ;;  %v11454_v54 = vmul.f32 %v10898_v9, %v14914_v44  ;;  %v11458_v62 = vmul.f32 %v10898_v9, %v14916_v61  ;;  %v14918_v26 = vld [vmem:[#allocation89_spill] sm:$0xff]  ;;  %v14920_v11 = vld [vmem:[#allocation91_spill] sm:$0xff] }
 0x58b   :  { %14912 = vst [vmem:[#allocation193_spill] sm:$0xff] %v11446_v51  ;;  %14913 = vst [vmem:[#allocation195_spill] sm:$0xff] %v11450_v19  ;;  %v11462_v43 = vmul.f32 %v10898_v9, %v14918_v26  ;;  %v11466_v45 = vmul.f32 %v10898_v9, %v14920_v11  ;;  %v14922_v51 = vld [vmem:[#allocation93_spill] sm:$0xff]  ;;  %v14924_v19 = vld [vmem:[#allocation95_spill] sm:$0xff] }
 0x58c   :  { %14915 = vst [vmem:[#allocation197_spill] sm:$0xff] %v11454_v54  ;;  %14917 = vst [vmem:[#allocation199_spill] sm:$0xff] %v11458_v62  ;;  %v11470_v53 = vmul.f32 %v10898_v9, %v14922_v51  ;;  %v11474_v44 = vmul.f32 %v10898_v9, %v14924_v19  ;;  %v14926_v54 = vld [vmem:[#allocation97_spill] sm:$0xff]  ;;  %v14928_v62 = vld [vmem:[#allocation99_spill] sm:$0xff] }
 0x58d   :  { %14919 = vst [vmem:[#allocation201_spill] sm:$0xff] %v11462_v43  ;;  %14921 = vst [vmem:[#allocation203_spill] sm:$0xff] %v11466_v45  ;;  %v11478_v61 = vmul.f32 %v10898_v9, %v14926_v54  ;;  %v11482_v26 = vmul.f32 %v10898_v9, %v14928_v62  ;;  %v14930_v43 = vld [vmem:[#allocation101_spill] sm:$0xff]  ;;  %v14932_v45 = vld [vmem:[#allocation103_spill] sm:$0xff] }
 0x58e   :  { %14923 = vst [vmem:[#allocation205_spill] sm:$0xff] %v11470_v53  ;;  %14925 = vst [vmem:[#allocation207_spill] sm:$0xff] %v11474_v44  ;;  %v11486_v11 = vmul.f32 %v10898_v9, %v14930_v43  ;;  %v11490_v51 = vmul.f32 %v10898_v9, %v14932_v45  ;;  %v14934_v53 = vld [vmem:[#allocation105_spill] sm:$0xff]  ;;  %v14935_v44 = vld [vmem:[#allocation107_spill] sm:$0xff] }
 0x58f   :  { %14927 = vst [vmem:[#allocation209_spill] sm:$0xff] %v11478_v61  ;;  %14929 = vst [vmem:[#allocation211_spill] sm:$0xff] %v11482_v26  ;;  %v11494_v19 = vmul.f32 %v10898_v9, %v14934_v53  ;;  %v11498_v54 = vmul.f32 %v10898_v9, %v14935_v44  ;;  %v14936_v61 = vld [vmem:[#allocation109_spill] sm:$0xff]  ;;  %v14937_v26 = vld [vmem:[#allocation111_spill] sm:$0xff]  ;;  %v11518_v44 = vmul.f32 %v10898_v9, %v10437_v49 }
 0x590   :  { %14931 = vst [vmem:[#allocation213_spill] sm:$0xff] %v11486_v11  ;;  %14933 = vst [vmem:[#allocation215_spill] sm:$0xff] %v11490_v51  ;;  %v11502_v62 = vmul.f32 %v10898_v9, %v14936_v61  ;;  %v11506_v43 = vmul.f32 %v10898_v9, %v14937_v26  ;;  %v14938_v11 = vld [vmem:[#allocation113_spill] sm:$0xff]  ;;  %v14939_v51 = vld [vmem:[#allocation115_spill] sm:$0xff]  ;;  %v11522_v61 = vmul.f32 %v10898_v9, %v10443_v55 }
 0x591   :  { %v11510_v45 = vmul.f32 %v10898_v9, %v14938_v11  ;;  %v11514_v53 = vmul.f32 %v10898_v9, %v14939_v51  ;;  %v11526_v26 = vmul.f32 %v10898_v9, %v10449_v38  ;;  %v11530_v11 = vmul.f32 %v10898_v9, %v10455_v39 }
 0x592   :  { %v11534_v51 = vmul.f32 %v10898_v9, %v10461_v12  ;;  %v11538_v49 = vmul.f32 %v10898_v9, %v10467_v52  ;;  %v11542_v55 = vmul.f32 %v10898_v9, %v10473_v14  ;;  %v11546_v38 = vmul.f32 %v10898_v9, %v10479_v47 }
 0x593   :  { %v11550_v39 = vmul.f32 %v10898_v9, %v10485_v15  ;;  %v11554_v12 = vmul.f32 %v10898_v9, %v10491_v56  ;;  %v11558_v52 = vmul.f32 %v10898_v9, %v10497_v3 }
 0x594   :  { %14940 = vst [vmem:[#allocation43_spill] sm:$0xff] %v11538_v49  ;;  %14941 = vst [vmem:[#allocation45_spill] sm:$0xff] %v11542_v55  ;;  %v14946_v49 = vld [vmem:[#allocation117_spill] sm:$0xff]  ;;  %v14948_v55 = vld [vmem:[#allocation119_spill] sm:$0xff] }
 0x595   :  { %14942 = vst [vmem:[#allocation47_spill] sm:$0xff] %v11546_v38  ;;  %14943 = vst [vmem:[#allocation49_spill] sm:$0xff] %v11550_v39  ;;  %v11562_v14 = vmul.f32 %v10898_v9, %v14946_v49  ;;  %v11566_v47 = vmul.f32 %v10898_v9, %v14948_v55  ;;  %v14949_v38 = vld [vmem:[#allocation121_spill] sm:$0xff]  ;;  %v14950_v39 = vld [vmem:[#allocation123_spill] sm:$0xff] }
 0x596   :  { %14944 = vst [vmem:[#allocation51_spill] sm:$0xff] %v11554_v12  ;;  %14945 = vst [vmem:[#allocation53_spill] sm:$0xff] %v11558_v52  ;;  %v11570_v15 = vmul.f32 %v10898_v9, %v14949_v38  ;;  %v11574_v56 = vmul.f32 %v10898_v9, %v14950_v39  ;;  %v14951_v12 = vld [vmem:[#allocation125_spill] sm:$0xff]  ;;  %v14953_v52 = vld [vmem:[#allocation127_spill] sm:$0xff]  ;;  %v11590_v38 = vmul.f32 %v10898_v9, %v10545_v57 }
 0x597   :  { %14947 = vst [vmem:[#allocation55_spill] sm:$0xff] %v11562_v14  ;;  %v11578_v3 = vmul.f32 %v10898_v9, %v14951_v12  ;;  %v11582_v49 = vmul.f32 %v10898_v9, %v14953_v52  ;;  %v14954_v14 = vld [vmem:[#allocation129_spill] sm:$0xff]  ;;  %v11594_v39 = vmul.f32 %v10898_v9, %v10551_v28  ;;  %v11598_v12 = vmul.f32 %v10898_v9, %v10557_v24 }
 0x598   :  { %v11586_v55 = vmul.f32 %v10898_v9, %v14954_v14  ;;  %14956 = vst [vmem:[#allocation61_spill] sm:$0xff] %v11590_v38  ;;  %v11606_v14 = vmul.f32 %v10898_v9, %v10569_v25  ;;  %v14962_v38 = vld [vmem:[#allocation135_spill] sm:$0xff] }
 0x599   :  { %14952 = vst [vmem:[#allocation57_spill] sm:$0xff] %v11578_v3  ;;  %14957 = vst [vmem:[#allocation63_spill] sm:$0xff] %v11594_v39  ;;  %v14959_v3 = vld [vmem:[#allocation131_spill] sm:$0xff]  ;;  %v11614_v28 = vmul.f32 %v10898_v9, %v14962_v38  ;;  %v14964_v39 = vld [vmem:[#allocation137_spill] sm:$0xff] }
 0x59a   :  { %14955 = vst [vmem:[#allocation59_spill] sm:$0xff] %v11586_v55  ;;  %14958 = vst [vmem:[#allocation65_spill] sm:$0xff] %v11598_v12  ;;  %v11602_v52 = vmul.f32 %v10898_v9, %v14959_v3  ;;  %v14961_v55 = vld [vmem:[#allocation133_spill] sm:$0xff]  ;;  %v11618_v24 = vmul.f32 %v10898_v9, %v14964_v39  ;;  %v14966_v12 = vld [vmem:[#allocation139_spill] sm:$0xff] }
 0x59b   :  { %v11610_v57 = vmul.f32 %v10898_v9, %v14961_v55  ;;  %14963 = vst [vmem:[#allocation69_spill] sm:$0xff] %v11614_v28  ;;  %v11622_v3 = vmul.f32 %v10898_v9, %v14966_v12  ;;  %v11630_v55 = vmul.f32 %v10898_v9, %v10605_v36  ;;  %v11635_v38 = vld [vmem:[%s12921_s3] ss:$0 sm:$0xff]  ;;  %v14980_v28 = vld [vmem:[#allocation194_spill] sm:$0xff]  ;;  %s7199_s3 = smov [#allocation8]  }
 0x59c   :  { %14960 = vst [vmem:[#allocation67_spill] sm:$0xff] %v11602_v52  ;;  %14965 = vst [vmem:[#allocation71_spill] sm:$0xff] %v11618_v24  ;;  %v14968_v52 = vld [vmem:[#allocation141_spill] sm:$0xff]  ;;  %v11639_v39 = vadd.f32 %v11635_v38, %v10609_v23  ;;  %v14972_v24 = vld [vmem:[#allocation143_spill] sm:$0xff]  ;;  %v11659_v23 = vadd.f32 %v11635_v38, %v14980_v28  ;;  %s6395_s8 = sshll.u32 %s7199_s3, 4  ;;  %s6396_s8 = int_to_ptr.vmem [resolvable:$true] %s6395_s8 }
 0x59d   :  { %14967 = vst [vmem:[#allocation73_spill] sm:$0xff] %v11622_v3  ;;  %v11626_v25 = vmul.f32 %v10898_v9, %v14968_v52  ;;  %14970 = vst [vmem:[#allocation77_spill] sm:$0xff] %v11630_v55  ;;  %v11643_v12 = vadd.f32 %v11635_v38, %v14972_v24  ;;  %v14974_v3 = vld [vmem:[#allocation145_spill] sm:$0xff]  ;;  %s7166_s9 = scalar_lea.vmem %s6396_s8, 32768  ;;  %p7171_p11 = scmp.lt.s32.totalorder %s6396_s8, %s6396_s8 }
 0x59e   :  { %14971 = vst [vmem:[#allocation79_spill] sm:$0xff] %v11639_v39  ;;  %v11647_v52 = vadd.f32 %v11635_v38, %v14974_v3  ;;  %v14978_v9 = vld [vmem:[#allocation149_spill] sm:$0xff]  ;;  %14981 = vst [vmem:[#allocation89_spill] sm:$0xff] %v11659_v23  ;;  %v14982_v39 = vld [vmem:[#allocation196_spill] sm:$0xff]  ;;  %p7167_p10 = scmp.ne.s32.totalorder %s6396_s8, %s7166_s9  ;;  %p7172_p12 = scmp.lt.s32.totalorder %s7166_s9, %s7166_s9 }
 0x59f   :  { %14969 = vst [vmem:[#allocation75_spill] sm:$0xff] %v11626_v25  ;;  %14973 = vst [vmem:[#allocation81_spill] sm:$0xff] %v11643_v12  ;;  %v14976_v25 = vld [vmem:[#allocation147_spill] sm:$0xff]  ;;  %v11655_v55 = vadd.f32 %v11635_v38, %v14978_v9  ;;  %v11663_v24 = vadd.f32 %v11635_v38, %v14982_v39  ;;  %v14984_v12 = vld [vmem:[#allocation198_spill] sm:$0xff] }
 0x5a0   :  { %14975 = vst [vmem:[#allocation83_spill] sm:$0xff] %v11647_v52  ;;  %v11651_v36 = vadd.f32 %v11635_v38, %v14976_v25  ;;  %v11667_v3 = vadd.f32 %v11635_v38, %v14984_v12  ;;  %v14986_v52 = vld [vmem:[#allocation200_spill] sm:$0xff]  ;;  %v14992_v23 = vld [vmem:[#allocation206_spill] sm:$0xff]  ;;  %p7173_p13 = por %p7172_p12, %p7171_p11 }
 0x5a1   :  { %14979 = vst [vmem:[#allocation87_spill] sm:$0xff] %v11655_v55  ;;  %14983 = vst [vmem:[#allocation91_spill] sm:$0xff] %v11663_v24  ;;  %v11671_v25 = vadd.f32 %v11635_v38, %v14986_v52  ;;  %v14990_v55 = vld [vmem:[#allocation204_spill] sm:$0xff]  ;;  %v11683_v39 = vadd.f32 %v11635_v38, %v14992_v23 }
 0x5a2   :  { %14977 = vst [vmem:[#allocation85_spill] sm:$0xff] %v11651_v36  ;;  %14985 = vst [vmem:[#allocation93_spill] sm:$0xff] %v11667_v3  ;;  %v14988_v36 = vld [vmem:[#allocation202_spill] sm:$0xff]  ;;  %v11679_v28 = vadd.f32 %v11635_v38, %v14990_v55  ;;  %v14994_v24 = vld [vmem:[#allocation208_spill] sm:$0xff]  ;;  %p7174_p0 = pnand %p7173_p13, %p7167_p10 }
 0x5a3   :  { %14987 = vst [vmem:[#allocation95_spill] sm:$0xff] %v11671_v25  ;;  %v11675_v9 = vadd.f32 %v11635_v38, %v14988_v36  ;;  %14993 = vst [vmem:[#allocation101_spill] sm:$0xff] %v11683_v39  ;;  %v11687_v12 = vadd.f32 %v11635_v38, %v14994_v24  ;;  %v14996_v3 = vld [vmem:[#allocation210_spill] sm:$0xff]  ;;  %v14998_v25 = vld [vmem:[#allocation212_spill] sm:$0xff] }
 0x5a4   :  { %14991 = vst [vmem:[#allocation99_spill] sm:$0xff] %v11679_v28  ;;  %v11691_v52 = vadd.f32 %v11635_v38, %v14996_v3  ;;  %v11695_v36 = vadd.f32 %v11635_v38, %v14998_v25  ;;  %v15002_v28 = vld [vmem:[#allocation216_spill] sm:$0xff]  ;;  %v15004_v39 = vld [vmem:[#allocation217_spill] sm:$0xff] }
 0x5a5   :  { %14989 = vst [vmem:[#allocation97_spill] sm:$0xff] %v11675_v9  ;;  %14995 = vst [vmem:[#allocation103_spill] sm:$0xff] %v11687_v12  ;;  %v15000_v9 = vld [vmem:[#allocation214_spill] sm:$0xff]  ;;  %v11703_v23 = vadd.f32 %v11635_v38, %v15002_v28  ;;  %v11707_v24 = vadd.f32 %v11635_v38, %v15004_v39 }
 0x5a6   :  { %14997 = vst [vmem:[#allocation105_spill] sm:$0xff] %v11691_v52  ;;  %14999 = vst [vmem:[#allocation107_spill] sm:$0xff] %v11695_v36  ;;  %v11699_v55 = vadd.f32 %v11635_v38, %v15000_v9  ;;  %v15006_v12 = vld [vmem:[#allocation218_spill] sm:$0xff]  ;;  %v15008_v52 = vld [vmem:[#allocation219_spill] sm:$0xff] }
 0x5a7   :  { %15003 = vst [vmem:[#allocation111_spill] sm:$0xff] %v11703_v23  ;;  %15005 = vst [vmem:[#allocation113_spill] sm:$0xff] %v11707_v24  ;;  %v11711_v3 = vadd.f32 %v11635_v38, %v15006_v12  ;;  %v11715_v25 = vadd.f32 %v11635_v38, %v15008_v52  ;;  %v15010_v36 = vld [vmem:[#allocation220_spill] sm:$0xff]  ;;  %v15014_v23 = vld [vmem:[#allocation233_spill] sm:$0xff] }
 0x5a8   :  { %15001 = vst [vmem:[#allocation109_spill] sm:$0xff] %v11699_v55  ;;  %v11719_v9 = vadd.f32 %v11635_v38, %v15010_v36  ;;  %v15012_v55 = vld [vmem:[#allocation232_spill] sm:$0xff]  ;;  %v11727_v39 = vadd.f32 %v11635_v38, %v15014_v23  ;;  %v15016_v24 = vld [vmem:[#allocation234_spill] sm:$0xff] }
 0x5a9   :  { %15007 = vst [vmem:[#allocation115_spill] sm:$0xff] %v11711_v3  ;;  %15009 = vst [vmem:[#allocation117_spill] sm:$0xff] %v11715_v25  ;;  %v11723_v28 = vadd.f32 %v11635_v38, %v15012_v55  ;;  %v11731_v12 = vadd.f32 %v11635_v38, %v15016_v24  ;;  %v15018_v3 = vld [vmem:[#allocation235_spill] sm:$0xff]  ;;  %v15020_v25 = vld [vmem:[#allocation236_spill] sm:$0xff] }
 0x5aa   :  { %15011 = vst [vmem:[#allocation119_spill] sm:$0xff] %v11719_v9  ;;  %15015 = vst [vmem:[#allocation123_spill] sm:$0xff] %v11727_v39  ;;  %v11735_v52 = vadd.f32 %v11635_v38, %v15018_v3  ;;  %v11739_v36 = vadd.f32 %v11635_v38, %v15020_v25  ;;  %v15022_v9 = vld [vmem:[#allocation237_spill] sm:$0xff]  ;;  %v15026_v39 = vld [vmem:[#allocation242_spill] sm:$0xff] }
 0x5ab   :  { %15013 = vst [vmem:[#allocation121_spill] sm:$0xff] %v11723_v28  ;;  %15017 = vst [vmem:[#allocation125_spill] sm:$0xff] %v11731_v12  ;;  %v11743_v55 = vadd.f32 %v11635_v38, %v15022_v9  ;;  %v15024_v28 = vld [vmem:[#allocation238_spill] sm:$0xff]  ;;  %v11751_v24 = vadd.f32 %v11635_v38, %v15026_v39  ;;  %v15028_v12 = vld [vmem:[#allocation244_spill] sm:$0xff] }
 0x5ac   :  { %15019 = vst [vmem:[#allocation127_spill] sm:$0xff] %v11735_v52  ;;  %15021 = vst [vmem:[#allocation129_spill] sm:$0xff] %v11739_v36  ;;  %v11747_v23 = vadd.f32 %v11635_v38, %v15024_v28  ;;  %v11755_v3 = vadd.f32 %v11635_v38, %v15028_v12  ;;  %v15030_v52 = vld [vmem:[#allocation167_spill] sm:$0xff]  ;;  %v15032_v36 = vld [vmem:[#allocation165_spill] sm:$0xff] }
 0x5ad   :  { %15023 = vst [vmem:[#allocation131_spill] sm:$0xff] %v11743_v55  ;;  %15027 = vst [vmem:[#allocation135_spill] sm:$0xff] %v11751_v24  ;;  %v11759_v25 = vadd.f32 %v11635_v38, %v15030_v52  ;;  %v11763_v9 = vadd.f32 %v11635_v38, %v15032_v36  ;;  %v15034_v55 = vld [vmem:[#allocation169_spill] sm:$0xff]  ;;  %v15038_v24 = vld [vmem:[#allocation228_spill] sm:$0xff] }
 0x5ae   :  { %15025 = vst [vmem:[#allocation133_spill] sm:$0xff] %v11747_v23  ;;  %15029 = vst [vmem:[#allocation137_spill] sm:$0xff] %v11755_v3  ;;  %v11767_v28 = vadd.f32 %v11635_v38, %v15034_v55  ;;  %v15036_v23 = vld [vmem:[#allocation171_spill] sm:$0xff]  ;;  %v11775_v12 = vadd.f32 %v11635_v38, %v15038_v24  ;;  %v15040_v3 = vld [vmem:[#allocation229_spill] sm:$0xff] }
 0x5af   :  { %15031 = vst [vmem:[#allocation139_spill] sm:$0xff] %v11759_v25  ;;  %15033 = vst [vmem:[#allocation141_spill] sm:$0xff] %v11763_v9  ;;  %v11771_v39 = vadd.f32 %v11635_v38, %v15036_v23  ;;  %v11779_v52 = vadd.f32 %v11635_v38, %v15040_v3  ;;  %v15042_v25 = vld [vmem:[#allocation230_spill] sm:$0xff]  ;;  %v15044_v9 = vld [vmem:[#allocation231_spill] sm:$0xff] }
 0x5b0   :  { %15035 = vst [vmem:[#allocation143_spill] sm:$0xff] %v11767_v28  ;;  %15039 = vst [vmem:[#allocation147_spill] sm:$0xff] %v11775_v12  ;;  %v11783_v36 = vadd.f32 %v11635_v38, %v15042_v25  ;;  %v11787_v55 = vadd.f32 %v11635_v38, %v15044_v9  ;;  %v15046_v28 = vld [vmem:[#allocation12_spill] sm:$0xff]  ;;  %v15050_v12 = vld [vmem:[#allocation170_spill] sm:$0xff] }
 0x5b1   :  { %15037 = vst [vmem:[#allocation145_spill] sm:$0xff] %v11771_v39  ;;  %15041 = vst [vmem:[#allocation149_spill] sm:$0xff] %v11779_v52  ;;  %v11791_v23 = vadd.f32 %v11635_v38, %v15046_v28  ;;  %v15048_v39 = vld [vmem:[#allocation13_spill] sm:$0xff]  ;;  %v11799_v3 = vadd.f32 %v11635_v38, %v15050_v12  ;;  %v15052_v52 = vld [vmem:[#allocation178_spill] sm:$0xff] }
 0x5b2   :  { %15043 = vst [vmem:[#allocation194_spill] sm:$0xff] %v11783_v36  ;;  %15045 = vst [vmem:[#allocation196_spill] sm:$0xff] %v11787_v55  ;;  %v11795_v24 = vadd.f32 %v11635_v38, %v15048_v39  ;;  %v11803_v25 = vadd.f32 %v11635_v38, %v15052_v52  ;;  %v15054_v36 = vld [vmem:[#allocation185_spill] sm:$0xff]  ;;  %v15056_v55 = vld [vmem:[#allocation151_spill] sm:$0xff] }
 0x5b3   :  { %15047 = vst [vmem:[#allocation198_spill] sm:$0xff] %v11791_v23  ;;  %15051 = vst [vmem:[#allocation202_spill] sm:$0xff] %v11799_v3  ;;  %v11807_v9 = vadd.f32 %v11635_v38, %v15054_v36  ;;  %v11811_v28 = vadd.f32 %v11635_v38, %v15056_v55  ;;  %v15058_v23 = vld [vmem:[#allocation153_spill] sm:$0xff] }
 0x5b4   :  { %15049 = vst [vmem:[#allocation200_spill] sm:$0xff] %v11795_v24  ;;  %15053 = vst [vmem:[#allocation204_spill] sm:$0xff] %v11803_v25  ;;  %v11815_v39 = vadd.f32 %v11635_v38, %v15058_v23  ;;  %v15060_v24 = vld [vmem:[#allocation155_spill] sm:$0xff]  ;;  %v15062_v3 = vld [vmem:[#allocation157_spill] sm:$0xff] }
 0x5b5   :  { %15055 = vst [vmem:[#allocation206_spill] sm:$0xff] %v11807_v9  ;;  %15057 = vst [vmem:[#allocation208_spill] sm:$0xff] %v11811_v28  ;;  %v11819_v12 = vadd.f32 %v11635_v38, %v15060_v24  ;;  %v11823_v52 = vadd.f32 %v11635_v38, %v15062_v3  ;;  %v15064_v25 = vld [vmem:[#allocation159_spill] sm:$0xff]  ;;  %v15066_v9 = vld [vmem:[#allocation161_spill] sm:$0xff] }
 0x5b6   :  { %15059 = vst [vmem:[#allocation210_spill] sm:$0xff] %v11815_v39  ;;  %v11827_v36 = vadd.f32 %v11635_v38, %v15064_v25  ;;  %v11831_v55 = vadd.f32 %v11635_v38, %v15066_v9  ;;  %v15068_v28 = vld [vmem:[#allocation163_spill] sm:$0xff]  ;;  %v15070_v39 = vld [vmem:[#allocation221_spill] sm:$0xff] }
 0x5b7   :  { %15061 = vst [vmem:[#allocation212_spill] sm:$0xff] %v11819_v12  ;;  %15063 = vst [vmem:[#allocation214_spill] sm:$0xff] %v11823_v52  ;;  %v11835_v23 = vadd.f32 %v11635_v38, %v15068_v28  ;;  %v11839_v24 = vadd.f32 %v11635_v38, %v15070_v39  ;;  %v15072_v12 = vld [vmem:[#allocation222_spill] sm:$0xff]  ;;  %v15074_v52 = vld [vmem:[#allocation223_spill] sm:$0xff] }
 0x5b8   :  { %15065 = vst [vmem:[#allocation216_spill] sm:$0xff] %v11827_v36  ;;  %15067 = vst [vmem:[#allocation217_spill] sm:$0xff] %v11831_v55  ;;  %v11843_v3 = vadd.f32 %v11635_v38, %v15072_v12  ;;  %v11847_v25 = vadd.f32 %v11635_v38, %v15074_v52  ;;  %v15076_v36 = vld [vmem:[#allocation224_spill] sm:$0xff]  ;;  %v15078_v55 = vld [vmem:[#allocation225_spill] sm:$0xff] }
 0x5b9   :  { %15069 = vst [vmem:[#allocation218_spill] sm:$0xff] %v11835_v23  ;;  %15071 = vst [vmem:[#allocation219_spill] sm:$0xff] %v11839_v24  ;;  %v11851_v9 = vadd.f32 %v11635_v38, %v15076_v36  ;;  %v11855_v28 = vadd.f32 %v11635_v38, %v15078_v55  ;;  %v15080_v23 = vld [vmem:[#allocation226_spill] sm:$0xff]  ;;  %v15082_v24 = vld [vmem:[#allocation227_spill] sm:$0xff] }
 0x5ba   :  { %15073 = vst [vmem:[#allocation220_spill] sm:$0xff] %v11843_v3  ;;  %15075 = vst [vmem:[#allocation232_spill] sm:$0xff] %v11847_v25  ;;  %v11859_v39 = vadd.f32 %v11635_v38, %v15080_v23  ;;  %v11863_v12 = vadd.f32 %v11635_v38, %v15082_v24  ;;  %v15084_v3 = vld [vmem:[#allocation239_spill] sm:$0xff]  ;;  %v15086_v25 = vld [vmem:[#allocation240_spill] sm:$0xff] }
 0x5bb   :  { %15077 = vst [vmem:[#allocation233_spill] sm:$0xff] %v11851_v9  ;;  %15079 = vst [vmem:[#allocation234_spill] sm:$0xff] %v11855_v28  ;;  %v11867_v52 = vadd.f32 %v11635_v38, %v15084_v3  ;;  %v11871_v36 = vadd.f32 %v11635_v38, %v15086_v25  ;;  %v15088_v9 = vld [vmem:[#allocation241_spill] sm:$0xff]  ;;  %v15090_v28 = vld [vmem:[#allocation243_spill] sm:$0xff] }
 0x5bc   :  { %15081 = vst [vmem:[#allocation235_spill] sm:$0xff] %v11859_v39  ;;  %15083 = vst [vmem:[#allocation236_spill] sm:$0xff] %v11863_v12  ;;  %v11875_v55 = vadd.f32 %v11635_v38, %v15088_v9  ;;  %v11879_v23 = vadd.f32 %v11635_v38, %v15090_v28  ;;  %v15092_v39 = vld [vmem:[#allocation245_spill] sm:$0xff]  ;;  %v15094_v12 = vld [vmem:[#allocation14_spill] sm:$0xff] }
 0x5bd   :  { %15085 = vst [vmem:[#allocation237_spill] sm:$0xff] %v11867_v52  ;;  %15087 = vst [vmem:[#allocation238_spill] sm:$0xff] %v11871_v36  ;;  %v11883_v24 = vadd.f32 %v11635_v38, %v15092_v39  ;;  %v11887_v3 = vadd.f32 %v11635_v38, %v15094_v12  ;;  %v15096_v52 = vld [vmem:[#allocation15_spill] sm:$0xff]  ;;  %v15098_v36 = vld [vmem:[#allocation16_spill] sm:$0xff] }
 0x5be   :  { %15089 = vst [vmem:[#allocation242_spill] sm:$0xff] %v11875_v55  ;;  %15091 = vst [vmem:[#allocation244_spill] sm:$0xff] %v11879_v23  ;;  %v11891_v25 = vadd.f32 %v11635_v38, %v15096_v52  ;;  %v11895_v9 = vadd.f32 %v11635_v38, %v15098_v36  ;;  %v15100_v55 = vld [vmem:[#allocation17_spill] sm:$0xff]  ;;  %v15102_v23 = vld [vmem:[#allocation18_spill] sm:$0xff] }
 0x5bf   :  { %15093 = vst [vmem:[#allocation167_spill] sm:$0xff] %v11883_v24  ;;  %15095 = vst [vmem:[#allocation165_spill] sm:$0xff] %v11887_v3  ;;  %v11899_v28 = vadd.f32 %v11635_v38, %v15100_v55  ;;  %v11903_v39 = vadd.f32 %v11635_v38, %v15102_v23  ;;  %v15104_v24 = vld [vmem:[#allocation19_spill] sm:$0xff]  ;;  %v15106_v3 = vld [vmem:[#allocation20_spill] sm:$0xff] }
 0x5c0   :  { %15097 = vst [vmem:[#allocation169_spill] sm:$0xff] %v11891_v25  ;;  %15099 = vst [vmem:[#allocation171_spill] sm:$0xff] %v11895_v9  ;;  %v11907_v12 = vadd.f32 %v11635_v38, %v15104_v24  ;;  %v11911_v52 = vadd.f32 %v11635_v38, %v15106_v3  ;;  %v15108_v25 = vld [vmem:[#allocation21_spill] sm:$0xff]  ;;  %v15110_v9 = vld [vmem:[#allocation22_spill] sm:$0xff] }
 0x5c1   :  { %15101 = vst [vmem:[#allocation228_spill] sm:$0xff] %v11899_v28  ;;  %15103 = vst [vmem:[#allocation229_spill] sm:$0xff] %v11903_v39  ;;  %v11915_v36 = vadd.f32 %v11635_v38, %v15108_v25  ;;  %v11919_v55 = vadd.f32 %v11635_v38, %v15110_v9  ;;  %v15112_v28 = vld [vmem:[#allocation23_spill] sm:$0xff]  ;;  %v15114_v39 = vld [vmem:[#allocation24_spill] sm:$0xff] }
 0x5c2   :  { %15105 = vst [vmem:[#allocation230_spill] sm:$0xff] %v11907_v12  ;;  %15107 = vst [vmem:[#allocation231_spill] sm:$0xff] %v11911_v52  ;;  %v11923_v23 = vadd.f32 %v11635_v38, %v15112_v28  ;;  %v11927_v24 = vadd.f32 %v11635_v38, %v15114_v39  ;;  %v15116_v12 = vld [vmem:[#allocation25_spill] sm:$0xff]  ;;  %v15118_v52 = vld [vmem:[#allocation26_spill] sm:$0xff] }
 0x5c3   :  { %15109 = vst [vmem:[#allocation12_spill] sm:$0xff] %v11915_v36  ;;  %15111 = vst [vmem:[#allocation13_spill] sm:$0xff] %v11919_v55  ;;  %v11931_v3 = vadd.f32 %v11635_v38, %v15116_v12  ;;  %v11935_v25 = vadd.f32 %v11635_v38, %v15118_v52  ;;  %v15120_v36 = vld [vmem:[#allocation27_spill] sm:$0xff]  ;;  %v15122_v55 = vld [vmem:[#allocation28_spill] sm:$0xff] }
 0x5c4   :  { %15113 = vst [vmem:[#allocation170_spill] sm:$0xff] %v11923_v23  ;;  %15115 = vst [vmem:[#allocation178_spill] sm:$0xff] %v11927_v24  ;;  %v11939_v9 = vadd.f32 %v11635_v38, %v15120_v36  ;;  %v11943_v28 = vadd.f32 %v11635_v38, %v15122_v55  ;;  %v15124_v23 = vld [vmem:[#allocation29_spill] sm:$0xff]  ;;  %v15126_v24 = vld [vmem:[#allocation30_spill] sm:$0xff] }
 0x5c5   :  { %15117 = vst [vmem:[#allocation185_spill] sm:$0xff] %v11931_v3  ;;  %15119 = vst [vmem:[#allocation151_spill] sm:$0xff] %v11935_v25  ;;  %v11947_v39 = vadd.f32 %v11635_v38, %v15124_v23  ;;  %v11951_v12 = vadd.f32 %v11635_v38, %v15126_v24  ;;  %v15127_v3 = vld [vmem:[#allocation31_spill] sm:$0xff]  ;;  %v15129_v25 = vld [vmem:[#allocation32_spill] sm:$0xff] }
 0x5c6   :  { %15121 = vst [vmem:[#allocation153_spill] sm:$0xff] %v11939_v9  ;;  %15123 = vst [vmem:[#allocation155_spill] sm:$0xff] %v11943_v28  ;;  %v11955_v52 = vadd.f32 %v11635_v38, %v15127_v3  ;;  %v11959_v36 = vadd.f32 %v11635_v38, %v15129_v25  ;;  %v15131_v9 = vld [vmem:[#allocation33_spill] sm:$0xff]  ;;  %v15133_v28 = vld [vmem:[#allocation34_spill] sm:$0xff]  ;;  %v11975_v3 = vadd.f32 %v11635_v38, %v10950_v59 }
 0x5c7   :  { %15125 = vst [vmem:[#allocation157_spill] sm:$0xff] %v11947_v39  ;;  %v11963_v55 = vadd.f32 %v11635_v38, %v15131_v9  ;;  %v11967_v23 = vadd.f32 %v11635_v38, %v15133_v28  ;;  %v15135_v39 = vld [vmem:[#allocation35_spill] sm:$0xff] }
 0x5c8   :  { %15128 = vst [vmem:[#allocation159_spill] sm:$0xff] %v11955_v52  ;;  %15130 = vst [vmem:[#allocation161_spill] sm:$0xff] %v11959_v36  ;;  %v11971_v24 = vadd.f32 %v11635_v38, %v15135_v39  ;;  %v15138_v52 = vld [vmem:[#allocation36_spill] sm:$0xff]  ;;  %v15139_v36 = vld [vmem:[#allocation37_spill] sm:$0xff] }
 0x5c9   :  { %15132 = vst [vmem:[#allocation163_spill] sm:$0xff] %v11963_v55  ;;  %15134 = vst [vmem:[#allocation221_spill] sm:$0xff] %v11967_v23  ;;  %v11979_v25 = vadd.f32 %v11635_v38, %v15138_v52  ;;  %v11983_v9 = vadd.f32 %v11635_v38, %v15139_v36  ;;  %v15141_v55 = vld [vmem:[#allocation38_spill] sm:$0xff]  ;;  %v15143_v23 = vld [vmem:[#allocation39_spill] sm:$0xff]  ;;  %v12003_v36 = vadd.f32 %v11635_v38, %v10978_v5 }
 0x5ca   :  { %15136 = vst [vmem:[#allocation222_spill] sm:$0xff] %v11971_v24  ;;  %15137 = vst [vmem:[#allocation223_spill] sm:$0xff] %v11975_v3  ;;  %v11987_v28 = vadd.f32 %v11635_v38, %v15141_v55  ;;  %v11991_v39 = vadd.f32 %v11635_v38, %v15143_v23  ;;  %v15145_v24 = vld [vmem:[#allocation40_spill] sm:$0xff]  ;;  %v15147_v3 = vld [vmem:[#allocation41_spill] sm:$0xff] }
 0x5cb   :  { %15140 = vst [vmem:[#allocation224_spill] sm:$0xff] %v11983_v9  ;;  %v11995_v59 = vadd.f32 %v11635_v38, %v15145_v24  ;;  %v11999_v52 = vadd.f32 %v11635_v38, %v15147_v3  ;;  %15149 = vst [vmem:[#allocation240_spill] sm:$0xff] %v12003_v36  ;;  %v15150_v9 = vld [vmem:[#allocation42_spill] sm:$0xff]  ;;  %v15159_v36 = vld [vmem:[#allocation52_spill] sm:$0xff] }
 0x5cc   :  { %15142 = vst [vmem:[#allocation225_spill] sm:$0xff] %v11987_v28  ;;  %15144 = vst [vmem:[#allocation226_spill] sm:$0xff] %v11991_v39  ;;  %v12007_v55 = vadd.f32 %v11635_v38, %v15150_v9  ;;  %v15151_v28 = vld [vmem:[#allocation44_spill] sm:$0xff]  ;;  %v15153_v39 = vld [vmem:[#allocation46_spill] sm:$0xff]  ;;  %v12027_v9 = vadd.f32 %v11635_v38, %v15159_v36 }
 0x5cd   :  { %15146 = vst [vmem:[#allocation227_spill] sm:$0xff] %v11995_v59  ;;  %15148 = vst [vmem:[#allocation239_spill] sm:$0xff] %v11999_v52  ;;  %v12011_v23 = vadd.f32 %v11635_v38, %v15151_v28  ;;  %v12015_v24 = vadd.f32 %v11635_v38, %v15153_v39  ;;  %v15155_v59 = vld [vmem:[#allocation48_spill] sm:$0xff]  ;;  %v15157_v52 = vld [vmem:[#allocation50_spill] sm:$0xff]  ;;  %v12031_v28 = vadd.f32 %v11635_v38, %v11006_v13 }
 0x5ce   :  { %v12019_v3 = vadd.f32 %v11635_v38, %v15155_v59  ;;  %v12023_v5 = vadd.f32 %v11635_v38, %v15157_v52  ;;  %15160 = vst [vmem:[#allocation15_spill] sm:$0xff] %v12027_v9  ;;  %v15170_v9 = vld [vmem:[#allocation62_spill] sm:$0xff] }
 0x5cf   :  { %15152 = vst [vmem:[#allocation241_spill] sm:$0xff] %v12011_v23  ;;  %15154 = vst [vmem:[#allocation243_spill] sm:$0xff] %v12015_v24  ;;  %v15162_v23 = vld [vmem:[#allocation54_spill] sm:$0xff]  ;;  %v15164_v24 = vld [vmem:[#allocation56_spill] sm:$0xff]  ;;  %v12051_v13 = vadd.f32 %v11635_v38, %v15170_v9 }
 0x5d0   :  { %15156 = vst [vmem:[#allocation245_spill] sm:$0xff] %v12019_v3  ;;  %15158 = vst [vmem:[#allocation14_spill] sm:$0xff] %v12023_v5  ;;  %v12035_v39 = vadd.f32 %v11635_v38, %v15162_v23  ;;  %v12039_v59 = vadd.f32 %v11635_v38, %v15164_v24  ;;  %v15166_v3 = vld [vmem:[#allocation58_spill] sm:$0xff]  ;;  %v15168_v5 = vld [vmem:[#allocation60_spill] sm:$0xff] }
 0x5d1   :  { %15161 = vst [vmem:[#allocation16_spill] sm:$0xff] %v12031_v28  ;;  %v12043_v52 = vadd.f32 %v11635_v38, %v15166_v3  ;;  %v12047_v36 = vadd.f32 %v11635_v38, %v15168_v5  ;;  %15171 = vst [vmem:[#allocation21_spill] sm:$0xff] %v12051_v13  ;;  %v15172_v28 = vld [vmem:[#allocation64_spill] sm:$0xff]  ;;  %v15182_v13 = vld [vmem:[#allocation74_spill] sm:$0xff] }
 0x5d2   :  { %15163 = vst [vmem:[#allocation17_spill] sm:$0xff] %v12035_v39  ;;  %15165 = vst [vmem:[#allocation18_spill] sm:$0xff] %v12039_v59  ;;  %v12055_v23 = vadd.f32 %v11635_v38, %v15172_v28  ;;  %v15174_v39 = vld [vmem:[#allocation66_spill] sm:$0xff]  ;;  %v15176_v59 = vld [vmem:[#allocation68_spill] sm:$0xff]  ;;  %v12075_v28 = vadd.f32 %v11635_v38, %v15182_v13 }
 0x5d3   :  { %15167 = vst [vmem:[#allocation19_spill] sm:$0xff] %v12043_v52  ;;  %15169 = vst [vmem:[#allocation20_spill] sm:$0xff] %v12047_v36  ;;  %v12059_v24 = vadd.f32 %v11635_v38, %v15174_v39  ;;  %v12063_v3 = vadd.f32 %v11635_v38, %v15176_v59  ;;  %v15178_v52 = vld [vmem:[#allocation70_spill] sm:$0xff]  ;;  %v15180_v36 = vld [vmem:[#allocation72_spill] sm:$0xff] }
 0x5d4   :  { %15173 = vst [vmem:[#allocation22_spill] sm:$0xff] %v12055_v23  ;;  %v12067_v5 = vadd.f32 %v11635_v38, %v15178_v52  ;;  %v12071_v9 = vadd.f32 %v11635_v38, %v15180_v36  ;;  %15183 = vst [vmem:[#allocation27_spill] sm:$0xff] %v12075_v28  ;;  %v15184_v23 = vld [vmem:[#allocation76_spill] sm:$0xff]  ;;  %v15194_v28 = vld [vmem:[#allocation86_spill] sm:$0xff] }
 0x5d5   :  { %15175 = vst [vmem:[#allocation23_spill] sm:$0xff] %v12059_v24  ;;  %15177 = vst [vmem:[#allocation24_spill] sm:$0xff] %v12063_v3  ;;  %v12079_v39 = vadd.f32 %v11635_v38, %v15184_v23  ;;  %v15186_v24 = vld [vmem:[#allocation78_spill] sm:$0xff]  ;;  %v15188_v3 = vld [vmem:[#allocation80_spill] sm:$0xff]  ;;  %v12099_v23 = vadd.f32 %v11635_v38, %v15194_v28 }
 0x5d6   :  { %15179 = vst [vmem:[#allocation25_spill] sm:$0xff] %v12067_v5  ;;  %15181 = vst [vmem:[#allocation26_spill] sm:$0xff] %v12071_v9  ;;  %v12083_v59 = vadd.f32 %v11635_v38, %v15186_v24  ;;  %v12087_v52 = vadd.f32 %v11635_v38, %v15188_v3  ;;  %v15190_v5 = vld [vmem:[#allocation82_spill] sm:$0xff]  ;;  %v15192_v9 = vld [vmem:[#allocation84_spill] sm:$0xff] }
 0x5d7   :  { %15185 = vst [vmem:[#allocation28_spill] sm:$0xff] %v12079_v39  ;;  %v12091_v36 = vadd.f32 %v11635_v38, %v15190_v5  ;;  %v12095_v13 = vadd.f32 %v11635_v38, %v15192_v9  ;;  %15195 = vst [vmem:[#allocation33_spill] sm:$0xff] %v12099_v23  ;;  %v15196_v39 = vld [vmem:[#allocation88_spill] sm:$0xff]  ;;  %v15206_v23 = vld [vmem:[#allocation98_spill] sm:$0xff] }
 0x5d8   :  { %15187 = vst [vmem:[#allocation29_spill] sm:$0xff] %v12083_v59  ;;  %15189 = vst [vmem:[#allocation30_spill] sm:$0xff] %v12087_v52  ;;  %v12103_v24 = vadd.f32 %v11635_v38, %v15196_v39  ;;  %v15198_v59 = vld [vmem:[#allocation90_spill] sm:$0xff]  ;;  %v15200_v52 = vld [vmem:[#allocation92_spill] sm:$0xff]  ;;  %v12123_v39 = vadd.f32 %v11635_v38, %v15206_v23 }
 0x5d9   :  { %15191 = vst [vmem:[#allocation31_spill] sm:$0xff] %v12091_v36  ;;  %15193 = vst [vmem:[#allocation32_spill] sm:$0xff] %v12095_v13  ;;  %v12107_v3 = vadd.f32 %v11635_v38, %v15198_v59  ;;  %v12111_v5 = vadd.f32 %v11635_v38, %v15200_v52  ;;  %v15202_v36 = vld [vmem:[#allocation94_spill] sm:$0xff]  ;;  %v15204_v13 = vld [vmem:[#allocation96_spill] sm:$0xff] }
 0x5da   :  { %15197 = vst [vmem:[#allocation34_spill] sm:$0xff] %v12103_v24  ;;  %v12115_v9 = vadd.f32 %v11635_v38, %v15202_v36  ;;  %v12119_v28 = vadd.f32 %v11635_v38, %v15204_v13  ;;  %15207 = vst [vmem:[#allocation39_spill] sm:$0xff] %v12123_v39  ;;  %v15208_v24 = vld [vmem:[#allocation100_spill] sm:$0xff]  ;;  %v15218_v39 = vld [vmem:[#allocation110_spill] sm:$0xff] }
 0x5db   :  { %15199 = vst [vmem:[#allocation35_spill] sm:$0xff] %v12107_v3  ;;  %15201 = vst [vmem:[#allocation36_spill] sm:$0xff] %v12111_v5  ;;  %v12127_v59 = vadd.f32 %v11635_v38, %v15208_v24  ;;  %v15210_v3 = vld [vmem:[#allocation102_spill] sm:$0xff]  ;;  %v15212_v5 = vld [vmem:[#allocation104_spill] sm:$0xff]  ;;  %v12147_v24 = vadd.f32 %v11635_v38, %v15218_v39 }
 0x5dc   :  { %15203 = vst [vmem:[#allocation37_spill] sm:$0xff] %v12115_v9  ;;  %15205 = vst [vmem:[#allocation38_spill] sm:$0xff] %v12119_v28  ;;  %v12131_v52 = vadd.f32 %v11635_v38, %v15210_v3  ;;  %v12135_v36 = vadd.f32 %v11635_v38, %v15212_v5  ;;  %v15214_v9 = vld [vmem:[#allocation106_spill] sm:$0xff]  ;;  %v15216_v28 = vld [vmem:[#allocation108_spill] sm:$0xff] }
 0x5dd   :  { %15209 = vst [vmem:[#allocation40_spill] sm:$0xff] %v12127_v59  ;;  %v12139_v13 = vadd.f32 %v11635_v38, %v15214_v9  ;;  %v12143_v23 = vadd.f32 %v11635_v38, %v15216_v28  ;;  %15219 = vst [vmem:[#allocation48_spill] sm:$0xff] %v12147_v24  ;;  %v15220_v59 = vld [vmem:[#allocation112_spill] sm:$0xff]  ;;  %v15230_v24 = vld [vmem:[#allocation122_spill] sm:$0xff] }
 0x5de   :  { %15211 = vst [vmem:[#allocation41_spill] sm:$0xff] %v12131_v52  ;;  %15213 = vst [vmem:[#allocation42_spill] sm:$0xff] %v12135_v36  ;;  %v12151_v3 = vadd.f32 %v11635_v38, %v15220_v59  ;;  %v15222_v52 = vld [vmem:[#allocation114_spill] sm:$0xff]  ;;  %v15224_v36 = vld [vmem:[#allocation116_spill] sm:$0xff]  ;;  %v12171_v59 = vadd.f32 %v11635_v38, %v15230_v24 }
 0x5df   :  { %15215 = vst [vmem:[#allocation44_spill] sm:$0xff] %v12139_v13  ;;  %15217 = vst [vmem:[#allocation46_spill] sm:$0xff] %v12143_v23  ;;  %v12155_v5 = vadd.f32 %v11635_v38, %v15222_v52  ;;  %v12159_v9 = vadd.f32 %v11635_v38, %v15224_v36  ;;  %v15226_v13 = vld [vmem:[#allocation118_spill] sm:$0xff]  ;;  %v15228_v23 = vld [vmem:[#allocation120_spill] sm:$0xff] }
 0x5e0   :  { %15221 = vst [vmem:[#allocation50_spill] sm:$0xff] %v12151_v3  ;;  %v12163_v28 = vadd.f32 %v11635_v38, %v15226_v13  ;;  %v12167_v39 = vadd.f32 %v11635_v38, %v15228_v23  ;;  %15231 = vst [vmem:[#allocation60_spill] sm:$0xff] %v12171_v59  ;;  %v15232_v3 = vld [vmem:[#allocation124_spill] sm:$0xff]  ;;  %v15242_v59 = vld [vmem:[#allocation134_spill] sm:$0xff] }
 0x5e1   :  { %15223 = vst [vmem:[#allocation52_spill] sm:$0xff] %v12155_v5  ;;  %15225 = vst [vmem:[#allocation54_spill] sm:$0xff] %v12159_v9  ;;  %v12175_v52 = vadd.f32 %v11635_v38, %v15232_v3  ;;  %v15234_v5 = vld [vmem:[#allocation126_spill] sm:$0xff]  ;;  %v15236_v9 = vld [vmem:[#allocation128_spill] sm:$0xff]  ;;  %v12195_v3 = vadd.f32 %v11635_v38, %v15242_v59 }
 0x5e2   :  { %15227 = vst [vmem:[#allocation56_spill] sm:$0xff] %v12163_v28  ;;  %15229 = vst [vmem:[#allocation58_spill] sm:$0xff] %v12167_v39  ;;  %v12179_v36 = vadd.f32 %v11635_v38, %v15234_v5  ;;  %v12183_v13 = vadd.f32 %v11635_v38, %v15236_v9  ;;  %v15238_v28 = vld [vmem:[#allocation130_spill] sm:$0xff]  ;;  %v15240_v39 = vld [vmem:[#allocation132_spill] sm:$0xff] }
 0x5e3   :  { %15233 = vst [vmem:[#allocation62_spill] sm:$0xff] %v12175_v52  ;;  %v12187_v23 = vadd.f32 %v11635_v38, %v15238_v28  ;;  %v12191_v24 = vadd.f32 %v11635_v38, %v15240_v39  ;;  %15243 = vst [vmem:[#allocation72_spill] sm:$0xff] %v12195_v3  ;;  %v15244_v52 = vld [vmem:[#allocation136_spill] sm:$0xff]  ;;  %v15254_v3 = vld [vmem:[#allocation146_spill] sm:$0xff] }
 0x5e4   :  { %15235 = vst [vmem:[#allocation64_spill] sm:$0xff] %v12179_v36  ;;  %15237 = vst [vmem:[#allocation66_spill] sm:$0xff] %v12183_v13  ;;  %v12199_v5 = vadd.f32 %v11635_v38, %v15244_v52  ;;  %v15246_v36 = vld [vmem:[#allocation138_spill] sm:$0xff]  ;;  %v15248_v13 = vld [vmem:[#allocation140_spill] sm:$0xff]  ;;  %v12219_v52 = vadd.f32 %v11635_v38, %v15254_v3 }
 0x5e5   :  { %15239 = vst [vmem:[#allocation68_spill] sm:$0xff] %v12187_v23  ;;  %15241 = vst [vmem:[#allocation70_spill] sm:$0xff] %v12191_v24  ;;  %v12203_v9 = vadd.f32 %v11635_v38, %v15246_v36  ;;  %v12207_v28 = vadd.f32 %v11635_v38, %v15248_v13  ;;  %v15250_v23 = vld [vmem:[#allocation142_spill] sm:$0xff]  ;;  %v15252_v24 = vld [vmem:[#allocation144_spill] sm:$0xff] }
 0x5e6   :  { %15245 = vst [vmem:[#allocation74_spill] sm:$0xff] %v12199_v5  ;;  %v12211_v39 = vadd.f32 %v11635_v38, %v15250_v23  ;;  %v12215_v59 = vadd.f32 %v11635_v38, %v15252_v24  ;;  %15255 = vst [vmem:[#allocation84_spill] sm:$0xff] %v12219_v52  ;;  %v15256_v5 = vld [vmem:[#allocation148_spill] sm:$0xff]  ;;  %v15266_v52 = vld [vmem:[#allocation158_spill] sm:$0xff] }
 0x5e7   :  { %15247 = vst [vmem:[#allocation76_spill] sm:$0xff] %v12203_v9  ;;  %15249 = vst [vmem:[#allocation78_spill] sm:$0xff] %v12207_v28  ;;  %v12223_v36 = vadd.f32 %v11635_v38, %v15256_v5  ;;  %v15258_v9 = vld [vmem:[#allocation150_spill] sm:$0xff]  ;;  %v15260_v28 = vld [vmem:[#allocation152_spill] sm:$0xff]  ;;  %v12243_v5 = vadd.f32 %v11635_v38, %v15266_v52 }
 0x5e8   :  { %15251 = vst [vmem:[#allocation80_spill] sm:$0xff] %v12211_v39  ;;  %15253 = vst [vmem:[#allocation82_spill] sm:$0xff] %v12215_v59  ;;  %v12227_v13 = vadd.f32 %v11635_v38, %v15258_v9  ;;  %v12231_v23 = vadd.f32 %v11635_v38, %v15260_v28  ;;  %v15262_v39 = vld [vmem:[#allocation154_spill] sm:$0xff]  ;;  %v15264_v59 = vld [vmem:[#allocation156_spill] sm:$0xff] }
 0x5e9   :  { %15257 = vst [vmem:[#allocation86_spill] sm:$0xff] %v12223_v36  ;;  %v12235_v24 = vadd.f32 %v11635_v38, %v15262_v39  ;;  %v12239_v3 = vadd.f32 %v11635_v38, %v15264_v59  ;;  %15267 = vst [vmem:[#allocation96_spill] sm:$0xff] %v12243_v5  ;;  %v15268_v36 = vld [vmem:[#allocation160_spill] sm:$0xff] }
 0x5ea   :  { %15259 = vst [vmem:[#allocation88_spill] sm:$0xff] %v12227_v13  ;;  %15261 = vst [vmem:[#allocation90_spill] sm:$0xff] %v12231_v23  ;;  %v12247_v9 = vadd.f32 %v11635_v38, %v15268_v36  ;;  %v15270_v13 = vld [vmem:[#allocation162_spill] sm:$0xff]  ;;  %v15272_v23 = vld [vmem:[#allocation164_spill] sm:$0xff] }
 0x5eb   :  { %15263 = vst [vmem:[#allocation92_spill] sm:$0xff] %v12235_v24  ;;  %15265 = vst [vmem:[#allocation94_spill] sm:$0xff] %v12239_v3  ;;  %v12251_v28 = vadd.f32 %v11635_v38, %v15270_v13  ;;  %v12255_v39 = vadd.f32 %v11635_v38, %v15272_v23  ;;  %v15274_v24 = vld [vmem:[#allocation166_spill] sm:$0xff]  ;;  %v15276_v3 = vld [vmem:[#allocation168_spill] sm:$0xff] }
 0x5ec   :  { %15269 = vst [vmem:[#allocation98_spill] sm:$0xff] %v12247_v9  ;;  %v12259_v59 = vadd.f32 %v11635_v38, %v15274_v24  ;;  %v12263_v52 = vadd.f32 %v11635_v38, %v15276_v3  ;;  %v15278_v5 = vld [vmem:[#allocation172_spill] sm:$0xff]  ;;  %v15280_v9 = vld [vmem:[#allocation173_spill] sm:$0xff] }
 0x5ed   :  { %15271 = vst [vmem:[#allocation100_spill] sm:$0xff] %v12251_v28  ;;  %15273 = vst [vmem:[#allocation102_spill] sm:$0xff] %v12255_v39  ;;  %v12267_v36 = vadd.f32 %v11635_v38, %v15278_v5  ;;  %v12271_v13 = vadd.f32 %v11635_v38, %v15280_v9  ;;  %v15282_v28 = vld [vmem:[#allocation174_spill] sm:$0xff]  ;;  %v15284_v39 = vld [vmem:[#allocation175_spill] sm:$0xff] }
 0x5ee   :  { %15275 = vst [vmem:[#allocation104_spill] sm:$0xff] %v12259_v59  ;;  %15277 = vst [vmem:[#allocation106_spill] sm:$0xff] %v12263_v52  ;;  %v12275_v23 = vadd.f32 %v11635_v38, %v15282_v28  ;;  %v12279_v24 = vadd.f32 %v11635_v38, %v15284_v39  ;;  %v15286_v59 = vld [vmem:[#allocation176_spill] sm:$0xff]  ;;  %v15288_v52 = vld [vmem:[#allocation177_spill] sm:$0xff] }
 0x5ef   :  { %15279 = vst [vmem:[#allocation108_spill] sm:$0xff] %v12267_v36  ;;  %15281 = vst [vmem:[#allocation110_spill] sm:$0xff] %v12271_v13  ;;  %v12283_v3 = vadd.f32 %v11635_v38, %v15286_v59  ;;  %v12287_v5 = vadd.f32 %v11635_v38, %v15288_v52  ;;  %v15290_v36 = vld [vmem:[#allocation179_spill] sm:$0xff]  ;;  %v15292_v13 = vld [vmem:[#allocation180_spill] sm:$0xff] }
 0x5f0   :  { %15283 = vst [vmem:[#allocation112_spill] sm:$0xff] %v12275_v23  ;;  %15285 = vst [vmem:[#allocation114_spill] sm:$0xff] %v12279_v24  ;;  %v12291_v9 = vadd.f32 %v11635_v38, %v15290_v36  ;;  %v12295_v28 = vadd.f32 %v11635_v38, %v15292_v13  ;;  %v15294_v23 = vld [vmem:[#allocation181_spill] sm:$0xff]  ;;  %v15296_v24 = vld [vmem:[#allocation182_spill] sm:$0xff] }
 0x5f1   :  { %15287 = vst [vmem:[#allocation116_spill] sm:$0xff] %v12283_v3  ;;  %15289 = vst [vmem:[#allocation118_spill] sm:$0xff] %v12287_v5  ;;  %v12299_v39 = vadd.f32 %v11635_v38, %v15294_v23  ;;  %v12303_v59 = vadd.f32 %v11635_v38, %v15296_v24  ;;  %v15297_v3 = vld [vmem:[#allocation183_spill] sm:$0xff]  ;;  %v15298_v5 = vld [vmem:[#allocation184_spill] sm:$0xff] }
 0x5f2   :  { %15291 = vst [vmem:[#allocation120_spill] sm:$0xff] %v12291_v9  ;;  %15293 = vst [vmem:[#allocation122_spill] sm:$0xff] %v12295_v28  ;;  %v12307_v52 = vadd.f32 %v11635_v38, %v15297_v3  ;;  %v12311_v36 = vadd.f32 %v11635_v38, %v15298_v5  ;;  %v15299_v9 = vld [vmem:[#allocation186_spill] sm:$0xff]  ;;  %v15300_v28 = vld [vmem:[#allocation187_spill] sm:$0xff]  ;;  %v12327_v3 = vadd.f32 %v11635_v38, %v11302_v29 }
 0x5f3   :  { %15295 = vst [vmem:[#allocation124_spill] sm:$0xff] %v12299_v39  ;;  %v12315_v13 = vadd.f32 %v11635_v38, %v15299_v9  ;;  %v12319_v23 = vadd.f32 %v11635_v38, %v15300_v28  ;;  %v15301_v39 = vld [vmem:[#allocation188_spill] sm:$0xff]  ;;  %v12331_v5 = vadd.f32 %v11635_v38, %v11306_v50  ;;  %v12335_v9 = vadd.f32 %v11635_v38, %v11310_v20 }
 0x5f4   :  { %v12323_v24 = vadd.f32 %v11635_v38, %v15301_v39  ;;  %v12339_v28 = vadd.f32 %v11635_v38, %v11314_v17  ;;  %v12343_v39 = vadd.f32 %v11635_v38, %v11318_v22  ;;  %v12347_v29 = vadd.f32 %v11635_v38, %v11322_v63 }
 0x5f5   :  { %v12351_v50 = vadd.f32 %v11635_v38, %v11326_v32  ;;  %v12355_v20 = vadd.f32 %v11635_v38, %v11330_v41  ;;  %v12359_v17 = vadd.f32 %v11635_v38, %v11334_v7  ;;  %v12363_v22 = vadd.f32 %v11635_v38, %v11338_v31 }
 0x5f6   :  { %v12367_v63 = vadd.f32 %v11635_v38, %v11342_v46  ;;  %v12371_v32 = vadd.f32 %v11635_v38, %v11346_v16  ;;  %v12375_v41 = vadd.f32 %v11635_v38, %v11350_v58  ;;  %v12379_v7 = vadd.f32 %v11635_v38, %v11354_v37 }
 0x5f7   :  { %v12383_v31 = vadd.f32 %v11635_v38, %v11358_v0  ;;  %v12387_v46 = vadd.f32 %v11635_v38, %v11362_v2  ;;  %v12391_v16 = vadd.f32 %v11635_v38, %v11366_v60  ;;  %v12395_v58 = vadd.f32 %v11635_v38, %v11370_v10 }
 0x5f8   :  { %v12399_v37 = vadd.f32 %v11635_v38, %v11374_v42  ;;  %v12403_v0 = vadd.f32 %v11635_v38, %v11378_v34  ;;  %v12407_v2 = vadd.f32 %v11635_v38, %v11382_v27  ;;  %v12411_v60 = vadd.f32 %v11635_v38, %v11386_v30 }
 0x5f9   :  { %v12415_v10 = vadd.f32 %v11635_v38, %v11390_v6  ;;  %v12419_v42 = vadd.f32 %v11635_v38, %v11394_v33  ;;  %v12423_v34 = vadd.f32 %v11635_v38, %v11398_v4  ;;  %v12427_v27 = vadd.f32 %v11635_v38, %v11402_v1 }
 0x5fa   :  { %v12431_v30 = vadd.f32 %v11635_v38, %v11406_v18  ;;  %v12435_v6 = vadd.f32 %v11635_v38, %v11410_v35  ;;  %v12439_v33 = vadd.f32 %v11635_v38, %v11414_v8  ;;  %v12443_v4 = vadd.f32 %v11635_v38, %v11418_v48 }
 0x5fb   :  { %v12447_v1 = vadd.f32 %v11635_v38, %v11422_v21  ;;  %v12451_v18 = vadd.f32 %v11635_v38, %v11426_v40 }
 0x5fc   :  { %15302 = vst [vmem:[#allocation126_spill] sm:$0xff] %v12431_v30  ;;  %15303 = vst [vmem:[#allocation128_spill] sm:$0xff] %v12435_v6  ;;  %v15308_v30 = vld [vmem:[#allocation189_spill] sm:$0xff]  ;;  %v15310_v6 = vld [vmem:[#allocation190_spill] sm:$0xff] }
 0x5fd   :  { %15304 = vst [vmem:[#allocation130_spill] sm:$0xff] %v12439_v33  ;;  %15305 = vst [vmem:[#allocation132_spill] sm:$0xff] %v12443_v4  ;;  %v12455_v35 = vadd.f32 %v11635_v38, %v15308_v30  ;;  %v12459_v8 = vadd.f32 %v11635_v38, %v15310_v6  ;;  %v15312_v33 = vld [vmem:[#allocation191_spill] sm:$0xff]  ;;  %v15314_v4 = vld [vmem:[#allocation192_spill] sm:$0xff] }
 0x5fe   :  { %15306 = vst [vmem:[#allocation134_spill] sm:$0xff] %v12447_v1  ;;  %15307 = vst [vmem:[#allocation136_spill] sm:$0xff] %v12451_v18  ;;  %v12463_v48 = vadd.f32 %v11635_v38, %v15312_v33  ;;  %v12467_v21 = vadd.f32 %v11635_v38, %v15314_v4  ;;  %v15316_v1 = vld [vmem:[#allocation193_spill] sm:$0xff]  ;;  %v15318_v18 = vld [vmem:[#allocation195_spill] sm:$0xff] }
 0x5ff   :  { %15309 = vst [vmem:[#allocation138_spill] sm:$0xff] %v12455_v35  ;;  %15311 = vst [vmem:[#allocation140_spill] sm:$0xff] %v12459_v8  ;;  %v12471_v40 = vadd.f32 %v11635_v38, %v15316_v1  ;;  %v12475_v30 = vadd.f32 %v11635_v38, %v15318_v18  ;;  %v15320_v35 = vld [vmem:[#allocation197_spill] sm:$0xff]  ;;  %v15322_v8 = vld [vmem:[#allocation199_spill] sm:$0xff] }
 0x600   :  { %15313 = vst [vmem:[#allocation142_spill] sm:$0xff] %v12463_v48  ;;  %15315 = vst [vmem:[#allocation144_spill] sm:$0xff] %v12467_v21  ;;  %v12479_v6 = vadd.f32 %v11635_v38, %v15320_v35  ;;  %v12483_v33 = vadd.f32 %v11635_v38, %v15322_v8  ;;  %v15324_v48 = vld [vmem:[#allocation201_spill] sm:$0xff]  ;;  %v15326_v21 = vld [vmem:[#allocation203_spill] sm:$0xff] }
 0x601   :  { %15317 = vst [vmem:[#allocation146_spill] sm:$0xff] %v12471_v40  ;;  %15319 = vst [vmem:[#allocation148_spill] sm:$0xff] %v12475_v30  ;;  %v12487_v4 = vadd.f32 %v11635_v38, %v15324_v48  ;;  %v12491_v1 = vadd.f32 %v11635_v38, %v15326_v21  ;;  %v15328_v40 = vld [vmem:[#allocation205_spill] sm:$0xff]  ;;  %v15329_v30 = vld [vmem:[#allocation207_spill] sm:$0xff] }
 0x602   :  { %15321 = vst [vmem:[#allocation150_spill] sm:$0xff] %v12479_v6  ;;  %15323 = vst [vmem:[#allocation152_spill] sm:$0xff] %v12483_v33  ;;  %v12495_v18 = vadd.f32 %v11635_v38, %v15328_v40  ;;  %v12499_v35 = vadd.f32 %v11635_v38, %v15329_v30  ;;  %v15330_v6 = vld [vmem:[#allocation209_spill] sm:$0xff]  ;;  %v15331_v33 = vld [vmem:[#allocation211_spill] sm:$0xff]  ;;  %v12519_v30 = vadd.f32 %v11635_v38, %v11494_v19 }
 0x603   :  { %15325 = vst [vmem:[#allocation154_spill] sm:$0xff] %v12487_v4  ;;  %15327 = vst [vmem:[#allocation156_spill] sm:$0xff] %v12491_v1  ;;  %v12503_v8 = vadd.f32 %v11635_v38, %v15330_v6  ;;  %v12507_v48 = vadd.f32 %v11635_v38, %v15331_v33  ;;  %v15332_v4 = vld [vmem:[#allocation213_spill] sm:$0xff]  ;;  %v15333_v1 = vld [vmem:[#allocation215_spill] sm:$0xff]  ;;  %v12523_v6 = vadd.f32 %v11635_v38, %v11498_v54 }
 0x604   :  { %v12511_v21 = vadd.f32 %v11635_v38, %v15332_v4  ;;  %v12515_v40 = vadd.f32 %v11635_v38, %v15333_v1  ;;  %15335 = vst [vmem:[#allocation160_spill] sm:$0xff] %v12519_v30  ;;  %v12527_v33 = vadd.f32 %v11635_v38, %v11502_v62  ;;  %v12531_v4 = vadd.f32 %v11635_v38, %v11506_v43 }
 0x605   :  { %15336 = vst [vmem:[#allocation162_spill] sm:$0xff] %v12523_v6  ;;  %v12535_v1 = vadd.f32 %v11635_v38, %v11510_v45  ;;  %v12539_v19 = vadd.f32 %v11635_v38, %v11514_v53  ;;  %v12543_v54 = vadd.f32 %v11635_v38, %v11518_v44  ;;  %v12547_v62 = vadd.f32 %v11635_v38, %v11522_v61 }
 0x606   :  { %15334 = vst [vmem:[#allocation158_spill] sm:$0xff] %v12515_v40  ;;  %15337 = vst [vmem:[#allocation164_spill] sm:$0xff] %v12527_v33  ;;  %v12551_v43 = vadd.f32 %v11635_v38, %v11526_v26  ;;  %v12555_v45 = vadd.f32 %v11635_v38, %v11530_v11  ;;  %v12559_v53 = vadd.f32 %v11635_v38, %v11534_v51 }
 0x607   :  { %15338 = vst [vmem:[#allocation166_spill] sm:$0xff] %v12531_v4  ;;  %15339 = vst [vmem:[#allocation168_spill] sm:$0xff] %v12535_v1  ;;  %v15396_v4 = vld [vmem:[#allocation95_spill] sm:$0xff] }
 0x608   :  { %15340 = vst [vmem:[#allocation172_spill] sm:$0xff] %v12539_v19  ;;  %15341 = vst [vmem:[#allocation173_spill] sm:$0xff] %v12543_v54  ;;  %v15346_v19 = vld [vmem:[#allocation43_spill] sm:$0xff]  ;;  %v15348_v54 = vld [vmem:[#allocation45_spill] sm:$0xff]  ;;  %v5886_v33 = vmax.f32 %v15396_v4, 0.0 }
 0x609   :  { %15342 = vst [vmem:[#allocation174_spill] sm:$0xff] %v12547_v62  ;;  %15343 = vst [vmem:[#allocation175_spill] sm:$0xff] %v12551_v43  ;;  %v12563_v44 = vadd.f32 %v11635_v38, %v15346_v19  ;;  %v12567_v61 = vadd.f32 %v11635_v38, %v15348_v54  ;;  %v15350_v62 = vld [vmem:[#allocation47_spill] sm:$0xff]  ;;  %v15352_v43 = vld [vmem:[#allocation49_spill] sm:$0xff] }
 0x60a   :  { %15344 = vst [vmem:[#allocation176_spill] sm:$0xff] %v12555_v45  ;;  %15345 = vst [vmem:[#allocation177_spill] sm:$0xff] %v12559_v53  ;;  %v12571_v26 = vadd.f32 %v11635_v38, %v15350_v62  ;;  %v12575_v11 = vadd.f32 %v11635_v38, %v15352_v43  ;;  %v15354_v45 = vld [vmem:[#allocation51_spill] sm:$0xff]  ;;  %v15356_v53 = vld [vmem:[#allocation53_spill] sm:$0xff]  ;;  %v12591_v62 = vadd.f32 %v11635_v38, %v11566_v47 }
 0x60b   :  { %15347 = vst [vmem:[#allocation179_spill] sm:$0xff] %v12563_v44  ;;  %15349 = vst [vmem:[#allocation180_spill] sm:$0xff] %v12567_v61  ;;  %v12579_v51 = vadd.f32 %v11635_v38, %v15354_v45  ;;  %v12583_v19 = vadd.f32 %v11635_v38, %v15356_v53  ;;  %v15358_v44 = vld [vmem:[#allocation55_spill] sm:$0xff]  ;;  %v12595_v43 = vadd.f32 %v11635_v38, %v11570_v15 }
 0x60c   :  { %15351 = vst [vmem:[#allocation181_spill] sm:$0xff] %v12571_v26  ;;  %15353 = vst [vmem:[#allocation182_spill] sm:$0xff] %v12575_v11  ;;  %v12587_v54 = vadd.f32 %v11635_v38, %v15358_v44  ;;  %v12599_v45 = vadd.f32 %v11635_v38, %v11574_v56  ;;  %v12607_v44 = vadd.f32 %v11635_v38, %v11582_v49  ;;  %v15392_v11 = vld [vmem:[#allocation87_spill] sm:$0xff] }
 0x60d   :  { %15355 = vst [vmem:[#allocation183_spill] sm:$0xff] %v12579_v51  ;;  %15357 = vst [vmem:[#allocation184_spill] sm:$0xff] %v12583_v19  ;;  %v15363_v51 = vld [vmem:[#allocation57_spill] sm:$0xff]  ;;  %v5882_v26 = vmax.f32 %v15392_v11, 0.0  ;;  %v15394_v61 = vld [vmem:[#allocation91_spill] sm:$0xff] }
 0x60e   :  { %15359 = vst [vmem:[#allocation186_spill] sm:$0xff] %v12587_v54  ;;  %15360 = vst [vmem:[#allocation187_spill] sm:$0xff] %v12591_v62  ;;  %v12603_v53 = vadd.f32 %v11635_v38, %v15363_v51  ;;  %v15366_v54 = vld [vmem:[#allocation59_spill] sm:$0xff]  ;;  %v15368_v62 = vld [vmem:[#allocation61_spill] sm:$0xff]  ;;  %v5884_v1 = vmax.f32 %v15394_v61, 0.0 }
 0x60f   :  { %15361 = vst [vmem:[#allocation188_spill] sm:$0xff] %v12595_v43  ;;  %15362 = vst [vmem:[#allocation189_spill] sm:$0xff] %v12599_v45  ;;  %v12611_v47 = vadd.f32 %v11635_v38, %v15366_v54  ;;  %v12615_v15 = vadd.f32 %v11635_v38, %v15368_v62  ;;  %v15370_v43 = vld [vmem:[#allocation63_spill] sm:$0xff]  ;;  %v15372_v45 = vld [vmem:[#allocation65_spill] sm:$0xff]  ;;  %v12631_v54 = vadd.f32 %v11635_v38, %v11606_v14 }
 0x610   :  { %15364 = vst [vmem:[#allocation190_spill] sm:$0xff] %v12603_v53  ;;  %15365 = vst [vmem:[#allocation191_spill] sm:$0xff] %v12607_v44  ;;  %v12619_v56 = vadd.f32 %v11635_v38, %v15370_v43  ;;  %v12623_v51 = vadd.f32 %v11635_v38, %v15372_v45  ;;  %v15374_v53 = vld [vmem:[#allocation67_spill] sm:$0xff]  ;;  %v12635_v62 = vadd.f32 %v11635_v38, %v11610_v57  ;;  %v15401_v11 = vld [vmem:[#allocation105_spill] sm:$0xff] }
 0x611   :  { %15367 = vst [vmem:[#allocation192_spill] sm:$0xff] %v12611_v47  ;;  %15369 = vst [vmem:[#allocation193_spill] sm:$0xff] %v12615_v15  ;;  %v12627_v49 = vadd.f32 %v11635_v38, %v15374_v53  ;;  %v15378_v15 = vld [vmem:[#allocation69_spill] sm:$0xff]  ;;  %v15390_v44 = vld [vmem:[#allocation83_spill] sm:$0xff] }
 0x612   :  { %15371 = vst [vmem:[#allocation195_spill] sm:$0xff] %v12619_v56  ;;  %15373 = vst [vmem:[#allocation197_spill] sm:$0xff] %v12623_v51  ;;  %v12639_v43 = vadd.f32 %v11635_v38, %v15378_v15  ;;  %v15380_v56 = vld [vmem:[#allocation71_spill] sm:$0xff]  ;;  %v15382_v51 = vld [vmem:[#allocation73_spill] sm:$0xff]  ;;  %v5880_v19 = vmax.f32 %v15390_v44, 0.0 }
 0x613   :  { %15375 = vst [vmem:[#allocation199_spill] sm:$0xff] %v12627_v49  ;;  %15376 = vst [vmem:[#allocation201_spill] sm:$0xff] %v12631_v54  ;;  %v12643_v45 = vadd.f32 %v11635_v38, %v15380_v56  ;;  %v12647_v53 = vadd.f32 %v11635_v38, %v15382_v51  ;;  %v15384_v49 = vld [vmem:[#allocation75_spill] sm:$0xff]  ;;  %v15386_v54 = vld [vmem:[#allocation77_spill] sm:$0xff] }
 0x614   :  { %15377 = vst [vmem:[#allocation203_spill] sm:$0xff] %v12635_v62  ;;  %15379 = vst [vmem:[#allocation205_spill] sm:$0xff] %v12639_v43  ;;  %v12651_v14 = vadd.f32 %v11635_v38, %v15384_v49  ;;  %v12655_v57 = vadd.f32 %v11635_v38, %v15386_v54  ;;  %v15388_v62 = vld [vmem:[#allocation79_spill] sm:$0xff]  ;;  %v15389_v15 = vld [vmem:[#allocation81_spill] sm:$0xff] }
 0x615   :  { %15381 = vst [vmem:[#allocation207_spill] sm:$0xff] %v12643_v45  ;;  %15383 = vst [vmem:[#allocation209_spill] sm:$0xff] %v12647_v53  ;;  %v5878_v47 = vmax.f32 %v15388_v62, 0.0  ;;  %v5879_v43 = vmax.f32 %v15389_v15, 0.0  ;;  %v15391_v56 = vld [vmem:[#allocation85_spill] sm:$0xff]  ;;  %v15398_v62 = vld [vmem:[#allocation99_spill] sm:$0xff] }
 0x616   :  { %15385 = vst [vmem:[#allocation211_spill] sm:$0xff] %v12651_v14  ;;  %15387 = vst [vmem:[#allocation213_spill] sm:$0xff] %v12655_v57  ;;  %v5881_v45 = vmax.f32 %v15391_v56, 0.0  ;;  %v15393_v51 = vld [vmem:[#allocation89_spill] sm:$0xff]  ;;  %v5888_v57 = vmax.f32 %v15398_v62, 0.0  ;;  %v15400_v44 = vld [vmem:[#allocation103_spill] sm:$0xff] }
 0x617   :  { %v5883_v53 = vmax.f32 %v15393_v51, 0.0  ;;  %v15395_v49 = vld [vmem:[#allocation93_spill] sm:$0xff]  ;;  %6134 = vst [vmem:[#allocation8] sm:$0xff] %v5878_v47  ;;  %v5890_v30 = vmax.f32 %v15400_v44, 0.0  ;;  %6135 = vst [vmem:[#allocation8 + $0x8] sm:$0xff] %v5879_v43  ;;  %v5891_v56 = vmax.f32 %v15401_v11, 0.0 }
 0x618   :  { %v5885_v14 = vmax.f32 %v15395_v49, 0.0  ;;  %v15397_v38 = vld [vmem:[#allocation97_spill] sm:$0xff]  ;;  %6136 = vst [vmem:[#allocation8 + $0x10] sm:$0xff] %v5880_v19  ;;  %6137 = vst [vmem:[#allocation8 + $0x18] sm:$0xff] %v5881_v45  ;;  %v15402_v61 = vld [vmem:[#allocation107_spill] sm:$0xff] }
 0x619   :  { %v5887_v54 = vmax.f32 %v15397_v38, 0.0  ;;  %v15399_v15 = vld [vmem:[#allocation101_spill] sm:$0xff]  ;;  %6138 = vst [vmem:[#allocation8 + $0x20] sm:$0xff] %v5882_v26  ;;  %v5892_v51 = vmax.f32 %v15402_v61, 0.0  ;;  %v15404_v4 = vld [vmem:[#allocation111_spill] sm:$0xff]  ;;  %6139 = vst [vmem:[#allocation8 + $0x28] sm:$0xff] %v5883_v53 }
 0x61a   :  { %v5889_v6 = vmax.f32 %v15399_v15, 0.0  ;;  %v15403_v49 = vld [vmem:[#allocation109_spill] sm:$0xff]  ;;  %v5894_v47 = vmax.f32 %v15404_v4, 0.0  ;;  %6140 = vst [vmem:[#allocation8 + $0x30] sm:$0xff] %v5884_v1  ;;  %6141 = vst [vmem:[#allocation8 + $0x38] sm:$0xff] %v5885_v14  ;;  %v15406_v15 = vld [vmem:[#allocation115_spill] sm:$0xff] }
 0x61b   :  { %v5893_v40 = vmax.f32 %v15403_v49, 0.0  ;;  %6142 = vst [vmem:[#allocation8 + $0x40] sm:$0xff] %v5886_v33  ;;  %v15405_v38 = vld [vmem:[#allocation113_spill] sm:$0xff]  ;;  %v5896_v44 = vmax.f32 %v15406_v15, 0.0  ;;  %v15408_v45 = vld [vmem:[#allocation119_spill] sm:$0xff]  ;;  %6143 = vst [vmem:[#allocation8 + $0x48] sm:$0xff] %v5887_v54 }
 0x61c   :  { %v5895_v62 = vmax.f32 %v15405_v38, 0.0  ;;  %v15407_v43 = vld [vmem:[#allocation117_spill] sm:$0xff]  ;;  %v5898_v26 = vmax.f32 %v15408_v45, 0.0  ;;  %6144 = vst [vmem:[#allocation8 + $0x50] sm:$0xff] %v5888_v57  ;;  %6145 = vst [vmem:[#allocation8 + $0x58] sm:$0xff] %v5889_v6  ;;  %v15410_v49 = vld [vmem:[#allocation123_spill] sm:$0xff] }
 0x61d   :  { %v5897_v19 = vmax.f32 %v15407_v43, 0.0  ;;  %6146 = vst [vmem:[#allocation8 + $0x60] sm:$0xff] %v5890_v30  ;;  %v15409_v11 = vld [vmem:[#allocation121_spill] sm:$0xff]  ;;  %v5900_v4 = vmax.f32 %v15410_v49, 0.0  ;;  %v15412_v14 = vld [vmem:[#allocation127_spill] sm:$0xff]  ;;  %6147 = vst [vmem:[#allocation8 + $0x68] sm:$0xff] %v5891_v56 }
 0x61e   :  { %v5899_v61 = vmax.f32 %v15409_v11, 0.0  ;;  %v15411_v53 = vld [vmem:[#allocation125_spill] sm:$0xff]  ;;  %v5902_v33 = vmax.f32 %v15412_v14, 0.0  ;;  %6148 = vst [vmem:[#allocation8 + $0x70] sm:$0xff] %v5892_v51  ;;  %6149 = vst [vmem:[#allocation8 + $0x78] sm:$0xff] %v5893_v40  ;;  %v15414_v43 = vld [vmem:[#allocation131_spill] sm:$0xff] }
 0x61f   :  { %v5901_v1 = vmax.f32 %v15411_v53, 0.0  ;;  %6150 = vst [vmem:[#allocation8 + $0x80] sm:$0xff] %v5894_v47  ;;  %v15413_v38 = vld [vmem:[#allocation129_spill] sm:$0xff]  ;;  %v5904_v45 = vmax.f32 %v15414_v43, 0.0  ;;  %v15416_v6 = vld [vmem:[#allocation135_spill] sm:$0xff]  ;;  %6151 = vst [vmem:[#allocation8 + $0x88] sm:$0xff] %v5895_v62 }
 0x620   :  { %v5903_v15 = vmax.f32 %v15413_v38, 0.0  ;;  %v15415_v54 = vld [vmem:[#allocation133_spill] sm:$0xff]  ;;  %v5906_v30 = vmax.f32 %v15416_v6, 0.0  ;;  %6152 = vst [vmem:[#allocation8 + $0x90] sm:$0xff] %v5896_v44  ;;  %6153 = vst [vmem:[#allocation8 + $0x98] sm:$0xff] %v5897_v19  ;;  %v15418_v53 = vld [vmem:[#allocation139_spill] sm:$0xff] }
 0x621   :  { %v5905_v57 = vmax.f32 %v15415_v54, 0.0  ;;  %6154 = vst [vmem:[#allocation8 + $0xa0] sm:$0xff] %v5898_v26  ;;  %v15417_v11 = vld [vmem:[#allocation137_spill] sm:$0xff]  ;;  %v5908_v14 = vmax.f32 %v15418_v53, 0.0  ;;  %v15420_v40 = vld [vmem:[#allocation143_spill] sm:$0xff]  ;;  %6155 = vst [vmem:[#allocation8 + $0xa8] sm:$0xff] %v5899_v61 }
 0x622   :  { %v5907_v49 = vmax.f32 %v15417_v11, 0.0  ;;  %v15419_v56 = vld [vmem:[#allocation141_spill] sm:$0xff]  ;;  %v5910_v47 = vmax.f32 %v15420_v40, 0.0  ;;  %6156 = vst [vmem:[#allocation8 + $0xb0] sm:$0xff] %v5900_v4  ;;  %6157 = vst [vmem:[#allocation8 + $0xb8] sm:$0xff] %v5901_v1  ;;  %v15422_v54 = vld [vmem:[#allocation147_spill] sm:$0xff] }
 0x623   :  { %v5909_v51 = vmax.f32 %v15419_v56, 0.0  ;;  %6158 = vst [vmem:[#allocation8 + $0xc0] sm:$0xff] %v5902_v33  ;;  %v15421_v38 = vld [vmem:[#allocation145_spill] sm:$0xff]  ;;  %v5912_v6 = vmax.f32 %v15422_v54, 0.0  ;;  %v15424_v19 = vld [vmem:[#allocation194_spill] sm:$0xff]  ;;  %6159 = vst [vmem:[#allocation8 + $0xc8] sm:$0xff] %v5903_v15 }
 0x624   :  { %v5911_v43 = vmax.f32 %v15421_v38, 0.0  ;;  %v15423_v62 = vld [vmem:[#allocation149_spill] sm:$0xff]  ;;  %v5914_v26 = vmax.f32 %v15424_v19, 0.0  ;;  %6160 = vst [vmem:[#allocation8 + $0xd0] sm:$0xff] %v5904_v45  ;;  %6161 = vst [vmem:[#allocation8 + $0xd8] sm:$0xff] %v5905_v57  ;;  %v15425_v11 = vld [vmem:[#allocation196_spill] sm:$0xff] }
 0x625   :  { %v5913_v44 = vmax.f32 %v15423_v62, 0.0  ;;  %6162 = vst [vmem:[#allocation8 + $0xe0] sm:$0xff] %v5906_v30  ;;  %v5915_v53 = vmax.f32 %v15425_v11, 0.0  ;;  %v15426_v56 = vld [vmem:[#allocation198_spill] sm:$0xff]  ;;  %v15427_v61 = vld [vmem:[#allocation200_spill] sm:$0xff]  ;;  %6163 = vst [vmem:[#allocation8 + $0xe8] sm:$0xff] %v5907_v49 }
 0x626   :  { %v5916_v40 = vmax.f32 %v15426_v56, 0.0  ;;  %v5917_v4 = vmax.f32 %v15427_v61, 0.0  ;;  %v15428_v1 = vld [vmem:[#allocation202_spill] sm:$0xff]  ;;  %6164 = vst [vmem:[#allocation8 + $0xf0] sm:$0xff] %v5908_v14  ;;  %6165 = vst [vmem:[#allocation8 + $0xf8] sm:$0xff] %v5909_v51  ;;  %v15429_v38 = vld [vmem:[#allocation204_spill] sm:$0xff] }
 0x627   :  { %v5918_v33 = vmax.f32 %v15428_v1, 0.0  ;;  %6166 = vst [vmem:[#allocation8 + $0x100] sm:$0xff] %v5910_v47  ;;  %v5919_v54 = vmax.f32 %v15429_v38, 0.0  ;;  %v15430_v62 = vld [vmem:[#allocation206_spill] sm:$0xff]  ;;  %v15431_v15 = vld [vmem:[#allocation208_spill] sm:$0xff]  ;;  %6167 = vst [vmem:[#allocation8 + $0x108] sm:$0xff] %v5911_v43 }
 0x628   :  { %v5920_v19 = vmax.f32 %v15430_v62, 0.0  ;;  %v5921_v45 = vmax.f32 %v15431_v15, 0.0  ;;  %v15432_v57 = vld [vmem:[#allocation210_spill] sm:$0xff]  ;;  %6168 = vst [vmem:[#allocation8 + $0x110] sm:$0xff] %v5912_v6  ;;  %6169 = vst [vmem:[#allocation8 + $0x118] sm:$0xff] %v5913_v44  ;;  %v15433_v11 = vld [vmem:[#allocation212_spill] sm:$0xff] }
 0x629   :  { %v5922_v30 = vmax.f32 %v15432_v57, 0.0  ;;  %6170 = vst [vmem:[#allocation8 + $0x120] sm:$0xff] %v5914_v26  ;;  %v5923_v56 = vmax.f32 %v15433_v11, 0.0  ;;  %v15434_v61 = vld [vmem:[#allocation214_spill] sm:$0xff]  ;;  %v15435_v49 = vld [vmem:[#allocation216_spill] sm:$0xff]  ;;  %v15436_v51 = vld [vmem:[#allocation217_spill] sm:$0xff] }
 0x62a   :  { %v5924_v1 = vmax.f32 %v15434_v61, 0.0  ;;  %v5925_v14 = vmax.f32 %v15435_v49, 0.0  ;;  %v5926_v47 = vmax.f32 %v15436_v51, 0.0  ;;  %6171 = vst [vmem:[#allocation8 + $0x128] sm:$0xff] %v5915_v53  ;;  %6172 = vst [vmem:[#allocation8 + $0x130] sm:$0xff] %v5916_v40  ;;  %v15437_v38 = vld [vmem:[#allocation218_spill] sm:$0xff] }
 0x62b   :  { %6173 = vst [vmem:[#allocation8 + $0x138] sm:$0xff] %v5917_v4  ;;  %6174 = vst [vmem:[#allocation8 + $0x140] sm:$0xff] %v5918_v33  ;;  %v5927_v62 = vmax.f32 %v15437_v38, 0.0  ;;  %v15438_v15 = vld [vmem:[#allocation219_spill] sm:$0xff]  ;;  %v15439_v43 = vld [vmem:[#allocation220_spill] sm:$0xff] }
 0x62c   :  { %v5928_v57 = vmax.f32 %v15438_v15, 0.0  ;;  %v5929_v6 = vmax.f32 %v15439_v43, 0.0  ;;  %v15440_v44 = vld [vmem:[#allocation232_spill] sm:$0xff]  ;;  %6175 = vst [vmem:[#allocation8 + $0x148] sm:$0xff] %v5919_v54  ;;  %6176 = vst [vmem:[#allocation8 + $0x150] sm:$0xff] %v5920_v19  ;;  %v15441_v11 = vld [vmem:[#allocation233_spill] sm:$0xff] }
 0x62d   :  { %v5930_v26 = vmax.f32 %v15440_v44, 0.0  ;;  %6177 = vst [vmem:[#allocation8 + $0x158] sm:$0xff] %v5921_v45  ;;  %6178 = vst [vmem:[#allocation8 + $0x160] sm:$0xff] %v5922_v30  ;;  %v5931_v61 = vmax.f32 %v15441_v11, 0.0  ;;  %v15442_v49 = vld [vmem:[#allocation234_spill] sm:$0xff]  ;;  %v15443_v53 = vld [vmem:[#allocation235_spill] sm:$0xff] }
 0x62e   :  { %v5932_v51 = vmax.f32 %v15442_v49, 0.0  ;;  %v5933_v40 = vmax.f32 %v15443_v53, 0.0  ;;  %v15444_v4 = vld [vmem:[#allocation236_spill] sm:$0xff]  ;;  %6179 = vst [vmem:[#allocation8 + $0x168] sm:$0xff] %v5923_v56  ;;  %6180 = vst [vmem:[#allocation8 + $0x170] sm:$0xff] %v5924_v1  ;;  %v15445_v38 = vld [vmem:[#allocation237_spill] sm:$0xff] }
 0x62f   :  { %v5934_v33 = vmax.f32 %v15444_v4, 0.0  ;;  %6181 = vst [vmem:[#allocation8 + $0x178] sm:$0xff] %v5925_v14  ;;  %6182 = vst [vmem:[#allocation8 + $0x180] sm:$0xff] %v5926_v47  ;;  %v5935_v15 = vmax.f32 %v15445_v38, 0.0  ;;  %v15446_v43 = vld [vmem:[#allocation238_spill] sm:$0xff]  ;;  %v15448_v45 = vld [vmem:[#allocation244_spill] sm:$0xff] }
 0x630   :  { %v5936_v44 = vmax.f32 %v15446_v43, 0.0  ;;  %v15447_v54 = vld [vmem:[#allocation242_spill] sm:$0xff]  ;;  %v5938_v30 = vmax.f32 %v15448_v45, 0.0  ;;  %6183 = vst [vmem:[#allocation8 + $0x188] sm:$0xff] %v5927_v62  ;;  %6184 = vst [vmem:[#allocation8 + $0x190] sm:$0xff] %v5928_v57  ;;  %v15449_v11 = vld [vmem:[#allocation167_spill] sm:$0xff] }
 0x631   :  { %v5937_v19 = vmax.f32 %v15447_v54, 0.0  ;;  %6185 = vst [vmem:[#allocation8 + $0x198] sm:$0xff] %v5929_v6  ;;  %6186 = vst [vmem:[#allocation8 + $0x1a0] sm:$0xff] %v5930_v26  ;;  %v5939_v49 = vmax.f32 %v15449_v11, 0.0  ;;  %v15450_v53 = vld [vmem:[#allocation165_spill] sm:$0xff]  ;;  %v15452_v14 = vld [vmem:[#allocation171_spill] sm:$0xff] }
 0x632   :  { %v5940_v4 = vmax.f32 %v15450_v53, 0.0  ;;  %v15451_v56 = vld [vmem:[#allocation169_spill] sm:$0xff]  ;;  %v5942_v47 = vmax.f32 %v15452_v14, 0.0  ;;  %6187 = vst [vmem:[#allocation8 + $0x1a8] sm:$0xff] %v5931_v61  ;;  %6188 = vst [vmem:[#allocation8 + $0x1b0] sm:$0xff] %v5932_v51  ;;  %v15453_v38 = vld [vmem:[#allocation228_spill] sm:$0xff] }
 0x633   :  { %v5941_v1 = vmax.f32 %v15451_v56, 0.0  ;;  %6189 = vst [vmem:[#allocation8 + $0x1b8] sm:$0xff] %v5933_v40  ;;  %6190 = vst [vmem:[#allocation8 + $0x1c0] sm:$0xff] %v5934_v33  ;;  %v5943_v43 = vmax.f32 %v15453_v38, 0.0  ;;  %v15454_v54 = vld [vmem:[#allocation229_spill] sm:$0xff]  ;;  %v15455_v62 = vld [vmem:[#allocation230_spill] sm:$0xff] }
 0x634   :  { %v5944_v45 = vmax.f32 %v15454_v54, 0.0  ;;  %v5945_v57 = vmax.f32 %v15455_v62, 0.0  ;;  %v15456_v6 = vld [vmem:[#allocation231_spill] sm:$0xff]  ;;  %6191 = vst [vmem:[#allocation8 + $0x1c8] sm:$0xff] %v5935_v15  ;;  %6192 = vst [vmem:[#allocation8 + $0x1d0] sm:$0xff] %v5936_v44  ;;  %v15457_v11 = vld [vmem:[#allocation12_spill] sm:$0xff] }
 0x635   :  { %v5946_v26 = vmax.f32 %v15456_v6, 0.0  ;;  %6193 = vst [vmem:[#allocation8 + $0x1d8] sm:$0xff] %v5937_v19  ;;  %6194 = vst [vmem:[#allocation8 + $0x1e0] sm:$0xff] %v5938_v30  ;;  %v5947_v53 = vmax.f32 %v15457_v11, 0.0  ;;  %v15458_v56 = vld [vmem:[#allocation13_spill] sm:$0xff]  ;;  %v15459_v61 = vld [vmem:[#allocation170_spill] sm:$0xff] }
 0x636   :  { %v5948_v14 = vmax.f32 %v15458_v56, 0.0  ;;  %v5949_v51 = vmax.f32 %v15459_v61, 0.0  ;;  %v15460_v40 = vld [vmem:[#allocation178_spill] sm:$0xff]  ;;  %6195 = vst [vmem:[#allocation8 + $0x1e8] sm:$0xff] %v5939_v49  ;;  %6196 = vst [vmem:[#allocation8 + $0x1f0] sm:$0xff] %v5940_v4  ;;  %v15461_v38 = vld [vmem:[#allocation185_spill] sm:$0xff] }
 0x637   :  { %v5950_v33 = vmax.f32 %v15460_v40, 0.0  ;;  %6197 = vst [vmem:[#allocation8 + $0x1f8] sm:$0xff] %v5941_v1  ;;  %6198 = vst [vmem:[#allocation8 + $0x200] sm:$0xff] %v5942_v47  ;;  %v5951_v54 = vmax.f32 %v15461_v38, 0.0  ;;  %v15462_v62 = vld [vmem:[#allocation151_spill] sm:$0xff]  ;;  %v15463_v15 = vld [vmem:[#allocation153_spill] sm:$0xff] }
 0x638   :  { %v5952_v6 = vmax.f32 %v15462_v62, 0.0  ;;  %v5953_v44 = vmax.f32 %v15463_v15, 0.0  ;;  %v15464_v19 = vld [vmem:[#allocation155_spill] sm:$0xff]  ;;  %6199 = vst [vmem:[#allocation8 + $0x208] sm:$0xff] %v5943_v43  ;;  %6200 = vst [vmem:[#allocation8 + $0x210] sm:$0xff] %v5944_v45  ;;  %v15465_v11 = vld [vmem:[#allocation157_spill] sm:$0xff] }
 0x639   :  { %v5954_v30 = vmax.f32 %v15464_v19, 0.0  ;;  %6201 = vst [vmem:[#allocation8 + $0x218] sm:$0xff] %v5945_v57  ;;  %6202 = vst [vmem:[#allocation8 + $0x220] sm:$0xff] %v5946_v26  ;;  %v5955_v56 = vmax.f32 %v15465_v11, 0.0  ;;  %v5956_v61 = vmax.f32 %v11951_v12, 0.0  ;;  %v15466_v49 = vld [vmem:[#allocation159_spill] sm:$0xff] }
 0x63a   :  { %v5957_v4 = vmax.f32 %v15466_v49, 0.0  ;;  %v15467_v1 = vld [vmem:[#allocation161_spill] sm:$0xff]  ;;  %6203 = vst [vmem:[#allocation8 + $0x228] sm:$0xff] %v5947_v53  ;;  %6204 = vst [vmem:[#allocation8 + $0x230] sm:$0xff] %v5948_v14  ;;  %v15468_v40 = vld [vmem:[#allocation163_spill] sm:$0xff]  ;;  %v5963_v12 = vmax.f32 %v11979_v25, 0.0 }
 0x63b   :  { %v5958_v47 = vmax.f32 %v15467_v1, 0.0  ;;  %6205 = vst [vmem:[#allocation8 + $0x238] sm:$0xff] %v5949_v51  ;;  %6206 = vst [vmem:[#allocation8 + $0x240] sm:$0xff] %v5950_v33  ;;  %v5959_v38 = vmax.f32 %v15468_v40, 0.0  ;;  %v15469_v62 = vld [vmem:[#allocation221_spill] sm:$0xff]  ;;  %v15470_v43 = vld [vmem:[#allocation222_spill] sm:$0xff] }
 0x63c   :  { %v5960_v15 = vmax.f32 %v15469_v62, 0.0  ;;  %v5961_v45 = vmax.f32 %v15470_v43, 0.0  ;;  %v15471_v57 = vld [vmem:[#allocation223_spill] sm:$0xff]  ;;  %6207 = vst [vmem:[#allocation8 + $0x248] sm:$0xff] %v5951_v54  ;;  %6208 = vst [vmem:[#allocation8 + $0x250] sm:$0xff] %v5952_v6  ;;  %v15472_v19 = vld [vmem:[#allocation224_spill] sm:$0xff] }
 0x63d   :  { %v5962_v26 = vmax.f32 %v15471_v57, 0.0  ;;  %6209 = vst [vmem:[#allocation8 + $0x258] sm:$0xff] %v5953_v44  ;;  %6210 = vst [vmem:[#allocation8 + $0x260] sm:$0xff] %v5954_v30  ;;  %v5964_v11 = vmax.f32 %v15472_v19, 0.0  ;;  %v15473_v53 = vld [vmem:[#allocation225_spill] sm:$0xff]  ;;  %v15474_v51 = vld [vmem:[#allocation226_spill] sm:$0xff] }
 0x63e   :  { %v5965_v14 = vmax.f32 %v15473_v53, 0.0  ;;  %v5966_v33 = vmax.f32 %v15474_v51, 0.0  ;;  %6211 = vst [vmem:[#allocation8 + $0x268] sm:$0xff] %v5955_v56  ;;  %6212 = vst [vmem:[#allocation8 + $0x270] sm:$0xff] %v5956_v61  ;;  %v15475_v49 = vld [vmem:[#allocation227_spill] sm:$0xff]  ;;  %v15477_v54 = vld [vmem:[#allocation240_spill] sm:$0xff] }
 0x63f   :  { %6213 = vst [vmem:[#allocation8 + $0x278] sm:$0xff] %v5957_v4  ;;  %6214 = vst [vmem:[#allocation8 + $0x280] sm:$0xff] %v5958_v47  ;;  %v5967_v1 = vmax.f32 %v15475_v49, 0.0  ;;  %v15476_v40 = vld [vmem:[#allocation239_spill] sm:$0xff]  ;;  %v5969_v6 = vmax.f32 %v15477_v54, 0.0  ;;  %v5970_v44 = vmax.f32 %v12007_v55, 0.0 }
 0x640   :  { %v5968_v62 = vmax.f32 %v15476_v40, 0.0  ;;  %6215 = vst [vmem:[#allocation8 + $0x288] sm:$0xff] %v5959_v38  ;;  %6216 = vst [vmem:[#allocation8 + $0x290] sm:$0xff] %v5960_v15  ;;  %v15478_v25 = vld [vmem:[#allocation241_spill] sm:$0xff]  ;;  %v15479_v43 = vld [vmem:[#allocation243_spill] sm:$0xff] }
 0x641   :  { %6217 = vst [vmem:[#allocation8 + $0x298] sm:$0xff] %v5961_v45  ;;  %6218 = vst [vmem:[#allocation8 + $0x2a0] sm:$0xff] %v5962_v26  ;;  %v5971_v30 = vmax.f32 %v15478_v25, 0.0  ;;  %v5972_v57 = vmax.f32 %v15479_v43, 0.0  ;;  %v15480_v56 = vld [vmem:[#allocation245_spill] sm:$0xff]  ;;  %v15481_v4 = vld [vmem:[#allocation14_spill] sm:$0xff] }
 0x642   :  { %v5973_v61 = vmax.f32 %v15480_v56, 0.0  ;;  %v5974_v47 = vmax.f32 %v15481_v4, 0.0  ;;  %6219 = vst [vmem:[#allocation8 + $0x2a8] sm:$0xff] %v5963_v12  ;;  %6220 = vst [vmem:[#allocation8 + $0x2b0] sm:$0xff] %v5964_v11  ;;  %v15482_v19 = vld [vmem:[#allocation15_spill] sm:$0xff]  ;;  %v15483_v51 = vld [vmem:[#allocation16_spill] sm:$0xff] }
 0x643   :  { %6221 = vst [vmem:[#allocation8 + $0x2b8] sm:$0xff] %v5965_v14  ;;  %6222 = vst [vmem:[#allocation8 + $0x2c0] sm:$0xff] %v5966_v33  ;;  %v5975_v53 = vmax.f32 %v15482_v19, 0.0  ;;  %v5976_v55 = vmax.f32 %v15483_v51, 0.0  ;;  %v15484_v38 = vld [vmem:[#allocation17_spill] sm:$0xff]  ;;  %v15485_v45 = vld [vmem:[#allocation18_spill] sm:$0xff] }
 0x644   :  { %v5977_v15 = vmax.f32 %v15484_v38, 0.0  ;;  %v5978_v26 = vmax.f32 %v15485_v45, 0.0  ;;  %6223 = vst [vmem:[#allocation8 + $0x2c8] sm:$0xff] %v5967_v1  ;;  %6224 = vst [vmem:[#allocation8 + $0x2d0] sm:$0xff] %v5968_v62  ;;  %v15486_v49 = vld [vmem:[#allocation19_spill] sm:$0xff]  ;;  %v15487_v54 = vld [vmem:[#allocation20_spill] sm:$0xff] }
 0x645   :  { %6225 = vst [vmem:[#allocation8 + $0x2d8] sm:$0xff] %v5969_v6  ;;  %6226 = vst [vmem:[#allocation8 + $0x2e0] sm:$0xff] %v5970_v44  ;;  %v5979_v40 = vmax.f32 %v15486_v49, 0.0  ;;  %v5980_v25 = vmax.f32 %v15487_v54, 0.0  ;;  %v15488_v12 = vld [vmem:[#allocation21_spill] sm:$0xff]  ;;  %v15489_v14 = vld [vmem:[#allocation22_spill] sm:$0xff] }
 0x646   :  { %v5981_v11 = vmax.f32 %v15488_v12, 0.0  ;;  %v5982_v33 = vmax.f32 %v15489_v14, 0.0  ;;  %6227 = vst [vmem:[#allocation8 + $0x2e8] sm:$0xff] %v5971_v30  ;;  %6228 = vst [vmem:[#allocation8 + $0x2f0] sm:$0xff] %v5972_v57  ;;  %v15490_v43 = vld [vmem:[#allocation23_spill] sm:$0xff]  ;;  %v15491_v4 = vld [vmem:[#allocation24_spill] sm:$0xff] }
 0x647   :  { %6229 = vst [vmem:[#allocation8 + $0x2f8] sm:$0xff] %v5973_v61  ;;  %6230 = vst [vmem:[#allocation8 + $0x300] sm:$0xff] %v5974_v47  ;;  %v5983_v56 = vmax.f32 %v15490_v43, 0.0  ;;  %v5984_v19 = vmax.f32 %v15491_v4, 0.0  ;;  %v15492_v1 = vld [vmem:[#allocation25_spill] sm:$0xff]  ;;  %v15493_v6 = vld [vmem:[#allocation26_spill] sm:$0xff] }
 0x648   :  { %v5985_v62 = vmax.f32 %v15492_v1, 0.0  ;;  %v5986_v44 = vmax.f32 %v15493_v6, 0.0  ;;  %6231 = vst [vmem:[#allocation8 + $0x308] sm:$0xff] %v5975_v53  ;;  %6232 = vst [vmem:[#allocation8 + $0x310] sm:$0xff] %v5976_v55  ;;  %v15494_v51 = vld [vmem:[#allocation27_spill] sm:$0xff]  ;;  %v15495_v45 = vld [vmem:[#allocation28_spill] sm:$0xff] }
 0x649   :  { %6233 = vst [vmem:[#allocation8 + $0x318] sm:$0xff] %v5977_v15  ;;  %6234 = vst [vmem:[#allocation8 + $0x320] sm:$0xff] %v5978_v26  ;;  %v5987_v38 = vmax.f32 %v15494_v51, 0.0  ;;  %v5988_v49 = vmax.f32 %v15495_v45, 0.0  ;;  %v15496_v30 = vld [vmem:[#allocation29_spill] sm:$0xff]  ;;  %v15497_v61 = vld [vmem:[#allocation30_spill] sm:$0xff] }
 0x64a   :  { %v5989_v57 = vmax.f32 %v15496_v30, 0.0  ;;  %v5990_v47 = vmax.f32 %v15497_v61, 0.0  ;;  %6235 = vst [vmem:[#allocation8 + $0x328] sm:$0xff] %v5979_v40  ;;  %6236 = vst [vmem:[#allocation8 + $0x330] sm:$0xff] %v5980_v25  ;;  %v15498_v54 = vld [vmem:[#allocation31_spill] sm:$0xff]  ;;  %v15499_v14 = vld [vmem:[#allocation32_spill] sm:$0xff] }
 0x64b   :  { %6237 = vst [vmem:[#allocation8 + $0x338] sm:$0xff] %v5981_v11  ;;  %6238 = vst [vmem:[#allocation8 + $0x340] sm:$0xff] %v5982_v33  ;;  %v5991_v12 = vmax.f32 %v15498_v54, 0.0  ;;  %v5992_v43 = vmax.f32 %v15499_v14, 0.0  ;;  %v15500_v53 = vld [vmem:[#allocation33_spill] sm:$0xff]  ;;  %v15501_v15 = vld [vmem:[#allocation34_spill] sm:$0xff] }
 0x64c   :  { %v5993_v55 = vmax.f32 %v15500_v53, 0.0  ;;  %v5994_v26 = vmax.f32 %v15501_v15, 0.0  ;;  %6239 = vst [vmem:[#allocation8 + $0x348] sm:$0xff] %v5983_v56  ;;  %6240 = vst [vmem:[#allocation8 + $0x350] sm:$0xff] %v5984_v19  ;;  %v15502_v4 = vld [vmem:[#allocation35_spill] sm:$0xff]  ;;  %v15503_v6 = vld [vmem:[#allocation36_spill] sm:$0xff] }
 0x64d   :  { %6241 = vst [vmem:[#allocation8 + $0x358] sm:$0xff] %v5985_v62  ;;  %6242 = vst [vmem:[#allocation8 + $0x360] sm:$0xff] %v5986_v44  ;;  %v5995_v1 = vmax.f32 %v15502_v4, 0.0  ;;  %v5996_v51 = vmax.f32 %v15503_v6, 0.0  ;;  %v15504_v40 = vld [vmem:[#allocation37_spill] sm:$0xff]  ;;  %v15505_v11 = vld [vmem:[#allocation38_spill] sm:$0xff] }
 0x64e   :  { %v5997_v25 = vmax.f32 %v15504_v40, 0.0  ;;  %v5998_v33 = vmax.f32 %v15505_v11, 0.0  ;;  %6243 = vst [vmem:[#allocation8 + $0x368] sm:$0xff] %v5987_v38  ;;  %6244 = vst [vmem:[#allocation8 + $0x370] sm:$0xff] %v5988_v49  ;;  %v15506_v45 = vld [vmem:[#allocation39_spill] sm:$0xff]  ;;  %v15507_v61 = vld [vmem:[#allocation40_spill] sm:$0xff] }
 0x64f   :  { %6245 = vst [vmem:[#allocation8 + $0x378] sm:$0xff] %v5989_v57  ;;  %6246 = vst [vmem:[#allocation8 + $0x380] sm:$0xff] %v5990_v47  ;;  %v5999_v30 = vmax.f32 %v15506_v45, 0.0  ;;  %v6000_v54 = vmax.f32 %v15507_v61, 0.0  ;;  %v15508_v56 = vld [vmem:[#allocation41_spill] sm:$0xff]  ;;  %v15509_v62 = vld [vmem:[#allocation42_spill] sm:$0xff] }
 0x650   :  { %v6001_v19 = vmax.f32 %v15508_v56, 0.0  ;;  %v6002_v44 = vmax.f32 %v15509_v62, 0.0  ;;  %6247 = vst [vmem:[#allocation8 + $0x388] sm:$0xff] %v5991_v12  ;;  %6248 = vst [vmem:[#allocation8 + $0x390] sm:$0xff] %v5992_v43  ;;  %v15510_v14 = vld [vmem:[#allocation44_spill] sm:$0xff]  ;;  %v15511_v15 = vld [vmem:[#allocation46_spill] sm:$0xff] }
 0x651   :  { %6249 = vst [vmem:[#allocation8 + $0x398] sm:$0xff] %v5993_v55  ;;  %6250 = vst [vmem:[#allocation8 + $0x3a0] sm:$0xff] %v5994_v26  ;;  %v6003_v53 = vmax.f32 %v15510_v14, 0.0  ;;  %v6004_v4 = vmax.f32 %v15511_v15, 0.0  ;;  %v15512_v38 = vld [vmem:[#allocation48_spill] sm:$0xff]  ;;  %v15513_v57 = vld [vmem:[#allocation50_spill] sm:$0xff] }
 0x652   :  { %v6005_v49 = vmax.f32 %v15512_v38, 0.0  ;;  %v6006_v47 = vmax.f32 %v15513_v57, 0.0  ;;  %6251 = vst [vmem:[#allocation8 + $0x3a8] sm:$0xff] %v5995_v1  ;;  %6252 = vst [vmem:[#allocation8 + $0x3b0] sm:$0xff] %v5996_v51  ;;  %v15514_v6 = vld [vmem:[#allocation52_spill] sm:$0xff]  ;;  %v15515_v11 = vld [vmem:[#allocation54_spill] sm:$0xff] }
 0x653   :  { %6253 = vst [vmem:[#allocation8 + $0x3b8] sm:$0xff] %v5997_v25  ;;  %6254 = vst [vmem:[#allocation8 + $0x3c0] sm:$0xff] %v5998_v33  ;;  %v6007_v40 = vmax.f32 %v15514_v6, 0.0  ;;  %v6008_v45 = vmax.f32 %v15515_v11, 0.0  ;;  %v15516_v12 = vld [vmem:[#allocation56_spill] sm:$0xff]  ;;  %v15517_v55 = vld [vmem:[#allocation58_spill] sm:$0xff] }
 0x654   :  { %v6009_v43 = vmax.f32 %v15516_v12, 0.0  ;;  %v6010_v26 = vmax.f32 %v15517_v55, 0.0  ;;  %6255 = vst [vmem:[#allocation8 + $0x3c8] sm:$0xff] %v5999_v30  ;;  %6256 = vst [vmem:[#allocation8 + $0x3d0] sm:$0xff] %v6000_v54  ;;  %v15518_v61 = vld [vmem:[#allocation60_spill] sm:$0xff]  ;;  %v15519_v62 = vld [vmem:[#allocation62_spill] sm:$0xff] }
 0x655   :  { %6257 = vst [vmem:[#allocation8 + $0x3d8] sm:$0xff] %v6001_v19  ;;  %6258 = vst [vmem:[#allocation8 + $0x3e0] sm:$0xff] %v6002_v44  ;;  %v6011_v56 = vmax.f32 %v15518_v61, 0.0  ;;  %v6012_v14 = vmax.f32 %v15519_v62, 0.0  ;;  %v15520_v1 = vld [vmem:[#allocation64_spill] sm:$0xff]  ;;  %v15521_v25 = vld [vmem:[#allocation66_spill] sm:$0xff] }
 0x656   :  { %v6013_v51 = vmax.f32 %v15520_v1, 0.0  ;;  %v6014_v33 = vmax.f32 %v15521_v25, 0.0  ;;  %6259 = vst [vmem:[#allocation8 + $0x3e8] sm:$0xff] %v6003_v53  ;;  %6260 = vst [vmem:[#allocation8 + $0x3f0] sm:$0xff] %v6004_v4  ;;  %v15522_v15 = vld [vmem:[#allocation68_spill] sm:$0xff]  ;;  %v15523_v57 = vld [vmem:[#allocation70_spill] sm:$0xff] }
 0x657   :  { %6261 = vst [vmem:[#allocation8 + $0x3f8] sm:$0xff] %v6005_v49  ;;  %6262 = vst [vmem:[#allocation8 + $0x400] sm:$0xff] %v6006_v47  ;;  %v6015_v38 = vmax.f32 %v15522_v15, 0.0  ;;  %v6016_v6 = vmax.f32 %v15523_v57, 0.0  ;;  %v15524_v30 = vld [vmem:[#allocation72_spill] sm:$0xff]  ;;  %v15525_v19 = vld [vmem:[#allocation74_spill] sm:$0xff] }
 0x658   :  { %v6017_v54 = vmax.f32 %v15524_v30, 0.0  ;;  %v6018_v44 = vmax.f32 %v15525_v19, 0.0  ;;  %6263 = vst [vmem:[#allocation8 + $0x408] sm:$0xff] %v6007_v40  ;;  %6264 = vst [vmem:[#allocation8 + $0x410] sm:$0xff] %v6008_v45  ;;  %v15526_v11 = vld [vmem:[#allocation76_spill] sm:$0xff]  ;;  %v15527_v55 = vld [vmem:[#allocation78_spill] sm:$0xff] }
 0x659   :  { %6265 = vst [vmem:[#allocation8 + $0x418] sm:$0xff] %v6009_v43  ;;  %6266 = vst [vmem:[#allocation8 + $0x420] sm:$0xff] %v6010_v26  ;;  %v6019_v12 = vmax.f32 %v15526_v11, 0.0  ;;  %v6020_v61 = vmax.f32 %v15527_v55, 0.0  ;;  %v15528_v53 = vld [vmem:[#allocation80_spill] sm:$0xff]  ;;  %v15529_v49 = vld [vmem:[#allocation82_spill] sm:$0xff] }
 0x65a   :  { %v6021_v4 = vmax.f32 %v15528_v53, 0.0  ;;  %v6022_v47 = vmax.f32 %v15529_v49, 0.0  ;;  %6267 = vst [vmem:[#allocation8 + $0x428] sm:$0xff] %v6011_v56  ;;  %6268 = vst [vmem:[#allocation8 + $0x430] sm:$0xff] %v6012_v14  ;;  %v15530_v62 = vld [vmem:[#allocation84_spill] sm:$0xff]  ;;  %v15531_v25 = vld [vmem:[#allocation86_spill] sm:$0xff] }
 0x65b   :  { %6269 = vst [vmem:[#allocation8 + $0x438] sm:$0xff] %v6013_v51  ;;  %6270 = vst [vmem:[#allocation8 + $0x440] sm:$0xff] %v6014_v33  ;;  %v6023_v1 = vmax.f32 %v15530_v62, 0.0  ;;  %v6024_v15 = vmax.f32 %v15531_v25, 0.0  ;;  %v15532_v40 = vld [vmem:[#allocation88_spill] sm:$0xff]  ;;  %v15533_v43 = vld [vmem:[#allocation90_spill] sm:$0xff] }
 0x65c   :  { %v6025_v45 = vmax.f32 %v15532_v40, 0.0  ;;  %v6026_v26 = vmax.f32 %v15533_v43, 0.0  ;;  %6271 = vst [vmem:[#allocation8 + $0x448] sm:$0xff] %v6015_v38  ;;  %6272 = vst [vmem:[#allocation8 + $0x450] sm:$0xff] %v6016_v6  ;;  %v15534_v57 = vld [vmem:[#allocation92_spill] sm:$0xff]  ;;  %v15535_v19 = vld [vmem:[#allocation94_spill] sm:$0xff] }
 0x65d   :  { %6273 = vst [vmem:[#allocation8 + $0x458] sm:$0xff] %v6017_v54  ;;  %6274 = vst [vmem:[#allocation8 + $0x460] sm:$0xff] %v6018_v44  ;;  %v6027_v30 = vmax.f32 %v15534_v57, 0.0  ;;  %v6028_v11 = vmax.f32 %v15535_v19, 0.0  ;;  %v15536_v56 = vld [vmem:[#allocation96_spill] sm:$0xff]  ;;  %v15537_v51 = vld [vmem:[#allocation98_spill] sm:$0xff] }
 0x65e   :  { %v6029_v14 = vmax.f32 %v15536_v56, 0.0  ;;  %v6030_v33 = vmax.f32 %v15537_v51, 0.0  ;;  %6275 = vst [vmem:[#allocation8 + $0x468] sm:$0xff] %v6019_v12  ;;  %6276 = vst [vmem:[#allocation8 + $0x470] sm:$0xff] %v6020_v61  ;;  %v15538_v55 = vld [vmem:[#allocation100_spill] sm:$0xff]  ;;  %v15539_v49 = vld [vmem:[#allocation102_spill] sm:$0xff] }
 0x65f   :  { %6277 = vst [vmem:[#allocation8 + $0x478] sm:$0xff] %v6021_v4  ;;  %6278 = vst [vmem:[#allocation8 + $0x480] sm:$0xff] %v6022_v47  ;;  %v6031_v53 = vmax.f32 %v15538_v55, 0.0  ;;  %v6032_v62 = vmax.f32 %v15539_v49, 0.0  ;;  %v15540_v38 = vld [vmem:[#allocation104_spill] sm:$0xff]  ;;  %v15541_v54 = vld [vmem:[#allocation106_spill] sm:$0xff] }
 0x660   :  { %v6033_v6 = vmax.f32 %v15540_v38, 0.0  ;;  %v6034_v44 = vmax.f32 %v15541_v54, 0.0  ;;  %6279 = vst [vmem:[#allocation8 + $0x488] sm:$0xff] %v6023_v1  ;;  %6280 = vst [vmem:[#allocation8 + $0x490] sm:$0xff] %v6024_v15  ;;  %v15542_v25 = vld [vmem:[#allocation108_spill] sm:$0xff]  ;;  %v15543_v43 = vld [vmem:[#allocation110_spill] sm:$0xff] }
 0x661   :  { %6281 = vst [vmem:[#allocation8 + $0x498] sm:$0xff] %v6025_v45  ;;  %6282 = vst [vmem:[#allocation8 + $0x4a0] sm:$0xff] %v6026_v26  ;;  %v6035_v40 = vmax.f32 %v15542_v25, 0.0  ;;  %v6036_v57 = vmax.f32 %v15543_v43, 0.0  ;;  %v15544_v12 = vld [vmem:[#allocation112_spill] sm:$0xff]  ;;  %v15545_v4 = vld [vmem:[#allocation114_spill] sm:$0xff] }
 0x662   :  { %v6037_v61 = vmax.f32 %v15544_v12, 0.0  ;;  %v6038_v47 = vmax.f32 %v15545_v4, 0.0  ;;  %6283 = vst [vmem:[#allocation8 + $0x4a8] sm:$0xff] %v6027_v30  ;;  %6284 = vst [vmem:[#allocation8 + $0x4b0] sm:$0xff] %v6028_v11  ;;  %v15546_v19 = vld [vmem:[#allocation116_spill] sm:$0xff]  ;;  %v15547_v51 = vld [vmem:[#allocation118_spill] sm:$0xff] }
 0x663   :  { %6285 = vst [vmem:[#allocation8 + $0x4b8] sm:$0xff] %v6029_v14  ;;  %6286 = vst [vmem:[#allocation8 + $0x4c0] sm:$0xff] %v6030_v33  ;;  %v6039_v56 = vmax.f32 %v15546_v19, 0.0  ;;  %v6040_v55 = vmax.f32 %v15547_v51, 0.0  ;;  %v15548_v1 = vld [vmem:[#allocation120_spill] sm:$0xff]  ;;  %v15549_v45 = vld [vmem:[#allocation122_spill] sm:$0xff] }
 0x664   :  { %v6041_v15 = vmax.f32 %v15548_v1, 0.0  ;;  %v6042_v26 = vmax.f32 %v15549_v45, 0.0  ;;  %6287 = vst [vmem:[#allocation8 + $0x4c8] sm:$0xff] %v6031_v53  ;;  %6288 = vst [vmem:[#allocation8 + $0x4d0] sm:$0xff] %v6032_v62  ;;  %v15550_v49 = vld [vmem:[#allocation124_spill] sm:$0xff]  ;;  %v6044_v54 = vmax.f32 %v12303_v59, 0.0 }
 0x665   :  { %6289 = vst [vmem:[#allocation8 + $0x4d8] sm:$0xff] %v6033_v6  ;;  %6290 = vst [vmem:[#allocation8 + $0x4e0] sm:$0xff] %v6034_v44  ;;  %v6043_v38 = vmax.f32 %v15550_v49, 0.0  ;;  %v6045_v30 = vmax.f32 %v12307_v52, 0.0  ;;  %v6046_v11 = vmax.f32 %v12311_v36, 0.0  ;;  %v6047_v14 = vmax.f32 %v12315_v13, 0.0 }
 0x666   :  { %6291 = vst [vmem:[#allocation8 + $0x4e8] sm:$0xff] %v6035_v40  ;;  %6292 = vst [vmem:[#allocation8 + $0x4f0] sm:$0xff] %v6036_v57  ;;  %v6048_v33 = vmax.f32 %v12319_v23, 0.0  ;;  %v6049_v53 = vmax.f32 %v12323_v24, 0.0  ;;  %v6050_v62 = vmax.f32 %v12327_v3, 0.0  ;;  %v6051_v59 = vmax.f32 %v12331_v5, 0.0 }
 0x667   :  { %6293 = vst [vmem:[#allocation8 + $0x4f8] sm:$0xff] %v6037_v61  ;;  %6294 = vst [vmem:[#allocation8 + $0x500] sm:$0xff] %v6038_v47  ;;  %v6052_v52 = vmax.f32 %v12335_v9, 0.0  ;;  %v6053_v36 = vmax.f32 %v12339_v28, 0.0  ;;  %v6054_v6 = vmax.f32 %v12343_v39, 0.0  ;;  %v6055_v13 = vmax.f32 %v12347_v29, 0.0 }
 0x668   :  { %6295 = vst [vmem:[#allocation8 + $0x508] sm:$0xff] %v6039_v56  ;;  %6296 = vst [vmem:[#allocation8 + $0x510] sm:$0xff] %v6040_v55  ;;  %v6056_v23 = vmax.f32 %v12351_v50, 0.0  ;;  %v6057_v24 = vmax.f32 %v12355_v20, 0.0  ;;  %v6058_v3 = vmax.f32 %v12359_v17, 0.0  ;;  %v6059_v5 = vmax.f32 %v12363_v22, 0.0 }
 0x669   :  { %6297 = vst [vmem:[#allocation8 + $0x518] sm:$0xff] %v6041_v15  ;;  %6298 = vst [vmem:[#allocation8 + $0x520] sm:$0xff] %v6042_v26  ;;  %v6060_v9 = vmax.f32 %v12367_v63, 0.0  ;;  %v6061_v28 = vmax.f32 %v12371_v32, 0.0  ;;  %v6062_v39 = vmax.f32 %v12375_v41, 0.0  ;;  %v6063_v29 = vmax.f32 %v12379_v7, 0.0 }
 0x66a   :  { %6299 = vst [vmem:[#allocation8 + $0x528] sm:$0xff] %v6043_v38  ;;  %6300 = vst [vmem:[#allocation8 + $0x530] sm:$0xff] %v6044_v54  ;;  %v6064_v50 = vmax.f32 %v12383_v31, 0.0  ;;  %v6065_v20 = vmax.f32 %v12387_v46, 0.0  ;;  %v6066_v17 = vmax.f32 %v12391_v16, 0.0  ;;  %v6067_v22 = vmax.f32 %v12395_v58, 0.0 }
 0x66b   :  { %6301 = vst [vmem:[#allocation8 + $0x538] sm:$0xff] %v6045_v30  ;;  %6302 = vst [vmem:[#allocation8 + $0x540] sm:$0xff] %v6046_v11  ;;  %v6068_v63 = vmax.f32 %v12399_v37, 0.0  ;;  %v6069_v32 = vmax.f32 %v12403_v0, 0.0  ;;  %v6070_v41 = vmax.f32 %v12407_v2, 0.0  ;;  %v6071_v7 = vmax.f32 %v12411_v60, 0.0 }
 0x66c   :  { %6303 = vst [vmem:[#allocation8 + $0x548] sm:$0xff] %v6047_v14  ;;  %6304 = vst [vmem:[#allocation8 + $0x550] sm:$0xff] %v6048_v33  ;;  %v6072_v31 = vmax.f32 %v12415_v10, 0.0  ;;  %v6073_v46 = vmax.f32 %v12419_v42, 0.0  ;;  %v6074_v16 = vmax.f32 %v12423_v34, 0.0  ;;  %v6075_v58 = vmax.f32 %v12427_v27, 0.0 }
 0x66d   :  { %6305 = vst [vmem:[#allocation8 + $0x558] sm:$0xff] %v6049_v53  ;;  %6306 = vst [vmem:[#allocation8 + $0x560] sm:$0xff] %v6050_v62  ;;  %v15551_v37 = vld [vmem:[#allocation126_spill] sm:$0xff]  ;;  %v15552_v2 = vld [vmem:[#allocation128_spill] sm:$0xff]  ;;  %v6092_v53 = vmax.f32 %v12495_v18, 0.0  ;;  %v6093_v62 = vmax.f32 %v12499_v35, 0.0 }
 0x66e   :  { %6307 = vst [vmem:[#allocation8 + $0x568] sm:$0xff] %v6051_v59  ;;  %6308 = vst [vmem:[#allocation8 + $0x570] sm:$0xff] %v6052_v52  ;;  %v6076_v0 = vmax.f32 %v15551_v37, 0.0  ;;  %v6077_v44 = vmax.f32 %v15552_v2, 0.0  ;;  %v15553_v25 = vld [vmem:[#allocation130_spill] sm:$0xff]  ;;  %v15554_v60 = vld [vmem:[#allocation132_spill] sm:$0xff] }
 0x66f   :  { %6309 = vst [vmem:[#allocation8 + $0x578] sm:$0xff] %v6053_v36  ;;  %6310 = vst [vmem:[#allocation8 + $0x580] sm:$0xff] %v6054_v6  ;;  %v6078_v40 = vmax.f32 %v15553_v25, 0.0  ;;  %v6079_v10 = vmax.f32 %v15554_v60, 0.0  ;;  %v15555_v42 = vld [vmem:[#allocation134_spill] sm:$0xff]  ;;  %v15556_v43 = vld [vmem:[#allocation136_spill] sm:$0xff] }
 0x670   :  { %6311 = vst [vmem:[#allocation8 + $0x588] sm:$0xff] %v6055_v13  ;;  %6312 = vst [vmem:[#allocation8 + $0x590] sm:$0xff] %v6056_v23  ;;  %v6080_v34 = vmax.f32 %v15555_v42, 0.0  ;;  %v6081_v57 = vmax.f32 %v15556_v43, 0.0  ;;  %v15557_v12 = vld [vmem:[#allocation138_spill] sm:$0xff]  ;;  %v15558_v27 = vld [vmem:[#allocation140_spill] sm:$0xff] }
 0x671   :  { %6313 = vst [vmem:[#allocation8 + $0x598] sm:$0xff] %v6057_v24  ;;  %6314 = vst [vmem:[#allocation8 + $0x5a0] sm:$0xff] %v6058_v3  ;;  %v6082_v61 = vmax.f32 %v15557_v12, 0.0  ;;  %v6083_v4 = vmax.f32 %v15558_v27, 0.0  ;;  %v15559_v47 = vld [vmem:[#allocation142_spill] sm:$0xff]  ;;  %v15560_v56 = vld [vmem:[#allocation144_spill] sm:$0xff] }
 0x672   :  { %6315 = vst [vmem:[#allocation8 + $0x5a8] sm:$0xff] %v6059_v5  ;;  %6316 = vst [vmem:[#allocation8 + $0x5b0] sm:$0xff] %v6060_v9  ;;  %v6084_v19 = vmax.f32 %v15559_v47, 0.0  ;;  %v6085_v51 = vmax.f32 %v15560_v56, 0.0  ;;  %v15561_v55 = vld [vmem:[#allocation146_spill] sm:$0xff]  ;;  %v15562_v15 = vld [vmem:[#allocation148_spill] sm:$0xff] }
 0x673   :  { %6317 = vst [vmem:[#allocation8 + $0x5b8] sm:$0xff] %v6061_v28  ;;  %6318 = vst [vmem:[#allocation8 + $0x5c0] sm:$0xff] %v6062_v39  ;;  %v6086_v1 = vmax.f32 %v15561_v55, 0.0  ;;  %v6087_v45 = vmax.f32 %v15562_v15, 0.0  ;;  %v15563_v26 = vld [vmem:[#allocation150_spill] sm:$0xff]  ;;  %v15564_v38 = vld [vmem:[#allocation152_spill] sm:$0xff] }
 0x674   :  { %6319 = vst [vmem:[#allocation8 + $0x5c8] sm:$0xff] %v6063_v29  ;;  %6320 = vst [vmem:[#allocation8 + $0x5d0] sm:$0xff] %v6064_v50  ;;  %v6088_v49 = vmax.f32 %v15563_v26, 0.0  ;;  %v6089_v54 = vmax.f32 %v15564_v38, 0.0  ;;  %v15565_v30 = vld [vmem:[#allocation154_spill] sm:$0xff]  ;;  %v15566_v14 = vld [vmem:[#allocation156_spill] sm:$0xff] }
 0x675   :  { %6321 = vst [vmem:[#allocation8 + $0x5d8] sm:$0xff] %v6065_v20  ;;  %6322 = vst [vmem:[#allocation8 + $0x5e0] sm:$0xff] %v6066_v17  ;;  %v6090_v11 = vmax.f32 %v15565_v30, 0.0  ;;  %v6091_v33 = vmax.f32 %v15566_v14, 0.0  ;;  %v6094_v59 = vmax.f32 %v12503_v8, 0.0  ;;  %v6095_v52 = vmax.f32 %v12507_v48, 0.0 }
 0x676   :  { %6323 = vst [vmem:[#allocation8 + $0x5e8] sm:$0xff] %v6067_v22  ;;  %6324 = vst [vmem:[#allocation8 + $0x5f0] sm:$0xff] %v6068_v63  ;;  %v6096_v36 = vmax.f32 %v12511_v21, 0.0  ;;  %v15567_v6 = vld [vmem:[#allocation158_spill] sm:$0xff]  ;;  %v15568_v23 = vld [vmem:[#allocation160_spill] sm:$0xff] }
 0x677   :  { %6325 = vst [vmem:[#allocation8 + $0x5f8] sm:$0xff] %v6069_v32  ;;  %6326 = vst [vmem:[#allocation8 + $0x600] sm:$0xff] %v6070_v41  ;;  %v6097_v13 = vmax.f32 %v15567_v6, 0.0  ;;  %v6098_v24 = vmax.f32 %v15568_v23, 0.0  ;;  %v15569_v18 = vld [vmem:[#allocation162_spill] sm:$0xff]  ;;  %v15570_v3 = vld [vmem:[#allocation164_spill] sm:$0xff] }
 0x678   :  { %6327 = vst [vmem:[#allocation8 + $0x608] sm:$0xff] %v6071_v7  ;;  %6328 = vst [vmem:[#allocation8 + $0x610] sm:$0xff] %v6072_v31  ;;  %v6099_v35 = vmax.f32 %v15569_v18, 0.0  ;;  %v6100_v8 = vmax.f32 %v15570_v3, 0.0  ;;  %v15571_v5 = vld [vmem:[#allocation166_spill] sm:$0xff]  ;;  %v15572_v28 = vld [vmem:[#allocation168_spill] sm:$0xff] }
 0x679   :  { %6329 = vst [vmem:[#allocation8 + $0x618] sm:$0xff] %v6073_v46  ;;  %6330 = vst [vmem:[#allocation8 + $0x620] sm:$0xff] %v6074_v16  ;;  %v6101_v9 = vmax.f32 %v15571_v5, 0.0  ;;  %v6102_v39 = vmax.f32 %v15572_v28, 0.0  ;;  %v15573_v48 = vld [vmem:[#allocation172_spill] sm:$0xff]  ;;  %v15574_v29 = vld [vmem:[#allocation173_spill] sm:$0xff] }
 0x67a   :  { %6331 = vst [vmem:[#allocation8 + $0x628] sm:$0xff] %v6075_v58  ;;  %6332 = vst [vmem:[#allocation8 + $0x630] sm:$0xff] %v6076_v0  ;;  %v6103_v21 = vmax.f32 %v15573_v48, 0.0  ;;  %v6104_v50 = vmax.f32 %v15574_v29, 0.0  ;;  %v15575_v20 = vld [vmem:[#allocation174_spill] sm:$0xff]  ;;  %v15576_v22 = vld [vmem:[#allocation175_spill] sm:$0xff] }
 0x67b   :  { %6333 = vst [vmem:[#allocation8 + $0x638] sm:$0xff] %v6077_v44  ;;  %6334 = vst [vmem:[#allocation8 + $0x640] sm:$0xff] %v6078_v40  ;;  %v6105_v17 = vmax.f32 %v15575_v20, 0.0  ;;  %v6106_v63 = vmax.f32 %v15576_v22, 0.0  ;;  %v15577_v32 = vld [vmem:[#allocation176_spill] sm:$0xff]  ;;  %v15578_v7 = vld [vmem:[#allocation177_spill] sm:$0xff] }
 0x67c   :  { %6335 = vst [vmem:[#allocation8 + $0x648] sm:$0xff] %v6079_v10  ;;  %6336 = vst [vmem:[#allocation8 + $0x650] sm:$0xff] %v6080_v34  ;;  %v6107_v41 = vmax.f32 %v15577_v32, 0.0  ;;  %v6108_v31 = vmax.f32 %v15578_v7, 0.0  ;;  %v15579_v46 = vld [vmem:[#allocation179_spill] sm:$0xff]  ;;  %v15580_v58 = vld [vmem:[#allocation180_spill] sm:$0xff] }
 0x67d   :  { %6337 = vst [vmem:[#allocation8 + $0x658] sm:$0xff] %v6081_v57  ;;  %6338 = vst [vmem:[#allocation8 + $0x660] sm:$0xff] %v6082_v61  ;;  %v6109_v16 = vmax.f32 %v15579_v46, 0.0  ;;  %v6110_v37 = vmax.f32 %v15580_v58, 0.0  ;;  %v15581_v0 = vld [vmem:[#allocation181_spill] sm:$0xff]  ;;  %v15582_v44 = vld [vmem:[#allocation182_spill] sm:$0xff] }
 0x67e   :  { %6339 = vst [vmem:[#allocation8 + $0x668] sm:$0xff] %v6083_v4  ;;  %6340 = vst [vmem:[#allocation8 + $0x670] sm:$0xff] %v6084_v19  ;;  %v6111_v2 = vmax.f32 %v15581_v0, 0.0  ;;  %v6112_v25 = vmax.f32 %v15582_v44, 0.0  ;;  %v15583_v40 = vld [vmem:[#allocation183_spill] sm:$0xff]  ;;  %v15584_v10 = vld [vmem:[#allocation184_spill] sm:$0xff] }
 0x67f   :  { %6341 = vst [vmem:[#allocation8 + $0x678] sm:$0xff] %v6085_v51  ;;  %6342 = vst [vmem:[#allocation8 + $0x680] sm:$0xff] %v6086_v1  ;;  %v6113_v60 = vmax.f32 %v15583_v40, 0.0  ;;  %v6114_v42 = vmax.f32 %v15584_v10, 0.0  ;;  %v15585_v34 = vld [vmem:[#allocation186_spill] sm:$0xff]  ;;  %v15586_v57 = vld [vmem:[#allocation187_spill] sm:$0xff] }
 0x680   :  { %6343 = vst [vmem:[#allocation8 + $0x688] sm:$0xff] %v6087_v45  ;;  %6344 = vst [vmem:[#allocation8 + $0x690] sm:$0xff] %v6088_v49  ;;  %v6115_v43 = vmax.f32 %v15585_v34, 0.0  ;;  %v6116_v12 = vmax.f32 %v15586_v57, 0.0  ;;  %v15587_v61 = vld [vmem:[#allocation188_spill] sm:$0xff]  ;;  %v15588_v4 = vld [vmem:[#allocation189_spill] sm:$0xff] }
 0x681   :  { %6345 = vst [vmem:[#allocation8 + $0x698] sm:$0xff] %v6089_v54  ;;  %6346 = vst [vmem:[#allocation8 + $0x6a0] sm:$0xff] %v6090_v11  ;;  %v6117_v27 = vmax.f32 %v15587_v61, 0.0  ;;  %v6118_v47 = vmax.f32 %v15588_v4, 0.0  ;;  %v15589_v19 = vld [vmem:[#allocation190_spill] sm:$0xff]  ;;  %v15590_v51 = vld [vmem:[#allocation191_spill] sm:$0xff] }
 0x682   :  { %6347 = vst [vmem:[#allocation8 + $0x6a8] sm:$0xff] %v6091_v33  ;;  %6348 = vst [vmem:[#allocation8 + $0x6b0] sm:$0xff] %v6092_v53  ;;  %v6119_v56 = vmax.f32 %v15589_v19, 0.0  ;;  %v6120_v55 = vmax.f32 %v15590_v51, 0.0  ;;  %v15591_v1 = vld [vmem:[#allocation192_spill] sm:$0xff]  ;;  %v15592_v45 = vld [vmem:[#allocation193_spill] sm:$0xff] }
 0x683   :  { %6349 = vst [vmem:[#allocation8 + $0x6b8] sm:$0xff] %v6093_v62  ;;  %6350 = vst [vmem:[#allocation8 + $0x6c0] sm:$0xff] %v6094_v59  ;;  %v6121_v15 = vmax.f32 %v15591_v1, 0.0  ;;  %v6122_v26 = vmax.f32 %v15592_v45, 0.0  ;;  %v15593_v49 = vld [vmem:[#allocation195_spill] sm:$0xff]  ;;  %v15594_v54 = vld [vmem:[#allocation197_spill] sm:$0xff] }
 0x684   :  { %6351 = vst [vmem:[#allocation8 + $0x6c8] sm:$0xff] %v6095_v52  ;;  %6352 = vst [vmem:[#allocation8 + $0x6d0] sm:$0xff] %v6096_v36  ;;  %v6123_v38 = vmax.f32 %v15593_v49, 0.0  ;;  %v6124_v30 = vmax.f32 %v15594_v54, 0.0  ;;  %v15595_v11 = vld [vmem:[#allocation199_spill] sm:$0xff]  ;;  %v15596_v33 = vld [vmem:[#allocation201_spill] sm:$0xff] }
 0x685   :  { %6353 = vst [vmem:[#allocation8 + $0x6d8] sm:$0xff] %v6097_v13  ;;  %6354 = vst [vmem:[#allocation8 + $0x6e0] sm:$0xff] %v6098_v24  ;;  %v6125_v14 = vmax.f32 %v15595_v11, 0.0  ;;  %v6126_v53 = vmax.f32 %v15596_v33, 0.0  ;;  %v15597_v62 = vld [vmem:[#allocation203_spill] sm:$0xff]  ;;  %v15598_v52 = vld [vmem:[#allocation205_spill] sm:$0xff] }
 0x686   :  { %6355 = vst [vmem:[#allocation8 + $0x6e8] sm:$0xff] %v6099_v35  ;;  %6356 = vst [vmem:[#allocation8 + $0x6f0] sm:$0xff] %v6100_v8  ;;  %v6127_v59 = vmax.f32 %v15597_v62, 0.0  ;;  %v6128_v36 = vmax.f32 %v15598_v52, 0.0  ;;  %v15599_v6 = vld [vmem:[#allocation207_spill] sm:$0xff]  ;;  %v15600_v23 = vld [vmem:[#allocation209_spill] sm:$0xff] }
 0x687   :  { %6357 = vst [vmem:[#allocation8 + $0x6f8] sm:$0xff] %v6101_v9  ;;  %6358 = vst [vmem:[#allocation8 + $0x700] sm:$0xff] %v6102_v39  ;;  %v6129_v13 = vmax.f32 %v15599_v6, 0.0  ;;  %v6130_v24 = vmax.f32 %v15600_v23, 0.0  ;;  %v15601_v18 = vld [vmem:[#allocation211_spill] sm:$0xff]  ;;  %v15602_v3 = vld [vmem:[#allocation213_spill] sm:$0xff] }
 0x688   :  { %6359 = vst [vmem:[#allocation8 + $0x708] sm:$0xff] %v6103_v21  ;;  %6360 = vst [vmem:[#allocation8 + $0x710] sm:$0xff] %v6104_v50  ;;  %v6131_v35 = vmax.f32 %v15601_v18, 0.0  ;;  %v6132_v8 = vmax.f32 %v15602_v3, 0.0 }
 0x689   :  { %6361 = vst [vmem:[#allocation8 + $0x718] sm:$0xff] %v6105_v17  ;;  %6362 = vst [vmem:[#allocation8 + $0x720] sm:$0xff] %v6106_v63 }
 0x68a   :  { %6363 = vst [vmem:[#allocation8 + $0x728] sm:$0xff] %v6107_v41  ;;  %6364 = vst [vmem:[#allocation8 + $0x730] sm:$0xff] %v6108_v31 }
 0x68b   :  { %6365 = vst [vmem:[#allocation8 + $0x738] sm:$0xff] %v6109_v16  ;;  %6366 = vst [vmem:[#allocation8 + $0x740] sm:$0xff] %v6110_v37 }
 0x68c   :  { %6367 = vst [vmem:[#allocation8 + $0x748] sm:$0xff] %v6111_v2  ;;  %6368 = vst [vmem:[#allocation8 + $0x750] sm:$0xff] %v6112_v25 }
 0x68d   :  { %6369 = vst [vmem:[#allocation8 + $0x758] sm:$0xff] %v6113_v60  ;;  %6370 = vst [vmem:[#allocation8 + $0x760] sm:$0xff] %v6114_v42 }
 0x68e   :  { %6371 = vst [vmem:[#allocation8 + $0x768] sm:$0xff] %v6115_v43  ;;  %6372 = vst [vmem:[#allocation8 + $0x770] sm:$0xff] %v6116_v12 }
 0x68f   :  { %6373 = vst [vmem:[#allocation8 + $0x778] sm:$0xff] %v6117_v27  ;;  %6374 = vst [vmem:[#allocation8 + $0x780] sm:$0xff] %v6118_v47 }
 0x690   :  { %6375 = vst [vmem:[#allocation8 + $0x788] sm:$0xff] %v6119_v56  ;;  %6376 = vst [vmem:[#allocation8 + $0x790] sm:$0xff] %v6120_v55 }
 0x691   :  { %6377 = vst [vmem:[#allocation8 + $0x798] sm:$0xff] %v6121_v15  ;;  %6378 = vst [vmem:[#allocation8 + $0x7a0] sm:$0xff] %v6122_v26 }
 0x692   :  { %6379 = vst [vmem:[#allocation8 + $0x7a8] sm:$0xff] %v6123_v38  ;;  %6380 = vst [vmem:[#allocation8 + $0x7b0] sm:$0xff] %v6124_v30 }
 0x693   :  { %6381 = vst [vmem:[#allocation8 + $0x7b8] sm:$0xff] %v6125_v14  ;;  %6382 = vst [vmem:[#allocation8 + $0x7c0] sm:$0xff] %v6126_v53 }
 0x694   :  { %6383 = vst [vmem:[#allocation8 + $0x7c8] sm:$0xff] %v6127_v59  ;;  %6384 = vst [vmem:[#allocation8 + $0x7d0] sm:$0xff] %v6128_v36 }
 0x695   :  { %6385 = vst [vmem:[#allocation8 + $0x7d8] sm:$0xff] %v6129_v13  ;;  %6386 = vst [vmem:[#allocation8 + $0x7e0] sm:$0xff] %v6130_v24 }
 0x696   :  { %6387 = vst [vmem:[#allocation8 + $0x7e8] sm:$0xff] %v6131_v35  ;;  %6388 = vst [vmem:[#allocation8 + $0x7f0] sm:$0xff] %v6132_v8 }
 0x697   :  { %7177 = shalt.err (!%p7174_p0)
}
 0x698   :  { %6401 = dma.vmem_to_hbm [thread:$0]  %s6396_s8, 32768, %s12922_s4, [#allocation5], %s7193_s18, %s7193_s18, %s7194_s19  }
 0x699   :  { %7190 = dma.done.wait [#allocation5], 32768  }
 0x69a   :  { %7191 = vsyncadd [#allocation5], 4294934528 }
 0x69b   :  { %6405 = vsyncpa [#allocation4], 1 }
 0x69c   :  { %6406 = vsyncpa [#allocation7], 1 }
 0x69d   :  { %6407 = vsyncpa [#allocation5], 1 }

</bundles_post_ra>
